<compile_context>
chip_gen: v5e
topology: v5e:2x2
jax: 0.10.0
libtpu: 0.0.40
codegen_flags: <defaults>
</compile_context>

<pallas_src>
import math
import functools

import numpy as np
import jax
import jax.numpy as jnp
from jax import lax
from jax.experimental import pallas as pl
from jax.experimental.pallas import tpu as pltpu

RMS_EPS = 1.1920929e-07  # torch.finfo(float32).eps — F.rms_norm default eps


def _rms(x):
    return x * lax.rsqrt(jnp.mean(x * x, axis=-1, keepdims=True) + RMS_EPS)


# ---------------------------------------------------------------------------
# Kernel 1: residual mix + rms_norm + q/k/v projections + per-head rms + RoPE
#           + v <- mix(v, vi).   Grid: (T // tm,)  ("parallel")
# ---------------------------------------------------------------------------
def _pre_attn_kernel(lambdas_ref, lamb_ref, x_ref, x0_ref, vi_ref,
                     wq_ref, wk_ref, wv_ref, wq_roll_ref, wk_roll_ref,
                     hmask_ref, hmask_t_ref, cos_ref, ss_ref,
                     xr_ref, q_ref, k_ref, v_ref, *, head_dim):
    lam0 = lambdas_ref[0]
    lam1 = lambdas_ref[1]
    lamb = lamb_ref[0]

    xr = lam0 * x_ref[...] + lam1 * x0_ref[...]
    xr_ref[...] = xr
    xn = _rms(xr).astype(jnp.bfloat16)

    hmask = hmask_ref[...]      # (D, H)   0/1 head membership
    hmask_t = hmask_t_ref[...]  # (H, D)
    cos = cos_ref[...]          # (tm, D)  cos table, repeated per head
    ss = ss_ref[...]            # (tm, D)  [+sin | -sin] table, repeated per head

    def proj_norm_rope(w_ref, w_roll_ref):
        # projection and "half-rolled" projection (roll folded into the weights)
        raw = jnp.dot(xn, w_ref[...], preferred_element_type=jnp.float32)
        raw_roll = jnp.dot(xn, w_roll_ref[...], preferred_element_type=jnp.float32)
        # per-head rms scale, broadcast back to (tm, D) with two tiny matmuls
        ms = jnp.dot(raw * raw, hmask,
                     preferred_element_type=jnp.float32) * (1.0 / head_dim)
        scale = lax.rsqrt(ms + RMS_EPS)                                    # (tm, H)
        scale_full = jnp.dot(scale, hmask_t,
                             preferred_element_type=jnp.float32)          # (tm, D)
        # RoPE: y = x*cos + roll_half(x)*[+sin|-sin]
        return (raw * scale_full) * cos + (raw_roll * scale_full) * ss

    q_ref[...] = proj_norm_rope(wq_ref, wq_roll_ref).astype(jnp.bfloat16)
    k_ref[...] = proj_norm_rope(wk_ref, wk_roll_ref).astype(jnp.bfloat16)

    v = jnp.dot(xn, wv_ref[...], preferred_element_type=jnp.float32)
    v_ref[...] = ((1.0 - lamb) * v + lamb * vi_ref[...]).astype(jnp.bfloat16)


# ---------------------------------------------------------------------------
# Kernel 2: flash attention.  Grid: (H, T//blk, T//blk)
#           ("parallel", "parallel", "arbitrary")
# TODO(synk): the real block_mask is a FlexAttention sliding-window/document mask
#             built outside Block; plain causal masking is implemented here.
# ---------------------------------------------------------------------------
def _flash_attn_kernel(q_ref, k_ref, v_ref, neg_ref, o_ref,
                       m_sc, l_sc, acc_sc, *, head_dim):
    qi = pl.program_id(1)
    ki = pl.program_id(2)

    @pl.when(ki == 0)
    def _init():
        m_sc[...] = jnp.full(m_sc.shape, -jnp.inf, jnp.float32)
        l_sc[...] = jnp.zeros(l_sc.shape, jnp.float32)
        acc_sc[...] = jnp.zeros(acc_sc.shape, jnp.float32)

    # kv blocks strictly above the causal diagonal contribute nothing: skip.
    @pl.when(ki <= qi)
    def _compute():
        scale = 1.0 / math.sqrt(head_dim)
        s = lax.dot_general(q_ref[...], k_ref[...], (((1,), (1,)), ((), ())),
                            preferred_element_type=jnp.float32) * scale
        # resident additive lower-triangular mask, active only on the diagonal block
        s = s + neg_ref[...] * (ki == qi).astype(jnp.float32)

        m_prev = m_sc[...]
        m_new = jnp.maximum(m_prev, jnp.max(s, axis=-1, keepdims=True))
        alpha = jnp.exp(m_prev - m_new)
        p = jnp.exp(s - m_new)
        l_sc[...] = alpha * l_sc[...] + jnp.sum(p, axis=-1, keepdims=True)
        acc_sc[...] = alpha * acc_sc[...] + jnp.dot(
            p.astype(jnp.bfloat16), v_ref[...], preferred_element_type=jnp.float32)
        m_sc[...] = m_new

    @pl.when(ki == pl.num_programs(2) - 1)
    def _finalize():
        inv_l = pl.reciprocal(l_sc[...], approx=True)
        o_ref[...] = (acc_sc[...] * inv_l).astype(o_ref.dtype)


# ---------------------------------------------------------------------------
# Kernel 3: attention out-proj + residual + rms + MLP (relu^2), hidden dim tiled.
#           Grid: (T//tm, 4D//th)  ("parallel", "arbitrary")
# ---------------------------------------------------------------------------
def _post_kernel(xr_ref, y_ref, wproj_ref, wfc_ref, wmlp_ref, out_ref,
                 x1_sc, xn_sc, acc_sc):
    k = pl.program_id(1)

    @pl.when(k == 0)
    def _init():
        attn_out = jnp.dot(y_ref[...], wproj_ref[...],
                           preferred_element_type=jnp.float32)
        x1 = xr_ref[...] + attn_out
        x1_sc[...] = x1
        xn_sc[...] = _rms(x1).astype(jnp.bfloat16)
        acc_sc[...] = jnp.zeros(acc_sc.shape, jnp.float32)

    h = jnp.dot(xn_sc[...], wfc_ref[...], preferred_element_type=jnp.float32)
    h = jnp.maximum(h, 0.0)
    h = (h * h).astype(jnp.bfloat16)
    acc_sc[...] += jnp.dot(h, wmlp_ref[...], preferred_element_type=jnp.float32)

    @pl.when(k == pl.num_programs(1) - 1)
    def _finalize():
        out_ref[...] = x1_sc[...] + acc_sc[...]


# ---------------------------------------------------------------------------
# Wrapper
# ---------------------------------------------------------------------------
def block_forward(x, vi, x0, params, n_head, *, tm=256, blk=256, th=512):
    # x, vi, x0: (1, T, D)  (batch must be 1, as in the PyTorch module)
    assert x.shape[0] == 1
    x2, vi2, x02 = x[0], vi[0], x0[0]
    T, D = x2.shape
    hd = D // n_head
    half = hd // 2
    hidden = 4 * D
    assert hd % 128 == 0 or n_head == 1, "head_dim must be lane-dense (mult of 128)"

    tm = min(tm, T)
    blk = min(blk, T)
    th = min(th, hidden)
    assert T % tm == 0 and T % blk == 0 and hidden % th == 0

    bf16 = jnp.bfloat16
    # weights transposed to (in, out) and cast to bf16 (glue, plain JAX)
    wq_t = params["wq"].T.astype(bf16)
    wk_t = params["wk"].T.astype(bf16)
    wv_t = params["wv"].T.astype(bf16)
    wproj_t = params["wproj"].T.astype(bf16)
    wfc_t = params["wfc"].T.astype(bf16)
    wmlp_t = params["wmlp_proj"].T.astype(bf16)

    # RoPE "roll" folded into the weights:  q_roll[:, j] = q[:, perm[j]]
    perm = np.concatenate([h * hd + (np.arange(hd) + half) % hd
                           for h in range(n_head)])
    wq_roll_t = params["wq"].T[:, perm].astype(bf16)
    wk_roll_t = params["wk"].T[:, perm].astype(bf16)

    # rotary tables (cached buffers in the PyTorch module) — full (T, D) width
    t_pos = jnp.arange(T, dtype=jnp.float32)
    inv_freq = (1.0 / 10000.0) ** (jnp.arange(0, hd, 2, dtype=jnp.float32) / hd)
    freqs = jnp.outer(t_pos, inv_freq)                       # (T, hd//2)
    cos_h = jnp.concatenate([jnp.cos(freqs), jnp.cos(freqs)], axis=1)   # (T, hd)
    ss_h = jnp.concatenate([jnp.sin(freqs), -jnp.sin(freqs)], axis=1)   # (T, hd)
    cos_full = jnp.tile(cos_h, (1, n_head))                  # (T, D)
    ss_full = jnp.tile(ss_h, (1, n_head))                    # (T, D)

    # head-membership masks for per-head rms norm
    hmask_np = (np.arange(D)[:, None] // hd ==
                np.arange(n_head)[None, :]).astype(np.float32)
    hmask = jnp.asarray(hmask_np)              # (D, H)
    hmask_t = jnp.asarray(np.ascontiguousarray(hmask_np.T))  # (H, D)

    # additive causal mask for the diagonal flash block (stays VMEM-resident)
    tri = np.tril(np.ones((blk, blk), dtype=np.float32))
    neg_mask = jnp.asarray((1.0 - tri) * (-1e30), dtype=jnp.float32)

    smem = pl.BlockSpec(memory_space=pltpu.MemorySpace.SMEM)
    row_td = pl.BlockSpec((tm, D), lambda i: (i, 0))
    w_dd = pl.BlockSpec((D, D), lambda i: (0, 0))
    cparams_1d = pltpu.CompilerParams(dimension_semantics=("parallel",),
                                      vmem_limit_bytes=48 * 1024 * 1024)

    # ---- kernel 1: pre-attention ------------------------------------------
    xr, q, k, v = pl.pallas_call(
        functools.partial(_pre_attn_kernel, head_dim=hd),
        grid=(T // tm,),
        in_specs=[smem, smem, row_td, row_td, row_td,
                  w_dd, w_dd, w_dd, w_dd, w_dd,
                  pl.BlockSpec((D, n_head), lambda i: (0, 0)),
                  pl.BlockSpec((n_head, D), lambda i: (0, 0)),
                  row_td, row_td],
        out_specs=[row_td, row_td, row_td, row_td],
        out_shape=[jax.ShapeDtypeStruct((T, D), jnp.float32),
                   jax.ShapeDtypeStruct((T, D), bf16),
                   jax.ShapeDtypeStruct((T, D), bf16),
                   jax.ShapeDtypeStruct((T, D), bf16)],
        compiler_params=cparams_1d,
    )(params["lambdas"], params["lamb"], x2, x02, vi2,
      wq_t, wk_t, wv_t, wq_roll_t, wk_roll_t, hmask, hmask_t, cos_full, ss_full)

    # ---- kernel 2: flash attention over head column-slabs of (T, D) --------
    nq = T // blk
    q_spec = pl.BlockSpec((blk, hd), lambda h, qi, ki: (qi, h))
    kv_spec = pl.BlockSpec((blk, hd), lambda h, qi, ki: (ki, h))
    y = pl.pallas_call(
        functools.partial(_flash_attn_kernel, head_dim=hd),
        grid=(n_head, nq, nq),
        in_specs=[q_spec, kv_spec, kv_spec,
                  pl.BlockSpec((blk, blk), lambda h, qi, ki: (0, 0))],
        out_specs=pl.BlockSpec((blk, hd), lambda h, qi, ki: (qi, h)),
        out_shape=jax.ShapeDtypeStruct((T, D), bf16),
        scratch_shapes=[pltpu.VMEM((blk, 1), jnp.float32),
                        pltpu.VMEM((blk, 1), jnp.float32),
                        pltpu.VMEM((blk, hd), jnp.float32)],
        compiler_params=pltpu.CompilerParams(
            dimension_semantics=("parallel", "parallel", "arbitrary"),
            vmem_limit_bytes=48 * 1024 * 1024),
    )(q, k, v, neg_mask)

    # ---- kernel 3: out-proj + residual + MLP (hidden dim tiled) ------------
    nh = hidden // th
    out = pl.pallas_call(
        _post_kernel,
        grid=(T // tm, nh),
        in_specs=[pl.BlockSpec((tm, D), lambda i, j: (i, 0)),
                  pl.BlockSpec((tm, D), lambda i, j: (i, 0)),
                  pl.BlockSpec((D, D), lambda i, j: (0, 0)),
                  pl.BlockSpec((D, th), lambda i, j: (0, j)),
                  pl.BlockSpec((th, D), lambda i, j: (j, 0))],
        out_specs=pl.BlockSpec((tm, D), lambda i, j: (i, 0)),
        out_shape=jax.ShapeDtypeStruct((T, D), jnp.float32),
        scratch_shapes=[pltpu.VMEM((tm, D), jnp.float32),
                        pltpu.VMEM((tm, D), bf16),
                        pltpu.VMEM((tm, D), jnp.float32)],
        compiler_params=pltpu.CompilerParams(
            dimension_semantics=("parallel", "arbitrary"),
            vmem_limit_bytes=48 * 1024 * 1024),
    )(xr, y, wproj_t, wfc_t, wmlp_t)

    return out[None]  # (1, T, D)


# ---------------------------------------------------------------------------
# Pure-JAX f32 reference (mirrors the PyTorch forward semantics)
# ---------------------------------------------------------------------------
def block_forward_ref(x, vi, x0, params, n_head):
    T, D = x.shape
    hd = D // n_head
    half = hd // 2
    lambdas, lamb = params["lambdas"], params["lamb"][0]

    xr = lambdas[0] * x + lambdas[1] * x0
    xn = _rms(xr)
    q = xn @ params["wq"].T
    k = xn @ params["wk"].T
    v = xn @ params["wv"].T
    v = (1.0 - lamb) * v + lamb * vi

    q = _rms(q.reshape(T, n_head, hd))
    k = _rms(k.reshape(T, n_head, hd))
    v = v.reshape(T, n_head, hd)

    t = jnp.arange(T, dtype=jnp.float32)
    inv_freq = (1.0 / 10000.0) ** (jnp.arange(0, hd, 2, dtype=jnp.float32) / hd)
    freqs = jnp.outer(t, inv_freq)
    cos, sin = jnp.cos(freqs)[:, None, :], jnp.sin(freqs)[:, None, :]

    def rope(z):
        z1, z2 = z[..., :half], z[..., half:]
        return jnp.concatenate([z1 * cos + z2 * sin, -z1 * sin + z2 * cos], axis=-1)

    q, k = rope(q), rope(k)
    qh, kh, vh = (a.transpose(1, 0, 2) for a in (q, k, v))
    s = jnp.einsum("htd,hsd->hts", qh, kh) / math.sqrt(hd)
    mask = jnp.tril(jnp.ones((T, T), dtype=bool))
    s = jnp.where(mask[None], s, -1e30)
    p = jax.nn.softmax(s, axis=-1)
    y = jnp.einsum("hts,hsd->htd", p, vh).transpose(1, 0, 2).reshape(T, D)

    x1 = xr + y @ params["wproj"].T
    h = jnp.maximum(_rms(x1) @ params["wfc"].T, 0.0) ** 2
    return x1 + h @ params["wmlp_proj"].T


if __name__ == "__main__":
    # small shapes consistent with the module: head_dim=128 as in the real model
    T, D, H = 512, 256, 2
    key = jax.random.PRNGKey(0)
    ks = jax.random.split(key, 10)

    x = jax.random.normal(ks[0], (1, T, D), jnp.float32)
    x0 = jax.random.normal(ks[1], (1, T, D), jnp.float32)
    vi = jax.random.normal(ks[2], (1, T, D), jnp.float32)

    # NOTE: the PyTorch __init__ zero-inits c_proj weights and sets lambdas=[1,0];
    # deterministic non-degenerate values are used so the kernels do real work.
    params = {
        "lambdas": jnp.array([0.8, 0.2], jnp.float32),        # Block.lambdas
        "lamb": jnp.array([0.5], jnp.float32),                 # CausalSelfAttention.lamb
        "wq": 0.02 * jax.random.normal(ks[3], (D, D), jnp.float32),
        "wk": 0.02 * jax.random.normal(ks[4], (D, D), jnp.float32),
        "wv": 0.02 * jax.random.normal(ks[5], (D, D), jnp.float32),
        "wproj": 0.02 * jax.random.normal(ks[6], (D, D), jnp.float32),
        "wfc": 0.02 * jax.random.normal(ks[7], (4 * D, D), jnp.float32),
        "wmlp_proj": 0.02 * jax.random.normal(ks[8], (D, 4 * D), jnp.float32),
    }

    out = block_forward(x, vi, x0, params, H)
    out = jax.block_until_ready(out)

    ref = block_forward_ref(x[0], vi[0], x0[0], params, H)
    # bf16 matmul operands (matching the bf16 CastedLinear path of the original
    # model) → compare against the f32 reference with a bf16-appropriate tolerance
    np.testing.assert_allclose(np.asarray(out[0]), np.asarray(ref),
                               atol=2e-2, rtol=2e-2)

    print("KERNEL_OK")
</pallas_src>

<mosaic_0001>
module attributes {stable_mosaic.version = 11 : i64} {
  func.func @_pre_attn_kernel(%arg0: i32, %arg1: memref<2xf32, #tpu.memory_space<smem>>, %arg2: memref<1xf32, #tpu.memory_space<smem>>, %arg3: memref<256x256xf32, #tpu.memory_space<vmem>>, %arg4: memref<256x256xf32, #tpu.memory_space<vmem>>, %arg5: memref<256x256xf32, #tpu.memory_space<vmem>>, %arg6: memref<256x256xbf16, #tpu.memory_space<vmem>>, %arg7: memref<256x256xbf16, #tpu.memory_space<vmem>>, %arg8: memref<256x256xbf16, #tpu.memory_space<vmem>>, %arg9: memref<256x256xbf16, #tpu.memory_space<vmem>>, %arg10: memref<256x256xbf16, #tpu.memory_space<vmem>>, %arg11: memref<256x2xf32, #tpu.memory_space<vmem>>, %arg12: memref<2x256xf32, #tpu.memory_space<vmem>>, %arg13: memref<256x256xf32, #tpu.memory_space<vmem>>, %arg14: memref<256x256xf32, #tpu.memory_space<vmem>>, %arg15: memref<256x256xf32, #tpu.memory_space<vmem>>, %arg16: memref<256x256xbf16, #tpu.memory_space<vmem>>, %arg17: memref<256x256xbf16, #tpu.memory_space<vmem>>, %arg18: memref<256x256xbf16, #tpu.memory_space<vmem>>) attributes {dimension_semantics = [#tpu.dimension_semantics<parallel>], iteration_bounds = array<i64: 2>, scalar_prefetch = 0 : i64, scratch_operands = 0 : i64, tpu.core_type = #tpu.core_type<tc>, window_params = [{transform_indices = @transform_0, window_bounds = array<i64: 2>}, {transform_indices = @transform_1, window_bounds = array<i64: 1>}, {transform_indices = @transform_2, window_bounds = array<i64: 256, 256>}, {transform_indices = @transform_3, window_bounds = array<i64: 256, 256>}, {transform_indices = @transform_4, window_bounds = array<i64: 256, 256>}, {pipeline_mode = #tpu.pipeline_mode<synchronous>, transform_indices = @transform_5, window_bounds = array<i64: 256, 256>}, {pipeline_mode = #tpu.pipeline_mode<synchronous>, transform_indices = @transform_6, window_bounds = array<i64: 256, 256>}, {pipeline_mode = #tpu.pipeline_mode<synchronous>, transform_indices = @transform_7, window_bounds = array<i64: 256, 256>}, {pipeline_mode = #tpu.pipeline_mode<synchronous>, transform_indices = @transform_8, window_bounds = array<i64: 256, 256>}, {pipeline_mode = #tpu.pipeline_mode<synchronous>, transform_indices = @transform_9, window_bounds = array<i64: 256, 256>}, {pipeline_mode = #tpu.pipeline_mode<synchronous>, transform_indices = @transform_10, window_bounds = array<i64: 256, 2>}, {pipeline_mode = #tpu.pipeline_mode<synchronous>, transform_indices = @transform_11, window_bounds = array<i64: 2, 256>}, {transform_indices = @transform_12, window_bounds = array<i64: 256, 256>}, {transform_indices = @transform_13, window_bounds = array<i64: 256, 256>}, {transform_indices = @transform_14, window_bounds = array<i64: 256, 256>}, {transform_indices = @transform_15, window_bounds = array<i64: 256, 256>}, {transform_indices = @transform_16, window_bounds = array<i64: 256, 256>}, {transform_indices = @transform_17, window_bounds = array<i64: 256, 256>}]} {
    %c0 = arith.constant 0 : index
    %0 = memref.load %arg1[%c0] : memref<2xf32, #tpu.memory_space<smem>>
    %c1 = arith.constant 1 : index
    %1 = memref.load %arg1[%c1] : memref<2xf32, #tpu.memory_space<smem>>
    %c0_0 = arith.constant 0 : index
    %2 = memref.load %arg2[%c0_0] : memref<1xf32, #tpu.memory_space<smem>>
    %c0_1 = arith.constant 0 : index
    %c0_2 = arith.constant 0 : index
    %3 = vector.load %arg3[%c0_1, %c0_2] : memref<256x256xf32, #tpu.memory_space<vmem>>, vector<256x256xf32>
    %4 = vector.broadcast %0 : f32 to vector<256x256xf32>
    %5 = arith.mulf %4, %3 : vector<256x256xf32>
    %c0_3 = arith.constant 0 : index
    %c0_4 = arith.constant 0 : index
    %6 = vector.load %arg4[%c0_3, %c0_4] : memref<256x256xf32, #tpu.memory_space<vmem>>, vector<256x256xf32>
    %7 = vector.broadcast %1 : f32 to vector<256x256xf32>
    %8 = arith.mulf %7, %6 : vector<256x256xf32>
    %9 = arith.addf %5, %8 : vector<256x256xf32>
    %c0_5 = arith.constant 0 : index
    %c0_6 = arith.constant 0 : index
    %10 = vector.load %arg15[%c0_5, %c0_6] : memref<256x256xf32, #tpu.memory_space<vmem>>, vector<256x256xf32>
    tpu.vector_store %arg15[%c0_5, %c0_6], %9 {strides = array<i32>} : memref<256x256xf32, #tpu.memory_space<vmem>>, vector<256x256xf32>,
    %11 = arith.mulf %9, %9 : vector<256x256xf32>
    %cst = arith.constant dense<0.000000e+00> : vector<256xf32>
    %12 = vector.multi_reduction <add>, %11, %cst [1] : vector<256x256xf32> to vector<256xf32>
    %13 = vector.shape_cast %12 : vector<256xf32> to vector<256x1xf32>
    %cst_7 = arith.constant 2.560000e+02 : f32
    %14 = vector.broadcast %cst_7 : f32 to vector<256x1xf32>
    %15 = arith.divf %13, %14 : vector<256x1xf32>
    %cst_8 = arith.constant 1.1920929E-7 : f32
    %16 = vector.broadcast %cst_8 : f32 to vector<256x1xf32>
    %17 = arith.addf %15, %16 : vector<256x1xf32>
    %18 = math.rsqrt %17 : vector<256x1xf32>
    %19 = vector.broadcast %18 : vector<256x1xf32> to vector<256x256xf32>
    %20 = arith.mulf %9, %19 : vector<256x256xf32>
    %21 = arith.truncf %20 : vector<256x256xf32> to vector<256x256xbf16>
    %c0_9 = arith.constant 0 : index
    %c0_10 = arith.constant 0 : index
    %22 = vector.load %arg11[%c0_9, %c0_10] : memref<256x2xf32, #tpu.memory_space<vmem>>, vector<256x2xf32>
    %c0_11 = arith.constant 0 : index
    %c0_12 = arith.constant 0 : index
    %23 = vector.load %arg12[%c0_11, %c0_12] : memref<2x256xf32, #tpu.memory_space<vmem>>, vector<2x256xf32>
    %c0_13 = arith.constant 0 : index
    %c0_14 = arith.constant 0 : index
    %24 = vector.load %arg13[%c0_13, %c0_14] : memref<256x256xf32, #tpu.memory_space<vmem>>, vector<256x256xf32>
    %c0_15 = arith.constant 0 : index
    %c0_16 = arith.constant 0 : index
    %25 = vector.load %arg14[%c0_15, %c0_16] : memref<256x256xf32, #tpu.memory_space<vmem>>, vector<256x256xf32>
    %c0_17 = arith.constant 0 : index
    %c0_18 = arith.constant 0 : index
    %26 = vector.load %arg6[%c0_17, %c0_18] : memref<256x256xbf16, #tpu.memory_space<vmem>>, vector<256x256xbf16>
    %cst_19 = arith.constant dense<0.000000e+00> : vector<256x256xf32>
    %27 = tpu.matmul %21, %26, %cst_19 {dimension_numbers = #tpu.dot_dimension_numbers<[1], [0], [0], [1], [0, 0, 1, 1], [], []>} : vector<256x256xbf16>, vector<256x256xbf16>, vector<256x256xf32> -> vector<256x256xf32>
    %c0_20 = arith.constant 0 : index
    %c0_21 = arith.constant 0 : index
    %28 = vector.load %arg9[%c0_20, %c0_21] : memref<256x256xbf16, #tpu.memory_space<vmem>>, vector<256x256xbf16>
    %cst_22 = arith.constant dense<0.000000e+00> : vector<256x256xf32>
    %29 = tpu.matmul %21, %28, %cst_22 {dimension_numbers = #tpu.dot_dimension_numbers<[1], [0], [0], [1], [0, 0, 1, 1], [], []>} : vector<256x256xbf16>, vector<256x256xbf16>, vector<256x256xf32> -> vector<256x256xf32>
    %30 = arith.mulf %27, %27 : vector<256x256xf32>
    %cst_23 = arith.constant dense<0.000000e+00> : vector<256x2xf32>
    %31 = tpu.matmul %30, %22, %cst_23 {dimension_numbers = #tpu.dot_dimension_numbers<[1], [0], [0], [1], [0, 0, 1, 1], [], []>} : vector<256x256xf32>, vector<256x2xf32>, vector<256x2xf32> -> vector<256x2xf32>
    %cst_24 = arith.constant 7.812500e-03 : f32
    %32 = vector.broadcast %cst_24 : f32 to vector<256x2xf32>
    %33 = arith.mulf %31, %32 : vector<256x2xf32>
    %cst_25 = arith.constant 1.1920929E-7 : f32
    %34 = vector.broadcast %cst_25 : f32 to vector<256x2xf32>
    %35 = arith.addf %33, %34 : vector<256x2xf32>
    %36 = math.rsqrt %35 : vector<256x2xf32>
    %cst_26 = arith.constant dense<0.000000e+00> : vector<256x256xf32>
    %37 = tpu.matmul %36, %23, %cst_26 {dimension_numbers = #tpu.dot_dimension_numbers<[1], [0], [0], [1], [0, 0, 1, 1], [], []>} : vector<256x2xf32>, vector<2x256xf32>, vector<256x256xf32> -> vector<256x256xf32>
    %38 = arith.mulf %27, %37 : vector<256x256xf32>
    %39 = arith.mulf %38, %24 : vector<256x256xf32>
    %40 = arith.mulf %29, %37 : vector<256x256xf32>
    %41 = arith.mulf %40, %25 : vector<256x256xf32>
    %42 = arith.addf %39, %41 : vector<256x256xf32>
    %43 = arith.truncf %42 : vector<256x256xf32> to vector<256x256xbf16>
    %c0_27 = arith.constant 0 : index
    %c0_28 = arith.constant 0 : index
    %44 = vector.load %arg16[%c0_27, %c0_28] : memref<256x256xbf16, #tpu.memory_space<vmem>>, vector<256x256xbf16>
    tpu.vector_store %arg16[%c0_27, %c0_28], %43 {strides = array<i32>} : memref<256x256xbf16, #tpu.memory_space<vmem>>, vector<256x256xbf16>,
    %c0_29 = arith.constant 0 : index
    %c0_30 = arith.constant 0 : index
    %45 = vector.load %arg7[%c0_29, %c0_30] : memref<256x256xbf16, #tpu.memory_space<vmem>>, vector<256x256xbf16>
    %cst_31 = arith.constant dense<0.000000e+00> : vector<256x256xf32>
    %46 = tpu.matmul %21, %45, %cst_31 {dimension_numbers = #tpu.dot_dimension_numbers<[1], [0], [0], [1], [0, 0, 1, 1], [], []>} : vector<256x256xbf16>, vector<256x256xbf16>, vector<256x256xf32> -> vector<256x256xf32>
    %c0_32 = arith.constant 0 : index
    %c0_33 = arith.constant 0 : index
    %47 = vector.load %arg10[%c0_32, %c0_33] : memref<256x256xbf16, #tpu.memory_space<vmem>>, vector<256x256xbf16>
    %cst_34 = arith.constant dense<0.000000e+00> : vector<256x256xf32>
    %48 = tpu.matmul %21, %47, %cst_34 {dimension_numbers = #tpu.dot_dimension_numbers<[1], [0], [0], [1], [0, 0, 1, 1], [], []>} : vector<256x256xbf16>, vector<256x256xbf16>, vector<256x256xf32> -> vector<256x256xf32>
    %49 = arith.mulf %46, %46 : vector<256x256xf32>
    %cst_35 = arith.constant dense<0.000000e+00> : vector<256x2xf32>
    %50 = tpu.matmul %49, %22, %cst_35 {dimension_numbers = #tpu.dot_dimension_numbers<[1], [0], [0], [1], [0, 0, 1, 1], [], []>} : vector<256x256xf32>, vector<256x2xf32>, vector<256x2xf32> -> vector<256x2xf32>
    %cst_36 = arith.constant 7.812500e-03 : f32
    %51 = vector.broadcast %cst_36 : f32 to vector<256x2xf32>
    %52 = arith.mulf %50, %51 : vector<256x2xf32>
    %cst_37 = arith.constant 1.1920929E-7 : f32
    %53 = vector.broadcast %cst_37 : f32 to vector<256x2xf32>
    %54 = arith.addf %52, %53 : vector<256x2xf32>
    %55 = math.rsqrt %54 : vector<256x2xf32>
    %cst_38 = arith.constant dense<0.000000e+00> : vector<256x256xf32>
    %56 = tpu.matmul %55, %23, %cst_38 {dimension_numbers = #tpu.dot_dimension_numbers<[1], [0], [0], [1], [0, 0, 1, 1], [], []>} : vector<256x2xf32>, vector<2x256xf32>, vector<256x256xf32> -> vector<256x256xf32>
    %57 = arith.mulf %46, %56 : vector<256x256xf32>
    %58 = arith.mulf %57, %24 : vector<256x256xf32>
    %59 = arith.mulf %48, %56 : vector<256x256xf32>
    %60 = arith.mulf %59, %25 : vector<256x256xf32>
    %61 = arith.addf %58, %60 : vector<256x256xf32>
    %62 = arith.truncf %61 : vector<256x256xf32> to vector<256x256xbf16>
    %c0_39 = arith.constant 0 : index
    %c0_40 = arith.constant 0 : index
    %63 = vector.load %arg17[%c0_39, %c0_40] : memref<256x256xbf16, #tpu.memory_space<vmem>>, vector<256x256xbf16>
    tpu.vector_store %arg17[%c0_39, %c0_40], %62 {strides = array<i32>} : memref<256x256xbf16, #tpu.memory_space<vmem>>, vector<256x256xbf16>,
    %c0_41 = arith.constant 0 : index
    %c0_42 = arith.constant 0 : index
    %64 = vector.load %arg8[%c0_41, %c0_42] : memref<256x256xbf16, #tpu.memory_space<vmem>>, vector<256x256xbf16>
    %cst_43 = arith.constant dense<0.000000e+00> : vector<256x256xf32>
    %65 = tpu.matmul %21, %64, %cst_43 {dimension_numbers = #tpu.dot_dimension_numbers<[1], [0], [0], [1], [0, 0, 1, 1], [], []>} : vector<256x256xbf16>, vector<256x256xbf16>, vector<256x256xf32> -> vector<256x256xf32>
    %cst_44 = arith.constant 1.000000e+00 : f32
    %66 = arith.subf %cst_44, %2 : f32
    %67 = vector.broadcast %66 : f32 to vector<256x256xf32>
    %68 = arith.mulf %67, %65 : vector<256x256xf32>
    %c0_45 = arith.constant 0 : index
    %c0_46 = arith.constant 0 : index
    %69 = vector.load %arg5[%c0_45, %c0_46] : memref<256x256xf32, #tpu.memory_space<vmem>>, vector<256x256xf32>
    %70 = vector.broadcast %2 : f32 to vector<256x256xf32>
    %71 = arith.mulf %70, %69 : vector<256x256xf32>
    %72 = arith.addf %68, %71 : vector<256x256xf32>
    %73 = arith.truncf %72 : vector<256x256xf32> to vector<256x256xbf16>
    %c0_47 = arith.constant 0 : index
    %c0_48 = arith.constant 0 : index
    %74 = vector.load %arg18[%c0_47, %c0_48] : memref<256x256xbf16, #tpu.memory_space<vmem>>, vector<256x256xbf16>
    tpu.vector_store %arg18[%c0_47, %c0_48], %73 {strides = array<i32>} : memref<256x256xbf16, #tpu.memory_space<vmem>>, vector<256x256xbf16>,
    return
  }
  func.func @transform_0(%arg0: i32) -> i32 {
    %c0_i32 = arith.constant 0 : i32
    %c0_i32_0 = arith.constant 0 : i32
    return %c0_i32 : i32
  }
  func.func @transform_1(%arg0: i32) -> i32 {
    %c0_i32 = arith.constant 0 : i32
    %c0_i32_0 = arith.constant 0 : i32
    return %c0_i32 : i32
  }
  func.func @transform_2(%arg0: i32) -> (i32, i32) {
    %c0_i32 = arith.constant 0 : i32
    %c0_i32_0 = arith.constant 0 : i32
    return %arg0, %c0_i32 : i32, i32
  }
  func.func @transform_3(%arg0: i32) -> (i32, i32) {
    %c0_i32 = arith.constant 0 : i32
    %c0_i32_0 = arith.constant 0 : i32
    return %arg0, %c0_i32 : i32, i32
  }
  func.func @transform_4(%arg0: i32) -> (i32, i32) {
    %c0_i32 = arith.constant 0 : i32
    %c0_i32_0 = arith.constant 0 : i32
    return %arg0, %c0_i32 : i32, i32
  }
  func.func @transform_5(%arg0: i32) -> (i32, i32) {
    %c0_i32 = arith.constant 0 : i32
    %c0_i32_0 = arith.constant 0 : i32
    %c0_i32_1 = arith.constant 0 : i32
    return %c0_i32, %c0_i32_0 : i32, i32
  }
  func.func @transform_6(%arg0: i32) -> (i32, i32) {
    %c0_i32 = arith.constant 0 : i32
    %c0_i32_0 = arith.constant 0 : i32
    %c0_i32_1 = arith.constant 0 : i32
    return %c0_i32, %c0_i32_0 : i32, i32
  }
  func.func @transform_7(%arg0: i32) -> (i32, i32) {
    %c0_i32 = arith.constant 0 : i32
    %c0_i32_0 = arith.constant 0 : i32
    %c0_i32_1 = arith.constant 0 : i32
    return %c0_i32, %c0_i32_0 : i32, i32
  }
  func.func @transform_8(%arg0: i32) -> (i32, i32) {
    %c0_i32 = arith.constant 0 : i32
    %c0_i32_0 = arith.constant 0 : i32
    %c0_i32_1 = arith.constant 0 : i32
    return %c0_i32, %c0_i32_0 : i32, i32
  }
  func.func @transform_9(%arg0: i32) -> (i32, i32) {
    %c0_i32 = arith.constant 0 : i32
    %c0_i32_0 = arith.constant 0 : i32
    %c0_i32_1 = arith.constant 0 : i32
    return %c0_i32, %c0_i32_0 : i32, i32
  }
  func.func @transform_10(%arg0: i32) -> (i32, i32) {
    %c0_i32 = arith.constant 0 : i32
    %c0_i32_0 = arith.constant 0 : i32
    %c0_i32_1 = arith.constant 0 : i32
    return %c0_i32, %c0_i32_0 : i32, i32
  }
  func.func @transform_11(%arg0: i32) -> (i32, i32) {
    %c0_i32 = arith.constant 0 : i32
    %c0_i32_0 = arith.constant 0 : i32
    %c0_i32_1 = arith.constant 0 : i32
    return %c0_i32, %c0_i32_0 : i32, i32
  }
  func.func @transform_12(%arg0: i32) -> (i32, i32) {
    %c0_i32 = arith.constant 0 : i32
    %c0_i32_0 = arith.constant 0 : i32
    return %arg0, %c0_i32 : i32, i32
  }
  func.func @transform_13(%arg0: i32) -> (i32, i32) {
    %c0_i32 = arith.constant 0 : i32
    %c0_i32_0 = arith.constant 0 : i32
    return %arg0, %c0_i32 : i32, i32
  }
  func.func @transform_14(%arg0: i32) -> (i32, i32) {
    %c0_i32 = arith.constant 0 : i32
    %c0_i32_0 = arith.constant 0 : i32
    return %arg0, %c0_i32 : i32, i32
  }
  func.func @transform_15(%arg0: i32) -> (i32, i32) {
    %c0_i32 = arith.constant 0 : i32
    %c0_i32_0 = arith.constant 0 : i32
    return %arg0, %c0_i32 : i32, i32
  }
  func.func @transform_16(%arg0: i32) -> (i32, i32) {
    %c0_i32 = arith.constant 0 : i32
    %c0_i32_0 = arith.constant 0 : i32
    return %arg0, %c0_i32 : i32, i32
  }
  func.func @transform_17(%arg0: i32) -> (i32, i32) {
    %c0_i32 = arith.constant 0 : i32
    %c0_i32_0 = arith.constant 0 : i32
    return %arg0, %c0_i32 : i32, i32
  }
}

</mosaic_0001>

<bundles_post_ra>
// kernel: tpu_custom_call.1
= control target key start
LH: loop header
LB: loop body
LE: loop exit
PB: predicated region body
PF: predicated region fallthrough
CT: control target
= control target key end

     0   :  { %s14922_s0 = inlined_call_operand.vmem [shape: f32[2], index: 0, kind: input, shape index: {}]   ;;  %s14923_s1 = inlined_call_operand.<no memory space> [shape: f32[1], index: 1, kind: input, shape index: {}]   ;;  %s14924_s2 = inlined_call_operand.hbm [shape: f32[512,256], index: 2, kind: input, shape index: {}]   ;;  %s14925_s3 = inlined_call_operand.hbm [shape: f32[512,256], index: 3, kind: input, shape index: {}]   ;;  %s14926_s4 = inlined_call_operand.hbm [shape: f32[512,256], index: 4, kind: input, shape index: {}]   ;;  %s14927_s5 = inlined_call_operand.vmem [shape: bf16[256,256], index: 5, kind: input, shape index: {}]   ;;  %s14928_s6 = inlined_call_operand.hbm [shape: bf16[256,256], index: 6, kind: input, shape index: {}]   ;;  %s14929_s7 = inlined_call_operand.hbm [shape: bf16[256,256], index: 7, kind: input, shape index: {}]   ;;  %s14930_s8 = inlined_call_operand.hbm [shape: bf16[256,256], index: 8, kind: input, shape index: {}]   ;;  %s14931_s9 = inlined_call_operand.hbm [shape: bf16[256,256], index: 9, kind: input, shape index: {}]   ;;  %s14932_s10 = inlined_call_operand.vmem [shape: f32[256,2], index: 10, kind: input, shape index: {}]   ;;  %s14933_s11 = inlined_call_operand.vmem [shape: f32[2,256], index: 11, kind: input, shape index: {}]   ;;  %s14934_s12 = inlined_call_operand.hbm [shape: f32[512,256], index: 12, kind: input, shape index: {}]   ;;  %s14935_s13 = inlined_call_operand.hbm [shape: f32[512,256], index: 13, kind: input, shape index: {}]   ;;  %s14936_s14 = inlined_call_operand.hbm [shape: f32[512,256], index: 14, kind: output, shape index: {0}]   ;;  %s14937_s15 = inlined_call_operand.hbm [shape: bf16[512,256], index: 15, kind: output, shape index: {1}]   ;;  %s14938_s16 = inlined_call_operand.hbm [shape: bf16[512,256], index: 16, kind: output, shape index: {2}]   ;;  %s14939_s17 = inlined_call_operand.hbm [shape: bf16[512,256], index: 17, kind: output, shape index: {3}]  }
   0x1   :  { %15169 = sst [smem:[#allocation214_spill]] %s14922_s0 }
   0x2   :  { %15170 = sst [smem:[#allocation215_spill]] %s14923_s1 }
   0x3   :  { %15171 = sst [smem:[#allocation216_spill]] %s14924_s2 }
   0x4   :  { %15172 = sst [smem:[#allocation217_spill]] %s14925_s3 }
   0x5   :  { %15173 = sst [smem:[#allocation218_spill]] %s14926_s4 }
   0x6   :  { %15174 = sst [smem:[#allocation219_spill]] %s14927_s5 }
   0x7   :  { %15175 = sst [smem:[#allocation220_spill]] %s14928_s6 }
   0x8   :  { %15176 = sst [smem:[#allocation221_spill]] %s14930_s8 }
   0x9   :  { %15177 = sst [smem:[#allocation222_spill]] %s14932_s10 }
   0xa   :  { %15178 = sst [smem:[#allocation223_spill]] %s14933_s11 }
   0xb   :  { %15179 = sst [smem:[#allocation224_spill]] %s14935_s13 }
   0xc   :  { %15180 = sst [smem:[#allocation225_spill]] %s14936_s14 }
   0xd   :  { %15181 = sst [smem:[#allocation226_spill]] %s14937_s15 }
   0xe   :  { %15182 = sst [smem:[#allocation227_spill]] %s14938_s16 }
   0xf   :  { %15183 = sst [smem:[#allocation228_spill]] %s14939_s17 }
  0x10   :  { %s15184_s26 = sld [smem:[#allocation215_spill]] }
  0x16   :  { %23 = sst [smem:[#allocation2]] %s15184_s26 }
  0x17   :  { %24 = vsyncpa [#allocation6], 0 }
  0x18   :  { %25 = vsyncpa [#allocation4], 0 }
  0x19   :  { %27 = vsyncpa [#allocation4 + $0x1], 0 }
  0x1a   :  { %28 = vsyncpa [#allocation9], 0 }
  0x1b   :  { %30 = vsyncpa [#allocation9 + $0x1], 0 }
  0x1c   :  { %31 = vsyncpa [#allocation12], 0 }
  0x1d   :  { %32 = vsyncpa [#allocation15], 0 }
  0x1e   :  { %33 = vsyncpa [#allocation18], 0 }
  0x1f   :  { %35 = vsyncpa [#allocation18 + $0x1], 0 }
  0x20   :  { %36 = vsyncpa [#allocation5], 0 }
  0x21   :  { %38 = vsyncpa [#allocation5 + $0x1], 0 }
  0x22   :  { %39 = vsyncpa [#allocation22], 0 }
  0x23   :  { %41 = vsyncpa [#allocation22 + $0x1], 0 }
  0x24   :  { %42 = vsyncpa [#allocation25], 0 }
  0x25   :  { %44 = vsyncpa [#allocation25 + $0x1], 0  ;;  %s10423_s27 = smov 0   ;;  %s10425_s28 = smov 0  }
  0x26   :  { %s10427_s29 = smov 0   ;;  %s10429_s0 = smov 0  }
  0x27 LB: > { %15185 = sst [smem:[#allocation35_spill]] %s10302_s27  ;;  %s10444_s30 = sadd.s32 4294967295, %s10314_s0   ;;  %s10314_s0 = sphi %s10429_s0, %s15919_s0   ;;  %s10310_s29 = sphi %s10427_s29, %s15923_s29   ;;  %s10306_s28 = sphi %s10425_s28, %s15922_s28   ;;  %s10302_s27 = sphi %s10423_s27, %s15920_s27  }
  0x28   : > { %15186 = sst [smem:[#allocation36_spill]] %s10306_s28  ;;  %s14940_s18 = sadd.s32 4294967294, %s10314_s0  }
  0x29   : > { %15187 = sst [smem:[#allocation37_spill]] %s10444_s30  ;;  %p112_p0 = scmp.ne.s32.totalorder %s10306_s28, %s10302_s27 }
  0x2a   : > { %p14957_p1 = scmp.eq.s32.totalorder %s10444_s30, 0  ;;  %p387_p2 = scmp.eq.s32.totalorder %s10444_s30, 1 }
  0x2b   : > { %p393_p3 = scmp.eq.s32.totalorder %s14940_s18, 1  ;;  %p8283_p5 = scmp.ge.s32.totalorder %s10314_s0, 1 }
  0x2c   : > { %p10455_p4 = por %p14957_p1, %p112_p0  ;;  %p478_p7 = scmp.lt.s32.totalorder %s10314_s0, 3 }
  0x2d   : > { %p10460_p6 = por %p393_p3, %p112_p0  ;;  %s15192_s6 = sld [smem:[#allocation220_spill]] }
  0x2e   : > { %s15188_s19 = scalar_select %p10455_p4, 1, 0 }
  0x2f   : > { %s15190_s1 = scalar_select %p10460_p6, 1, 0 }
  0x30   : > { %15189 = sst [smem:[#allocation38_spill]] %s15188_s19  ;;  %p10468_p8 = pnand %p8283_p5, %p478_p7 }
  0x31   : > { %15191 = sst [smem:[#allocation39_spill]] %s15190_s1  ;;  %s10316_s24 = smov [#allocation11]  }
  0x32   : > { %s15193_s23 = scalar_select %p10468_p8, 1, 0 }
  0x33   : > { %s505_s22 = sshll.u32 %s15192_s6, 4  ;;  %p9332_p9 = pneg %p10468_p8  ;;  %s506_s22 = int_to_ptr.hbm [resolvable:$true] %s505_s22 }
  0x34   : > { %15194 = sst [smem:[#allocation40_spill]] %s15193_s23  ;;  %s507_s25 = sshll.u32 %s10316_s24, 4  ;;  %s508_s25 = int_to_ptr.vmem [resolvable:$true] %s507_s25 }
  0x35   : > { %p10476_p10 = pnand %p9332_p9, %p14957_p1  ;;  %s15196_s8 = sld [smem:[#allocation221_spill]] }
  0x36   : > { %s14943_s24 = smov 128   ;;  %s14945_s6 = smov 8  }
  0x37   : > { %9338 = dma.hbm_to_vmem [thread:$0]  (!%p10476_p10), %s506_s22, 4096, %s508_s25, [#allocation12], %s14943_s24, %s14943_s24, %s14945_s6  }
  0x38   : > { %s10319_s1 = smov [#allocation14]   ;;  %s10495_s20 = sadd.s32 1, %s10314_s0  }
  0x39   : > { %s535_s27 = sshll.u32 %s10319_s1, 4  ;;  %15197 = sst [smem:[#allocation41_spill]] %s10495_s20  ;;  %s536_s27 = int_to_ptr.vmem [resolvable:$true] %s535_s27 }
  0x3a   : > { %s99_s21 = sadd.s32 1, %s10310_s29  ;;  %p106_p12 = scmp.ne.s32.totalorder %s10310_s29, %s10306_s28 }
  0x3b   : > { %s533_s18 = sshll.u32 %s15196_s8, 4  ;;  %s96_s8 = ssub.s32 %s10314_s0, %s10495_s20  ;;  %s534_s18 = int_to_ptr.hbm [resolvable:$true] %s533_s18 }
  0x3c   : > { %9344 = dma.hbm_to_vmem [thread:$0]  (!%p10476_p10), %s534_s18, 4096, %s536_s27, [#allocation15], %s14943_s24, %s14943_s24, %s14945_s6  }
  0x3d   : > { %p97_p13 = scmp.eq.s32.totalorder %s96_s8, 0  ;;  %p107_p0 = scmp.eq.s32.totalorder %s10314_s0, 0 }
  0x3e   : > { %p10505_p3 = por %p387_p2, %p106_p12  ;;  %p9382_p5 = scmp.lt.s32.totalorder %s10314_s0, 2 }
  0x3f   : > { %s10511_s1 = scalar_select %p97_p13, %s10310_s29, %s99_s21  }
  0x40   : > { %s15198_s22 = scalar_select %p10505_p3, 1, 0 }
  0x41   : > { %15200 = sst [smem:[#allocation43_spill]] %s10511_s1  ;;  %p108_p7 = por %p107_p0, %p106_p12 }
  0x42   : > { %15199 = sst [smem:[#allocation42_spill]] %s15198_s22  ;;  %s14951_s25 = sand.u32 1, %s10310_s29  }
  0x43   : > { %s10516_s27 = sshll.u32 %s14951_s25, 9  ;;  %s10519_s18 = sshll.u32 %s10314_s0, 9 }
  0x44   : > { %p10521_p9 = pnand %p9382_p5, %p108_p7  ;;  %s14956_s24 = sand.u32 1, %s10314_s0  }
  0x45   : > { %s15202_s3 = sld [smem:[#allocation217_spill]]  ;;  %s596_s17 = scalar_lea.vmem [#allocation8], %s10516_s27 }
  0x46   : > { %s605_s14 = sshll.u32 %s596_s17, 4  ;;  %s10533_s25 = scalar_lea.sflag [#allocation9], %s14956_s24  ;;  %s606_s14 = int_to_ptr.vmem [resolvable:$true] %s605_s14 }
  0x47   : > { %p10537_p12 = pneg %p10521_p9 }
  0x4b   : > { %s602_s21 = scalar_lea.hbm %s15202_s3, %s10519_s18  ;;  %s9918_s20 = scalar_lea.hbm %s15202_s3, 1024 }
  0x4c   : > { %s603_s1 = sshll.u32 %s602_s21, 4  ;;  %s604_s1 = int_to_ptr.hbm [resolvable:$true] %s603_s1 }
  0x4d   : > { %s9911_s16 = sshra.s32 %s604_s1, 4  ;;  %s9912_s16 = int_to_ptr.hbm [resolvable:$true] %s9911_s16 }
  0x4e   : > { %s9913_s22 = scalar_lea.hbm %s9912_s16, 512  ;;  %p9919_p5 = scmp.lt.s32.totalorder %s9912_s16, %s15202_s3 }
  0x4f   : > { %p9914_p2 = scmp.ne.s32.totalorder %s9912_s16, %s9913_s22  ;;  %p9920_p7 = scmp.lt.s32.totalorder %s9918_s20, %s9913_s22 }
  0x51   : > { %p9916_p13 = pnand %p10537_p12, %p9914_p2  ;;  %p9921_p11 = por %p9920_p7, %p9919_p5 }
  0x53   : > { %p9917_p0 = pneg %p9916_p13 }
  0x55   : > { %p9922_p1 = pnand %p9921_p11, %p9917_p0 }
  0x57   : > { %9925 = shalt.err (!%p9922_p1)
}
  0x58   : > { %s10320_s11 = smov 256   ;;  %s10321_s10 = smov 16  }
  0x59   : > { %9354 = dma.hbm_to_vmem [thread:$0]  (!%p10521_p9), %s604_s1, 8192, %s606_s14, %s10533_s25, %s10320_s11, %s10320_s11, %s10321_s10  }
  0x5a   : > { %s648_s16 = scalar_lea.hbm %s14934_s12, %s10519_s18  ;;  %s642_s22 = scalar_lea.vmem [#allocation17], %s10516_s27 }
  0x5b   : > { %s651_s17 = sshll.u32 %s642_s22, 4  ;;  %s649_s20 = sshll.u32 %s648_s16, 4  ;;  %s652_s17 = int_to_ptr.vmem [resolvable:$true] %s651_s17  ;;  %s650_s20 = int_to_ptr.hbm [resolvable:$true] %s649_s20 }
  0x5c   : > { %s15204_s5 = sld [smem:[#allocation214_spill]]  ;;  %s15205_s28 = sand.u32 1, %s10314_s0  }
  0x5d   : > { %s10565_s30 = scalar_lea.sflag [#allocation18], %s15205_s28  ;;  %s9941_s23 = sshra.s32 %s650_s20, 4  ;;  %s9942_s23 = int_to_ptr.hbm [resolvable:$true] %s9941_s23 }
  0x5e   : > { %s9943_s13 = scalar_lea.hbm %s9942_s23, 512  ;;  %s9948_s6 = scalar_lea.hbm %s14934_s12, 1024 }
  0x5f   : > { %p9944_p1 = scmp.ne.s32.totalorder %s9942_s23, %s9943_s13  ;;  %p9949_p13 = scmp.lt.s32.totalorder %s9942_s23, %s14934_s12 }
  0x60   : > { %p9950_p0 = scmp.lt.s32.totalorder %s9948_s6, %s9943_s13 }
  0x61   : > { %p9946_p11 = pnand %p9944_p1, %p10537_p12 }
  0x62   : > { %s490_s19 = sshll.u32 %s15204_s5, 4  ;;  %p9951_p5 = por %p9950_p0, %p9949_p13  ;;  %s491_s19 = int_to_ptr.vmem [resolvable:$true] %s490_s19 }
  0x63   : > { %p9947_p2 = pneg %p9946_p11 }
  0x65   : > { %p9952_p7 = pnand %p9951_p5, %p9947_p2 }
  0x67   : > { %9955 = shalt.err (!%p9952_p7)
}
  0x68   : > { %9360 = dma.hbm_to_vmem [thread:$0]  (!%p10521_p9), %s650_s20, 8192, %s652_s17, %s10565_s30, %s10320_s11, %s10320_s11, %s10321_s10  }
  0x69   : > { %s10322_s3 = smov [#allocation3]   ;;  %s519_s28 = sshll.u32 %s14929_s7, 4  ;;  %s520_s28 = int_to_ptr.hbm [resolvable:$true] %s519_s28 }
  0x6a   : > { %9335 = dma.vmem_to_smem (!%p10476_p10), %s491_s19, 16, %s10322_s3, [#allocation6]  }
  0x6b   : > { %s10323_s23 = smov [#allocation13]   ;;  %s547_s1 = sshll.u32 %s14931_s9, 4  ;;  %s548_s1 = int_to_ptr.hbm [resolvable:$true] %s547_s1 }
  0x6c   : > { %s521_s22 = sshll.u32 %s10323_s23, 4  ;;  %s15206_s17 = smov 8   ;;  %s522_s22 = int_to_ptr.vmem [resolvable:$true] %s521_s22 }
  0x6d   : > { %s15207_s20 = smov 128   ;;  %s10324_s19 = smov [#allocation16]  }
  0x6e   : > { %9341 = dma.hbm_to_vmem [thread:$0]  (!%p10476_p10), %s520_s28, 4096, %s522_s22, [#allocation12], %s15207_s20, %s15207_s20, %s15206_s17  }
  0x6f   : > { %s549_s6 = sshll.u32 %s10324_s19, 4  ;;  %s15208_s2 = sld [smem:[#allocation216_spill]]  ;;  %s550_s6 = int_to_ptr.vmem [resolvable:$true] %s549_s6 }
  0x70   : > { %9347 = dma.hbm_to_vmem [thread:$0]  (!%p10476_p10), %s548_s1, 4096, %s550_s6, [#allocation15], %s15207_s20, %s15207_s20, %s15206_s17  }
  0x71   : > { %s573_s5 = scalar_lea.vmem [#allocation7], %s10516_s27  ;;  %s15209_s28 = sand.u32 1, %s10310_s29  }
  0x72   : > { %s582_s13 = sshll.u32 %s573_s5, 4  ;;  %s570_s22 = scalar_lea.sflag [#allocation4], %s15209_s28  ;;  %s583_s13 = int_to_ptr.vmem [resolvable:$true] %s582_s13 }
  0x75   : > { %s579_s3 = scalar_lea.hbm %s15208_s2, %s10519_s18  ;;  %s10053_s17 = scalar_lea.hbm %s15208_s2, 1024 }
  0x76   : > { %s580_s23 = sshll.u32 %s579_s3, 4  ;;  %s581_s23 = int_to_ptr.hbm [resolvable:$true] %s580_s23 }
  0x77   : > { %s10046_s21 = sshra.s32 %s581_s23, 4  ;;  %s10047_s21 = int_to_ptr.hbm [resolvable:$true] %s10046_s21 }
  0x78   : > { %s10048_s14 = scalar_lea.hbm %s10047_s21, 512  ;;  %p10054_p10 = scmp.lt.s32.totalorder %s10047_s21, %s15208_s2 }
  0x79   : > { %p10049_p1 = scmp.ne.s32.totalorder %s10047_s21, %s10048_s14  ;;  %p10055_p13 = scmp.lt.s32.totalorder %s10053_s17, %s10048_s14 }
  0x7b   : > { %p10051_p11 = pnand %p10049_p1, %p10537_p12  ;;  %p10056_p0 = por %p10055_p13, %p10054_p10 }
  0x7d   : > { %p10052_p2 = pneg %p10051_p11 }
  0x7f   : > { %p10057_p5 = pnand %p10056_p0, %p10052_p2 }
  0x81   : > { %10060 = shalt.err (!%p10057_p5)
}
  0x82   : > { %9351 = dma.hbm_to_vmem [thread:$0]  (!%p10521_p9), %s581_s23, 8192, %s583_s13, %s570_s22, %s10320_s11, %s10320_s11, %s10321_s10  }
  0x83   : > { %s15210_s4 = sld [smem:[#allocation218_spill]]  ;;  %s619_s3 = scalar_lea.vmem [#allocation10], %s10516_s27 }
  0x84   : > { %s628_s5 = sshll.u32 %s619_s3, 4  ;;  %s629_s5 = int_to_ptr.vmem [resolvable:$true] %s628_s5 }
  0x89   : > { %s625_s16 = scalar_lea.hbm %s15210_s4, %s10519_s18  ;;  %s10083_s13 = scalar_lea.hbm %s15210_s4, 1024 }
  0x8a   : > { %s626_s28 = sshll.u32 %s625_s16, 4  ;;  %s627_s28 = int_to_ptr.hbm [resolvable:$true] %s626_s28 }
  0x8b   : > { %s10076_s21 = sshra.s32 %s627_s28, 4  ;;  %s10077_s21 = int_to_ptr.hbm [resolvable:$true] %s10076_s21 }
  0x8c   : > { %s10078_s14 = scalar_lea.hbm %s10077_s21, 512  ;;  %p10084_p2 = scmp.lt.s32.totalorder %s10077_s21, %s15210_s4 }
  0x8d   : > { %p10079_p7 = scmp.ne.s32.totalorder %s10077_s21, %s10078_s14  ;;  %p10085_p10 = scmp.lt.s32.totalorder %s10083_s13, %s10078_s14 }
  0x8f   : > { %p10081_p1 = pnand %p10079_p7, %p10537_p12  ;;  %p10086_p13 = por %p10085_p10, %p10084_p2 }
  0x91   : > { %p10082_p11 = pneg %p10081_p1 }
  0x93   : > { %p10087_p0 = pnand %p10086_p13, %p10082_p11 }
  0x95   : > { %10090 = shalt.err (!%p10087_p0)
}
  0x96   : > { %9357 = dma.hbm_to_vmem [thread:$0]  (!%p10521_p9), %s627_s28, 8192, %s629_s5, %s10533_s25, %s10320_s11, %s10320_s11, %s10321_s10  }
  0x97   : > { %s15211_s19 = sld [smem:[#allocation224_spill]]  ;;  %s665_s24 = scalar_lea.vmem [#allocation19], %s10516_s27 }
  0x98   : > { %s674_s16 = sshll.u32 %s665_s24, 4  ;;  %s675_s16 = int_to_ptr.vmem [resolvable:$true] %s674_s16 }
  0x9d   : > { %s671_s6 = scalar_lea.hbm %s15211_s19, %s10519_s18  ;;  %s10113_s25 = scalar_lea.hbm %s15211_s19, 1024 }
  0x9e   : > { %s672_s3 = sshll.u32 %s671_s6, 4  ;;  %s673_s3 = int_to_ptr.hbm [resolvable:$true] %s672_s3 }
  0x9f   : > { %s10106_s21 = sshra.s32 %s673_s3, 4  ;;  %s10107_s21 = int_to_ptr.hbm [resolvable:$true] %s10106_s21 }
  0xa0   : > { %s10108_s14 = scalar_lea.hbm %s10107_s21, 512  ;;  %p10114_p11 = scmp.lt.s32.totalorder %s10107_s21, %s15211_s19 }
  0xa1   : > { %p10109_p5 = scmp.ne.s32.totalorder %s10107_s21, %s10108_s14  ;;  %p10115_p2 = scmp.lt.s32.totalorder %s10113_s25, %s10108_s14 }
  0xa3   : > { %p10111_p7 = pnand %p10109_p5, %p10537_p12  ;;  %p10116_p10 = por %p10115_p2, %p10114_p11 }
  0xa5   : > { %p10112_p1 = pneg %p10111_p7 }
  0xa7   : > { %p10117_p13 = pnand %p10116_p10, %p10112_p1 }
  0xa9   : > { %10120 = shalt.err (!%p10117_p13)
}
  0xaa   : > { %9363 = dma.hbm_to_vmem [thread:$0]  (!%p10521_p9), %s673_s3, 8192, %s675_s16, %s10565_s30, %s10320_s11, %s10320_s11, %s10321_s10  }
  0xab   : > { %686 = sbr.rel (%p10468_p8) target bundleno = 2477 (0x9ad), region = 76 }
  0xb0   : > { %s15213_s27 = sld [smem:[#allocation37_spill]] }
  0xb6   : > { %p15214_p12 = scmp.eq.s32.totalorder %s15213_s27, 0 }
  0xb8   : > { %10265 = dma.done.wait (%p15214_p12), [#allocation6], 16   ;;  %p15215_p0 = pmov %p15214_p12 }
  0xb9   : > { %s15216_s18 = sld [smem:[#allocation36_spill]] }
  0xba   : > { %10267 = vsyncadd (%p15215_p0), [#allocation6], 4294967280 }
  0xbf   : > { %s10664_s23 = sand.u32 1, %s15216_s18  }
  0xc0   : > { %s10667_s8 = sshll.u32 %s10664_s23, 9  ;;  %s694_s22 = scalar_lea.sflag [#allocation4], %s10664_s23 }
  0xc1   : > { %s10671_s10 = scalar_lea.vmem [#allocation7], %s10667_s8 }
  0xc2   : > { %10269 = dma.done.wait (%p10455_p4), %s694_s22, 8192  }
  0xc3   : > { %10271 = vsyncadd (%p10455_p4), %s694_s22, 4294959104  ;;  %s10678_s11 = sand.u32 1, %s15213_s27   ;;  %s10682_s17 = scalar_lea.vmem [#allocation8], %s10667_s8 }
  0xc4   : > { %s704_s30 = scalar_lea.sflag [#allocation9], %s10678_s11 }
  0xc5   : > { %10273 = dma.done.wait (%p10455_p4), %s704_s30, 16384  }
  0xc6   : > { %10275 = vsyncadd (%p10455_p4), %s704_s30, 4294950912  ;;  %s10689_s20 = scalar_lea.vmem [#allocation10], %s10667_s8  ;;  %p15218_p8 = pmov %p15215_p0 }
  0xc7   : > { %p15219_p9 = pmov %p15215_p0 }
  0xc8   : > { %10277 = dma.done.wait (%p15218_p8), [#allocation12], 8192  }
  0xc9   : > { %10279 = vsyncadd (%p15219_p9), [#allocation12], 4294959104  ;;  %p15220_p5 = pmov %p15215_p0 }
  0xca   : > { %p15221_p7 = pmov %p15215_p0 }
  0xcb   : > { %10281 = dma.done.wait (%p15220_p5), [#allocation15], 8192  }
  0xcc   : > { %10283 = vsyncadd (%p15221_p7), [#allocation15], 4294959104  ;;  %s744_s6 = scalar_lea.sflag [#allocation18], %s10678_s11  ;;  %s10701_s24 = scalar_lea.vmem [#allocation17], %s10667_s8 }
  0xcd   : > { %10285 = dma.done.wait (%p10455_p4), %s744_s6, 16384  }
  0xce   : > { %10287 = vsyncadd (%p10455_p4), %s744_s6, 4294950912  ;;  %s10708_s16 = scalar_lea.vmem [#allocation19], %s10667_s8 }
  0xcf   : > { %763 = sfence }
  0xd0   : > { %s854_s3 = sld [smem:[#allocation3]]  ;;  %v861_v0 = vld [vmem:[%s10671_s10 + $0x20] sm:$0xff]  ;;  %v862_v1 = vld [vmem:[%s10671_s10 + $0x28] sm:$0xff]  ;;  %v863_v9 = vld [vmem:[%s10671_s10 + $0x30] sm:$0xff]  ;;  %s10747_s14 = scalar_lea.vmem [#allocation20], %s10667_s8 }
  0xd1   : > { %s8325_s21 = sld [smem:[#allocation3 + $0x1]]  ;;  %v990_v2 = vld [vmem:[%s10682_s17 + $0x20] sm:$0xff]  ;;  %v991_v3 = vld [vmem:[%s10682_s17 + $0x28] sm:$0xff]  ;;  %v864_v10 = vld [vmem:[%s10671_s10 + $0x38] sm:$0xff]  ;;  %s12661_s22 = sshll.u32 %s10664_s23, 8 }
  0xd2   : > { %v857_v4 = vld [vmem:[%s10671_s10] sm:$0xff]  ;;  %v858_v5 = vld [vmem:[%s10671_s10 + $0x8] sm:$0xff]  ;;  %v992_v11 = vld [vmem:[%s10682_s17 + $0x30] sm:$0xff]  ;;  %s15222_s25 = sld [smem:[#allocation219_spill]]  ;;  %s12682_s30 = scalar_lea.vmem [#allocation21], %s12661_s22 }
  0xd3   : > { %v986_v6 = vld [vmem:[%s10682_s17] sm:$0xff]  ;;  %v987_v7 = vld [vmem:[%s10682_s17 + $0x8] sm:$0xff]  ;;  %v993_v16 = vld [vmem:[%s10682_s17 + $0x38] sm:$0xff]  ;;  %s13960_s26 = scalar_lea.vmem [#allocation23], %s12661_s22  ;;  %s14457_s1 = sld [smem:[#allocation2]] }
  0xd4   : > { %v859_v21 = vld [vmem:[%s10671_s10 + $0x10] sm:$0xff]  ;;  %v860_v22 = vld [vmem:[%s10671_s10 + $0x18] sm:$0xff]  ;;  %v865_v37 = vld [vmem:[%s10671_s10 + $0x40] sm:$0xff]  ;;  %s15907_s15 = sld [smem:[#allocation226_spill]]  ;;  %s7938_s8 = sshll.u32 %s12682_s30, 4  ;;  %s7939_s8 = int_to_ptr.vmem [resolvable:$true] %s7938_s8 }
  0xd5   : > { %v988_v31 = vld [vmem:[%s10682_s17 + $0x10] sm:$0xff]  ;;  %v989_v32 = vld [vmem:[%s10682_s17 + $0x18] sm:$0xff]  ;;  %v866_v38 = vld [vmem:[%s10671_s10 + $0x48] sm:$0xff] }
  0xd6   : > { %v10718_v8 = vstv %s854_s3  ;;  %v994_v43 = vld [vmem:[%s10682_s17 + $0x40] sm:$0xff]  ;;  %v995_v48 = vld [vmem:[%s10682_s17 + $0x48] sm:$0xff]  ;;  %v867_v49 = vld [vmem:[%s10671_s10 + $0x50] sm:$0xff]  ;;  %s15279_s3 = sld [smem:[#allocation222_spill]] }
  0xd7   : > { %v926_v12 = vmul.f32 %v10718_v8, %v861_v0  ;;  %v927_v13 = vmul.f32 %v10718_v8, %v862_v1  ;;  %v10725_v14 = vstv %s8325_s21  ;;  %v922_v15 = vmul.f32 %v10718_v8, %v857_v4  ;;  %v868_v58 = vld [vmem:[%s10671_s10 + $0x58] sm:$0xff]  ;;  %v996_v59 = vld [vmem:[%s10682_s17 + $0x50] sm:$0xff]  ;;  %s15909_s21 = sld [smem:[#allocation227_spill]] }
  0xd8   : > { %v1055_v17 = vmul.f32 %v10725_v14, %v990_v2  ;;  %v1056_v18 = vmul.f32 %v10725_v14, %v991_v3  ;;  %v923_v19 = vmul.f32 %v10718_v8, %v858_v5  ;;  %v1051_v20 = vmul.f32 %v10725_v14, %v986_v6  ;;  %v997_v60 = vld [vmem:[%s10682_s17 + $0x58] sm:$0xff]  ;;  %v871_v0 = vld [vmem:[%s10671_s10 + $0x70] sm:$0xff] }
  0xd9   : > { %v1052_v23 = vmul.f32 %v10725_v14, %v987_v7  ;;  %v928_v24 = vmul.f32 %v10718_v8, %v863_v9  ;;  %v929_v25 = vmul.f32 %v10718_v8, %v864_v10  ;;  %v1057_v26 = vmul.f32 %v10725_v14, %v992_v11  ;;  %v872_v1 = vld [vmem:[%s10671_s10 + $0x78] sm:$0xff]  ;;  %v1000_v5 = vld [vmem:[%s10682_s17 + $0x70] sm:$0xff]  ;;  %s7568_s5 = ssub.f32 1.0, %s14457_s1 }
  0xda   : > { %v1119_v27 = vadd.f32 %v1055_v17, %v926_v12  ;;  %v1120_v28 = vadd.f32 %v1056_v18, %v927_v13  ;;  %v1115_v29 = vadd.f32 %v1051_v20, %v922_v15  ;;  %v1058_v30 = vmul.f32 %v10725_v14, %v993_v16  ;;  %v1001_v6 = vld [vmem:[%s10682_s17 + $0x78] sm:$0xff]  ;;  %v869_v12 = vld [vmem:[%s10671_s10 + $0x60] sm:$0xff]  ;;  %v870_v13 = vld [vmem:[%s10671_s10 + $0x68] sm:$0xff]  ;;  %s10156_s2 = scalar_lea.hbm %s15907_s15, 512 }
  0xdb   : > { %v1116_v33 = vadd.f32 %v1052_v23, %v923_v19  ;;  %v1121_v34 = vadd.f32 %v1057_v26, %v928_v24  ;;  %v924_v35 = vmul.f32 %v10718_v8, %v859_v21  ;;  %v925_v36 = vmul.f32 %v10718_v8, %v860_v22  ;;  %v998_v15 = vld [vmem:[%s10682_s17 + $0x60] sm:$0xff]  ;;  %v999_v24 = vld [vmem:[%s10682_s17 + $0x68] sm:$0xff] }
  0xdc   : > { %v1247_v39 = vmul.f32 %v1119_v27, %v1119_v27  ;;  %v1248_v40 = vmul.f32 %v1120_v28, %v1120_v28  ;;  %1183 = vst [vmem:[%s10747_s14 + $0x20] sm:$0xff] %v1119_v27  ;;  %v1243_v41 = vmul.f32 %v1115_v29, %v1115_v29  ;;  %v1122_v42 = vadd.f32 %v1058_v30, %v929_v25  ;;  %v873_v25 = vld [vmem:[%s10671_s10 + $0x80] sm:$0xff]  ;;  %v874_v30 = vld [vmem:[%s10671_s10 + $0x88] sm:$0xff] }
  0xdd   : > { %1184 = vst [vmem:[%s10747_s14 + $0x28] sm:$0xff] %v1120_v28  ;;  %v1244_v44 = vmul.f32 %v1116_v33, %v1116_v33  ;;  %v1249_v45 = vmul.f32 %v1121_v34, %v1121_v34  ;;  %v1053_v46 = vmul.f32 %v10725_v14, %v988_v31  ;;  %v1054_v47 = vmul.f32 %v10725_v14, %v989_v32 }
  0xde   : > { %v1313_v50 = vadd.f32 %v1248_v40, %v1247_v39  ;;  %1179 = vst [vmem:[%s10747_s14] sm:$0xff] %v1115_v29  ;;  %v1250_v51 = vmul.f32 %v1122_v42, %v1122_v42  ;;  %v930_v52 = vmul.f32 %v10718_v8, %v865_v37  ;;  %v931_v53 = vmul.f32 %v10718_v8, %v866_v38  ;;  %v1003_v40 = vld [vmem:[%s10682_s17 + $0x88] sm:$0xff] }
  0xdf   : > { %v1307_v54 = vadd.f32 %v1244_v44, %v1243_v41  ;;  %1180 = vst [vmem:[%s10747_s14 + $0x8] sm:$0xff] %v1116_v33  ;;  %v10760_v55 = vadd.f32 %v1053_v46, %v924_v35  ;;  %v10762_v56 = vadd.f32 %v1054_v47, %v925_v36  ;;  %v1059_v57 = vmul.f32 %v10725_v14, %v994_v43  ;;  %v1002_v35 = vld [vmem:[%s10682_s17 + $0x80] sm:$0xff]  ;;  %v875_v41 = vld [vmem:[%s10671_s10 + $0x90] sm:$0xff]  ;;  %v1005_v47 = vld [vmem:[%s10682_s17 + $0x98] sm:$0xff] }
  0xe0   : > { %1314 = vadd.xlane.f32.xlu1 %v1313_v50  ;;  %v1316_v61 = vadd.f32 %v1250_v51, %v1249_v45  ;;  %1185 = vst [vmem:[%s10747_s14 + $0x30] sm:$0xff] %v1121_v34  ;;  %v1060_v62 = vmul.f32 %v10725_v14, %v995_v48  ;;  %v932_v63 = vmul.f32 %v10718_v8, %v867_v49  ;;  %v1004_v46 = vld [vmem:[%s10682_s17 + $0x90] sm:$0xff] }
  0xe1   : > { %1308 = vadd.xlane.f32.xlu0 %v1307_v54  ;;  %1186 = vst [vmem:[%s10747_s14 + $0x38] sm:$0xff] %v1122_v42  ;;  %v1245_v2 = vmul.f32 %v10760_v55, %v10760_v55  ;;  %v1246_v3 = vmul.f32 %v10762_v56, %v10762_v56  ;;  %v1123_v4 = vadd.f32 %v1059_v57, %v930_v52  ;;  %v876_v42 = vld [vmem:[%s10671_s10 + $0x98] sm:$0xff]  ;;  %v879_v51 = vld [vmem:[%s10671_s10 + $0xb0] sm:$0xff] }
  0xe2   : > { %1181 = vst [vmem:[%s10747_s14 + $0x10] sm:$0xff] %v10760_v55  ;;  %v1124_v7 = vadd.f32 %v1060_v62, %v931_v53  ;;  %v933_v9 = vmul.f32 %v10718_v8, %v868_v58  ;;  %v1061_v10 = vmul.f32 %v10725_v14, %v996_v59  ;;  %v1062_v11 = vmul.f32 %v10725_v14, %v997_v60  ;;  %v880_v52 = vld [vmem:[%s10671_s10 + $0xb8] sm:$0xff]  ;;  %v1008_v59 = vld [vmem:[%s10682_s17 + $0xb0] sm:$0xff] }
  0xe3   : > { %v1310_v16 = vadd.f32 %v1246_v3, %v1245_v2  ;;  %1182 = vst [vmem:[%s10747_s14 + $0x18] sm:$0xff] %v10762_v56  ;;  %v1251_v17 = vmul.f32 %v1123_v4, %v1123_v4  ;;  %v936_v18 = vmul.f32 %v10718_v8, %v871_v0  ;;  %v937_v19 = vmul.f32 %v10718_v8, %v872_v1  ;;  %v1009_v0 = vld [vmem:[%s10682_s17 + $0xb8] sm:$0xff]  ;;  %v877_v1 = vld [vmem:[%s10671_s10 + $0xa0] sm:$0xff] }
  0xe4   : > { %v1252_v20 = vmul.f32 %v1124_v7, %v1124_v7  ;;  %1187 = vst [vmem:[%s10747_s14 + $0x40] sm:$0xff] %v1123_v4  ;;  %v1125_v21 = vadd.f32 %v1061_v10, %v932_v63  ;;  %v1126_v22 = vadd.f32 %v1062_v11, %v933_v9  ;;  %v1065_v23 = vmul.f32 %v10725_v14, %v1000_v5 }
  0xe5   : > { %1188 = vst [vmem:[%s10747_s14 + $0x48] sm:$0xff] %v1124_v7  ;;  %v1066_v26 = vmul.f32 %v10725_v14, %v1001_v6  ;;  %v934_v27 = vmul.f32 %v10718_v8, %v869_v12  ;;  %v935_v28 = vmul.f32 %v10718_v8, %v870_v13  ;;  %v1063_v29 = vmul.f32 %v10725_v14, %v998_v15  ;;  %v878_v6 = vld [vmem:[%s10671_s10 + $0xa8] sm:$0xff]  ;;  %v1006_v12 = vld [vmem:[%s10682_s17 + $0xa0] sm:$0xff] }
  0xe6   : > { %v1319_v31 = vadd.f32 %v1252_v20, %v1251_v17  ;;  %v1253_v32 = vmul.f32 %v1125_v21, %v1125_v21  ;;  %v1254_v33 = vmul.f32 %v1126_v22, %v1126_v22  ;;  %1189 = vst [vmem:[%s10747_s14 + $0x50] sm:$0xff] %v1125_v21  ;;  %v1129_v34 = vadd.f32 %v1065_v23, %v936_v18  ;;  %v1007_v18 = vld [vmem:[%s10682_s17 + $0xa8] sm:$0xff]  ;;  %v884_v23 = vld [vmem:[%s10671_s10 + $0xd8] sm:$0xff] }
  0xe7   : > { %1190 = vst [vmem:[%s10747_s14 + $0x58] sm:$0xff] %v1126_v22  ;;  %v1130_v36 = vadd.f32 %v1066_v26, %v937_v19  ;;  %v1064_v37 = vmul.f32 %v10725_v14, %v999_v24  ;;  %v1127_v38 = vadd.f32 %v1063_v29, %v934_v27  ;;  %v938_v39 = vmul.f32 %v10718_v8, %v873_v25  ;;  %v883_v22 = vld [vmem:[%s10671_s10 + $0xd0] sm:$0xff]  ;;  %v1013_v27 = vld [vmem:[%s10682_s17 + $0xd8] sm:$0xff] }
  0xe8   : > { %1317 = vadd.xlane.f32.xlu1 %v1316_v61  ;;  %1320 = vadd.xlane.f32.xlu2 %v1319_v31  ;;  %v1322_v43 = vadd.f32 %v1254_v33, %v1253_v32  ;;  %v1257_v44 = vmul.f32 %v1129_v34, %v1129_v34  ;;  %1193 = vst [vmem:[%s10747_s14 + $0x70] sm:$0xff] %v1129_v34  ;;  %v1012_v26 = vld [vmem:[%s10682_s17 + $0xd0] sm:$0xff]  ;;  %v882_v32 = vld [vmem:[%s10671_s10 + $0xc8] sm:$0xff]  ;;  %v1010_v33 = vld [vmem:[%s10682_s17 + $0xc0] sm:$0xff] }
  0xe9   : > { %v939_v45 = vmul.f32 %v10718_v8, %v874_v30  ;;  %1311 = vadd.xlane.f32.xlu0 %v1310_v16  ;;  %v1258_v48 = vmul.f32 %v1130_v36, %v1130_v36  ;;  %1194 = vst [vmem:[%s10747_s14 + $0x78] sm:$0xff] %v1130_v36  ;;  %v1128_v49 = vadd.f32 %v1064_v37, %v935_v28  ;;  %v881_v28 = vld [vmem:[%s10671_s10 + $0xc0] sm:$0xff] }
  0xea   : > { %v1255_v50 = vmul.f32 %v1127_v38, %v1127_v38  ;;  %1191 = vst [vmem:[%s10747_s14 + $0x60] sm:$0xff] %v1127_v38  ;;  %v1067_v53 = vmul.f32 %v10725_v14, %v1002_v35  ;;  %v1068_v54 = vmul.f32 %v10725_v14, %v1003_v40  ;;  %v940_v57 = vmul.f32 %v10718_v8, %v875_v41  ;;  %v1011_v38 = vld [vmem:[%s10682_s17 + $0xc8] sm:$0xff] }
  0xeb   : > { %v941_v58 = vmul.f32 %v10718_v8, %v876_v42  ;;  %v1328_v60 = vadd.f32 %v1258_v48, %v1257_v44  ;;  %v1256_v61 = vmul.f32 %v1128_v49, %v1128_v49  ;;  %1192 = vst [vmem:[%s10747_s14 + $0x68] sm:$0xff] %v1128_v49  ;;  %v1069_v62 = vmul.f32 %v10725_v14, %v1004_v46  ;;  %v886_v44 = vld [vmem:[%s10671_s10 + $0xe8] sm:$0xff] }
  0xec   : > { %v1070_v63 = vmul.f32 %v10725_v14, %v1005_v47  ;;  %v1131_v2 = vadd.f32 %v1067_v53, %v938_v39  ;;  %v1132_v3 = vadd.f32 %v1068_v54, %v939_v45  ;;  %v944_v4 = vmul.f32 %v10718_v8, %v879_v51  ;;  %v1014_v45 = vld [vmem:[%s10682_s17 + $0xe0] sm:$0xff]  ;;  %v1015_v54 = vld [vmem:[%s10682_s17 + $0xe8] sm:$0xff] }
  0xed   : > { %v945_v5 = vmul.f32 %v10718_v8, %v880_v52  ;;  %v1325_v7 = vadd.f32 %v1256_v61, %v1255_v50  ;;  %v1133_v9 = vadd.f32 %v1069_v62, %v940_v57  ;;  %v1073_v11 = vmul.f32 %v10725_v14, %v1008_v59  ;;  %v887_v61 = vld [vmem:[%s10671_s10 + $0xf0] sm:$0xff] }
  0xee   : > { %v1134_v10 = vadd.f32 %v1070_v63, %v941_v58  ;;  %v1259_v13 = vmul.f32 %v1131_v2, %v1131_v2  ;;  %v1260_v15 = vmul.f32 %v1132_v3, %v1132_v3  ;;  %1195 = vst [vmem:[%s10747_s14 + $0x80] sm:$0xff] %v1131_v2  ;;  %v1074_v16 = vmul.f32 %v10725_v14, %v1009_v0  ;;  %v888_v2 = vld [vmem:[%s10671_s10 + $0xf8] sm:$0xff] }
  0xef   : > { %v942_v17 = vmul.f32 %v10718_v8, %v877_v1  ;;  %1196 = vst [vmem:[%s10747_s14 + $0x88] sm:$0xff] %v1132_v3  ;;  %v1261_v19 = vmul.f32 %v1133_v9, %v1133_v9  ;;  %v943_v21 = vmul.f32 %v10718_v8, %v878_v6  ;;  %v1137_v24 = vadd.f32 %v1073_v11, %v944_v4  ;;  %v1016_v3 = vld [vmem:[%s10682_s17 + $0xf0] sm:$0xff] }
  0xf0   : > { %v1262_v20 = vmul.f32 %v1134_v10, %v1134_v10  ;;  %1323 = vadd.xlane.f32.xlu2 %v1322_v43  ;;  %1329 = vadd.xlane.f32.xlu1 %v1328_v60  ;;  %1197 = vst [vmem:[%s10747_s14 + $0x90] sm:$0xff] %v1133_v9  ;;  %v1071_v25 = vmul.f32 %v10725_v14, %v1006_v12  ;;  %v885_v43 = vld [vmem:[%s10671_s10 + $0xe0] sm:$0xff] }
  0xf1   : > { %1326 = vadd.xlane.f32.xlu0 %v1325_v7  ;;  %v1331_v29 = vadd.f32 %v1260_v15, %v1259_v13  ;;  %1198 = vst [vmem:[%s10747_s14 + $0x98] sm:$0xff] %v1134_v10  ;;  %v1138_v30 = vadd.f32 %v1074_v16, %v945_v5  ;;  %v1072_v31 = vmul.f32 %v10725_v14, %v1007_v18  ;;  %v1017_v7 = vld [vmem:[%s10682_s17 + $0xf8] sm:$0xff] }
  0xf2   : > { %v1334_v34 = vadd.f32 %v1262_v20, %v1261_v19  ;;  %1201 = vst [vmem:[%s10747_s14 + $0xb0] sm:$0xff] %v1137_v24  ;;  %v1135_v35 = vadd.f32 %v1071_v25, %v942_v17  ;;  %v948_v36 = vmul.f32 %v10718_v8, %v883_v22  ;;  %v949_v37 = vmul.f32 %v10718_v8, %v884_v23 }
  0xf3   : > { %1202 = vst [vmem:[%s10747_s14 + $0xb8] sm:$0xff] %v1138_v30  ;;  %v1136_v39 = vadd.f32 %v1072_v31, %v943_v21  ;;  %v1077_v40 = vmul.f32 %v10725_v14, %v1012_v26  ;;  %v1078_v41 = vmul.f32 %v10725_v14, %v1013_v27  ;;  %v946_v42 = vmul.f32 %v10718_v8, %v881_v28  ;;  %v891_v28 = vld [vmem:[%s10671_s10 + $0x110] sm:$0xff] }
  0xf4   : > { %v1265_v46 = vmul.f32 %v1137_v24, %v1137_v24  ;;  %v1263_v47 = vmul.f32 %v1135_v35, %v1135_v35  ;;  %1199 = vst [vmem:[%s10747_s14 + $0xa0] sm:$0xff] %v1135_v35  ;;  %v947_v48 = vmul.f32 %v10718_v8, %v882_v32  ;;  %v1075_v49 = vmul.f32 %v10725_v14, %v1010_v33  ;;  %v1021_v33 = vld [vmem:[%s10682_s17 + $0x118] sm:$0xff]  ;;  %v889_v35 = vld [vmem:[%s10671_s10 + $0x100] sm:$0xff] }
  0xf5   : > { %v1264_v50 = vmul.f32 %v1136_v39, %v1136_v39  ;;  %1200 = vst [vmem:[%s10747_s14 + $0xa8] sm:$0xff] %v1136_v39  ;;  %v1141_v51 = vadd.f32 %v1077_v40, %v948_v36  ;;  %v1142_v52 = vadd.f32 %v1078_v41, %v949_v37  ;;  %v1076_v53 = vmul.f32 %v10725_v14, %v1011_v38  ;;  %v890_v36 = vld [vmem:[%s10671_s10 + $0x108] sm:$0xff]  ;;  %v1018_v40 = vld [vmem:[%s10682_s17 + $0x100] sm:$0xff] }
  0xf6   : > { %v1139_v57 = vadd.f32 %v1075_v49, %v946_v42  ;;  %v950_v58 = vmul.f32 %v10718_v8, %v885_v43  ;;  %v951_v59 = vmul.f32 %v10718_v8, %v886_v44  ;;  %v1079_v60 = vmul.f32 %v10725_v14, %v1014_v45  ;;  %v1019_v41 = vld [vmem:[%s10682_s17 + $0x108] sm:$0xff] }
  0xf7   : > { %v1266_v62 = vmul.f32 %v1138_v30, %v1138_v30  ;;  %v1337_v63 = vadd.f32 %v1264_v50, %v1263_v47  ;;  %v1269_v0 = vmul.f32 %v1141_v51, %v1141_v51  ;;  %1205 = vst [vmem:[%s10747_s14 + $0xd0] sm:$0xff] %v1141_v51  ;;  %v1140_v1 = vadd.f32 %v1076_v53, %v947_v48  ;;  %v1020_v30 = vld [vmem:[%s10682_s17 + $0x110] sm:$0xff]  ;;  %v8384_v45 = vld [vmem:[%s15222_s25 + $0x70] sm:$0xf]  ;;  %v9140_v51 = vld [vmem:[%s15222_s25 + $0x74] sm:$0xf] }
  0xf8   : > { %1332 = vadd.xlane.f32.xlu2 %v1331_v29  ;;  %v1270_v4 = vmul.f32 %v1142_v52, %v1142_v52  ;;  %1206 = vst [vmem:[%s10747_s14 + $0xd8] sm:$0xff] %v1142_v52  ;;  %v1267_v5 = vmul.f32 %v1139_v57, %v1139_v57  ;;  %v1080_v6 = vmul.f32 %v10725_v14, %v1015_v54  ;;  %v892_v29 = vld [vmem:[%s10671_s10 + $0x118] sm:$0xff]  ;;  %v8448_v47 = vld [vmem:[%s15222_s25 + $0xf0] sm:$0xf]  ;;  %v9157_v50 = vld [vmem:[%s15222_s25 + $0xf4] sm:$0xf0] }
  0xf9   : > { %1335 = vadd.xlane.f32.xlu0 %v1334_v34  ;;  %1338 = vadd.xlane.f32.xlu1 %v1337_v63  ;;  %v1268_v9 = vmul.f32 %v1140_v1, %v1140_v1  ;;  %1203 = vst [vmem:[%s10747_s14 + $0xc0] sm:$0xff] %v1139_v57  ;;  %v1143_v10 = vadd.f32 %v1079_v60, %v950_v58  ;;  %v8386_v52 = vld [vmem:[%s15222_s25 + $0x78] sm:$0xf0]  ;;  %v10325_v58 = vmov 256.0  }
  0xfa   : > { %v952_v11 = vmul.f32 %v10718_v8, %v887_v61  ;;  %1204 = vst [vmem:[%s10747_s14 + $0xc8] sm:$0xff] %v1140_v1  ;;  %v1144_v12 = vadd.f32 %v1080_v6, %v951_v59  ;;  %v953_v13 = vmul.f32 %v10718_v8, %v888_v2  ;;  %v1081_v15 = vmul.f32 %v10725_v14, %v1016_v3  ;;  %v9156_v61 = vld [vmem:[%s15222_s25 + $0xf4] sm:$0xf] }
  0xfb   : > { %1207 = vst [vmem:[%s10747_s14 + $0xe0] sm:$0xff] %v1143_v10  ;;  %v1082_v16 = vmul.f32 %v10725_v14, %v1017_v7  ;;  %v1340_v17 = vadd.f32 %v1266_v62, %v1265_v46  ;;  %v1346_v19 = vadd.f32 %v1270_v4, %v1269_v0  ;;  %v1343_v20 = vadd.f32 %v1268_v9, %v1267_v5  ;;  %v9141_v46 = vld [vmem:[%s15222_s25 + $0x74] sm:$0xf0]  ;;  %v8450_v62 = vld [vmem:[%s15222_s25 + $0xf8] sm:$0xf0] }
  0xfc   : > { %1208 = vst [vmem:[%s10747_s14 + $0xe8] sm:$0xff] %v1144_v12  ;;  %v1145_v18 = vadd.f32 %v1081_v15, %v952_v11  ;;  %v1271_v22 = vmul.f32 %v1143_v10, %v1143_v10  ;;  %v1272_v23 = vmul.f32 %v1144_v12, %v1144_v12  ;;  %v956_v31 = vmul.f32 %v10718_v8, %v891_v28  ;;  %v8376_v4 = vld [vmem:[%s15222_s25 + $0x60] sm:$0xf]  ;;  %v9139_v5 = vld [vmem:[%s15222_s25 + $0x64] sm:$0xf0] }
  0xfd   : > { %v1146_v21 = vadd.f32 %v1082_v16, %v953_v13  ;;  %v957_v32 = vmul.f32 %v10718_v8, %v892_v29  ;;  %v1085_v34 = vmul.f32 %v10725_v14, %v1020_v30  ;;  %v1086_v37 = vmul.f32 %v10725_v14, %v1021_v33  ;;  %v8440_v9 = vld [vmem:[%s15222_s25 + $0xe0] sm:$0xf]  ;;  %v9155_v10 = vld [vmem:[%s15222_s25 + $0xe4] sm:$0xf0]  ;;  %v9138_v12 = vld [vmem:[%s15222_s25 + $0x64] sm:$0xf] }
  0xfe   : > { %1209 = vst [vmem:[%s10747_s14 + $0xf0] sm:$0xff] %v1145_v18  ;;  %v1273_v24 = vmul.f32 %v1145_v18, %v1145_v18  ;;  %v1349_v26 = vadd.f32 %v1272_v23, %v1271_v22  ;;  %v954_v38 = vmul.f32 %v10718_v8, %v889_v35  ;;  %v955_v39 = vmul.f32 %v10718_v8, %v890_v36  ;;  %v8378_v13 = vld [vmem:[%s15222_s25 + $0x68] sm:$0xf0]  ;;  %v9154_v15 = vld [vmem:[%s15222_s25 + $0xe4] sm:$0xf] }
  0xff   : > { %1210 = vst [vmem:[%s10747_s14 + $0xf8] sm:$0xff] %v1146_v21  ;;  %v1274_v25 = vmul.f32 %v1146_v21, %v1146_v21  ;;  %v1149_v42 = vadd.f32 %v1085_v34, %v956_v31  ;;  %v1083_v43 = vmul.f32 %v10725_v14, %v1018_v40  ;;  %v1084_v44 = vmul.f32 %v10725_v14, %v1019_v41  ;;  %v9137_v21 = vld [vmem:[%s15222_s25 + $0x54] sm:$0xf0]  ;;  %v8432_v22 = vld [vmem:[%s15222_s25 + $0xd0] sm:$0xf] }
 0x100   : > { %1341 = vadd.xlane.f32.xlu2 %v1340_v17  ;;  %v1150_v48 = vadd.f32 %v1086_v37, %v957_v32  ;;  %v8385_v49 = vor.u32 %v9141_v46, %v8384_v45  ;;  %9435 = vrcp.f32 %v10325_v58  ;;  %v8449_v59 = vor.u32 %v9157_v50, %v8448_v47  ;;  %v8442_v17 = vld [vmem:[%s15222_s25 + $0xe8] sm:$0xf0]  ;;  %v9152_v29 = vld [vmem:[%s15222_s25 + $0xd4] sm:$0xf]  ;;  %v8434_v30 = vld [vmem:[%s15222_s25 + $0xd8] sm:$0xf0] }
 0x101   : > { %1347 = vadd.xlane.f32.xlu1 %v1346_v19  ;;  %1344 = vadd.xlane.f32.xlu0 %v1343_v20  ;;  %v1352_v27 = vadd.f32 %v1274_v25, %v1273_v24  ;;  %v1277_v53 = vmul.f32 %v1149_v42, %v1149_v42  ;;  %v1147_v54 = vadd.f32 %v1083_v43, %v954_v38  ;;  %v8368_v20 = vld [vmem:[%s15222_s25 + $0x50] sm:$0xf]  ;;  %v9153_v24 = vld [vmem:[%s15222_s25 + $0xd4] sm:$0xf0]  ;;  %v9136_v25 = vld [vmem:[%s15222_s25 + $0x54] sm:$0xf] }
 0x102   : > { %v1148_v57 = vadd.f32 %v1084_v44, %v955_v39  ;;  %v8389_v60 = vor.u32 %v9140_v51, %v8386_v52  ;;  %v1278_v63 = vmul.f32 %v1150_v48, %v1150_v48  ;;  %1213 = vst [vmem:[%s10747_s14 + $0x110] sm:$0xff] %v1149_v42  ;;  %2243 = vmatpush.bf16.msra.mxu0 %v8385_v49  ;;  %v8360_v33 = vld [vmem:[%s15222_s25 + $0x40] sm:$0xf]  ;;  %v9135_v34 = vld [vmem:[%s15222_s25 + $0x44] sm:$0xf0]  ;;  %v895_v44 = vld [vmem:[%s10671_s10 + $0x130] sm:$0xff] }
 0x103   : > { %v8453_v0 = vor.u32 %v9156_v61, %v8450_v62  ;;  %1214 = vst [vmem:[%s10747_s14 + $0x118] sm:$0xff] %v1150_v48  ;;  %v1275_v1 = vmul.f32 %v1147_v54, %v1147_v54  ;;  %2332 = vmatpush.bf16.msra.mxu1 %v8449_v59  ;;  %v8377_v7 = vor.u32 %v9139_v5, %v8376_v4  ;;  %v8424_v35 = vld [vmem:[%s15222_s25 + $0xc0] sm:$0xf]  ;;  %v9151_v37 = vld [vmem:[%s15222_s25 + $0xc4] sm:$0xf0]  ;;  %v1024_v49 = vld [vmem:[%s10682_s17 + $0x130] sm:$0xff] }
 0x104   : > { %v1276_v2 = vmul.f32 %v1148_v57, %v1148_v57  ;;  %2421 = vmatpush.bf16.msra.mxu2 %v8389_v60  ;;  %v1358_v3 = vadd.f32 %v1278_v63, %v1277_v53  ;;  %1211 = vst [vmem:[%s10747_s14 + $0x100] sm:$0xff] %v1147_v54  ;;  %v8441_v11 = vor.u32 %v9155_v10, %v8440_v9  ;;  %v9134_v38 = vld [vmem:[%s15222_s25 + $0x44] sm:$0xf]  ;;  %v8362_v39 = vld [vmem:[%s15222_s25 + $0x48] sm:$0xf0]  ;;  %v894_v9 = vld [vmem:[%s10671_s10 + $0x128] sm:$0xff] }
 0x105   : > { %2510 = vmatpush.bf16.msra.mxu3 %v8453_v0  ;;  %1212 = vst [vmem:[%s10747_s14 + $0x108] sm:$0xff] %v1148_v57  ;;  %v8381_v16 = vor.u32 %v9138_v12, %v8378_v13  ;;  %v8445_v19 = vor.u32 %v9154_v15, %v8442_v17  ;;  %v8369_v23 = vor.u32 %v9137_v21, %v8368_v20  ;;  %v9150_v42 = vld [vmem:[%s15222_s25 + $0xc4] sm:$0xf]  ;;  %v8426_v43 = vld [vmem:[%s15222_s25 + $0xc8] sm:$0xf0]  ;;  %v1023_v12 = vld [vmem:[%s10682_s17 + $0x128] sm:$0xff] }
 0x106   : > { %v1355_v6 = vadd.f32 %v1276_v2, %v1275_v1  ;;  %2244 = vmatpush.bf16.msra.mxu0 %v8377_v7  ;;  %v10955_v18 = vpop.eup %9435  ;;  %v8437_v32 = vor.u32 %v9152_v29, %v8434_v30  ;;  %v8361_v36 = vor.u32 %v9135_v34, %v8360_v33  ;;  %v8425_v40 = vor.u32 %v9151_v37, %v8424_v35  ;;  %v896_v47 = vld [vmem:[%s10671_s10 + $0x138] sm:$0xff]  ;;  %v8352_v51 = vld [vmem:[%s15222_s25 + $0x30] sm:$0xf]  ;;  %v9133_v52 = vld [vmem:[%s15222_s25 + $0x34] sm:$0xf0] }
 0x107   : > { %2333 = vmatpush.bf16.msra.mxu1 %v8441_v11  ;;  %v1404_v31 = vmul.f32 256.0, %v10955_v18  ;;  %v8365_v41 = vor.u32 %v9134_v38, %v8362_v39  ;;  %v8429_v46 = vor.u32 %v9150_v42, %v8426_v43  ;;  %v960_v48 = vmul.f32 %v10718_v8, %v895_v44  ;;  %v1025_v50 = vld [vmem:[%s10682_s17 + $0x138] sm:$0xff]  ;;  %v8416_v53 = vld [vmem:[%s15222_s25 + $0xb0] sm:$0xf]  ;;  %v9149_v60 = vld [vmem:[%s15222_s25 + $0xb4] sm:$0xf0] }
 0x108   : > { %1350 = vadd.xlane.f32.xlu2 %v1349_v26  ;;  %2422 = vmatpush.bf16.msra.mxu2 %v8381_v16  ;;  %v8370_v26 = vld [vmem:[%s15222_s25 + $0x58] sm:$0xf0]  ;;  %v961_v54 = vmul.f32 %v10718_v8, %v896_v47  ;;  %v1089_v57 = vmul.f32 %v10725_v14, %v1024_v49  ;;  %v1090_v58 = vmul.f32 %v10725_v14, %v1025_v50  ;;  %v9132_v61 = vld [vmem:[%s15222_s25 + $0x34] sm:$0xf]  ;;  %v893_v5 = vld [vmem:[%s10671_s10 + $0x120] sm:$0xff]  ;;  %vm1408_vm0 = vweird.f32 %v10955_v18 }
 0x109   : > { %1353 = vadd.xlane.f32.xlu0 %v1352_v27  ;;  %1356 = vadd.xlane.f32.xlu1 %v1355_v6  ;;  %v8433_v27 = vor.u32 %v9153_v24, %v8432_v22  ;;  %v8373_v28 = vor.u32 %v9136_v25, %v8370_v26  ;;  %v1405_v45 = vsub.f32 1.0, %v1404_v31  ;;  %v8353_v59 = vor.u32 %v9133_v52, %v8352_v51  ;;  %v8354_v62 = vld [vmem:[%s15222_s25 + $0x38] sm:$0xf0]  ;;  %v9148_v1 = vld [vmem:[%s15222_s25 + $0xb4] sm:$0xf]  ;;  %v1022_v11 = vld [vmem:[%s10682_s17 + $0x120] sm:$0xff] }
 0x10a   : > { %2511 = vmatpush.bf16.msra.mxu3 %v8445_v19  ;;  %2245 = vmatpush.bf16.msra.mxu0 %v8369_v23  ;;  %v8417_v63 = vor.u32 %v9149_v60, %v8416_v53  ;;  %v8357_v0 = vor.u32 %v9132_v61, %v8354_v62  ;;  %v8418_v2 = vld [vmem:[%s15222_s25 + $0xb8] sm:$0xf0]  ;;  %v1154_v4 = vadd.f32 %v1090_v58, %v961_v54  ;;  %v8344_v17 = vld [vmem:[%s15222_s25 + $0x20] sm:$0xf]  ;;  %v9131_v19 = vld [vmem:[%s15222_s25 + $0x24] sm:$0xf0] }
 0x10b   : > { %2334 = vmatpush.bf16.msra.mxu1 %v8433_v27  ;;  %v1406_v6 = vmul.f32 %v10955_v18, %v1405_v45  ;;  %v8421_v7 = vor.u32 %v9148_v1, %v8418_v2  ;;  %v958_v10 = vmul.f32 %v10718_v8, %v893_v5  ;;  %v959_v16 = vmul.f32 %v10718_v8, %v894_v9  ;;  %v8408_v23 = vld [vmem:[%s15222_s25 + $0xa0] sm:$0xf]  ;;  %v9147_v24 = vld [vmem:[%s15222_s25 + $0xa4] sm:$0xf0]  ;;  %v9130_v27 = vld [vmem:[%s15222_s25 + $0x24] sm:$0xf] }
 0x10c   : > { %2423 = vmatpush.bf16.msra.mxu2 %v8373_v28  ;;  %v1282_v15 = vmul.f32 %v1154_v4, %v1154_v4  ;;  %1218 = vst [vmem:[%s10747_s14 + $0x138] sm:$0xff] %v1154_v4  ;;  %v1087_v20 = vmul.f32 %v10725_v14, %v1022_v11  ;;  %v1088_v21 = vmul.f32 %v10725_v14, %v1023_v12  ;;  %v8346_v28 = vld [vmem:[%s15222_s25 + $0x28] sm:$0xf0]  ;;  %v9146_v29 = vld [vmem:[%s15222_s25 + $0xa4] sm:$0xf]  ;;  %v898_v4 = vld [vmem:[%s10671_s10 + $0x148] sm:$0xff] }
 0x10d   : > { %v8345_v22 = vor.u32 %v9131_v19, %v8344_v17  ;;  %v8409_v26 = vor.u32 %v9147_v24, %v8408_v23  ;;  %v8410_v33 = vld [vmem:[%s15222_s25 + $0xa8] sm:$0xf0]  ;;  %v1407_v34 = vadd.f32 %v10955_v18, %v1406_v6  ;;  %v9129_v37 = vld [vmem:[%s15222_s25 + $0x14] sm:$0xf0]  ;;  %v8400_v38 = vld [vmem:[%s15222_s25 + $0x90] sm:$0xf] }
 0x10e   : > { %2512 = vmatpush.bf16.msra.mxu3 %v8437_v32  ;;  %2246 = vmatpush.bf16.msra.mxu0 %v8361_v36  ;;  %v1151_v30 = vadd.f32 %v1087_v20, %v958_v10  ;;  %v1152_v31 = vadd.f32 %v1088_v21, %v959_v16  ;;  %v8349_v32 = vor.u32 %v9130_v27, %v8346_v28  ;;  %v8336_v36 = vld [vmem:[%s15222_s25 + $0x10] sm:$0xf]  ;;  %v9145_v42 = vld [vmem:[%s15222_s25 + $0x94] sm:$0xf0]  ;;  %v9128_v43 = vld [vmem:[%s15222_s25 + $0x14] sm:$0xf] }
 0x10f   : > { %2335 = vmatpush.bf16.msra.mxu1 %v8425_v40  ;;  %v8413_v35 = vor.u32 %v9146_v29, %v8410_v33  ;;  %v8401_v44 = vor.u32 %v9145_v42, %v8400_v38  ;;  %v8338_v45 = vld [vmem:[%s15222_s25 + $0x18] sm:$0xf0]  ;;  %v8328_v51 = vld [vmem:[%s15222_s25] sm:$0xf]  ;;  %v9127_v52 = vld [vmem:[%s15222_s25 + $0x4] sm:$0xf0]  ;;  %v11111_v54 = vsel %vm1408_vm0, %v10955_v18, %v1407_v34  ;;  %v963_v10 = vmul.f32 %v10718_v8, %v898_v4 }
 0x110   : > { %1359 = vadd.xlane.f32.xlu2 %v1358_v3  ;;  %2424 = vmatpush.bf16.msra.mxu2 %v8365_v41  ;;  %v1153_v3 = vadd.f32 %v1089_v57, %v960_v48  ;;  %v1279_v39 = vmul.f32 %v1151_v30, %v1151_v30  ;;  %v1280_v40 = vmul.f32 %v1152_v31, %v1152_v31  ;;  %v8402_v49 = vld [vmem:[%s15222_s25 + $0x98] sm:$0xf0]  ;;  %v8392_v53 = vld [vmem:[%s15222_s25 + $0x80] sm:$0xf]  ;;  %v9143_v58 = vld [vmem:[%s15222_s25 + $0x84] sm:$0xf0] }
 0x111   : > { %1215 = vst [vmem:[%s10747_s14 + $0x120] sm:$0xff] %v1151_v30  ;;  %v8337_v41 = vor.u32 %v9129_v37, %v8336_v36  ;;  %v8341_v48 = vor.u32 %v9128_v43, %v8338_v45  ;;  %v8329_v57 = vor.u32 %v9127_v52, %v8328_v51  ;;  %v8330_v60 = vld [vmem:[%s15222_s25 + $0x8] sm:$0xf0]  ;;  %v8393_v61 = vor.u32 %v9143_v58, %v8392_v53  ;;  %v1028_v16 = vld [vmem:[%s10682_s17 + $0x150] sm:$0xff]  ;;  %v1029_v20 = vld [vmem:[%s10682_s17 + $0x158] sm:$0xff] }
 0x112   : > { %2513 = vmatpush.bf16.msra.mxu3 %v8429_v46  ;;  %2247 = vmatpush.bf16.msra.mxu0 %v8353_v59  ;;  %v1281_v13 = vmul.f32 %v1153_v3, %v1153_v3  ;;  %1217 = vst [vmem:[%s10747_s14 + $0x130] sm:$0xff] %v1153_v3  ;;  %v9144_v46 = vld [vmem:[%s15222_s25 + $0x94] sm:$0xf]  ;;  %v1361_v47 = vadd.f32 %v1280_v40, %v1279_v39  ;;  %v9126_v59 = vld [vmem:[%s15222_s25 + $0x4] sm:$0xf]  ;;  %v897_v1 = vld [vmem:[%s10671_s10 + $0x140] sm:$0xff] }
 0x113   : > { %2336 = vmatpush.bf16.msra.mxu1 %v8417_v63  ;;  %1216 = vst [vmem:[%s10747_s14 + $0x128] sm:$0xff] %v1152_v31  ;;  %v8405_v50 = vor.u32 %v9144_v46, %v8402_v49  ;;  %v8333_v62 = vor.u32 %v9126_v59, %v8330_v60  ;;  %v9142_v63 = vld [vmem:[%s15222_s25 + $0x84] sm:$0xf]  ;;  %v962_v5 = vmul.f32 %v10718_v8, %v897_v1  ;;  %v1026_v6 = vld [vmem:[%s10682_s17 + $0x140] sm:$0xff]  ;;  %v8512_v37 = vld [vmem:[#allocation14 + $0x70] sm:$0xf] }
 0x114   : > { %2425 = vmatpush.bf16.msra.mxu2 %v8357_v0  ;;  %v1364_v25 = vadd.f32 %v1282_v15, %v1281_v13  ;;  %1362 = vadd.xlane.f32.xlu0 %v1361_v47  ;;  %v8394_v0 = vld [vmem:[%s15222_s25 + $0x88] sm:$0xf0]  ;;  %v1091_v11 = vmul.f32 %v10725_v14, %v1026_v6  ;;  %v899_v13 = vld [vmem:[%s10671_s10 + $0x150] sm:$0xff]  ;;  %v900_v15 = vld [vmem:[%s10671_s10 + $0x158] sm:$0xff]  ;;  %v1093_v21 = vmul.f32 %v10725_v14, %v1028_v16 }
 0x115   : > { %v8397_v3 = vor.u32 %v9142_v63, %v8394_v0  ;;  %v964_v17 = vmul.f32 %v10718_v8, %v899_v13  ;;  %v965_v19 = vmul.f32 %v10718_v8, %v900_v15  ;;  %v9173_v38 = vld [vmem:[#allocation14 + $0x74] sm:$0xf0]  ;;  %v8576_v39 = vld [vmem:[#allocation14 + $0xf0] sm:$0xf]  ;;  %v901_v13 = vld [vmem:[%s10671_s10 + $0x160] sm:$0xff] }
 0x116   : > { %2514 = vmatpush.bf16.msra.mxu3 %v8421_v7  ;;  %2248 = vmatpush.bf16.msra.mxu0 %v8345_v22  ;;  %v1027_v7 = vld [vmem:[%s10682_s17 + $0x148] sm:$0xff]  ;;  %v1155_v23 = vadd.f32 %v1091_v11, %v962_v5  ;;  %v8513_v42 = vor.u32 %v9173_v38, %v8512_v37  ;;  %v9189_v43 = vld [vmem:[#allocation14 + $0xf4] sm:$0xf0]  ;;  %v903_v52 = vld [vmem:[%s10671_s10 + $0x170] sm:$0xff] }
 0x117   : > { %1365 = vadd.xlane.f32.xlu1 %v1364_v25  ;;  %2337 = vmatpush.bf16.msra.mxu1 %v8409_v26  ;;  %v1092_v12 = vmul.f32 %v10725_v14, %v1027_v7  ;;  %v1094_v25 = vmul.f32 %v10725_v14, %v1029_v20  ;;  %v1157_v26 = vadd.f32 %v1093_v21, %v964_v17  ;;  %v904_v53 = vld [vmem:[%s10671_s10 + $0x178] sm:$0xff] }
 0x118   : > { %2426 = vmatpush.bf16.msra.mxu2 %v8349_v32  ;;  %v1283_v27 = vmul.f32 %v1155_v23, %v1155_v23  ;;  %1219 = vst [vmem:[%s10747_s14 + $0x140] sm:$0xff] %v1155_v23  ;;  %v8577_v46 = vor.u32 %v9189_v43, %v8576_v39  ;;  %v968_v58 = vmul.f32 %v10718_v8, %v903_v52  ;;  %v1033_v60 = vld [vmem:[%s10682_s17 + $0x178] sm:$0xff]  ;;  %v1030_v23 = vld [vmem:[%s10682_s17 + $0x160] sm:$0xff] }
 0x119   : > { %v1156_v24 = vadd.f32 %v1092_v12, %v963_v10  ;;  %v1158_v30 = vadd.f32 %v1094_v25, %v965_v19  ;;  %v1285_v31 = vmul.f32 %v1157_v26, %v1157_v26  ;;  %1221 = vst [vmem:[%s10747_s14 + $0x150] sm:$0xff] %v1157_v26  ;;  %v969_v59 = vmul.f32 %v10718_v8, %v904_v53 }
 0x11a   : > { %2515 = vmatpush.bf16.msra.mxu3 %v8413_v35  ;;  %2249 = vmatpush.bf16.msra.mxu0 %v8337_v41  ;;  %v1098_v63 = vmul.f32 %v10725_v14, %v1033_v60  ;;  %v966_v21 = vmul.f32 %v10718_v8, %v901_v13 }
 0x11b   : > { %2338 = vmatpush.bf16.msra.mxu1 %v8401_v44  ;;  %v1284_v28 = vmul.f32 %v1156_v24, %v1156_v24  ;;  %1220 = vst [vmem:[%s10747_s14 + $0x148] sm:$0xff] %v1156_v24  ;;  %v1286_v40 = vmul.f32 %v1158_v30, %v1158_v30 }
 0x11c   : > { %2427 = vmatpush.bf16.msra.mxu2 %v8341_v48  ;;  %1222 = vst [vmem:[%s10747_s14 + $0x158] sm:$0xff] %v1158_v30 }
 0x11d   : > { %v1367_v34 = vadd.f32 %v1284_v28, %v1283_v27  ;;  %v1370_v47 = vadd.f32 %v1286_v40, %v1285_v31  ;;  %v902_v28 = vld [vmem:[%s10671_s10 + $0x168] sm:$0xff]  ;;  %v9629_v40 = vld [vmem:[%s10747_s14] sm:$0xff] }
 0x11e   : > { %2516 = vmatpush.bf16.msra.mxu3 %v8405_v50  ;;  %2250 = vmatpush.bf16.msra.mxu0 %v8329_v57  ;;  %v1032_v57 = vld [vmem:[%s10682_s17 + $0x170] sm:$0xff] }
 0x11f   : > { %2339 = vmatpush.bf16.msra.mxu1 %v8393_v61  ;;  %1368 = vadd.xlane.f32.xlu2 %v1367_v34 }
 0x120   : > { %2428 = vmatpush.bf16.msra.mxu2 %v8333_v62  ;;  %1371 = vadd.xlane.f32.xlu0 %v1370_v47 }
 0x122   : > { %2517 = vmatpush.bf16.msra.mxu3 %v8397_v3  ;;  %2791 = vmatpush.bf16.msrb.mxu0 %v8513_v42  ;;  %v1162_v3 = vadd.f32 %v1098_v63, %v969_v59  ;;  %v9630_v42 = vld [vmem:[%s10747_s14 + $0x8] sm:$0xff] }
 0x123   : > { %2880 = vmatpush.bf16.msrb.mxu1 %v8577_v46 }
 0x124   : > { %1226 = vst [vmem:[%s10747_s14 + $0x178] sm:$0xff] %v1162_v3  ;;  %v1290_v26 = vmul.f32 %v1162_v3, %v1162_v3  ;;  %v8568_v3 = vld [vmem:[#allocation14 + $0xe0] sm:$0xf] }
 0x153   : > { %v1315_v18 = vpop.xlane.xlu1 %1314 }
 0x154   : > { %v1309_v2 = vpop.xlane.xlu0 %1308  ;;  %v1412_v29 = vmul.f32 %v11111_v54, %v1315_v18  ;;  %v1097_v18 = vmul.f32 %v10725_v14, %v1032_v57 }
 0x155   : > { %v1410_v9 = vmul.f32 %v11111_v54, %v1309_v2 }
 0x156   : > { %v11155_v44 = vadd.f32 1.1920929e-07, %v1412_v29  ;;  %v1161_v1 = vadd.f32 %v1097_v18, %v968_v58 }
 0x157   : > { %v11144_v22 = vadd.f32 1.1920929e-07, %v1410_v9 }
 0x158   : > { %1225 = vst [vmem:[%s10747_s14 + $0x170] sm:$0xff] %v1161_v1  ;;  %v1289_v25 = vmul.f32 %v1161_v1, %v1161_v1  ;;  %vm1500_vm9 = vweird.f32 %v11155_v44 }
 0x159   : > { %9437 = vrsqrt.f32 %v11144_v22  ;;  %vm1480_vm2 = vweird.f32 %v11144_v22 }
 0x15a   : > { %v1376_v31 = vadd.f32 %v1290_v26, %v1289_v25  ;;  %v1035_v25 = vld [vmem:[%s10682_s17 + $0x188] sm:$0xff] }
 0x15b   : > { %v1318_v32 = vpop.xlane.xlu1 %1317  ;;  %v1321_v33 = vpop.xlane.xlu2 %1320 }
 0x15c   : > { %v1413_v35 = vmul.f32 %v11111_v54, %v1318_v32  ;;  %v1312_v36 = vpop.xlane.xlu0 %1311  ;;  %v1414_v0 = vmul.f32 %v11111_v54, %v1321_v33  ;;  %v1095_v32 = vmul.f32 %v10725_v14, %v1030_v23  ;;  %1377 = vadd.xlane.f32.xlu2 %v1376_v31 }
 0x15d   : > { %v1411_v41 = vmul.f32 %v11111_v54, %v1312_v36  ;;  %v967_v36 = vmul.f32 %v10718_v8, %v902_v28 }
 0x15e   : > { %v11157_v45 = vadd.f32 1.1920929e-07, %v1413_v35  ;;  %v11180_v11 = vadd.f32 1.1920929e-07, %v1414_v0  ;;  %v1159_v38 = vadd.f32 %v1095_v32, %v966_v21 }
 0x15f   : > { %v9438_v48 = vpop.eup %9437  ;;  %v1443_v49 = vadd.f32 1.1920929e-07, %v1411_v41 }
 0x160   : > { %v1475_v50 = vmul.f32 %v9438_v48, %v11144_v22  ;;  %9439 = vrsqrt.f32 %v11157_v45  ;;  %vm1481_vm1 = vweird.f32 %v9438_v48  ;;  %v1031_v22 = vld [vmem:[%s10682_s17 + $0x168] sm:$0xff]  ;;  %1223 = vst [vmem:[%s10747_s14 + $0x160] sm:$0xff] %v1159_v38  ;;  %vm1510_vm7 = vweird.f32 %v11157_v45 }
 0x161   : > { %9441 = vrsqrt.f32 %v1443_v49  ;;  %vm1482_vm4 = vmor %vm1480_vm2, %vm1481_vm1  ;;  %vm1490_vm5 = vweird.f32 %v1443_v49  ;;  %v1096_v37 = vmul.f32 %v10725_v14, %v1031_v22  ;;  %vm1520_vm13 = vweird.f32 %v11180_v11 }
 0x162   : > { %9443 = vrsqrt.f32 %v11155_v44  ;;  %v1476_v51 = vmul.f32 %v9438_v48, %v1475_v50 }
 0x163   : > { %v1324_v62 = vpop.xlane.xlu2 %1323  ;;  %9445 = vrsqrt.f32 %v11180_v11  ;;  %v1330_v35 = vpop.xlane.xlu1 %1329  ;;  %v1160_v58 = vadd.f32 %v1096_v37, %v967_v36  ;;  %v9631_v36 = vld [vmem:[%s10747_s14 + $0x30] sm:$0xff] }
 0x164   : > { %v1477_v61 = vmul.f32 0.5, %v1476_v51  ;;  %v1415_v5 = vmul.f32 %v11111_v54, %v1324_v62  ;;  %v1417_v53 = vmul.f32 %v11111_v54, %v1330_v35  ;;  %v1327_v57 = vpop.xlane.xlu0 %1326  ;;  %v9171_v62 = vld [vmem:[#allocation14 + $0x64] sm:$0xf0] }
 0x165   : > { %v1288_v18 = vmul.f32 %v1160_v58, %v1160_v58  ;;  %1224 = vst [vmem:[%s10747_s14 + $0x168] sm:$0xff] %v1160_v58  ;;  %v1416_v1 = vmul.f32 %v11111_v54, %v1327_v57 }
 0x166   : > { %v11171_v2 = vpop.eup %9439  ;;  %v1478_v7 = vsub.f32 1.5, %v1477_v61  ;;  %v11185_v16 = vadd.f32 1.1920929e-07, %v1415_v5  ;;  %v8504_v61 = vld [vmem:[#allocation14 + $0x60] sm:$0xf]  ;;  %v11225_v0 = vadd.f32 1.1920929e-07, %v1417_v53  ;;  %v9634_v53 = vld [vmem:[%s10747_s14 + $0x28] sm:$0xff] }
 0x167   : > { %v9442_v4 = vpop.eup %9441  ;;  %v1505_v10 = vmul.f32 %v11171_v2, %v11157_v45  ;;  %vm1511_vm8 = vweird.f32 %v11171_v2  ;;  %v8505_v13 = vor.u32 %v9171_v62, %v8504_v61  ;;  %v906_v45 = vld [vmem:[%s10671_s10 + $0x188] sm:$0xff] }
 0x168   : > { %v11175_v6 = vpop.eup %9443  ;;  %v1485_v9 = vmul.f32 %v9442_v4, %v1443_v49  ;;  %v1479_v17 = vmul.f32 %v9438_v48, %v1478_v7  ;;  %vm1491_vm3 = vweird.f32 %v9442_v4  ;;  %9447 = vrsqrt.f32 %v11185_v16  ;;  %vm11234_vm11 = vmor %vm1510_vm7, %vm1511_vm8 }
 0x169   : > { %v1495_v15 = vmul.f32 %v11175_v6, %v11155_v44  ;;  %v1506_v20 = vmul.f32 %v11171_v2, %v1505_v10  ;;  %vm1492_vm6 = vmor %vm1490_vm5, %vm1491_vm3  ;;  %v11199_v39 = vpop.eup %9445  ;;  %vm1501_vm10 = vweird.f32 %v11175_v6  ;;  %v908_v10 = vld [vmem:[%s10671_s10 + $0x198] sm:$0xff]  ;;  %9449 = vrsqrt.f32 %v11225_v0  ;;  %2792 = vmatpush.bf16.msrb.mxu0 %v8505_v13 }
 0x16a   : > { %v1486_v12 = vmul.f32 %v9442_v4, %v1485_v9  ;;  %v1483_v29 = vsel %vm1482_vm4, %v9438_v48, %v1479_v17  ;;  %v907_v9 = vld [vmem:[%s10671_s10 + $0x190] sm:$0xff]  ;;  %vm1502_vm12 = vmor %vm1500_vm9, %vm1501_vm10  ;;  %v973_v22 = vmul.f32 %v10718_v8, %v908_v10  ;;  %vm1521_vm14 = vweird.f32 %v11199_v39  ;;  %v1039_v10 = vld [vmem:[%s10682_s17 + $0x1a8] sm:$0xff] }
 0x16b   : > { %v1496_v27 = vmul.f32 %v11175_v6, %v1495_v15  ;;  %v1507_v33 = vmul.f32 0.5, %v1506_v20  ;;  %v1794_v41 = vmul.f32 %v9629_v40, %v1483_v29  ;;  %v1795_v43 = vmul.f32 %v9630_v42, %v1483_v29  ;;  %v1036_v17 = vld [vmem:[%s10682_s17 + $0x190] sm:$0xff]  ;;  %v905_v20 = vld [vmem:[%s10671_s10 + $0x180] sm:$0xff]  ;;  %vm11306_vm1 = vmor %vm1520_vm13, %vm1521_vm14 }
 0x16c   : > { %v1487_v19 = vmul.f32 0.5, %v1486_v12  ;;  %v972_v28 = vmul.f32 %v10718_v8, %v907_v9  ;;  %v1101_v29 = vmul.f32 %v10725_v14, %v1036_v17  ;;  %vm1530_vm15 = vweird.f32 %v11185_v16  ;;  %v1336_v5 = vpop.xlane.xlu0 %1335 }
 0x16d   : > { %v1497_v48 = vmul.f32 0.5, %v1496_v27  ;;  %v1508_v50 = vsub.f32 1.5, %v1507_v33  ;;  %v11257_v27 = vadd.f32 1.1920929e-07, %v1416_v1  ;;  %v1100_v33 = vmul.f32 %v10725_v14, %v1035_v25  ;;  %v1040_v25 = vld [vmem:[%s10682_s17 + $0x1b0] sm:$0xff] }
 0x16e   : > { %v1488_v24 = vsub.f32 1.5, %v1487_v19  ;;  %v11206_v49 = vpop.eup %9447  ;;  %v1037_v19 = vld [vmem:[%s10682_s17 + $0x198] sm:$0xff]  ;;  %v1165_v42 = vadd.f32 %v1101_v29, %v972_v28  ;;  %v1104_v28 = vmul.f32 %v10725_v14, %v1039_v10  ;;  %vm1550_vm3 = vweird.f32 %v11225_v0 }
 0x16f   : > { %v1498_v59 = vsub.f32 1.5, %v1497_v48  ;;  %v1525_v60 = vmul.f32 %v11206_v49, %v11185_v16  ;;  %v1509_v63 = vmul.f32 %v11171_v2, %v1508_v50  ;;  %v1102_v44 = vmul.f32 %v10725_v14, %v1037_v19  ;;  %v11272_v48 = vpop.eup %9449  ;;  %v1041_v29 = vld [vmem:[%s10682_s17 + $0x1b8] sm:$0xff] }
 0x170   : > { %v1489_v30 = vmul.f32 %v9442_v4, %v1488_v24  ;;  %v1034_v24 = vld [vmem:[%s10682_s17 + $0x180] sm:$0xff]  ;;  %9451 = vrsqrt.f32 %v11257_v27  ;;  %1229 = vst [vmem:[%s10747_s14 + $0x190] sm:$0xff] %v1165_v42  ;;  %vm1531_vm0 = vweird.f32 %v11206_v49  ;;  %v1545_v17 = vmul.f32 %v11272_v48, %v11225_v0 }
 0x171   : > { %v1499_v21 = vmul.f32 %v11175_v6, %v1498_v59  ;;  %v1526_v23 = vmul.f32 %v11206_v49, %v1525_v60  ;;  %v1513_v26 = vsel %vm11234_vm11, %v11171_v2, %v1509_v63  ;;  %v971_v2 = vmul.f32 %v10718_v8, %v906_v45  ;;  %vm1532_vm2 = vmor %vm1530_vm15, %vm1531_vm0 }
 0x172   : > { %v1493_v34 = vsel %vm1492_vm6, %v9442_v4, %v1489_v30  ;;  %v9187_v4 = vld [vmem:[#allocation14 + $0xe4] sm:$0xf0]  ;;  %v970_v30 = vmul.f32 %v10718_v8, %v905_v20  ;;  %v1099_v32 = vmul.f32 %v10725_v14, %v1034_v24  ;;  %v1800_v37 = vmul.f32 %v9631_v36, %v1513_v26  ;;  %v912_v20 = vld [vmem:[%s10671_s10 + $0x1b8] sm:$0xff] }
 0x173   : > { %v1796_v46 = vmul.f32 %v1493_v34, %v10760_v55  ;;  %v1797_v47 = vmul.f32 %v1493_v34, %v10762_v56  ;;  %v1515_v55 = vmul.f32 %v11199_v39, %v11180_v11  ;;  %v1287_v56 = vmul.f32 %v1159_v38, %v1159_v38  ;;  %v9632_v38 = vld [vmem:[%s10747_s14 + $0x38] sm:$0xff] }
 0x174   : > { %v8569_v15 = vor.u32 %v9187_v4, %v8568_v3  ;;  %v1503_v34 = vsel %vm1502_vm12, %v11175_v6, %v1499_v21  ;;  %v1527_v35 = vmul.f32 0.5, %v1526_v23  ;;  %v1801_v40 = vmul.f32 %v9632_v38, %v1513_v26  ;;  %v9633_v6 = vld [vmem:[%s10747_s14 + $0x20] sm:$0xff]  ;;  %v910_v3 = vld [vmem:[%s10671_s10 + $0x1a8] sm:$0xff] }
 0x175   : > { %v11208_v51 = vpack.c.bf16 %v1796_v46, %v1794_v41  ;;  %v11210_v52 = vpack.c.bf16 %v1797_v47, %v1795_v43  ;;  %v1373_v7 = vadd.f32 %v1288_v18, %v1287_v56  ;;  %v1516_v12 = vmul.f32 %v11199_v39, %v1515_v55  ;;  %v1333_v41 = vpop.xlane.xlu2 %1332  ;;  %v909_v56 = vld [vmem:[%s10671_s10 + $0x1a0] sm:$0xff] }
 0x176   : > { %2881 = vmatpush.bf16.msrb.mxu1 %v8569_v15  ;;  %v1166_v43 = vadd.f32 %v1102_v44, %v973_v22  ;;  %v1163_v46 = vadd.f32 %v1099_v32, %v970_v30  ;;  %v1164_v47 = vadd.f32 %v1100_v33, %v971_v2  ;;  %v1798_v50 = vmul.f32 %v9633_v6, %v1503_v34  ;;  %v1038_v4 = vld [vmem:[%s10682_s17 + $0x1a0] sm:$0xff]  ;;  %v11294_v13 = vpop.eup %9451 }
 0x177   : > { %15223 = vst [vmem:[#allocation44_spill] sm:$0xff] %v11208_v51  ;;  %2251 = vmatmul.bf16.vlgmr.msra.gmra.mxu0 %v11208_v51  ;;  %2340 = vmatmul.bf16.vlgmr.msra.gmra.mxu1 %v11210_v52  ;;  %v1517_v31 = vmul.f32 0.5, %v1516_v12  ;;  %v1799_v57 = vmul.f32 %v9634_v53, %v1503_v34  ;;  %v1293_v55 = vmul.f32 %v1165_v42, %v1165_v42  ;;  %v1528_v59 = vsub.f32 1.5, %v1527_v35  ;;  %v911_v12 = vld [vmem:[%s10671_s10 + $0x1b0] sm:$0xff] }
 0x178   : > { %15224 = vst [vmem:[#allocation45_spill] sm:$0xff] %v11210_v52  ;;  %2429 = vmatmul.bf16.vlgmr.msra.gmra.mxu2 %v11208_v51  ;;  %2518 = vmatmul.bf16.vlgmr.msra.gmra.mxu3 %v11210_v52  ;;  %v1418_v60 = vmul.f32 %v11111_v54, %v1333_v41  ;;  %v1294_v18 = vmul.f32 %v1166_v43, %v1166_v43  ;;  %vm1540_vm4 = vweird.f32 %v11257_v27  ;;  %vm1551_vm5 = vweird.f32 %v11272_v48 }
 0x179   : > { %1374 = vadd.xlane.f32.xlu1 %v1373_v7  ;;  %v1518_v58 = vsub.f32 1.5, %v1517_v31  ;;  %1230 = vst [vmem:[%s10747_s14 + $0x198] sm:$0xff] %v1166_v43  ;;  %v11281_v61 = vpack.c.bf16 %v1800_v37, %v1798_v50  ;;  %v11283_v62 = vpack.c.bf16 %v1801_v40, %v1799_v57  ;;  %v1291_v63 = vmul.f32 %v1163_v46, %v1163_v46  ;;  %v9635_v43 = vld [vmem:[%s10747_s14 + $0x40] sm:$0xff]  ;;  %v9637_v57 = vld [vmem:[%s10747_s14 + $0x48] sm:$0xff]  ;;  %vm1552_vm7 = vmor %vm1550_vm3, %vm1551_vm5 }
 0x17a   : > { %v1292_v1 = vmul.f32 %v1164_v47, %v1164_v47  ;;  %1227 = vst [vmem:[%s10747_s14 + $0x180] sm:$0xff] %v1163_v46  ;;  %v1382_v7 = vadd.f32 %v1294_v18, %v1293_v55  ;;  %v974_v9 = vmul.f32 %v10718_v8, %v909_v56  ;;  %v1529_v23 = vmul.f32 %v11206_v49, %v1528_v59  ;;  %v9638_v55 = vld [vmem:[%s10747_s14 + $0x58] sm:$0xff]  ;;  %v915_v18 = vld [vmem:[%s10671_s10 + $0x1d0] sm:$0xff] }
 0x17b   : > { %15227 = vst [vmem:[#allocation46_spill] sm:$0xff] %v11281_v61  ;;  %v1519_v15 = vmul.f32 %v11199_v39, %v1518_v58  ;;  %v975_v45 = vmul.f32 %v10718_v8, %v910_v3  ;;  %v1103_v24 = vmul.f32 %v10725_v14, %v1038_v4  ;;  %v11320_v11 = vadd.f32 1.1920929e-07, %v1418_v60 }
 0x17c   : > { %15228 = vst [vmem:[#allocation47_spill] sm:$0xff] %v11283_v62  ;;  %v1379_v19 = vadd.f32 %v1292_v1, %v1291_v63  ;;  %v1419_v26 = vmul.f32 %v11111_v54, %v1336_v5  ;;  %v976_v22 = vmul.f32 %v10718_v8, %v911_v12  ;;  %v1535_v44 = vmul.f32 %v11294_v13, %v11257_v27  ;;  %v916_v63 = vld [vmem:[%s10671_s10 + $0x1d8] sm:$0xff]  ;;  %v1044_v1 = vld [vmem:[%s10682_s17 + $0x1d0] sm:$0xff] }
 0x17d   : > { %1228 = vst [vmem:[%s10747_s14 + $0x188] sm:$0xff] %v1164_v47  ;;  %v1167_v30 = vadd.f32 %v1103_v24, %v974_v9  ;;  %v977_v16 = vmul.f32 %v10718_v8, %v912_v20  ;;  %v1523_v31 = vsel %vm11306_vm1, %v11199_v39, %v1519_v15  ;;  %v1168_v2 = vadd.f32 %v1104_v28, %v975_v45  ;;  %v9636_v47 = vld [vmem:[%s10747_s14 + $0x50] sm:$0xff]  ;;  %v1045_v5 = vld [vmem:[%s10682_s17 + $0x1d8] sm:$0xff]  ;;  %v1342_v12 = vpop.xlane.xlu2 %1341  ;;  %v1043_v24 = vld [vmem:[%s10682_s17 + $0x1c8] sm:$0xff]  ;;  %v1339_v28 = vpop.xlane.xlu1 %1338 }
 0x17e   : > { %1380 = vadd.xlane.f32.xlu0 %v1379_v19  ;;  %v1105_v32 = vmul.f32 %v10725_v14, %v1040_v25  ;;  %v1533_v33 = vsel %vm1532_vm2, %v11206_v49, %v1529_v23  ;;  %v1546_v34 = vmul.f32 %v11272_v48, %v1545_v17  ;;  %v1106_v36 = vmul.f32 %v10725_v14, %v1041_v29  ;;  %v914_v17 = vld [vmem:[%s10671_s10 + $0x1c8] sm:$0xff]  ;;  %v1042_v19 = vld [vmem:[%s10682_s17 + $0x1c0] sm:$0xff] }
 0x17f   : > { %v1295_v35 = vmul.f32 %v1167_v30, %v1167_v30  ;;  %1231 = vst [vmem:[%s10747_s14 + $0x1a0] sm:$0xff] %v1167_v30  ;;  %9453 = vrsqrt.f32 %v11320_v11  ;;  %v11338_v37 = vadd.f32 1.1920929e-07, %v1419_v26  ;;  %v1296_v39 = vmul.f32 %v1168_v2, %v1168_v2 }
 0x180   : > { %1232 = vst [vmem:[%s10747_s14 + $0x1a8] sm:$0xff] %v1168_v2  ;;  %v1169_v38 = vadd.f32 %v1105_v32, %v976_v22  ;;  %v1536_v40 = vmul.f32 %v11294_v13, %v1535_v44  ;;  %v1170_v49 = vadd.f32 %v1106_v36, %v977_v16  ;;  %v1802_v46 = vmul.f32 %v9635_v43, %v1523_v31  ;;  %v9169_v2 = vld [vmem:[#allocation14 + $0x54] sm:$0xf0]  ;;  %v8560_v32 = vld [vmem:[#allocation14 + $0xd0] sm:$0xf] }
 0x181   : > { %1383 = vadd.xlane.f32.xlu1 %v1382_v7  ;;  %v1385_v41 = vadd.f32 %v1296_v39, %v1295_v35  ;;  %v1804_v6 = vmul.f32 %v9636_v47, %v1533_v33  ;;  %v1547_v50 = vmul.f32 0.5, %v1546_v34  ;;  %v1803_v58 = vmul.f32 %v9637_v57, %v1523_v31  ;;  %v913_v7 = vld [vmem:[%s10671_s10 + $0x1c0] sm:$0xff]  ;;  %v8496_v31 = vld [vmem:[#allocation14 + $0x50] sm:$0xf] }
 0x182   : > { %v1297_v42 = vmul.f32 %v1169_v38, %v1169_v38  ;;  %1233 = vst [vmem:[%s10747_s14 + $0x1b0] sm:$0xff] %v1169_v38  ;;  %v1298_v53 = vmul.f32 %v1170_v49, %v1170_v49  ;;  %v1805_v56 = vmul.f32 %v9638_v55, %v1533_v33  ;;  %9455 = vrsqrt.f32 %v11338_v37 }
 0x183   : > { %1234 = vst [vmem:[%s10747_s14 + $0x1b8] sm:$0xff] %v1170_v49  ;;  %1386 = vadd.xlane.f32.xlu2 %v1385_v41  ;;  %v1537_v59 = vmul.f32 0.5, %v1536_v40  ;;  %v980_v4 = vmul.f32 %v10718_v8, %v915_v18  ;;  %v11357_v9 = vpack.c.bf16 %v1804_v6, %v1802_v46  ;;  %v1548_v10 = vsub.f32 1.5, %v1547_v50  ;;  %v9185_v40 = vld [vmem:[#allocation14 + $0xd4] sm:$0xf0] }
 0x184   : > { %v1388_v60 = vadd.f32 %v1298_v53, %v1297_v42  ;;  %v981_v15 = vmul.f32 %v10718_v8, %v916_v63  ;;  %v11363_v20 = vpack.c.bf16 %v1805_v56, %v1803_v58  ;;  %v1109_v21 = vmul.f32 %v10725_v14, %v1044_v1  ;;  %v9640_v63 = vld [vmem:[%s10747_s14 + $0x78] sm:$0xff] }
 0x185   : > { %v11352_v3 = vpop.eup %9453  ;;  %15231 = vst [vmem:[#allocation48_spill] sm:$0xff] %v11357_v9  ;;  %v1110_v23 = vmul.f32 %v10725_v14, %v1045_v5  ;;  %v978_v45 = vmul.f32 %v10718_v8, %v913_v7  ;;  %v1538_v25 = vsub.f32 1.5, %v1537_v59  ;;  %v1107_v22 = vmul.f32 %v10725_v14, %v1042_v19  ;;  %v9639_v59 = vld [vmem:[%s10747_s14 + $0x70] sm:$0xff]  ;;  %v9642_v5 = vld [vmem:[%s10747_s14 + $0x68] sm:$0xff] }
 0x186   : > { %1389 = vadd.xlane.f32.xlu0 %v1388_v60  ;;  %15232 = vst [vmem:[#allocation49_spill] sm:$0xff] %v11363_v20  ;;  %v1555_v26 = vmul.f32 %v11352_v3, %v11320_v11  ;;  %v1421_v44 = vmul.f32 %v11111_v54, %v1342_v12  ;;  %v1173_v30 = vadd.f32 %v1109_v21, %v980_v4  ;;  %vm1541_vm6 = vweird.f32 %v11294_v13  ;;  %v919_v12 = vld [vmem:[%s10671_s10 + $0x1f0] sm:$0xff] }
 0x187   : > { %2256 = vmatmul.bf16.gmra.mxu0 %v11281_v61  ;;  %2345 = vmatmul.bf16.gmra.mxu1 %v11283_v62  ;;  %v979_v16 = vmul.f32 %v10718_v8, %v914_v17  ;;  %v1174_v33 = vadd.f32 %v1110_v23, %v981_v15  ;;  %v1108_v34 = vmul.f32 %v10725_v14, %v1043_v24  ;;  %vm1542_vm8 = vmor %vm1540_vm4, %vm1541_vm6  ;;  %v920_v15 = vld [vmem:[%s10671_s10 + $0x1f8] sm:$0xff]  ;;  %v1048_v17 = vld [vmem:[%s10682_s17 + $0x1f0] sm:$0xff]  ;;  %vm1560_vm9 = vweird.f32 %v11320_v11 }
 0x188   : > { %2434 = vmatmul.bf16.gmra.mxu2 %v11281_v61  ;;  %2523 = vmatmul.bf16.gmra.mxu3 %v11283_v62  ;;  %v11373_v29 = vpop.eup %9455  ;;  %v1171_v35 = vadd.f32 %v1107_v22, %v978_v45  ;;  %v1549_v36 = vmul.f32 %v11272_v48, %v1548_v10  ;;  %v1420_v39 = vmul.f32 %v11111_v54, %v1339_v28  ;;  %v11401_v0 = vadd.f32 1.1920929e-07, %v1421_v44  ;;  %v1049_v23 = vld [vmem:[%s10682_s17 + $0x1f8] sm:$0xff]  ;;  %v917_v24 = vld [vmem:[%s10671_s10 + $0x1e0] sm:$0xff]  ;;  %v1047_v44 = vld [vmem:[%s10682_s17 + $0x1e8] sm:$0xff] }
 0x189   : > { %v8497_v38 = vor.u32 %v9169_v2, %v8496_v31  ;;  %1237 = vst [vmem:[%s10747_s14 + $0x1d0] sm:$0xff] %v1173_v30  ;;  %v1539_v49 = vmul.f32 %v11294_v13, %v1538_v25  ;;  %v1565_v41 = vmul.f32 %v11373_v29, %v11338_v37  ;;  %v8561_v42 = vor.u32 %v9185_v40, %v8560_v32  ;;  %v918_v25 = vld [vmem:[%s10671_s10 + $0x1e8] sm:$0xff]  ;;  %v1046_v22 = vld [vmem:[%s10682_s17 + $0x1e0] sm:$0xff]  ;;  %v1348_v31 = vpop.xlane.xlu1 %1347  ;;  %s15318_s10 = sld [smem:[#allocation223_spill]] }
 0x18a   : > { %v1301_v43 = vmul.f32 %v1173_v30, %v1173_v30  ;;  %1238 = vst [vmem:[%s10747_s14 + $0x1d8] sm:$0xff] %v1174_v33  ;;  %v1556_v46 = vmul.f32 %v11352_v3, %v1555_v26  ;;  %v1302_v47 = vmul.f32 %v1174_v33, %v1174_v33  ;;  %v1172_v6 = vadd.f32 %v1108_v34, %v979_v16 }
 0x18b   : > { %2793 = vmatpush.bf16.msrb.mxu0 %v8497_v38  ;;  %1235 = vst [vmem:[%s10747_s14 + $0x1c0] sm:$0xff] %v1171_v35  ;;  %2882 = vmatpush.bf16.msrb.mxu1 %v8561_v42  ;;  %v1299_v50 = vmul.f32 %v1171_v35, %v1171_v35  ;;  %v1553_v53 = vsel %vm1552_vm7, %v11272_v48, %v1549_v36  ;;  %v11404_v57 = vadd.f32 1.1920929e-07, %v1420_v39  ;;  %9457 = vrsqrt.f32 %v11401_v0  ;;  %v1345_v35 = vpop.xlane.xlu0 %1344 }
 0x18c   : > { %v1543_v27 = vsel %vm1542_vm8, %v11294_v13, %v1539_v49  ;;  %v1566_v58 = vmul.f32 %v11373_v29, %v1565_v41  ;;  %v1394_v55 = vadd.f32 %v1302_v47, %v1301_v43  ;;  %v1300_v56 = vmul.f32 %v1172_v6, %v1172_v6  ;;  %1236 = vst [vmem:[%s10747_s14 + $0x1c8] sm:$0xff] %v1172_v6  ;;  %v9641_v13 = vld [vmem:[%s10747_s14 + $0x60] sm:$0xff] }
 0x18d   : > { %v1808_v60 = vmul.f32 %v9639_v59, %v1553_v53  ;;  %v1557_v18 = vmul.f32 0.5, %v1556_v46  ;;  %v1809_v1 = vmul.f32 %v9640_v63, %v1553_v53  ;;  %v1806_v4 = vmul.f32 %v9641_v13, %v1543_v27  ;;  %v9643_v63 = vld [vmem:[%s10747_s14 + $0x80] sm:$0xff]  ;;  %v9644_v13 = vld [vmem:[%s10747_s14 + $0x88] sm:$0xff] }
 0x18e   : > { %1395 = vadd.xlane.f32.xlu2 %v1394_v55  ;;  %v1391_v48 = vadd.f32 %v1300_v56, %v1299_v50  ;;  %v1807_v7 = vmul.f32 %v9642_v5, %v1543_v27  ;;  %9459 = vrsqrt.f32 %v11404_v57  ;;  %v1567_v10 = vmul.f32 0.5, %v1566_v58  ;;  %v9645_v5 = vld [vmem:[%s10747_s14 + $0x90] sm:$0xff] }
 0x18f   : > { %v984_v19 = vmul.f32 %v10718_v8, %v919_v12  ;;  %v985_v21 = vmul.f32 %v10718_v8, %v920_v15  ;;  %v1113_v45 = vmul.f32 %v10725_v14, %v1048_v17  ;;  %v1558_v26 = vsub.f32 1.5, %v1557_v18 }
 0x190   : > { %1392 = vadd.xlane.f32.xlu1 %v1391_v48  ;;  %v1114_v28 = vmul.f32 %v10725_v14, %v1049_v23  ;;  %v11427_v30 = vpack.c.bf16 %v1808_v60, %v1806_v4  ;;  %v11429_v16 = vpack.c.bf16 %v1809_v1, %v1807_v7  ;;  %v982_v32 = vmul.f32 %v10718_v8, %v917_v24 }
 0x191   : > { %v1177_v2 = vadd.f32 %v1113_v45, %v984_v19  ;;  %v11432_v33 = vpop.eup %9457  ;;  %v1568_v34 = vsub.f32 1.5, %v1567_v10  ;;  %v983_v39 = vmul.f32 %v10718_v8, %v918_v25  ;;  %v1111_v38 = vmul.f32 %v10725_v14, %v1046_v22  ;;  %v9167_v22 = vld [vmem:[#allocation14 + $0x44] sm:$0xf0] }
 0x192   : > { %15233 = vst [vmem:[#allocation50_spill] sm:$0xff] %v11427_v30  ;;  %v1178_v36 = vadd.f32 %v1114_v28, %v985_v21  ;;  %vm1561_vm10 = vweird.f32 %v11352_v3  ;;  %v1112_v41 = vmul.f32 %v10725_v14, %v1047_v44  ;;  %v1559_v42 = vmul.f32 %v11352_v3, %v1558_v26  ;;  %v1351_v21 = vpop.xlane.xlu2 %1350  ;;  %v8488_v28 = vld [vmem:[#allocation14 + $0x40] sm:$0xf] }
 0x193   : > { %15234 = vst [vmem:[#allocation51_spill] sm:$0xff] %v11429_v16  ;;  %v1305_v49 = vmul.f32 %v1177_v2, %v1177_v2  ;;  %vm1570_vm11 = vweird.f32 %v11338_v37  ;;  %vm1571_vm12 = vweird.f32 %v11373_v29  ;;  %v1423_v8 = vmul.f32 %v11111_v54, %v1348_v31  ;;  %vm1562_vm13 = vmor %vm1560_vm9, %vm1561_vm10  ;;  %v1354_v24 = vpop.xlane.xlu0 %1353  ;;  %v8552_v44 = vld [vmem:[#allocation14 + $0xc0] sm:$0xf] }
 0x194   : > { %v11436_v40 = vpop.eup %9459  ;;  %1241 = vst [vmem:[%s10747_s14 + $0x1f0] sm:$0xff] %v1177_v2  ;;  %v1585_v43 = vmul.f32 %v11432_v33, %v11401_v0  ;;  %v1422_v46 = vmul.f32 %v11111_v54, %v1345_v35  ;;  %v1306_v14 = vmul.f32 %v1178_v36, %v1178_v36  ;;  %v1175_v47 = vadd.f32 %v1111_v38, %v982_v32  ;;  %vm1572_vm14 = vmor %vm1570_vm11, %vm1571_vm12  ;;  %v9183_v35 = vld [vmem:[#allocation14 + $0xc4] sm:$0xf0] }
 0x195   : > { %1242 = vst [vmem:[%s10747_s14 + $0x1f8] sm:$0xff] %v1178_v36  ;;  %v1569_v37 = vmul.f32 %v11373_v29, %v1568_v34  ;;  %v1575_v6 = vmul.f32 %v11436_v40, %v11404_v57  ;;  %v1176_v50 = vadd.f32 %v1112_v41, %v983_v39  ;;  %v11462_v58 = vadd.f32 1.1920929e-07, %v1423_v8 }
 0x196   : > { %v1400_v53 = vadd.f32 %v1306_v14, %v1305_v49  ;;  %v1303_v27 = vmul.f32 %v1175_v47, %v1175_v47  ;;  %1239 = vst [vmem:[%s10747_s14 + $0x1e0] sm:$0xff] %v1175_v47  ;;  %v1563_v11 = vsel %vm1562_vm13, %v11352_v3, %v1559_v42  ;;  %v1586_v56 = vmul.f32 %v11432_v33, %v1585_v43  ;;  %v9646_v3 = vld [vmem:[%s10747_s14 + $0x98] sm:$0xff] }
 0x197   : > { %2261 = vmatmul.bf16.gmra.mxu0 %v11357_v9  ;;  %2350 = vmatmul.bf16.gmra.mxu1 %v11363_v20  ;;  %v1304_v55 = vmul.f32 %v1176_v50, %v1176_v50  ;;  %1240 = vst [vmem:[%s10747_s14 + $0x1e8] sm:$0xff] %v1176_v50  ;;  %v11467_v59 = vadd.f32 1.1920929e-07, %v1422_v46  ;;  %v1573_v60 = vsel %vm1572_vm14, %v11373_v29, %v1569_v37  ;;  %9461 = vrsqrt.f32 %v11462_v58  ;;  %v9647_v46 = vld [vmem:[%s10747_s14 + $0xb0] sm:$0xff]  ;;  %v9648_v47 = vld [vmem:[%s10747_s14 + $0xb8] sm:$0xff]  ;;  %v9649_v37 = vld [vmem:[%s10747_s14 + $0xa0] sm:$0xff] }
 0x198   : > { %2439 = vmatmul.bf16.gmra.mxu2 %v11357_v9  ;;  %2528 = vmatmul.bf16.gmra.mxu3 %v11363_v20  ;;  %v1576_v18 = vmul.f32 %v11436_v40, %v1575_v6  ;;  %v1810_v1 = vmul.f32 %v9643_v63, %v1563_v11  ;;  %v1811_v4 = vmul.f32 %v9644_v13, %v1563_v11  ;;  %v1587_v12 = vmul.f32 0.5, %v1586_v56  ;;  %v9650_v50 = vld [vmem:[%s10747_s14 + $0xa8] sm:$0xff] }
 0x199   : > { %1401 = vadd.xlane.f32.xlu1 %v1400_v53  ;;  %v1397_v48 = vadd.f32 %v1304_v55, %v1303_v27  ;;  %v1812_v7 = vmul.f32 %v9645_v5, %v1573_v60  ;;  %v1813_v10 = vmul.f32 %v9646_v3, %v1573_v60  ;;  %9463 = vrsqrt.f32 %v11467_v59  ;;  %v1357_v60 = vpop.xlane.xlu1 %1356 }
 0x19a   : > { %v1577_v15 = vmul.f32 0.5, %v1576_v18  ;;  %v1588_v19 = vsub.f32 1.5, %v1587_v12  ;;  %vm1590_vm15 = vweird.f32 %v11401_v0  ;;  %vm1591_vm0 = vweird.f32 %v11432_v33  ;;  %v1360_v55 = vpop.xlane.xlu2 %1359 }
 0x19b   : > { %1398 = vadd.xlane.f32.xlu0 %v1397_v48  ;;  %v11477_v17 = vpack.c.bf16 %v1812_v7, %v1810_v1  ;;  %v11479_v29 = vpack.c.bf16 %v1813_v10, %v1811_v4  ;;  %vm1580_vm1 = vweird.f32 %v11404_v57  ;;  %vm1581_vm2 = vweird.f32 %v11436_v40  ;;  %vm1592_vm3 = vmor %vm1590_vm15, %vm1591_vm0 }
 0x19c   : > { %v1578_v45 = vsub.f32 1.5, %v1577_v15  ;;  %v1424_v26 = vmul.f32 %v11111_v54, %v1351_v21  ;;  %v1589_v31 = vmul.f32 %v11432_v33, %v1588_v19  ;;  %v1425_v32 = vmul.f32 %v11111_v54, %v1354_v24  ;;  %vm1582_vm4 = vmor %vm1580_vm1, %vm1581_vm2  ;;  %v9651_v21 = vld [vmem:[%s10747_s14 + $0xd0] sm:$0xff]  ;;  %v9652_v24 = vld [vmem:[%s10747_s14 + $0xd8] sm:$0xff] }
 0x19d   : > { %15235 = vst [vmem:[#allocation52_spill] sm:$0xff] %v11477_v17  ;;  %v11481_v23 = vpop.eup %9461  ;;  %v8489_v34 = vor.u32 %v9167_v22, %v8488_v28  ;;  %v8553_v38 = vor.u32 %v9183_v35, %v8552_v44  ;;  %vm1610_vm5 = vweird.f32 %v11462_v58  ;;  %v1427_v1 = vmul.f32 %v11111_v54, %v1360_v55  ;;  %v9653_v28 = vld [vmem:[%s10747_s14 + $0xc0] sm:$0xff]  ;;  %v9654_v44 = vld [vmem:[%s10747_s14 + $0xc8] sm:$0xff] }
 0x19e   : > { %15236 = vst [vmem:[#allocation53_spill] sm:$0xff] %v11479_v29  ;;  %v1605_v2 = vmul.f32 %v11481_v23, %v11462_v58  ;;  %v1579_v36 = vmul.f32 %v11436_v40, %v1578_v45  ;;  %v11509_v49 = vadd.f32 1.1920929e-07, %v1424_v26  ;;  %v1593_v0 = vsel %vm1592_vm3, %v11432_v33, %v1589_v31 }
 0x19f   : > { %v11483_v25 = vpop.eup %9463  ;;  %2794 = vmatpush.bf16.msrb.mxu0 %v8489_v34  ;;  %2883 = vmatpush.bf16.msrb.mxu1 %v8553_v38  ;;  %v11513_v42 = vadd.f32 1.1920929e-07, %v1425_v32  ;;  %v1816_v14 = vmul.f32 %v9647_v46, %v1593_v0  ;;  %v1817_v57 = vmul.f32 %v9648_v47, %v1593_v0  ;;  %vm1611_vm6 = vweird.f32 %v11481_v23  ;;  %v1363_v0 = vpop.xlane.xlu0 %1362  ;;  %v9165_v46 = vld [vmem:[#allocation14 + $0x34] sm:$0xf0] }
 0x1a0   : > { %v1595_v39 = vmul.f32 %v11483_v25, %v11467_v59  ;;  %v1606_v41 = vmul.f32 %v11481_v23, %v1605_v2  ;;  %v1583_v8 = vsel %vm1582_vm4, %v11436_v40, %v1579_v36  ;;  %9465 = vrsqrt.f32 %v11509_v49  ;;  %vm1612_vm9 = vmor %vm1610_vm5, %vm1611_vm6 }
 0x1a1   : > { %v1814_v6 = vmul.f32 %v9649_v37, %v1583_v8  ;;  %v1815_v53 = vmul.f32 %v9650_v50, %v1583_v8  ;;  %9467 = vrsqrt.f32 %v11513_v42  ;;  %vm1600_vm7 = vweird.f32 %v11467_v59  ;;  %v1366_v36 = vpop.xlane.xlu1 %1365  ;;  %v9181_v50 = vld [vmem:[#allocation14 + $0xb4] sm:$0xf0] }
 0x1a2   : > { %v1596_v43 = vmul.f32 %v11483_v25, %v1595_v39  ;;  %v1607_v27 = vmul.f32 0.5, %v1606_v41  ;;  %vm1601_vm8 = vweird.f32 %v11483_v25  ;;  %v1426_v13 = vmul.f32 %v11111_v54, %v1357_v60 }
 0x1a3   : > { %v11523_v11 = vpack.c.bf16 %v1816_v14, %v1814_v6  ;;  %v11525_v40 = vpack.c.bf16 %v1817_v57, %v1815_v53  ;;  %vm1602_vm10 = vmor %vm1600_vm7, %vm1601_vm8  ;;  %v11547_v7 = vadd.f32 1.1920929e-07, %v1427_v1  ;;  %vm1620_vm11 = vweird.f32 %v11509_v49  ;;  %v8544_v14 = vld [vmem:[#allocation14 + $0xb0] sm:$0xf]  ;;  %v9655_v1 = vld [vmem:[%s10747_s14 + $0xe0] sm:$0xff] }
 0x1a4   : > { %v1597_v33 = vmul.f32 0.5, %v1596_v43  ;;  %v1608_v56 = vsub.f32 1.5, %v1607_v27  ;;  %v11549_v3 = vadd.f32 1.1920929e-07, %v1426_v13  ;;  %vm1630_vm13 = vweird.f32 %v11513_v42  ;;  %v8480_v43 = vld [vmem:[#allocation14 + $0x30] sm:$0xf] }
 0x1a5   : > { %15237 = vst [vmem:[#allocation54_spill] sm:$0xff] %v11523_v11  ;;  %9469 = vrsqrt.f32 %v11547_v7  ;;  %v1429_v8 = vmul.f32 %v11111_v54, %v1366_v36  ;;  %v1428_v37 = vmul.f32 %v11111_v54, %v1363_v0  ;;  %v8481_v6 = vor.u32 %v9165_v46, %v8480_v43  ;;  %v9172_v46 = vld [vmem:[#allocation14 + $0x74] sm:$0xf] }
 0x1a6   : > { %15238 = vst [vmem:[#allocation55_spill] sm:$0xff] %v11525_v40  ;;  %v11527_v18 = vpop.eup %9465  ;;  %v1598_v48 = vsub.f32 1.5, %v1597_v33  ;;  %v1609_v58 = vmul.f32 %v11481_v23, %v1608_v56  ;;  %9471 = vrsqrt.f32 %v11549_v3  ;;  %v8545_v27 = vor.u32 %v9181_v50, %v8544_v14  ;;  %v8514_v14 = vld [vmem:[#allocation14 + $0x78] sm:$0xf0] }
 0x1a7   : > { %2266 = vmatmul.bf16.gmra.mxu0 %v11427_v30  ;;  %2355 = vmatmul.bf16.gmra.mxu1 %v11429_v16  ;;  %v11529_v63 = vpop.eup %9467  ;;  %v1615_v4 = vmul.f32 %v11527_v18, %v11509_v49  ;;  %vm1621_vm12 = vweird.f32 %v11527_v18  ;;  %v11594_v55 = vadd.f32 1.1920929e-07, %v1429_v8  ;;  %v11598_v60 = vadd.f32 1.1920929e-07, %v1428_v37  ;;  %v9659_v8 = vld [vmem:[%s10747_s14 + $0x110] sm:$0xff] }
 0x1a8   : > { %2444 = vmatmul.bf16.gmra.mxu2 %v11427_v30  ;;  %2533 = vmatmul.bf16.gmra.mxu3 %v11429_v16  ;;  %v1599_v5 = vmul.f32 %v11483_v25, %v1598_v48  ;;  %v1625_v59 = vmul.f32 %v11529_v63, %v11513_v42  ;;  %v1613_v10 = vsel %vm1612_vm9, %v11481_v23, %v1609_v58  ;;  %vm1631_vm14 = vweird.f32 %v11529_v63  ;;  %vm1622_vm15 = vmor %vm1620_vm11, %vm1621_vm12  ;;  %v9656_v42 = vld [vmem:[%s10747_s14 + $0xe8] sm:$0xff] }
 0x1a9   : > { %v1616_v12 = vmul.f32 %v11527_v18, %v1615_v4  ;;  %v1820_v45 = vmul.f32 %v9651_v21, %v1613_v10  ;;  %v1821_v26 = vmul.f32 %v9652_v24, %v1613_v10  ;;  %vm1632_vm0 = vmor %vm1630_vm13, %vm1631_vm14  ;;  %2795 = vmatpush.bf16.msrb.mxu0 %v8481_v6  ;;  %2884 = vmatpush.bf16.msrb.mxu1 %v8545_v27  ;;  %9473 = vrsqrt.f32 %v11594_v55  ;;  %v9658_v10 = vld [vmem:[%s10747_s14 + $0xf8] sm:$0xff]  ;;  %v9661_v6 = vld [vmem:[%s10747_s14 + $0x100] sm:$0xff] }
 0x1aa   : > { %v1603_v15 = vsel %vm1602_vm10, %v11483_v25, %v1599_v5  ;;  %v1626_v19 = vmul.f32 %v11529_v63, %v1625_v59  ;;  %v9657_v5 = vld [vmem:[%s10747_s14 + $0xf0] sm:$0xff]  ;;  %9475 = vrsqrt.f32 %v11598_v60  ;;  %vm1650_vm1 = vweird.f32 %v11547_v7 }
 0x1ab   : > { %v1818_v22 = vmul.f32 %v9653_v28, %v1603_v15  ;;  %v1819_v31 = vmul.f32 %v9654_v44, %v1603_v15  ;;  %v1617_v2 = vmul.f32 0.5, %v1616_v12  ;;  %v11561_v32 = vpop.eup %9469  ;;  %vm1640_vm3 = vweird.f32 %v11549_v3 }
 0x1ac   : > { %v1627_v23 = vmul.f32 0.5, %v1626_v19  ;;  %v11567_v39 = vpop.eup %9471  ;;  %v1645_v41 = vmul.f32 %v11561_v32, %v11547_v7  ;;  %vm1651_vm2 = vweird.f32 %v11561_v32  ;;  %v8517_v50 = vor.u32 %v9172_v46, %v8514_v14 }
 0x1ad   : > { %v11563_v34 = vpack.c.bf16 %v1820_v45, %v1818_v22  ;;  %v11565_v25 = vpack.c.bf16 %v1821_v26, %v1819_v31  ;;  %v1618_v35 = vsub.f32 1.5, %v1617_v2  ;;  %v1635_v57 = vmul.f32 %v11567_v39, %v11549_v3  ;;  %v1369_v45 = vpop.xlane.xlu2 %1368  ;;  %v1372_v26 = vpop.xlane.xlu0 %1371  ;;  %vm1652_vm5 = vmor %vm1650_vm1, %vm1651_vm2 }
 0x1ae   : > { %v1628_v38 = vsub.f32 1.5, %v1627_v23  ;;  %v1646_v33 = vmul.f32 %v11561_v32, %v1645_v41  ;;  %vm1641_vm4 = vweird.f32 %v11567_v39  ;;  %v1430_v7 = vmul.f32 %v11111_v54, %v1369_v45  ;;  %2969 = vmatpush.bf16.msrb.mxu2 %v8517_v50  ;;  %v9163_v45 = vld [vmem:[#allocation14 + $0x24] sm:$0xf0] }
 0x1af   : > { %15239 = vst [vmem:[#allocation56_spill] sm:$0xff] %v11563_v34  ;;  %v1619_v47 = vmul.f32 %v11527_v18, %v1618_v35  ;;  %v1636_v49 = vmul.f32 %v11567_v39, %v1635_v57  ;;  %v11611_v24 = vpop.eup %9473  ;;  %v1431_v31 = vmul.f32 %v11111_v54, %v1372_v26  ;;  %vm1642_vm6 = vmor %vm1640_vm3, %vm1641_vm4  ;;  %v9660_v57 = vld [vmem:[%s10747_s14 + $0x118] sm:$0xff]  ;;  %vm1670_vm7 = vweird.f32 %v11594_v55  ;;  %v8536_v26 = vld [vmem:[#allocation14 + $0xa0] sm:$0xf] }
 0x1b0   : > { %15240 = vst [vmem:[#allocation57_spill] sm:$0xff] %v11565_v25  ;;  %v1629_v53 = vmul.f32 %v11529_v63, %v1628_v38  ;;  %v1647_v4 = vmul.f32 0.5, %v1646_v33  ;;  %v11615_v28 = vpop.eup %9475  ;;  %v1665_v3 = vmul.f32 %v11611_v24, %v11594_v55  ;;  %v11632_v35 = vadd.f32 1.1920929e-07, %v1430_v7 }
 0x1b1   : > { %v1623_v56 = vsel %vm1622_vm15, %v11527_v18, %v1619_v47  ;;  %v1637_v15 = vmul.f32 0.5, %v1636_v49  ;;  %v1655_v2 = vmul.f32 %v11615_v28, %v11598_v60  ;;  %v11636_v0 = vadd.f32 1.1920929e-07, %v1431_v31  ;;  %v9188_v47 = vld [vmem:[#allocation14 + $0xf4] sm:$0xf]  ;;  %v9179_v31 = vld [vmem:[#allocation14 + $0xa4] sm:$0xf0] }
 0x1b2   : > { %v1633_v48 = vsel %vm1632_vm0, %v11529_v63, %v1629_v53  ;;  %v1822_v13 = vmul.f32 %v9655_v1, %v1623_v56  ;;  %v1823_v58 = vmul.f32 %v9656_v42, %v1623_v56  ;;  %v1648_v18 = vsub.f32 1.5, %v1647_v4  ;;  %v9662_v53 = vld [vmem:[%s10747_s14 + $0x108] sm:$0xff] }
 0x1b3   : > { %v1824_v59 = vmul.f32 %v9657_v5, %v1633_v48  ;;  %v1825_v12 = vmul.f32 %v9658_v10, %v1633_v48  ;;  %v1638_v63 = vsub.f32 1.5, %v1637_v15  ;;  %v1666_v38 = vmul.f32 %v11611_v24, %v1665_v3 }
 0x1b4   : > { %v1649_v22 = vmul.f32 %v11561_v32, %v1648_v18  ;;  %v1656_v41 = vmul.f32 %v11615_v28, %v1655_v2  ;;  %9477 = vrsqrt.f32 %v11632_v35  ;;  %vm1671_vm8 = vweird.f32 %v11611_v24 }
 0x1b5   : > { %v11607_v19 = vpack.c.bf16 %v1824_v59, %v1822_v13  ;;  %v11609_v21 = vpack.c.bf16 %v1825_v12, %v1823_v58  ;;  %v1639_v44 = vmul.f32 %v11567_v39, %v1638_v63  ;;  %v1667_v33 = vmul.f32 0.5, %v1666_v38  ;;  %v8472_v63 = vld [vmem:[#allocation14 + $0x20] sm:$0xf]  ;;  %vm1672_vm11 = vmor %vm1670_vm7, %vm1671_vm8 }
 0x1b6   : > { %v1653_v23 = vsel %vm1652_vm5, %v11561_v32, %v1649_v22  ;;  %9479 = vrsqrt.f32 %v11636_v0  ;;  %v1657_v49 = vmul.f32 0.5, %v1656_v41  ;;  %vm1660_vm9 = vweird.f32 %v11598_v60 }
 0x1b7   : > { %2271 = vmatmul.bf16.gmra.mxu0 %v11477_v17  ;;  %2360 = vmatmul.bf16.gmra.mxu1 %v11479_v29  ;;  %15241 = vst [vmem:[#allocation58_spill] sm:$0xff] %v11607_v19  ;;  %v1643_v36 = vsel %vm1642_vm6, %v11567_v39, %v1639_v44  ;;  %v1828_v43 = vmul.f32 %v9659_v8, %v1653_v23  ;;  %v8578_v39 = vld [vmem:[#allocation14 + $0xf8] sm:$0xf0]  ;;  %v1668_v58 = vsub.f32 1.5, %v1667_v33  ;;  %vm1661_vm10 = vweird.f32 %v11615_v28 }
 0x1b8   : > { %2449 = vmatmul.bf16.gmra.mxu2 %v11477_v17  ;;  %2538 = vmatmul.bf16.gmra.mxu3 %v11479_v29  ;;  %15242 = vst [vmem:[#allocation59_spill] sm:$0xff] %v11609_v21  ;;  %v1829_v37 = vmul.f32 %v9660_v57, %v1653_v23  ;;  %v1826_v32 = vmul.f32 %v9661_v6, %v1643_v36  ;;  %v1658_v10 = vsub.f32 1.5, %v1657_v49  ;;  %vm1662_vm12 = vmor %vm1660_vm9, %vm1661_vm10  ;;  %vm1680_vm13 = vweird.f32 %v11632_v35 }
 0x1b9   : > { %v1827_v27 = vmul.f32 %v9662_v53, %v1643_v36  ;;  %v8581_v56 = vor.u32 %v9188_v47, %v8578_v39  ;;  %v1669_v22 = vmul.f32 %v11611_v24, %v1668_v58  ;;  %v8473_v3 = vor.u32 %v9163_v45, %v8472_v63  ;;  %v9664_v39 = vld [vmem:[%s10747_s14 + $0x138] sm:$0xff] }
 0x1ba   : > { %v11645_v13 = vpack.c.bf16 %v1828_v43, %v1826_v32  ;;  %v11651_v59 = vpop.eup %9477  ;;  %v1659_v2 = vmul.f32 %v11615_v28, %v1658_v10  ;;  %v8537_v36 = vor.u32 %v9179_v31, %v8536_v26  ;;  %v9663_v32 = vld [vmem:[%s10747_s14 + $0x130] sm:$0xff]  ;;  %vm1690_vm15 = vweird.f32 %v11636_v0 }
 0x1bb   : > { %3058 = vmatpush.bf16.msrb.mxu3 %v8581_v56  ;;  %v11647_v42 = vpack.c.bf16 %v1829_v37, %v1827_v27  ;;  %v1675_v7 = vmul.f32 %v11651_v59, %v11632_v35  ;;  %2796 = vmatpush.bf16.msrb.mxu0 %v8473_v3  ;;  %v1673_v14 = vsel %vm1672_vm11, %v11611_v24, %v1669_v22  ;;  %v9665_v27 = vld [vmem:[%s10747_s14 + $0x120] sm:$0xff]  ;;  %v9666_v56 = vld [vmem:[%s10747_s14 + $0x128] sm:$0xff]  ;;  %vm1681_vm14 = vweird.f32 %v11651_v59 }
 0x1bc   : > { %15243 = vst [vmem:[#allocation60_spill] sm:$0xff] %v11645_v13  ;;  %v11653_v15 = vpop.eup %9479  ;;  %2885 = vmatpush.bf16.msrb.mxu1 %v8537_v36  ;;  %v1663_v37 = vsel %vm1662_vm12, %v11615_v28, %v1659_v2  ;;  %v1832_v50 = vmul.f32 %v9663_v32, %v1673_v14  ;;  %v1833_v53 = vmul.f32 %v9664_v39, %v1673_v14  ;;  %vm1682_vm1 = vmor %vm1680_vm13, %vm1681_vm14 }
 0x1bd   : > { %15244 = vst [vmem:[#allocation61_spill] sm:$0xff] %v11647_v42  ;;  %v1685_v23 = vmul.f32 %v11653_v15, %v11636_v0  ;;  %v1676_v47 = vmul.f32 %v11651_v59, %v1675_v7  ;;  %v1830_v33 = vmul.f32 %v9665_v27, %v1663_v37  ;;  %v1831_v24 = vmul.f32 %v9666_v56, %v1663_v37  ;;  %v9170_v27 = vld [vmem:[#allocation14 + $0x64] sm:$0xf] }
 0x1be   : > { %vm1691_vm0 = vweird.f32 %v11653_v15  ;;  %v9667_v56 = vld [vmem:[%s10747_s14 + $0x140] sm:$0xff] }
 0x1bf   : > { %v1686_v6 = vmul.f32 %v11653_v15, %v1685_v23  ;;  %v1677_v49 = vmul.f32 0.5, %v1676_v47  ;;  %v11701_v63 = vpack.c.bf16 %v1833_v53, %v1831_v24  ;;  %vm1692_vm2 = vmor %vm1690_vm15, %vm1691_vm0 }
 0x1c1   : > { %15246 = vst [vmem:[#allocation63_spill] sm:$0xff] %v11701_v63  ;;  %v1678_v45 = vsub.f32 1.5, %v1677_v49  ;;  %v9668_v49 = vld [vmem:[%s10747_s14 + $0x148] sm:$0xff] }
 0x1c3   : > { %v1679_v2 = vmul.f32 %v11651_v59, %v1678_v45 }
 0x1c5   : > { %v1683_v37 = vsel %vm1682_vm1, %v11651_v59, %v1679_v2 }
 0x1c6   : > { %v1834_v24 = vmul.f32 %v9667_v56, %v1683_v37  ;;  %v1835_v59 = vmul.f32 %v9668_v49, %v1683_v37  ;;  %v9161_v49 = vld [vmem:[#allocation14 + $0x14] sm:$0xf0] }
 0x1c7   : > { %2276 = vmatmul.bf16.gmra.mxu0 %v11523_v11  ;;  %2365 = vmatmul.bf16.gmra.mxu1 %v11525_v40 }
 0x1c8   : > { %2454 = vmatmul.bf16.gmra.mxu2 %v11523_v11  ;;  %2543 = vmatmul.bf16.gmra.mxu3 %v11525_v40 }
 0x1cf   : > { %v1378_v5 = vpop.xlane.xlu2 %1377 }
 0x1d0   : > { %v1433_v18 = vmul.f32 %v11111_v54, %v1378_v5 }
 0x1d2   : > { %v11681_v46 = vadd.f32 1.1920929e-07, %v1433_v18  ;;  %v11699_v18 = vpack.c.bf16 %v1832_v50, %v1830_v33  ;;  %v8506_v33 = vld [vmem:[#allocation14 + $0x68] sm:$0xf0] }
 0x1d4   : > { %9481 = vrsqrt.f32 %v11681_v46  ;;  %15245 = vst [vmem:[#allocation62_spill] sm:$0xff] %v11699_v18  ;;  %vm1710_vm3 = vweird.f32 %v11681_v46 }
 0x1d7   : > { %2281 = vmatmul.bf16.gmra.mxu0 %v11563_v34  ;;  %2370 = vmatmul.bf16.gmra.mxu1 %v11565_v25 }
 0x1d8   : > { %2459 = vmatmul.bf16.gmra.mxu2 %v11563_v34  ;;  %2548 = vmatmul.bf16.gmra.mxu3 %v11565_v25 }
 0x1da   : > { %v11705_v22 = vpop.eup %9481 }
 0x1db   : > { %v1705_v36 = vmul.f32 %v11705_v22, %v11681_v46  ;;  %vm1711_vm4 = vweird.f32 %v11705_v22 }
 0x1dc   : > { %vm11772_vm7 = vmor %vm1710_vm3, %vm1711_vm4 }
 0x1dd   : > { %v1706_v39 = vmul.f32 %v11705_v22, %v1705_v36 }
 0x1e7   : > { %2286 = vmatmul.bf16.gmra.mxu0 %v11607_v19  ;;  %2375 = vmatmul.bf16.gmra.mxu1 %v11609_v21 }
 0x1e8   : > { %2464 = vmatmul.bf16.gmra.mxu2 %v11607_v19  ;;  %2553 = vmatmul.bf16.gmra.mxu3 %v11609_v21 }
 0x1ec   : > { %v1375_v12 = vpop.xlane.xlu1 %1374 }
 0x1ed   : > { %v1432_v44 = vmul.f32 %v11111_v54, %v1375_v12 }
 0x1ef   : > { %v11687_v57 = vadd.f32 1.1920929e-07, %v1432_v44 }
 0x1f1   : > { %9483 = vrsqrt.f32 %v11687_v57  ;;  %v1381_v44 = vpop.xlane.xlu0 %1380  ;;  %vm1700_vm5 = vweird.f32 %v11687_v57 }
 0x1f2   : > { %v1434_v35 = vmul.f32 %v11111_v54, %v1381_v44 }
 0x1f4   : > { %v2252_v48 = vpop.f32.mrf.mxu0  ;;  %v2341_v1 = vpop.f32.mrf.mxu1  ;;  %v11732_v32 = vadd.f32 1.1920929e-07, %v1434_v35 }
 0x1f5   : > { %v11649_v4 = vadd.f32 %v2341_v1, %v2252_v48  ;;  %v1687_v48 = vmul.f32 0.5, %v1686_v6  ;;  %v1384_v1 = vpop.xlane.xlu1 %1383 }
 0x1f6   : > { %v1435_v31 = vmul.f32 %v11111_v54, %v1384_v1  ;;  %v9186_v1 = vld [vmem:[#allocation14 + $0xe4] sm:$0xf]  ;;  %vm1720_vm11 = vweird.f32 %v11732_v32 }
 0x1f7   : > { %2291 = vmatmul.bf16.gmra.mxu0 %v11645_v13  ;;  %2380 = vmatmul.bf16.gmra.mxu1 %v11647_v42  ;;  %v1688_v7 = vsub.f32 1.5, %v1687_v48  ;;  %v11707_v3 = vpop.eup %9483  ;;  %v8509_v48 = vor.u32 %v9170_v27, %v8506_v33 }
 0x1f8   : > { %2469 = vmatmul.bf16.gmra.mxu2 %v11645_v13  ;;  %2558 = vmatmul.bf16.gmra.mxu3 %v11647_v42  ;;  %vm1701_vm6 = vweird.f32 %v11707_v3 }
 0x1f9   : > { %v1689_v23 = vmul.f32 %v11653_v15, %v1688_v7  ;;  %v1707_v7 = vmul.f32 0.5, %v1706_v39  ;;  %2970 = vmatpush.bf16.msrb.mxu2 %v8509_v48  ;;  %v1390_v37 = vpop.xlane.xlu0 %1389  ;;  %v8528_v48 = vld [vmem:[#allocation14 + $0x90] sm:$0xf]  ;;  %vm1702_vm8 = vmor %vm1700_vm5, %vm1701_vm6 }
 0x1fa   : > { %v1437_v56 = vmul.f32 %v11111_v54, %v1390_v37 }
 0x1fb   : > { %v2430_v38 = vpop.f32.mrf.mxu2  ;;  %v2519_v41 = vpop.f32.mrf.mxu3  ;;  %v1693_v50 = vsel %vm1692_vm2, %v11653_v15, %v1689_v23 }
 0x1fc   : > { %v11679_v8 = vadd.f32 %v2519_v41, %v2430_v38  ;;  %v2254_v55 = vpop.f32.mrf.mxu0  ;;  %v2343_v43 = vpop.f32.mrf.mxu1  ;;  %v1695_v38 = vmul.f32 %v11707_v3, %v11687_v57 }
 0x1fd   : > { %v11685_v60 = vadd.f32 %v2343_v43, %v2254_v55  ;;  %v11725_v55 = vadd.f32 1.1920929e-07, %v1435_v31  ;;  %v1387_v31 = vpop.xlane.xlu2 %1386 }
 0x1fe   : > { %v1696_v53 = vmul.f32 %v11707_v3, %v1695_v38  ;;  %v1436_v27 = vmul.f32 %v11111_v54, %v1387_v31 }
 0x1ff   : > { %9485 = vrsqrt.f32 %v11725_v55  ;;  %vm1730_vm9 = vweird.f32 %v11725_v55 }
 0x200   : > { %9487 = vrsqrt.f32 %v11732_v32  ;;  %v1697_v44 = vmul.f32 0.5, %v1696_v53 }
 0x202   : > { %v1698_v39 = vsub.f32 1.5, %v1697_v44 }
 0x203   : > { %v2432_v58 = vpop.f32.mrf.mxu2  ;;  %v2521_v5 = vpop.f32.mrf.mxu3 }
 0x204   : > { %v11697_v28 = vadd.f32 %v2521_v5, %v2432_v58  ;;  %v2257_v10 = vpop.f32.mrf.mxu0  ;;  %v2346_v12 = vpop.f32.mrf.mxu1  ;;  %v8570_v58 = vld [vmem:[#allocation14 + $0xe8] sm:$0xf0]  ;;  %v9669_v5 = vld [vmem:[%s10747_s14 + $0x150] sm:$0xff] }
 0x205   : > { %v11703_v26 = vadd.f32 %v2346_v12, %v2257_v10  ;;  %v1836_v10 = vmul.f32 %v9669_v5, %v1693_v50  ;;  %v9670_v12 = vld [vmem:[%s10747_s14 + $0x158] sm:$0xff]  ;;  %v8573_v15 = vor.u32 %v9186_v1, %v8570_v58  ;;  %v1396_v5 = vpop.xlane.xlu2 %1395 }
 0x206   : > { %v1837_v45 = vmul.f32 %v9670_v12, %v1693_v50  ;;  %v1708_v50 = vsub.f32 1.5, %v1707_v7  ;;  %v9177_v1 = vld [vmem:[#allocation14 + $0x94] sm:$0xf0]  ;;  %v11781_v7 = vadd.f32 1.1920929e-07, %v1436_v27  ;;  %v9671_v27 = vld [vmem:[%s10747_s14 + $0x170] sm:$0xff] }
 0x207   : > { %2296 = vmatmul.bf16.gmra.mxu0 %v11699_v18  ;;  %2385 = vmatmul.bf16.gmra.mxu1 %v11701_v63  ;;  %v8529_v44 = vor.u32 %v9177_v1, %v8528_v48  ;;  %v9674_v48 = vld [vmem:[%s10747_s14 + $0x168] sm:$0xff] }
 0x208   : > { %2474 = vmatmul.bf16.gmra.mxu2 %v11699_v18  ;;  %2563 = vmatmul.bf16.gmra.mxu3 %v11701_v63  ;;  %v1709_v58 = vmul.f32 %v11705_v22, %v1708_v50  ;;  %9489 = vrsqrt.f32 %v11781_v7  ;;  %vm1740_vm15 = vweird.f32 %v11781_v7 }
 0x209   : > { %3059 = vmatpush.bf16.msrb.mxu3 %v8573_v15  ;;  %2886 = vmatpush.bf16.msrb.mxu1 %v8529_v44 }
 0x20b   : > { %v2435_v0 = vpop.f32.mrf.mxu2  ;;  %v2524_v41 = vpop.f32.mrf.mxu3 }
 0x20c   : > { %v11727_v43 = vadd.f32 %v2524_v41, %v2435_v0  ;;  %v2259_v14 = vpop.f32.mrf.mxu0  ;;  %v2348_v47 = vpop.f32.mrf.mxu1  ;;  %v11747_v41 = vpack.c.bf16 %v1836_v10, %v1834_v24  ;;  %v8464_v24 = vld [vmem:[#allocation14 + $0x10] sm:$0xf]  ;;  %v1699_v10 = vmul.f32 %v11707_v3, %v1698_v39 }
 0x20d   : > { %v11730_v6 = vadd.f32 %v2348_v47, %v2259_v14  ;;  %v11745_v0 = vpop.eup %9485  ;;  %v11749_v14 = vpack.c.bf16 %v1837_v45, %v1835_v59  ;;  %v8465_v59 = vor.u32 %v9161_v49, %v8464_v24  ;;  %v9673_v49 = vld [vmem:[%s10747_s14 + $0x160] sm:$0xff] }
 0x20e   : > { %15249 = vst [vmem:[#allocation66_spill] sm:$0xff] %v11747_v41  ;;  %v11753_v53 = vpop.eup %9487  ;;  %v1725_v33 = vmul.f32 %v11745_v0, %v11725_v55  ;;  %v1703_v37 = vsel %vm1702_vm8, %v11707_v3, %v1699_v10  ;;  %vm1731_vm10 = vweird.f32 %v11745_v0 }
 0x20f   : > { %15247 = vst [vmem:[#allocation64_spill] sm:$0xff] %v11730_v6  ;;  %v1715_v12 = vmul.f32 %v11753_v53, %v11732_v32  ;;  %2797 = vmatpush.bf16.msrb.mxu0 %v8465_v59  ;;  %v1838_v59 = vmul.f32 %v9673_v49, %v1703_v37  ;;  %v1839_v1 = vmul.f32 %v9674_v48, %v1703_v37  ;;  %v11803_v44 = vpop.eup %9489  ;;  %vm1721_vm12 = vweird.f32 %v11753_v53  ;;  %vm1732_vm13 = vmor %vm1730_vm9, %vm1731_vm10 }
 0x210   : > { %15250 = vst [vmem:[#allocation67_spill] sm:$0xff] %v11749_v14  ;;  %v1726_v46 = vmul.f32 %v11745_v0, %v1725_v33  ;;  %vm1722_vm14 = vmor %vm1720_vm11, %vm1721_vm12  ;;  %vm1741_vm0 = vweird.f32 %v11803_v44 }
 0x211   : > { %v1716_v50 = vmul.f32 %v11753_v53, %v1715_v12  ;;  %vm1742_vm3 = vmor %vm1740_vm15, %vm1741_vm0 }
 0x212   : > { %v1727_v39 = vmul.f32 0.5, %v1726_v46 }
 0x213   : > { %v2437_v2 = vpop.f32.mrf.mxu2  ;;  %v2526_v35 = vpop.f32.mrf.mxu3 }
 0x214   : > { %v11743_v23 = vadd.f32 %v2526_v35, %v2437_v2  ;;  %v2262_v36 = vpop.f32.mrf.mxu0  ;;  %v2351_v38 = vpop.f32.mrf.mxu1  ;;  %v1728_v3 = vsub.f32 1.5, %v1727_v39 }
 0x215   : > { %v11751_v47 = vadd.f32 %v2351_v38, %v2262_v36  ;;  %v11786_v36 = vadd.f32 1.1920929e-07, %v1437_v56  ;;  %v1713_v38 = vsel %vm11772_vm7, %v11705_v22, %v1709_v58  ;;  %v9672_v56 = vld [vmem:[%s10747_s14 + $0x178] sm:$0xff] }
 0x216   : > { %15248 = vst [vmem:[#allocation65_spill] sm:$0xff] %v11743_v23  ;;  %v1840_v33 = vmul.f32 %v9671_v27, %v1713_v38  ;;  %v1841_v24 = vmul.f32 %v9672_v56, %v1713_v38  ;;  %v1393_v38 = vpop.xlane.xlu1 %1392  ;;  %v1729_v39 = vmul.f32 %v11745_v0, %v1728_v3 }
 0x217   : > { %15251 = vst [vmem:[#allocation68_spill] sm:$0xff] %v11751_v47  ;;  %2301 = vmatmul.bf16.gmra.mxu0 %v11747_v41  ;;  %2390 = vmatmul.bf16.gmra.mxu1 %v11749_v14  ;;  %9491 = vrsqrt.f32 %v11786_v36  ;;  %v1438_v55 = vmul.f32 %v11111_v54, %v1393_v38  ;;  %v9675_v38 = vld [vmem:[%s10747_s14 + $0x190] sm:$0xff]  ;;  %vm1750_vm1 = vweird.f32 %v11786_v36 }
 0x218   : > { %2479 = vmatmul.bf16.gmra.mxu2 %v11747_v41  ;;  %2568 = vmatmul.bf16.gmra.mxu3 %v11749_v14  ;;  %v11805_v46 = vpack.c.bf16 %v1840_v33, %v1838_v59  ;;  %v1735_v33 = vmul.f32 %v11803_v44, %v11781_v7  ;;  %v1733_v48 = vsel %vm1732_vm13, %v11745_v0, %v1729_v39  ;;  %v9168_v0 = vld [vmem:[#allocation14 + $0x54] sm:$0xf] }
 0x219   : > { %v9184_v39 = vld [vmem:[#allocation14 + $0xd4] sm:$0xf] }
 0x21a   : > { %15257 = vst [vmem:[#allocation72_spill] sm:$0xff] %v11805_v46 }
 0x21b   : > { %v2440_v45 = vpop.f32.mrf.mxu2  ;;  %v2529_v15 = vpop.f32.mrf.mxu3 }
 0x21c   : > { %v11784_v31 = vadd.f32 %v2529_v15, %v2440_v45  ;;  %v2264_v2 = vpop.f32.mrf.mxu0  ;;  %v2353_v35 = vpop.f32.mrf.mxu1  ;;  %v1717_v45 = vmul.f32 0.5, %v1716_v50  ;;  %v1439_v50 = vmul.f32 %v11111_v54, %v1396_v5 }
 0x21d   : > { %v11788_v57 = vadd.f32 %v2353_v35, %v2264_v2  ;;  %v11807_v2 = vpack.c.bf16 %v1841_v24, %v1839_v1  ;;  %v11811_v27 = vpop.eup %9491  ;;  %v1736_v1 = vmul.f32 %v11803_v44, %v1735_v33  ;;  %v9676_v33 = vld [vmem:[%s10747_s14 + $0x198] sm:$0xff] }
 0x21e   : > { %15254 = vst [vmem:[#allocation69_spill] sm:$0xff] %v11784_v31  ;;  %v1718_v37 = vsub.f32 1.5, %v1717_v45  ;;  %v1745_v32 = vmul.f32 %v11811_v27, %v11786_v36  ;;  %v11829_v59 = vadd.f32 1.1920929e-07, %v1439_v50  ;;  %v8498_v50 = vld [vmem:[#allocation14 + $0x58] sm:$0xf0]  ;;  %vm1751_vm2 = vweird.f32 %v11811_v27 }
 0x21f   : > { %15255 = vst [vmem:[#allocation70_spill] sm:$0xff] %v11788_v57  ;;  %vm1752_vm4 = vmor %vm1750_vm1, %vm1751_vm2  ;;  %vm3922_vm1 = vcmask 1041408  }
 0x220   : > { %15258 = vst [vmem:[#allocation73_spill] sm:$0xff] %v11807_v2  ;;  %v1719_v56 = vmul.f32 %v11753_v53, %v1718_v37  ;;  %v1746_v3 = vmul.f32 %v11811_v27, %v1745_v32  ;;  %v1844_v37 = vmul.f32 %v9675_v38, %v1733_v48  ;;  %9493 = vrsqrt.f32 %v11829_v59  ;;  %v9677_v32 = vld [vmem:[%s10747_s14 + $0x180] sm:$0xff] }
 0x221   : > { %vm1770_vm5 = vweird.f32 %v11829_v59 }
 0x223   : > { %v2442_v22 = vpop.f32.mrf.mxu2  ;;  %v2531_v58 = vpop.f32.mrf.mxu3 }
 0x224   : > { %v11801_v10 = vadd.f32 %v2531_v58, %v2442_v22  ;;  %v2267_v12 = vpop.f32.mrf.mxu0  ;;  %v2356_v15 = vpop.f32.mrf.mxu1  ;;  %v11835_v58 = vadd.f32 1.1920929e-07, %v1438_v55  ;;  %v8501_v55 = vor.u32 %v9168_v0, %v8498_v50 }
 0x225   : > { %v11809_v35 = vadd.f32 %v2356_v15, %v2267_v12  ;;  %v1723_v15 = vsel %vm1722_vm14, %v11753_v53, %v1719_v56  ;;  %v1402_v56 = vpop.xlane.xlu1 %1401 }
 0x226   : > { %15256 = vst [vmem:[#allocation71_spill] sm:$0xff] %v11801_v10  ;;  %9495 = vrsqrt.f32 %v11835_v58  ;;  %2971 = vmatpush.bf16.msrb.mxu2 %v8501_v55  ;;  %vm1760_vm7 = vweird.f32 %v11835_v58 }
 0x227   : > { %15259 = vst [vmem:[#allocation74_spill] sm:$0xff] %v11809_v35  ;;  %2306 = vmatmul.bf16.gmra.mxu0 %v11805_v46  ;;  %2395 = vmatmul.bf16.gmra.mxu1 %v11807_v2  ;;  %v1747_v35 = vmul.f32 0.5, %v1746_v3 }
 0x228   : > { %2484 = vmatmul.bf16.gmra.mxu2 %v11805_v46  ;;  %2573 = vmatmul.bf16.gmra.mxu3 %v11807_v2 }
 0x22b   : > { %v2445_v24 = vpop.f32.mrf.mxu2  ;;  %v2534_v49 = vpop.f32.mrf.mxu3 }
 0x22c   : > { %v11833_v45 = vadd.f32 %v2534_v49, %v2445_v24  ;;  %v2269_v5 = vpop.f32.mrf.mxu0  ;;  %v2358_v22 = vpop.f32.mrf.mxu1  ;;  %v1845_v24 = vmul.f32 %v9676_v33, %v1733_v48  ;;  %v1737_v49 = vmul.f32 0.5, %v1736_v1 }
 0x22d   : > { %v11838_v12 = vadd.f32 %v2358_v22, %v2269_v5  ;;  %v1842_v5 = vmul.f32 %v9677_v32, %v1723_v15  ;;  %v9678_v22 = vld [vmem:[%s10747_s14 + $0x188] sm:$0xff]  ;;  %v11849_v33 = vpop.eup %9493  ;;  %v1748_v32 = vsub.f32 1.5, %v1747_v35 }
 0x22e   : > { %15260 = vst [vmem:[#allocation75_spill] sm:$0xff] %v11833_v45  ;;  %v8562_v45 = vld [vmem:[#allocation14 + $0xd8] sm:$0xf0]  ;;  %v1738_v57 = vsub.f32 1.5, %v1737_v49  ;;  %v11857_v3 = vpop.eup %9495  ;;  %vm1771_vm6 = vweird.f32 %v11849_v33 }
 0x22f   : > { %15261 = vst [vmem:[#allocation76_spill] sm:$0xff] %v11838_v12  ;;  %v1843_v12 = vmul.f32 %v9678_v22, %v1723_v15  ;;  %v8565_v53 = vor.u32 %v9184_v39, %v8562_v45  ;;  %v11851_v0 = vpack.c.bf16 %v1844_v37, %v1842_v5  ;;  %v1399_v45 = vpop.xlane.xlu0 %1398  ;;  %v9159_v37 = vld [vmem:[#allocation14 + $0x4] sm:$0xf0]  ;;  %v1749_v39 = vmul.f32 %v11811_v27, %v1748_v32  ;;  %v8520_v5 = vld [vmem:[#allocation14 + $0x80] sm:$0xf]  ;;  %vm11922_vm9 = vmor %vm1770_vm5, %vm1771_vm6 }
 0x230   : > { %v1739_v35 = vmul.f32 %v11803_v44, %v1738_v57  ;;  %v1440_v7 = vmul.f32 %v11111_v54, %v1399_v45  ;;  %v1755_v49 = vmul.f32 %v11857_v3, %v11835_v58  ;;  %v9175_v57 = vld [vmem:[#allocation14 + $0x84] sm:$0xf0]  ;;  %vm1761_vm8 = vweird.f32 %v11857_v3 }
 0x231   : > { %3060 = vmatpush.bf16.msrb.mxu3 %v8565_v53  ;;  %15263 = vst [vmem:[#allocation78_spill] sm:$0xff] %v11851_v0  ;;  %v11853_v50 = vpack.c.bf16 %v1845_v24, %v1843_v12  ;;  %v8456_v12 = vld [vmem:[#allocation14] sm:$0xf]  ;;  %v1765_v24 = vmul.f32 %v11849_v33, %v11829_v59  ;;  %v1753_v36 = vsel %vm1752_vm4, %v11811_v27, %v1749_v39  ;;  %v9166_v39 = vld [vmem:[#allocation14 + $0x44] sm:$0xf]  ;;  %vm1762_vm10 = vmor %vm1760_vm7, %vm1761_vm8  ;;  %vm3825_vm4 = vcmask 15360  }
 0x232   : > { %v8457_v55 = vor.u32 %v9159_v37, %v8456_v12  ;;  %v11884_v45 = vadd.f32 1.1920929e-07, %v1440_v7  ;;  %v1756_v37 = vmul.f32 %v11857_v3, %v1755_v49 }
 0x233   : > { %v2447_v38 = vpop.f32.mrf.mxu2  ;;  %v2536_v10 = vpop.f32.mrf.mxu3  ;;  %15264 = vst [vmem:[#allocation79_spill] sm:$0xff] %v11853_v50  ;;  %v1766_v12 = vmul.f32 %v11849_v33, %v1765_v24  ;;  %v8490_v24 = vld [vmem:[#allocation14 + $0x48] sm:$0xf0] }
 0x234   : > { %v11847_v31 = vadd.f32 %v2536_v10, %v2447_v38  ;;  %v2272_v48 = vpop.f32.mrf.mxu0  ;;  %v2361_v1 = vpop.f32.mrf.mxu1  ;;  %v1441_v10 = vmul.f32 %v11111_v54, %v1402_v56  ;;  %v8521_v54 = vor.u32 %v9175_v57, %v8520_v5  ;;  %2798 = vmatpush.bf16.msrb.mxu0 %v8457_v55  ;;  %v1743_v38 = vsel %vm1742_vm3, %v11803_v44, %v1739_v35  ;;  %v9679_v44 = vld [vmem:[%s10747_s14 + $0x1a0] sm:$0xff]  ;;  %v9680_v55 = vld [vmem:[%s10747_s14 + $0x1b0] sm:$0xff]  ;;  %v9681_v57 = vld [vmem:[%s10747_s14 + $0x1a8] sm:$0xff] }
 0x235   : > { %v11855_v15 = vadd.f32 %v2361_v1, %v2272_v48  ;;  %v1846_v35 = vmul.f32 %v9679_v44, %v1743_v38  ;;  %v1848_v5 = vmul.f32 %v9680_v55, %v1753_v36  ;;  %v1847_v7 = vmul.f32 %v9681_v57, %v1743_v38 }
 0x236   : > { %15262 = vst [vmem:[#allocation77_spill] sm:$0xff] %v11847_v31  ;;  %v11879_v56 = vadd.f32 1.1920929e-07, %v1441_v10  ;;  %2887 = vmatpush.bf16.msrb.mxu1 %v8521_v54  ;;  %v1757_v27 = vmul.f32 0.5, %v1756_v37  ;;  %vm1780_vm13 = vweird.f32 %v11884_v45 }
 0x237   : > { %15265 = vst [vmem:[#allocation80_spill] sm:$0xff] %v11855_v15  ;;  %2311 = vmatmul.bf16.gmra.mxu0 %v11851_v0  ;;  %2400 = vmatmul.bf16.gmra.mxu1 %v11853_v50  ;;  %v11897_v15 = vpack.c.bf16 %v1848_v5, %v1846_v35  ;;  %v9164_v35 = vld [vmem:[#allocation14 + $0x34] sm:$0xf]  ;;  %v8482_v5 = vld [vmem:[#allocation14 + $0x38] sm:$0xf0] }
 0x238   : > { %2489 = vmatmul.bf16.gmra.mxu2 %v11851_v0  ;;  %2578 = vmatmul.bf16.gmra.mxu3 %v11853_v50  ;;  %9497 = vrsqrt.f32 %v11879_v56  ;;  %vm1790_vm11 = vweird.f32 %v11879_v56 }
 0x239   : > { %9499 = vrsqrt.f32 %v11884_v45  ;;  %15268 = vst [vmem:[#allocation83_spill] sm:$0xff] %v11897_v15 }
 0x23b   : > { %v2450_v22 = vpop.f32.mrf.mxu2  ;;  %v2539_v53 = vpop.f32.mrf.mxu3 }
 0x23c   : > { %v11882_v48 = vadd.f32 %v2539_v53, %v2450_v22  ;;  %v2274_v1 = vpop.f32.mrf.mxu0  ;;  %v2363_v32 = vpop.f32.mrf.mxu1  ;;  %v9682_v22 = vld [vmem:[%s10747_s14 + $0x1b8] sm:$0xff]  ;;  %v1767_v53 = vmul.f32 0.5, %v1766_v12  ;;  %v1758_v12 = vsub.f32 1.5, %v1757_v27 }
 0x23d   : > { %v11889_v10 = vadd.f32 %v2363_v32, %v2274_v1  ;;  %v1849_v54 = vmul.f32 %v9682_v22, %v1753_v36  ;;  %v8493_v32 = vor.u32 %v9166_v39, %v8490_v24  ;;  %v9180_v22 = vld [vmem:[#allocation14 + $0xb4] sm:$0xf]  ;;  %v9162_v39 = vld [vmem:[#allocation14 + $0x24] sm:$0xf]  ;;  %v8474_v24 = vld [vmem:[#allocation14 + $0x28] sm:$0xf0] }
 0x23e   : > { %15266 = vst [vmem:[#allocation81_spill] sm:$0xff] %v11882_v48  ;;  %v9182_v48 = vld [vmem:[#allocation14 + $0xc4] sm:$0xf]  ;;  %v11901_v23 = vpop.eup %9497  ;;  %v1768_v36 = vsub.f32 1.5, %v1767_v53  ;;  %v1759_v27 = vmul.f32 %v11857_v3, %v1758_v12 }
 0x23f   : > { %15267 = vst [vmem:[#allocation82_spill] sm:$0xff] %v11889_v10  ;;  %v8554_v10 = vld [vmem:[#allocation14 + $0xc8] sm:$0xf0]  ;;  %v11903_v38 = vpack.c.bf16 %v1849_v54, %v1847_v7  ;;  %2972 = vmatpush.bf16.msrb.mxu2 %v8493_v32  ;;  %v11907_v57 = vpop.eup %9499  ;;  %v1785_v54 = vmul.f32 %v11901_v23, %v11879_v56  ;;  %v8477_v32 = vor.u32 %v9162_v39, %v8474_v24  ;;  %v9160_v39 = vld [vmem:[#allocation14 + $0x14] sm:$0xf]  ;;  %vm1791_vm12 = vweird.f32 %v11901_v23 }
 0x240   : > { %v8557_v47 = vor.u32 %v9182_v48, %v8554_v10  ;;  %v8485_v48 = vor.u32 %v9164_v35, %v8482_v5  ;;  %v8546_v10 = vld [vmem:[#allocation14 + $0xb8] sm:$0xf0]  ;;  %v1775_v53 = vmul.f32 %v11907_v57, %v11884_v45  ;;  %vm1781_vm14 = vweird.f32 %v11907_v57  ;;  %v1921_v56 = vld [vmem:[%s15279_s3 + $0xf8] sm:$0xff]  ;;  %vm1792_vm15 = vmor %vm1790_vm11, %vm1791_vm12 }
 0x241   : > { %15270 = vst [vmem:[#allocation85_spill] sm:$0xff] %v11903_v38  ;;  %v8466_v24 = vld [vmem:[#allocation14 + $0x18] sm:$0xf0]  ;;  %3324 = vmatpush.msra.mxu1 %v1921_v56  ;;  %vm1782_vm0 = vmor %vm1780_vm13, %vm1781_vm14 }
 0x242   : > { %3061 = vmatpush.bf16.msrb.mxu3 %v8557_v47  ;;  %v1769_v47 = vmul.f32 %v11849_v33, %v1768_v36  ;;  %v1776_v58 = vmul.f32 %v11907_v57, %v1775_v53  ;;  %v9686_v53 = vld [vmem:[%s10747_s14 + $0x1c8] sm:$0xff] }
 0x243   : > { %v2452_v49 = vpop.f32.mrf.mxu2  ;;  %v2541_v1 = vpop.f32.mrf.mxu3  ;;  %2973 = vmatpush.bf16.msrb.mxu2 %v8485_v48  ;;  %v1786_v48 = vmul.f32 %v11901_v23, %v1785_v54 }
 0x244   : > { %v11899_v44 = vadd.f32 %v2541_v1, %v2452_v49  ;;  %v2277_v55 = vpop.f32.mrf.mxu0  ;;  %v2366_v31 = vpop.f32.mrf.mxu1  ;;  %v9178_v49 = vld [vmem:[#allocation14 + $0xa4] sm:$0xf]  ;;  %v1773_v12 = vsel %vm11922_vm9, %v11849_v33, %v1769_v47  ;;  %v9684_v33 = vld [vmem:[%s10747_s14 + $0x1d8] sm:$0xff] }
 0x245   : > { %v11905_v37 = vadd.f32 %v2366_v31, %v2277_v55  ;;  %v8549_v31 = vor.u32 %v9180_v22, %v8546_v10  ;;  %v8538_v55 = vld [vmem:[#allocation14 + $0xa8] sm:$0xf0]  ;;  %v1853_v47 = vmul.f32 %v9684_v33, %v1773_v12 }
 0x246   : > { %15269 = vst [vmem:[#allocation84_spill] sm:$0xff] %v11899_v44  ;;  %v8541_v22 = vor.u32 %v9178_v49, %v8538_v55  ;;  %v8469_v49 = vor.u32 %v9160_v39, %v8466_v24  ;;  %v9683_v55 = vld [vmem:[%s10747_s14 + $0x1d0] sm:$0xff]  ;;  %v8522_v24 = vld [vmem:[#allocation14 + $0x88] sm:$0xf0] }
 0x247   : > { %15271 = vst [vmem:[#allocation86_spill] sm:$0xff] %v11905_v37  ;;  %2316 = vmatmul.bf16.gmra.mxu0 %v11897_v15  ;;  %2405 = vmatmul.bf16.gmra.mxu1 %v11903_v38  ;;  %v1852_v7 = vmul.f32 %v9683_v55, %v1773_v12 }
 0x248   : > { %2494 = vmatmul.bf16.gmra.mxu2 %v11897_v15  ;;  %2583 = vmatmul.bf16.gmra.mxu3 %v11903_v38 }
 0x249   : > { %3062 = vmatpush.bf16.msrb.mxu3 %v8549_v31  ;;  %2974 = vmatpush.bf16.msrb.mxu2 %v8477_v32  ;;  %v1763_v31 = vsel %vm1762_vm10, %v11857_v3, %v1759_v27  ;;  %v9158_v3 = vld [vmem:[#allocation14 + $0x4] sm:$0xf]  ;;  %v8458_v27 = vld [vmem:[#allocation14 + $0x8] sm:$0xf0] }
 0x24a   : > { %v9174_v32 = vld [vmem:[#allocation14 + $0x84] sm:$0xf]  ;;  %v8461_v39 = vor.u32 %v9158_v3, %v8458_v27  ;;  %v9688_v27 = vld [vmem:[%s10747_s14 + $0x1f8] sm:$0xff] }
 0x24b   : > { %v2455_v59 = vpop.f32.mrf.mxu2  ;;  %v2544_v1 = vpop.f32.mrf.mxu3 }
 0x24c   : > { %v11933_v36 = vadd.f32 %v2544_v1, %v2455_v59  ;;  %v2279_v35 = vpop.f32.mrf.mxu0  ;;  %v2368_v5 = vpop.f32.mrf.mxu1  ;;  %v9176_v59 = vld [vmem:[#allocation14 + $0x94] sm:$0xf]  ;;  %v8530_v1 = vld [vmem:[#allocation14 + $0x98] sm:$0xf0] }
 0x24d   : > { %v11940_v10 = vadd.f32 %v2368_v5, %v2279_v35  ;;  %3063 = vmatpush.bf16.msrb.mxu3 %v8541_v22  ;;  %v8533_v54 = vor.u32 %v9176_v59, %v8530_v1  ;;  %v1851_v35 = vmul.f32 %v9686_v53, %v1763_v31  ;;  %v1787_v5 = vmul.f32 0.5, %v1786_v48  ;;  %2975 = vmatpush.bf16.msrb.mxu2 %v8469_v49 }
 0x24e   : > { %15274 = vst [vmem:[#allocation87_spill] sm:$0xff] %v11933_v36  ;;  %v9685_v36 = vld [vmem:[%s10747_s14 + $0x1c0] sm:$0xff]  ;;  %v8525_v59 = vor.u32 %v9174_v32, %v8522_v24  ;;  %v9690_v24 = vld [vmem:[%s10747_s14 + $0x1e8] sm:$0xff] }
 0x24f   : > { %15275 = vst [vmem:[#allocation88_spill] sm:$0xff] %v11940_v10  ;;  %v1850_v37 = vmul.f32 %v9685_v36, %v1763_v31  ;;  %v1777_v10 = vmul.f32 0.5, %v1776_v58  ;;  %v11951_v36 = vpack.c.bf16 %v1853_v47, %v1851_v35  ;;  %v1788_v58 = vsub.f32 1.5, %v1787_v5  ;;  %v9687_v5 = vld [vmem:[%s10747_s14 + $0x1f0] sm:$0xff] }
 0x251   : > { %3064 = vmatpush.bf16.msrb.mxu3 %v8533_v54  ;;  %v11949_v1 = vpack.c.bf16 %v1852_v7, %v1850_v37  ;;  %15277 = vst [vmem:[#allocation90_spill] sm:$0xff] %v11951_v36  ;;  %2976 = vmatpush.bf16.msrb.mxu2 %v8461_v39  ;;  %v1778_v31 = vsub.f32 1.5, %v1777_v10  ;;  %v1789_v45 = vmul.f32 %v11901_v23, %v1788_v58 }
 0x253   : > { %v2457_v22 = vpop.f32.mrf.mxu2  ;;  %v2546_v44 = vpop.f32.mrf.mxu3  ;;  %15276 = vst [vmem:[#allocation89_spill] sm:$0xff] %v11949_v1  ;;  %v1779_v37 = vmul.f32 %v11907_v57, %v1778_v31  ;;  %v1793_v53 = vsel %vm1792_vm15, %v11901_v23, %v1789_v45  ;;  %v1920_v45 = vld [vmem:[%s15279_s3 + $0xf0] sm:$0xff] }
 0x254   : > { %v11947_v6 = vadd.f32 %v2546_v44, %v2457_v22  ;;  %v2282_v55 = vpop.f32.mrf.mxu0  ;;  %v2371_v12 = vpop.f32.mrf.mxu1  ;;  %v1905_v44 = vld [vmem:[%s15279_s3 + $0x78] sm:$0xff]  ;;  %v1856_v3 = vmul.f32 %v9687_v5, %v1793_v53  ;;  %v1857_v32 = vmul.f32 %v9688_v27, %v1793_v53  ;;  %v9689_v22 = vld [vmem:[%s10747_s14 + $0x1e0] sm:$0xff]  ;;  %3325 = vmatpush.msra.mxu1 %v1920_v45 }
 0x255   : > { %v11953_v48 = vadd.f32 %v2371_v12, %v2282_v55  ;;  %3065 = vmatpush.bf16.msrb.mxu3 %v8525_v59  ;;  %3211 = vmatpush.msra.mxu0 %v1905_v44  ;;  %v1783_v35 = vsel %vm1782_vm0, %v11907_v57, %v1779_v37  ;;  %v1904_v57 = vld [vmem:[%s15279_s3 + $0x70] sm:$0xff] }
 0x256   : > { %v1854_v39 = vmul.f32 %v9689_v22, %v1783_v35  ;;  %v1855_v55 = vmul.f32 %v9690_v24, %v1783_v35  ;;  %v1903_v24 = vld [vmem:[%s15279_s3 + $0x68] sm:$0xff] }
 0x257   : > { %15278 = vst [vmem:[#allocation91_spill] sm:$0xff] %v11953_v48  ;;  %2321 = vmatmul.bf16.gmra.mxu0 %v11949_v1  ;;  %2410 = vmatmul.bf16.gmra.mxu1 %v11951_v36 }
 0x258   : > { %2499 = vmatmul.bf16.gmra.mxu2 %v11949_v1  ;;  %2588 = vmatmul.bf16.gmra.mxu3 %v11951_v36  ;;  %v11983_v56 = vpack.c.bf16 %v1856_v3, %v1854_v39 }
 0x259   : > { %3212 = vmatpush.msra.mxu0 %v1904_v57 }
 0x25a   : > { %15283 = vst [vmem:[#allocation95_spill] sm:$0xff] %v11983_v56 }
 0x25b   : > { %v2460_v10 = vpop.f32.mrf.mxu2  ;;  %v2549_v49 = vpop.f32.mrf.mxu3  ;;  %3213 = vmatpush.msra.mxu0 %v1903_v24 }
 0x25c   : > { %v11971_v7 = vadd.f32 %v2549_v49, %v2460_v10  ;;  %v2284_v33 = vpop.f32.mrf.mxu0  ;;  %v2373_v47 = vpop.f32.mrf.mxu1  ;;  %v11985_v10 = vpack.c.bf16 %v1857_v32, %v1855_v55  ;;  %v1919_v55 = vld [vmem:[%s15279_s3 + $0xe8] sm:$0xff] }
 0x25d   : > { %v11973_v54 = vadd.f32 %v2373_v47, %v2284_v33  ;;  %3326 = vmatpush.msra.mxu1 %v1919_v55 }
 0x25e   : > { %15280 = vst [vmem:[#allocation92_spill] sm:$0xff] %v11971_v7 }
 0x25f   : > { %15281 = vst [vmem:[#allocation93_spill] sm:$0xff] %v11973_v54 }
 0x260   : > { %15284 = vst [vmem:[#allocation96_spill] sm:$0xff] %v11985_v10 }
 0x263   : > { %v2462_v12 = vpop.f32.mrf.mxu2  ;;  %v2551_v59 = vpop.f32.mrf.mxu3 }
 0x264   : > { %v11981_v58 = vadd.f32 %v2551_v59, %v2462_v12  ;;  %v2287_v31 = vpop.f32.mrf.mxu0  ;;  %v2376_v44 = vpop.f32.mrf.mxu1 }
 0x265   : > { %v11987_v23 = vadd.f32 %v2376_v44, %v2287_v31 }
 0x266   : > { %15282 = vst [vmem:[#allocation94_spill] sm:$0xff] %v11981_v58 }
 0x267   : > { %15285 = vst [vmem:[#allocation97_spill] sm:$0xff] %v11987_v23  ;;  %2326 = vmatmul.bf16.gmra.mxu0 %v11983_v56  ;;  %2415 = vmatmul.bf16.gmra.mxu1 %v11985_v10 }
 0x268   : > { %2504 = vmatmul.bf16.gmra.mxu2 %v11983_v56  ;;  %2593 = vmatmul.bf16.gmra.mxu3 %v11985_v10 }
 0x26b   : > { %v2465_v37 = vpop.f32.mrf.mxu2  ;;  %v2554_v49 = vpop.f32.mrf.mxu3 }
 0x26c   : > { %v11999_v33 = vadd.f32 %v2554_v49, %v2465_v37  ;;  %v2289_v47 = vpop.f32.mrf.mxu0  ;;  %v2378_v53 = vpop.f32.mrf.mxu1 }
 0x26d   : > { %v12001_v35 = vadd.f32 %v2378_v53, %v2289_v47 }
 0x26e   : > { %15286 = vst [vmem:[#allocation98_spill] sm:$0xff] %v11999_v33 }
 0x26f   : > { %15287 = vst [vmem:[#allocation99_spill] sm:$0xff] %v12001_v35 }
 0x273   : > { %v2467_v5 = vpop.f32.mrf.mxu2  ;;  %v2556_v3 = vpop.f32.mrf.mxu3 }
 0x274   : > { %v12003_v27 = vadd.f32 %v2556_v3, %v2467_v5  ;;  %v2292_v32 = vpop.f32.mrf.mxu0  ;;  %v2381_v22 = vpop.f32.mrf.mxu1 }
 0x275   : > { %v12005_v39 = vadd.f32 %v2381_v22, %v2292_v32  ;;  %v1902_v32 = vld [vmem:[%s15279_s3 + $0x60] sm:$0xff] }
 0x276   : > { %15288 = vst [vmem:[#allocation100_spill] sm:$0xff] %v12003_v27  ;;  %v1918_v22 = vld [vmem:[%s15279_s3 + $0xe0] sm:$0xff]  ;;  %3214 = vmatpush.msra.mxu0 %v1902_v32  ;;  %v1901_v32 = vld [vmem:[%s15279_s3 + $0x58] sm:$0xff] }
 0x277   : > { %15289 = vst [vmem:[#allocation101_spill] sm:$0xff] %v12005_v39  ;;  %2799 = vmatmul.bf16.vlgmr.msrb.gmra.mxu0 %v11208_v51  ;;  %2888 = vmatmul.bf16.vlgmr.msrb.gmra.mxu1 %v11210_v52 }
 0x278   : > { %2977 = vmatmul.bf16.vlgmr.msrb.gmra.mxu2 %v11208_v51  ;;  %3066 = vmatmul.bf16.vlgmr.msrb.gmra.mxu3 %v11210_v52 }
 0x279   : > { %3327 = vmatpush.msra.mxu1 %v1918_v22  ;;  %v1917_v22 = vld [vmem:[%s15279_s3 + $0xd8] sm:$0xff]  ;;  %3215 = vmatpush.msra.mxu0 %v1901_v32  ;;  %v1900_v32 = vld [vmem:[%s15279_s3 + $0x50] sm:$0xff] }
 0x27b   : > { %v2470_v12 = vpop.f32.mrf.mxu2  ;;  %v2559_v59 = vpop.f32.mrf.mxu3  ;;  %3328 = vmatpush.msra.mxu1 %v1917_v22  ;;  %v1916_v22 = vld [vmem:[%s15279_s3 + $0xd0] sm:$0xff]  ;;  %3216 = vmatpush.msra.mxu0 %v1900_v32  ;;  %v1899_v32 = vld [vmem:[%s15279_s3 + $0x48] sm:$0xff] }
 0x27c   : > { %v12017_v31 = vadd.f32 %v2559_v59, %v2470_v12  ;;  %v2294_v44 = vpop.f32.mrf.mxu0  ;;  %v2383_v57 = vpop.f32.mrf.mxu1 }
 0x27d   : > { %v12019_v45 = vadd.f32 %v2383_v57, %v2294_v44  ;;  %3329 = vmatpush.msra.mxu1 %v1916_v22  ;;  %v1915_v22 = vld [vmem:[%s15279_s3 + $0xc8] sm:$0xff]  ;;  %3217 = vmatpush.msra.mxu0 %v1899_v32  ;;  %v1898_v32 = vld [vmem:[%s15279_s3 + $0x40] sm:$0xff] }
 0x27e   : > { %15290 = vst [vmem:[#allocation102_spill] sm:$0xff] %v12017_v31 }
 0x27f   : > { %15291 = vst [vmem:[#allocation103_spill] sm:$0xff] %v12019_v45  ;;  %3330 = vmatpush.msra.mxu1 %v1915_v22  ;;  %v1914_v22 = vld [vmem:[%s15279_s3 + $0xc0] sm:$0xff]  ;;  %3218 = vmatpush.msra.mxu0 %v1898_v32  ;;  %v1897_v32 = vld [vmem:[%s15279_s3 + $0x38] sm:$0xff] }
 0x281   : > { %3331 = vmatpush.msra.mxu1 %v1914_v22  ;;  %v1913_v22 = vld [vmem:[%s15279_s3 + $0xb8] sm:$0xff]  ;;  %3219 = vmatpush.msra.mxu0 %v1897_v32  ;;  %v1896_v32 = vld [vmem:[%s15279_s3 + $0x30] sm:$0xff] }
 0x283   : > { %v2472_v37 = vpop.f32.mrf.mxu2  ;;  %v2561_v49 = vpop.f32.mrf.mxu3  ;;  %3332 = vmatpush.msra.mxu1 %v1913_v22  ;;  %v1912_v22 = vld [vmem:[%s15279_s3 + $0xb0] sm:$0xff]  ;;  %3220 = vmatpush.msra.mxu0 %v1896_v32 }
 0x284   : > { %v12021_v47 = vadd.f32 %v2561_v49, %v2472_v37  ;;  %v2297_v53 = vpop.f32.mrf.mxu0  ;;  %v2386_v5 = vpop.f32.mrf.mxu1 }
 0x285   : > { %v12023_v3 = vadd.f32 %v2386_v5, %v2297_v53  ;;  %3333 = vmatpush.msra.mxu1 %v1912_v22 }
 0x286   : > { %15292 = vst [vmem:[#allocation104_spill] sm:$0xff] %v12021_v47 }
 0x287   : > { %15293 = vst [vmem:[#allocation105_spill] sm:$0xff] %v12023_v3  ;;  %2804 = vmatmul.bf16.gmra.mxu0 %v11281_v61  ;;  %2893 = vmatmul.bf16.gmra.mxu1 %v11283_v62 }
 0x288   : > { %2982 = vmatmul.bf16.gmra.mxu2 %v11281_v61  ;;  %3071 = vmatmul.bf16.gmra.mxu3 %v11283_v62 }
 0x28b   : > { %v2475_v24 = vpop.f32.mrf.mxu2  ;;  %v2564_v55 = vpop.f32.mrf.mxu3 }
 0x28c   : > { %v12035_v12 = vadd.f32 %v2564_v55, %v2475_v24  ;;  %v2299_v59 = vpop.f32.mrf.mxu0  ;;  %v2388_v44 = vpop.f32.mrf.mxu1 }
 0x28d   : > { %v12037_v57 = vadd.f32 %v2388_v44, %v2299_v59 }
 0x28e   : > { %15294 = vst [vmem:[#allocation106_spill] sm:$0xff] %v12035_v12 }
 0x293   : > { %v2477_v37 = vpop.f32.mrf.mxu2  ;;  %v2566_v49 = vpop.f32.mrf.mxu3 }
 0x294   : > { %v12039_v53 = vadd.f32 %v2566_v49, %v2477_v37  ;;  %v2302_v5 = vpop.f32.mrf.mxu0  ;;  %v2391_v62 = vpop.f32.mrf.mxu1 }
 0x295   : > { %v12041_v61 = vadd.f32 %v2391_v62, %v2302_v5 }
 0x297   : > { %15295 = vst [vmem:[#allocation107_spill] sm:$0xff] %v12041_v61  ;;  %2809 = vmatmul.bf16.gmra.mxu0 %v11357_v9  ;;  %2898 = vmatmul.bf16.gmra.mxu1 %v11363_v20 }
 0x298   : > { %2987 = vmatmul.bf16.gmra.mxu2 %v11357_v9  ;;  %3076 = vmatmul.bf16.gmra.mxu3 %v11363_v20 }
 0x29b   : > { %v2480_v62 = vpop.f32.mrf.mxu2  ;;  %v2569_v24 = vpop.f32.mrf.mxu3 }
 0x29c   : > { %v12053_v55 = vadd.f32 %v2569_v24, %v2480_v62  ;;  %v2304_v59 = vpop.f32.mrf.mxu0  ;;  %v2393_v44 = vpop.f32.mrf.mxu1 }
 0x29d   : > { %v12055_v37 = vadd.f32 %v2393_v44, %v2304_v59 }
 0x29e   : > { %15296 = vst [vmem:[#allocation108_spill] sm:$0xff] %v12053_v55 }
 0x29f   : > { %15297 = vst [vmem:[#allocation109_spill] sm:$0xff] %v12055_v37 }
 0x2a3   : > { %v2482_v49 = vpop.f32.mrf.mxu2  ;;  %v2571_v5 = vpop.f32.mrf.mxu3 }
 0x2a4   : > { %v12057_v20 = vadd.f32 %v2571_v5, %v2482_v49  ;;  %v2307_v9 = vpop.f32.mrf.mxu0  ;;  %v2396_v52 = vpop.f32.mrf.mxu1 }
 0x2a5   : > { %v12059_v51 = vadd.f32 %v2396_v52, %v2307_v9 }
 0x2a6   : > { %15298 = vst [vmem:[#allocation110_spill] sm:$0xff] %v12057_v20 }
 0x2a7   : > { %15299 = vst [vmem:[#allocation111_spill] sm:$0xff] %v12059_v51  ;;  %2814 = vmatmul.bf16.gmra.mxu0 %v11427_v30  ;;  %2903 = vmatmul.bf16.gmra.mxu1 %v11429_v16 }
 0x2a8   : > { %2992 = vmatmul.bf16.gmra.mxu2 %v11427_v30  ;;  %3081 = vmatmul.bf16.gmra.mxu3 %v11429_v16 }
 0x2ab   : > { %v2485_v52 = vpop.f32.mrf.mxu2  ;;  %v2574_v9 = vpop.f32.mrf.mxu3 }
 0x2ac   : > { %v12071_v62 = vadd.f32 %v2574_v9, %v2485_v52  ;;  %v2309_v24 = vpop.f32.mrf.mxu0  ;;  %v2398_v59 = vpop.f32.mrf.mxu1 }
 0x2ad   : > { %v12073_v44 = vadd.f32 %v2398_v59, %v2309_v24 }
 0x2ae   : > { %15300 = vst [vmem:[#allocation112_spill] sm:$0xff] %v12071_v62 }
 0x2af   : > { %15301 = vst [vmem:[#allocation113_spill] sm:$0xff] %v12073_v44 }
 0x2b3   : > { %v2487_v49 = vpop.f32.mrf.mxu2  ;;  %v2576_v5 = vpop.f32.mrf.mxu3 }
 0x2b4   : > { %v12075_v16 = vadd.f32 %v2576_v5, %v2487_v49  ;;  %v2312_v30 = vpop.f32.mrf.mxu0  ;;  %v2401_v51 = vpop.f32.mrf.mxu1 }
 0x2b5   : > { %v12077_v20 = vadd.f32 %v2401_v51, %v2312_v30 }
 0x2b6   : > { %15302 = vst [vmem:[#allocation114_spill] sm:$0xff] %v12075_v16 }
 0x2b7   : > { %15303 = vst [vmem:[#allocation115_spill] sm:$0xff] %v12077_v20  ;;  %2819 = vmatmul.bf16.gmra.mxu0 %v11477_v17  ;;  %2908 = vmatmul.bf16.gmra.mxu1 %v11479_v29 }
 0x2b8   : > { %2997 = vmatmul.bf16.gmra.mxu2 %v11477_v17  ;;  %3086 = vmatmul.bf16.gmra.mxu3 %v11479_v29 }
 0x2bb   : > { %v2490_v51 = vpop.f32.mrf.mxu2  ;;  %v2579_v30 = vpop.f32.mrf.mxu3 }
 0x2bc   : > { %v12089_v52 = vadd.f32 %v2579_v30, %v2490_v51  ;;  %v2314_v9 = vpop.f32.mrf.mxu0  ;;  %v2403_v24 = vpop.f32.mrf.mxu1 }
 0x2bd   : > { %v12091_v59 = vadd.f32 %v2403_v24, %v2314_v9 }
 0x2be   : > { %15304 = vst [vmem:[#allocation116_spill] sm:$0xff] %v12089_v52 }
 0x2bf   : > { %15305 = vst [vmem:[#allocation117_spill] sm:$0xff] %v12091_v59 }
 0x2c3   : > { %v2492_v49 = vpop.f32.mrf.mxu2  ;;  %v2581_v5 = vpop.f32.mrf.mxu3 }
 0x2c4   : > { %v12093_v29 = vadd.f32 %v2581_v5, %v2492_v49  ;;  %v2317_v17 = vpop.f32.mrf.mxu0  ;;  %v2406_v20 = vpop.f32.mrf.mxu1 }
 0x2c5   : > { %v12095_v16 = vadd.f32 %v2406_v20, %v2317_v17 }
 0x2c6   : > { %15306 = vst [vmem:[#allocation118_spill] sm:$0xff] %v12093_v29 }
 0x2c7   : > { %15307 = vst [vmem:[#allocation119_spill] sm:$0xff] %v12095_v16  ;;  %2824 = vmatmul.bf16.gmra.mxu0 %v11523_v11  ;;  %2913 = vmatmul.bf16.gmra.mxu1 %v11525_v40 }
 0x2c8   : > { %3002 = vmatmul.bf16.gmra.mxu2 %v11523_v11  ;;  %3091 = vmatmul.bf16.gmra.mxu3 %v11525_v40 }
 0x2cb   : > { %v2495_v20 = vpop.f32.mrf.mxu2  ;;  %v2584_v17 = vpop.f32.mrf.mxu3 }
 0x2cc   : > { %v12107_v51 = vadd.f32 %v2584_v17, %v2495_v20  ;;  %v2319_v30 = vpop.f32.mrf.mxu0  ;;  %v2408_v9 = vpop.f32.mrf.mxu1 }
 0x2cd   : > { %v12109_v24 = vadd.f32 %v2408_v9, %v2319_v30 }
 0x2ce   : > { %15308 = vst [vmem:[#allocation120_spill] sm:$0xff] %v12107_v51 }
 0x2cf   : > { %15309 = vst [vmem:[#allocation121_spill] sm:$0xff] %v12109_v24 }
 0x2d3   : > { %v2497_v49 = vpop.f32.mrf.mxu2  ;;  %v2586_v5 = vpop.f32.mrf.mxu3 }
 0x2d4   : > { %v12111_v40 = vadd.f32 %v2586_v5, %v2497_v49  ;;  %v2322_v11 = vpop.f32.mrf.mxu0  ;;  %v2411_v16 = vpop.f32.mrf.mxu1 }
 0x2d5   : > { %v12113_v29 = vadd.f32 %v2411_v16, %v2322_v11 }
 0x2d6   : > { %15310 = vst [vmem:[#allocation122_spill] sm:$0xff] %v12111_v40 }
 0x2d7   : > { %15311 = vst [vmem:[#allocation123_spill] sm:$0xff] %v12113_v29  ;;  %2829 = vmatmul.bf16.gmra.mxu0 %v11563_v34  ;;  %2918 = vmatmul.bf16.gmra.mxu1 %v11565_v25 }
 0x2d8   : > { %3007 = vmatmul.bf16.gmra.mxu2 %v11563_v34  ;;  %3096 = vmatmul.bf16.gmra.mxu3 %v11565_v25 }
 0x2db   : > { %v2500_v16 = vpop.f32.mrf.mxu2  ;;  %v2589_v11 = vpop.f32.mrf.mxu3 }
 0x2dc   : > { %v12125_v20 = vadd.f32 %v2589_v11, %v2500_v16  ;;  %v2324_v17 = vpop.f32.mrf.mxu0  ;;  %v2413_v30 = vpop.f32.mrf.mxu1 }
 0x2dd   : > { %v12127_v9 = vadd.f32 %v2413_v30, %v2324_v17 }
 0x2de   : > { %15312 = vst [vmem:[#allocation124_spill] sm:$0xff] %v12125_v20 }
 0x2df   : > { %15313 = vst [vmem:[#allocation125_spill] sm:$0xff] %v12127_v9 }
 0x2e3   : > { %v2502_v49 = vpop.f32.mrf.mxu2  ;;  %v2591_v5 = vpop.f32.mrf.mxu3 }
 0x2e4   : > { %v12129_v25 = vadd.f32 %v2591_v5, %v2502_v49  ;;  %v2327_v34 = vpop.f32.mrf.mxu0  ;;  %v2416_v29 = vpop.f32.mrf.mxu1  ;;  %v1922_v49 = vld [vmem:[%s15318_s10] sm:$0xf] }
 0x2e5   : > { %v12131_v40 = vadd.f32 %v2416_v29, %v2327_v34  ;;  %3822 = vst [vmem:[#allocation1] ss:$4 sm:$0xff] %v1922_v49 }
 0x2e6   : > { %15314 = vst [vmem:[#allocation126_spill] sm:$0xff] %v12129_v25 }
 0x2e7   : > { %15315 = vst [vmem:[#allocation127_spill] sm:$0xff] %v12131_v40  ;;  %2834 = vmatmul.bf16.gmra.mxu0 %v11607_v19  ;;  %2923 = vmatmul.bf16.gmra.mxu1 %v11609_v21 }
 0x2e8   : > { %3012 = vmatmul.bf16.gmra.mxu2 %v11607_v19  ;;  %3101 = vmatmul.bf16.gmra.mxu3 %v11609_v21 }
 0x2eb   : > { %v2505_v29 = vpop.f32.mrf.mxu2  ;;  %v2594_v34 = vpop.f32.mrf.mxu3 }
 0x2ec   : > { %v12143_v16 = vadd.f32 %v2594_v34, %v2505_v29  ;;  %v2329_v11 = vpop.f32.mrf.mxu0  ;;  %v2418_v17 = vpop.f32.mrf.mxu1  ;;  %v3823_v29 = vld.sshfl [vmem:[#allocation1] sm:$0xff pattern:$0x73625140]  ;;  %v3824_v34 = vld.sshfl [vmem:[#allocation1 + $0x8] sm:$0xff pattern:$0x73625140] }
 0x2ed   : > { %v12145_v30 = vadd.f32 %v2418_v17, %v2329_v11  ;;  %8582 = vmatpush.msk.msra.mxu2 %vm3922_vm1, %v3823_v29  ;;  %8615 = vmatpush.msk.msra.mxu3 %vm3922_vm1, %v3824_v34  ;;  %6307 = vst [vmem:[#allocation1] ss:$4 sm:$0xff] %v1922_v49  ;;  %v1911_v11 = vld [vmem:[%s15279_s3 + $0xa8] sm:$0xff] }
 0x2ee   : > { %15316 = vst [vmem:[#allocation128_spill] sm:$0xff] %v12143_v16  ;;  %3334 = vmatpush.msra.mxu1 %v1911_v11 }
 0x2ef   : > { %15317 = vst [vmem:[#allocation129_spill] sm:$0xff] %v12145_v30 }
 0x2f3   : > { %v2507_v5 = vpop.f32.mrf.mxu2  ;;  %v2596_v21 = vpop.f32.mrf.mxu3 }
 0x2f4   : > { %v12150_v19 = vadd.f32 %v2596_v21, %v2507_v5  ;;  %v2800_v32 = vpop.f32.mrf.mxu0  ;;  %v2889_v22 = vpop.f32.mrf.mxu1  ;;  %v1895_v21 = vld [vmem:[%s15279_s3 + $0x28] sm:$0xff] }
 0x2f5   : > { %v12152_v40 = vadd.f32 %v2889_v22, %v2800_v32  ;;  %3221 = vmatpush.msra.mxu0 %v1895_v21  ;;  %v1894_v21 = vld [vmem:[%s15279_s3 + $0x20] sm:$0xff] }
 0x2f6   : > { %15319 = vst [vmem:[#allocation130_spill] sm:$0xff] %v12150_v19 }
 0x2f7   : > { %15320 = vst [vmem:[#allocation131_spill] sm:$0xff] %v12152_v40  ;;  %2839 = vmatmul.bf16.gmra.mxu0 %v11645_v13  ;;  %2928 = vmatmul.bf16.gmra.mxu1 %v11647_v42 }
 0x2f8   : > { %3017 = vmatmul.bf16.gmra.mxu2 %v11645_v13  ;;  %3106 = vmatmul.bf16.gmra.mxu3 %v11647_v42 }
 0x2f9   : > { %3222 = vmatpush.msra.mxu0 %v1894_v21  ;;  %v1893_v21 = vld [vmem:[%s15279_s3 + $0x18] sm:$0xff] }
 0x2fb   : > { %v2978_v17 = vpop.f32.mrf.mxu2  ;;  %v3067_v49 = vpop.f32.mrf.mxu3  ;;  %3223 = vmatpush.msra.mxu0 %v1893_v21  ;;  %v1892_v21 = vld [vmem:[%s15279_s3 + $0x10] sm:$0xff] }
 0x2fc   : > { %v12166_v5 = vadd.f32 %v3067_v49, %v2978_v17  ;;  %v2802_v32 = vpop.f32.mrf.mxu0  ;;  %v2891_v22 = vpop.f32.mrf.mxu1 }
 0x2fd   : > { %v12168_v29 = vadd.f32 %v2891_v22, %v2802_v32  ;;  %3224 = vmatpush.msra.mxu0 %v1892_v21  ;;  %v1891_v21 = vld [vmem:[%s15279_s3 + $0x8] sm:$0xff] }
 0x2ff   : > { %3225 = vmatpush.msra.mxu0 %v1891_v21 }
 0x303   : > { %v2980_v34 = vpop.f32.mrf.mxu2  ;;  %v3069_v42 = vpop.f32.mrf.mxu3 }
 0x304   : > { %v12170_v13 = vadd.f32 %v3069_v42, %v2980_v34  ;;  %v2805_v40 = vpop.f32.mrf.mxu0  ;;  %v2894_v19 = vpop.f32.mrf.mxu1  ;;  %v1910_v42 = vld [vmem:[%s15279_s3 + $0xa0] sm:$0xff] }
 0x305   : > { %v12172_v30 = vadd.f32 %v2894_v19, %v2805_v40  ;;  %3335 = vmatpush.msra.mxu1 %v1910_v42  ;;  %v1909_v42 = vld [vmem:[%s15279_s3 + $0x98] sm:$0xff] }
 0x306   : > { %15321 = vst [vmem:[#allocation132_spill] sm:$0xff] %v12170_v13 }
 0x307   : > { %15322 = vst [vmem:[#allocation133_spill] sm:$0xff] %v12172_v30  ;;  %2844 = vmatmul.bf16.gmra.mxu0 %v11699_v18  ;;  %2933 = vmatmul.bf16.gmra.mxu1 %v11701_v63 }
 0x308   : > { %3022 = vmatmul.bf16.gmra.mxu2 %v11699_v18  ;;  %3111 = vmatmul.bf16.gmra.mxu3 %v11701_v63 }
 0x309   : > { %3336 = vmatpush.msra.mxu1 %v1909_v42  ;;  %v1908_v42 = vld [vmem:[%s15279_s3 + $0x90] sm:$0xff] }
 0x30b   : > { %v2983_v40 = vpop.f32.mrf.mxu2  ;;  %v3072_v19 = vpop.f32.mrf.mxu3  ;;  %3337 = vmatpush.msra.mxu1 %v1908_v42  ;;  %v1907_v42 = vld [vmem:[%s15279_s3 + $0x88] sm:$0xff] }
 0x30c   : > { %v12184_v11 = vadd.f32 %v3072_v19, %v2983_v40  ;;  %v2807_v17 = vpop.f32.mrf.mxu0  ;;  %v2896_v49 = vpop.f32.mrf.mxu1 }
 0x30d   : > { %v12186_v32 = vadd.f32 %v2896_v49, %v2807_v17  ;;  %3338 = vmatpush.msra.mxu1 %v1907_v42 }
 0x313   : > { %v2985_v22 = vpop.f32.mrf.mxu2  ;;  %v3074_v34 = vpop.f32.mrf.mxu3 }
 0x314   : > { %v12188_v63 = vadd.f32 %v3074_v34, %v2985_v22  ;;  %v2810_v18 = vpop.f32.mrf.mxu0  ;;  %v2899_v30 = vpop.f32.mrf.mxu1 }
 0x315   : > { %v12190_v13 = vadd.f32 %v2899_v30, %v2810_v18 }
 0x316   : > { %15323 = vst [vmem:[#allocation134_spill] sm:$0xff] %v12188_v63 }
 0x317   : > { %15324 = vst [vmem:[#allocation135_spill] sm:$0xff] %v12190_v13  ;;  %2849 = vmatmul.bf16.gmra.mxu0 %v11747_v41  ;;  %2938 = vmatmul.bf16.gmra.mxu1 %v11749_v14 }
 0x318   : > { %3027 = vmatmul.bf16.gmra.mxu2 %v11747_v41  ;;  %3116 = vmatmul.bf16.gmra.mxu3 %v11749_v14 }
 0x31b   : > { %v2988_v18 = vpop.f32.mrf.mxu2  ;;  %v3077_v30 = vpop.f32.mrf.mxu3 }
 0x31c   : > { %v12202_v40 = vadd.f32 %v3077_v30, %v2988_v18  ;;  %v2812_v19 = vpop.f32.mrf.mxu0  ;;  %v2901_v17 = vpop.f32.mrf.mxu1 }
 0x31d   : > { %v12204_v49 = vadd.f32 %v2901_v17, %v2812_v19 }
 0x323   : > { %v2990_v22 = vpop.f32.mrf.mxu2  ;;  %v3079_v34 = vpop.f32.mrf.mxu3 }
 0x324   : > { %v12206_v14 = vadd.f32 %v3079_v34, %v2990_v22  ;;  %v2815_v41 = vpop.f32.mrf.mxu0  ;;  %v2904_v13 = vpop.f32.mrf.mxu1 }
 0x325   : > { %v12208_v63 = vadd.f32 %v2904_v13, %v2815_v41 }
 0x327   : > { %15325 = vst [vmem:[#allocation136_spill] sm:$0xff] %v12208_v63  ;;  %2854 = vmatmul.bf16.gmra.mxu0 %v11805_v46  ;;  %2943 = vmatmul.bf16.gmra.mxu1 %v11807_v2 }
 0x328   : > { %3032 = vmatmul.bf16.gmra.mxu2 %v11805_v46  ;;  %3121 = vmatmul.bf16.gmra.mxu3 %v11807_v2 }
 0x32b   : > { %v2993_v13 = vpop.f32.mrf.mxu2  ;;  %v3082_v41 = vpop.f32.mrf.mxu3 }
 0x32c   : > { %v12220_v18 = vadd.f32 %v3082_v41, %v2993_v13  ;;  %v2817_v30 = vpop.f32.mrf.mxu0  ;;  %v2906_v19 = vpop.f32.mrf.mxu1 }
 0x32d   : > { %v12222_v17 = vadd.f32 %v2906_v19, %v2817_v30 }
 0x32e   : > { %15326 = vst [vmem:[#allocation137_spill] sm:$0xff] %v12220_v18  ;;  %v9215_v18 = vld [vmem:[#allocation11 + $0xc4] sm:$0xf0] }
 0x32f   : > { %15327 = vst [vmem:[#allocation138_spill] sm:$0xff] %v12222_v17 }
 0x333   : > { %v2995_v22 = vpop.f32.mrf.mxu2  ;;  %v3084_v34 = vpop.f32.mrf.mxu3 }
 0x334   : > { %v12224_v2 = vadd.f32 %v3084_v34, %v2995_v22  ;;  %v12226_v46 = vpop.f32.mrf.mxu0  ;;  %v12228_v63 = vpop.f32.mrf.mxu1  ;;  %v1890_v22 = vld [vmem:[%s15279_s3] sm:$0xff] }
 0x335   : > { %15329 = vst [vmem:[#allocation140_spill] sm:$0xff] %v12226_v46  ;;  %v1906_v34 = vld [vmem:[%s15279_s3 + $0x80] sm:$0xff]  ;;  %3226 = vmatpush.msra.mxu0 %v1890_v22 }
 0x336   : > { %15328 = vst [vmem:[#allocation139_spill] sm:$0xff] %v12224_v2  ;;  %3339 = vmatpush.msra.mxu1 %v1906_v34  ;;  %v9221_v34 = vld [vmem:[#allocation11 + $0xf4] sm:$0xf0] }
 0x337   : > { %15330 = vst [vmem:[#allocation141_spill] sm:$0xff] %v12228_v63  ;;  %2859 = vmatmul.bf16.gmra.mxu0 %v11851_v0  ;;  %2948 = vmatmul.bf16.gmra.mxu1 %v11853_v50  ;;  %v15362_v63 = vld [vmem:[#allocation71_spill] sm:$0xff] }
 0x338   : > { %3037 = vmatmul.bf16.gmra.mxu2 %v11851_v0  ;;  %3126 = vmatmul.bf16.gmra.mxu3 %v11853_v50  ;;  %v3158_v46 = vmul.f32 %v15362_v63, %v15362_v63 }
 0x33c   : > { %v12240_v13 = vpop.f32.mrf.mxu0  ;;  %v12242_v41 = vpop.f32.mrf.mxu1 }
 0x33d   : > { %15331 = vst [vmem:[#allocation142_spill] sm:$0xff] %v12240_v13 }
 0x33e   : > { %15332 = vst [vmem:[#allocation143_spill] sm:$0xff] %v12242_v41  ;;  %v9217_v41 = vld [vmem:[#allocation11 + $0xd4] sm:$0xf0] }
 0x344   : > { %v12244_v30 = vpop.f32.mrf.mxu0  ;;  %v12246_v19 = vpop.f32.mrf.mxu1 }
 0x345   : > { %15333 = vst [vmem:[#allocation144_spill] sm:$0xff] %v12244_v30 }
 0x346   : > { %15334 = vst [vmem:[#allocation145_spill] sm:$0xff] %v12246_v19  ;;  %v8770_v19 = vld [vmem:[#allocation11 + $0xf0] sm:$0xf] }
 0x347   : > { %2864 = vmatmul.bf16.gmra.mxu0 %v11897_v15  ;;  %2953 = vmatmul.bf16.gmra.mxu1 %v11903_v38 }
 0x348   : > { %3042 = vmatmul.bf16.gmra.mxu2 %v11897_v15  ;;  %3131 = vmatmul.bf16.gmra.mxu3 %v11903_v38  ;;  %v8706_v38 = vld [vmem:[#allocation11 + $0x70] sm:$0xf]  ;;  %v9205_v15 = vld [vmem:[#allocation11 + $0x74] sm:$0xf0] }
 0x349   : > { %v8707_v22 = vor.u32 %v9205_v15, %v8706_v38 }
 0x34b   : > { %4729 = vmatpush.bf16.msrb.mxu0 %v8707_v22  ;;  %v3147_v22 = vmul.f32 %v11649_v4, %v11649_v4 }
 0x34c   : > { %v12258_v21 = vpop.f32.mrf.mxu0  ;;  %v12260_v42 = vpop.f32.mrf.mxu1 }
 0x34d   : > { %15335 = vst [vmem:[#allocation146_spill] sm:$0xff] %v12258_v21  ;;  %v8771_v21 = vor.u32 %v9221_v34, %v8770_v19  ;;  %v3148_v34 = vmul.f32 %v11679_v8, %v11679_v8 }
 0x34e   : > { %15336 = vst [vmem:[#allocation147_spill] sm:$0xff] %v12260_v42 }
 0x34f   : > { %4818 = vmatpush.bf16.msrb.mxu1 %v8771_v21 }
 0x354   : > { %v12262_v50 = vpop.f32.mrf.mxu0  ;;  %v12264_v0 = vpop.f32.mrf.mxu1 }
 0x355   : > { %15337 = vst [vmem:[#allocation148_spill] sm:$0xff] %v12262_v50 }
 0x356   : > { %15338 = vst [vmem:[#allocation149_spill] sm:$0xff] %v12264_v0 }
 0x357   : > { %2869 = vmatmul.bf16.gmra.mxu0 %v11949_v1  ;;  %2958 = vmatmul.bf16.gmra.mxu1 %v11951_v36 }
 0x358   : > { %3047 = vmatmul.bf16.gmra.mxu2 %v11949_v1  ;;  %3136 = vmatmul.bf16.gmra.mxu3 %v11951_v36  ;;  %v8698_v36 = vld [vmem:[#allocation11 + $0x60] sm:$0xf] }
 0x359   : > { %v8762_v1 = vld [vmem:[#allocation11 + $0xe0] sm:$0xf] }
 0x35c   : > { %v12270_v42 = vpop.f32.mrf.mxu0  ;;  %v12272_v50 = vpop.f32.mrf.mxu1 }
 0x35d   : > { %15339 = vst [vmem:[#allocation150_spill] sm:$0xff] %v12270_v42 }
 0x35e   : > { %15340 = vst [vmem:[#allocation151_spill] sm:$0xff] %v12272_v50  ;;  %v8754_v50 = vld [vmem:[#allocation11 + $0xd0] sm:$0xf] }
 0x35f   : > { %v8755_v13 = vor.u32 %v9217_v41, %v8754_v50 }
 0x364   : > { %v12274_v0 = vpop.f32.mrf.mxu0  ;;  %v12276_v30 = vpop.f32.mrf.mxu1 }
 0x365   : > { %15341 = vst [vmem:[#allocation152_spill] sm:$0xff] %v12274_v0  ;;  %v3150_v0 = vmul.f32 %v11697_v28, %v11697_v28 }
 0x366   : > { %15342 = vst [vmem:[#allocation153_spill] sm:$0xff] %v12276_v30  ;;  %v9219_v30 = vld [vmem:[#allocation11 + $0xe4] sm:$0xf0] }
 0x367   : > { %2874 = vmatmul.bf16.gmra.mxu0 %v11983_v56  ;;  %2963 = vmatmul.bf16.gmra.mxu1 %v11985_v10 }
 0x368   : > { %3052 = vmatmul.bf16.gmra.mxu2 %v11983_v56  ;;  %3141 = vmatmul.bf16.gmra.mxu3 %v11985_v10  ;;  %v9203_v56 = vld [vmem:[#allocation11 + $0x64] sm:$0xf0] }
 0x369   : > { %v8699_v10 = vor.u32 %v9203_v56, %v8698_v36  ;;  %v3152_v36 = vmul.f32 %v11727_v43, %v11727_v43 }
 0x36b   : > { %4730 = vmatpush.bf16.msrb.mxu0 %v8699_v10 }
 0x36c   : > { %v12282_v15 = vpop.f32.mrf.mxu0  ;;  %v12284_v38 = vpop.f32.mrf.mxu1 }
 0x36d   : > { %15343 = vst [vmem:[#allocation154_spill] sm:$0xff] %v12282_v15  ;;  %v8763_v15 = vor.u32 %v9219_v30, %v8762_v1  ;;  %v3151_v1 = vmul.f32 %v11703_v26, %v11703_v26  ;;  %v15353_v30 = vld [vmem:[#allocation64_spill] sm:$0xff] }
 0x36e   : > { %15344 = vst [vmem:[#allocation155_spill] sm:$0xff] %v12284_v38 }
 0x36f   : > { %4819 = vmatpush.bf16.msrb.mxu1 %v8763_v15  ;;  %v3153_v15 = vmul.f32 %v15353_v30, %v15353_v30 }
 0x373   : > { %4820 = vmatpush.bf16.msrb.mxu1 %v8755_v13  ;;  %v15367_v13 = vld [vmem:[#allocation74_spill] sm:$0xff] }
 0x374   : > { %v12286_v19 = vpop.f32.mrf.mxu0  ;;  %v12288_v21 = vpop.f32.mrf.mxu1  ;;  %v3159_v41 = vmul.f32 %v15367_v13, %v15367_v13 }
 0x375   : > { %15345 = vst [vmem:[#allocation156_spill] sm:$0xff] %v12286_v19 }
 0x376   : > { %15346 = vst [vmem:[#allocation157_spill] sm:$0xff] %v12288_v21  ;;  %v3149_v21 = vmul.f32 %v11685_v60, %v11685_v60 }
 0x377   : > { %3227 = vmatmul.f32.vlgmr.msra.gmra.mxu0 %v3147_v22  ;;  %3340 = vmatmul.f32.vlgmr.msra.gmra.mxu1 %v3148_v34 }
 0x37c   : > { %v12294_v38 = vpop.f32.mrf.mxu0  ;;  %v12296_v19 = vpop.f32.mrf.mxu1 }
 0x37d   : > { %15347 = vst [vmem:[#allocation158_spill] sm:$0xff] %v12294_v38  ;;  %v9201_v38 = vld [vmem:[#allocation11 + $0x54] sm:$0xf0] }
 0x37e   : > { %15348 = vst [vmem:[#allocation159_spill] sm:$0xff] %v12296_v19  ;;  %v15357_v19 = vld [vmem:[#allocation68_spill] sm:$0xff] }
 0x37f   : > { %3230 = vmatmul.f32.gmra.mxu0 %v3149_v21  ;;  %3343 = vmatmul.f32.gmra.mxu1 %v3150_v0  ;;  %v15354_v0 = vld [vmem:[#allocation65_spill] sm:$0xff] }
 0x380   : > { %v3154_v21 = vmul.f32 %v15354_v0, %v15354_v0 }
 0x384   : > { %v12302_v22 = vpop.f32.mrf.mxu0  ;;  %v12304_v34 = vpop.f32.mrf.mxu1 }
 0x385   : > { %15349 = vst [vmem:[#allocation160_spill] sm:$0xff] %v12302_v22 }
 0x386   : > { %15350 = vst [vmem:[#allocation161_spill] sm:$0xff] %v12304_v34 }
 0x387   : > { %3233 = vmatmul.f32.gmra.mxu0 %v3151_v1  ;;  %3346 = vmatmul.f32.gmra.mxu1 %v3152_v36  ;;  %v3155_v1 = vmul.f32 %v15357_v19, %v15357_v19  ;;  %v15358_v36 = vld [vmem:[#allocation69_spill] sm:$0xff] }
 0x38c   : > { %v12310_v56 = vpop.f32.mrf.mxu0  ;;  %v12312_v10 = vpop.f32.mrf.mxu1 }
 0x38d   : > { %15351 = vst [vmem:[#allocation162_spill] sm:$0xff] %v12310_v56  ;;  %v3156_v56 = vmul.f32 %v15358_v36, %v15358_v36 }
 0x38e   : > { %15352 = vst [vmem:[#allocation163_spill] sm:$0xff] %v12312_v10  ;;  %v8690_v10 = vld [vmem:[#allocation11 + $0x50] sm:$0xf] }
 0x38f   : > { %3236 = vmatmul.f32.gmra.mxu0 %v3153_v15  ;;  %3349 = vmatmul.f32.gmra.mxu1 %v3154_v21  ;;  %v8691_v42 = vor.u32 %v9201_v38, %v8690_v10 }
 0x391   : > { %4731 = vmatpush.bf16.msrb.mxu0 %v8691_v42  ;;  %v15368_v42 = vld [vmem:[#allocation75_spill] sm:$0xff] }
 0x392   : > { %v3160_v10 = vmul.f32 %v15368_v42, %v15368_v42  ;;  %v15383_v42 = vld [vmem:[#allocation82_spill] sm:$0xff] }
 0x394   : > { %v12318_v34 = vpop.f32.mrf.mxu0  ;;  %v12320_v22 = vpop.f32.mrf.mxu1 }
 0x395   : > { %15355 = vst [vmem:[#allocation64_spill] sm:$0xff] %v12318_v34 }
 0x396   : > { %15356 = vst [vmem:[#allocation65_spill] sm:$0xff] %v12320_v22  ;;  %v15361_v22 = vld [vmem:[#allocation70_spill] sm:$0xff] }
 0x397   : > { %3239 = vmatmul.f32.gmra.mxu0 %v3155_v1  ;;  %3352 = vmatmul.f32.gmra.mxu1 %v3156_v56  ;;  %v3157_v34 = vmul.f32 %v15361_v22, %v15361_v22  ;;  %v12334_v56 = vpop.f32.mrf.mxu2  ;;  %v12336_v1 = vpop.f32.mrf.mxu3 }
 0x398   : > { %15363 = vst [vmem:[#allocation70_spill] sm:$0xff] %v12334_v56 }
 0x399   : > { %15364 = vst [vmem:[#allocation71_spill] sm:$0xff] %v12336_v1  ;;  %v15373_v1 = vld [vmem:[#allocation76_spill] sm:$0xff] }
 0x39c   : > { %v12326_v15 = vpop.f32.mrf.mxu0  ;;  %v12328_v21 = vpop.f32.mrf.mxu1 }
 0x39d   : > { %15359 = vst [vmem:[#allocation68_spill] sm:$0xff] %v12326_v15 }
 0x39e   : > { %15360 = vst [vmem:[#allocation69_spill] sm:$0xff] %v12328_v21 }
 0x39f   : > { %3242 = vmatmul.f32.gmra.mxu0 %v3157_v34  ;;  %3355 = vmatmul.f32.gmra.mxu1 %v3158_v46  ;;  %v12346_v21 = vpop.f32.mrf.mxu2  ;;  %v12348_v34 = vpop.f32.mrf.mxu3 }
 0x3a0   : > { %15369 = vst [vmem:[#allocation74_spill] sm:$0xff] %v12346_v21 }
 0x3a1   : > { %15370 = vst [vmem:[#allocation166_spill] sm:$0xff] %v12348_v34  ;;  %v15378_v34 = vld [vmem:[#allocation81_spill] sm:$0xff] }
 0x3a4   : > { %v12338_v38 = vpop.f32.mrf.mxu0  ;;  %v12340_v50 = vpop.f32.mrf.mxu1 }
 0x3a5   : > { %15365 = vst [vmem:[#allocation164_spill] sm:$0xff] %v12338_v38  ;;  %v3161_v38 = vmul.f32 %v15373_v1, %v15373_v1  ;;  %v8682_v1 = vld [vmem:[#allocation11 + $0x40] sm:$0xf] }
 0x3a6   : > { %15366 = vst [vmem:[#allocation165_spill] sm:$0xff] %v12340_v50  ;;  %v15374_v50 = vld [vmem:[#allocation77_spill] sm:$0xff] }
 0x3a7   : > { %3245 = vmatmul.f32.gmra.mxu0 %v3159_v41  ;;  %3358 = vmatmul.f32.gmra.mxu1 %v3160_v10  ;;  %v3162_v56 = vmul.f32 %v15374_v50, %v15374_v50  ;;  %v15377_v10 = vld [vmem:[#allocation80_spill] sm:$0xff]  ;;  %v12366_v17 = vpop.f32.mrf.mxu2  ;;  %v9199_v50 = vld [vmem:[#allocation11 + $0x44] sm:$0xf0] }
 0x3a8   : > { %v3163_v21 = vmul.f32 %v15377_v10, %v15377_v10  ;;  %15379 = vst [vmem:[#allocation171_spill] sm:$0xff] %v12366_v17  ;;  %v15384_v17 = vld [vmem:[#allocation84_spill] sm:$0xff] }
 0x3ac   : > { %v12350_v46 = vpop.f32.mrf.mxu0  ;;  %v12352_v15 = vpop.f32.mrf.mxu1 }
 0x3ad   : > { %15371 = vst [vmem:[#allocation167_spill] sm:$0xff] %v12350_v46  ;;  %v3164_v46 = vmul.f32 %v15378_v34, %v15378_v34  ;;  %v3165_v34 = vmul.f32 %v15383_v42, %v15383_v42 }
 0x3ae   : > { %15372 = vst [vmem:[#allocation168_spill] sm:$0xff] %v12352_v15  ;;  %v12368_v15 = vpop.f32.mrf.mxu3 }
 0x3af   : > { %3248 = vmatmul.f32.gmra.mxu0 %v3161_v38  ;;  %3361 = vmatmul.f32.gmra.mxu1 %v3162_v56  ;;  %15380 = vst [vmem:[#allocation172_spill] sm:$0xff] %v12368_v15  ;;  %v8746_v38 = vld [vmem:[#allocation11 + $0xc0] sm:$0xf]  ;;  %v8683_v56 = vor.u32 %v9199_v50, %v8682_v1  ;;  %v3166_v15 = vmul.f32 %v15384_v17, %v15384_v17 }
 0x3b1   : > { %4732 = vmatpush.bf16.msrb.mxu0 %v8683_v56 }
 0x3b4   : > { %v12358_v2 = vpop.f32.mrf.mxu0  ;;  %v12360_v41 = vpop.f32.mrf.mxu1 }
 0x3b5   : > { %15375 = vst [vmem:[#allocation169_spill] sm:$0xff] %v12358_v2  ;;  %v8747_v2 = vor.u32 %v9215_v18, %v8746_v38  ;;  %v15390_v38 = vld [vmem:[#allocation87_spill] sm:$0xff] }
 0x3b6   : > { %15376 = vst [vmem:[#allocation170_spill] sm:$0xff] %v12360_v41  ;;  %v3168_v56 = vmul.f32 %v15390_v38, %v15390_v38 }
 0x3b7   : > { %3251 = vmatmul.f32.gmra.mxu0 %v3163_v21  ;;  %3364 = vmatmul.f32.gmra.mxu1 %v3164_v46  ;;  %v12378_v21 = vpop.f32.mrf.mxu2  ;;  %v12380_v46 = vpop.f32.mrf.mxu3 }
 0x3b8   : > { %4821 = vmatpush.bf16.msrb.mxu1 %v8747_v2  ;;  %15385 = vst [vmem:[#allocation82_spill] sm:$0xff] %v12378_v21  ;;  %v15389_v2 = vld [vmem:[#allocation86_spill] sm:$0xff] }
 0x3b9   : > { %15386 = vst [vmem:[#allocation84_spill] sm:$0xff] %v12380_v46  ;;  %v3167_v50 = vmul.f32 %v15389_v2, %v15389_v2 }
 0x3bc   : > { %v12370_v41 = vpop.f32.mrf.mxu0  ;;  %v12372_v10 = vpop.f32.mrf.mxu1 }
 0x3bd   : > { %15381 = vst [vmem:[#allocation173_spill] sm:$0xff] %v12370_v41 }
 0x3be   : > { %15382 = vst [vmem:[#allocation174_spill] sm:$0xff] %v12372_v10 }
 0x3bf   : > { %3254 = vmatmul.f32.gmra.mxu0 %v3165_v34  ;;  %3367 = vmatmul.f32.gmra.mxu1 %v3166_v15  ;;  %v12390_v10 = vpop.f32.mrf.mxu2  ;;  %v12392_v41 = vpop.f32.mrf.mxu3  ;;  %v15395_v15 = vld [vmem:[#allocation88_spill] sm:$0xff] }
 0x3c0   : > { %15391 = vst [vmem:[#allocation86_spill] sm:$0xff] %v12390_v10 }
 0x3c1   : > { %15392 = vst [vmem:[#allocation87_spill] sm:$0xff] %v12392_v41 }
 0x3c4   : > { %v12382_v1 = vpop.f32.mrf.mxu0  ;;  %v12384_v18 = vpop.f32.mrf.mxu1 }
 0x3c5   : > { %15387 = vst [vmem:[#allocation175_spill] sm:$0xff] %v12382_v1  ;;  %v3169_v1 = vmul.f32 %v15395_v15, %v15395_v15 }
 0x3c6   : > { %15388 = vst [vmem:[#allocation176_spill] sm:$0xff] %v12384_v18  ;;  %v3170_v18 = vmul.f32 %v11947_v6, %v11947_v6 }
 0x3c7   : > { %3257 = vmatmul.f32.gmra.mxu0 %v3167_v50  ;;  %3370 = vmatmul.f32.gmra.mxu1 %v3168_v56  ;;  %v12402_v46 = vpop.f32.mrf.mxu2  ;;  %v12404_v50 = vpop.f32.mrf.mxu3 }
 0x3c8   : > { %15396 = vst [vmem:[#allocation88_spill] sm:$0xff] %v12402_v46 }
 0x3c9   : > { %15397 = vst [vmem:[#allocation179_spill] sm:$0xff] %v12404_v50 }
 0x3cc   : > { %v12394_v21 = vpop.f32.mrf.mxu0  ;;  %v12396_v34 = vpop.f32.mrf.mxu1 }
 0x3cd   : > { %15393 = vst [vmem:[#allocation177_spill] sm:$0xff] %v12394_v21  ;;  %v3171_v21 = vmul.f32 %v11953_v48, %v11953_v48 }
 0x3ce   : > { %15394 = vst [vmem:[#allocation178_spill] sm:$0xff] %v12396_v34  ;;  %v3172_v34 = vmul.f32 %v11971_v7, %v11971_v7 }
 0x3cf   : > { %3260 = vmatmul.f32.gmra.mxu0 %v3169_v1  ;;  %3373 = vmatmul.f32.gmra.mxu1 %v3170_v18  ;;  %v3173_v18 = vmul.f32 %v11973_v54, %v11973_v54  ;;  %v12422_v50 = vpop.f32.mrf.mxu2 }
 0x3d0   : > { %15402 = vst [vmem:[#allocation184_spill] sm:$0xff] %v12422_v50  ;;  %v8674_v50 = vld [vmem:[#allocation11 + $0x30] sm:$0xf] }
 0x3d4   : > { %v12406_v56 = vpop.f32.mrf.mxu0  ;;  %v12408_v10 = vpop.f32.mrf.mxu1 }
 0x3d5   : > { %15398 = vst [vmem:[#allocation180_spill] sm:$0xff] %v12406_v56  ;;  %v3174_v56 = vmul.f32 %v11981_v58, %v11981_v58  ;;  %v9213_v58 = vld [vmem:[#allocation11 + $0xb4] sm:$0xf0] }
 0x3d6   : > { %15399 = vst [vmem:[#allocation181_spill] sm:$0xff] %v12408_v10  ;;  %v12424_v10 = vpop.f32.mrf.mxu3 }
 0x3d7   : > { %3263 = vmatmul.f32.gmra.mxu0 %v3171_v21  ;;  %3376 = vmatmul.f32.gmra.mxu1 %v3172_v34  ;;  %15403 = vst [vmem:[#allocation185_spill] sm:$0xff] %v12424_v10  ;;  %v3175_v34 = vmul.f32 %v11987_v23, %v11987_v23  ;;  %v9197_v10 = vld [vmem:[#allocation11 + $0x34] sm:$0xf0]  ;;  %v3177_v23 = vmul.f32 %v12001_v35, %v12001_v35 }
 0x3dc   : > { %v12414_v41 = vpop.f32.mrf.mxu0  ;;  %v12416_v1 = vpop.f32.mrf.mxu1 }
 0x3dd   : > { %15400 = vst [vmem:[#allocation182_spill] sm:$0xff] %v12414_v41  ;;  %v12434_v41 = vpop.f32.mrf.mxu2 }
 0x3de   : > { %15401 = vst [vmem:[#allocation183_spill] sm:$0xff] %v12416_v1  ;;  %v3176_v1 = vmul.f32 %v11999_v33, %v11999_v33  ;;  %v12436_v54 = vpop.f32.mrf.mxu3 }
 0x3df   : > { %3266 = vmatmul.f32.gmra.mxu0 %v3173_v18  ;;  %3379 = vmatmul.f32.gmra.mxu1 %v3174_v56  ;;  %15406 = vst [vmem:[#allocation188_spill] sm:$0xff] %v12434_v41  ;;  %v8738_v18 = vld [vmem:[#allocation11 + $0xb0] sm:$0xf]  ;;  %v8675_v56 = vor.u32 %v9197_v10, %v8674_v50  ;;  %v3178_v41 = vmul.f32 %v12003_v27, %v12003_v27 }
 0x3e0   : > { %15407 = vst [vmem:[#allocation189_spill] sm:$0xff] %v12436_v54  ;;  %v8739_v7 = vor.u32 %v9213_v58, %v8738_v18  ;;  %v3180_v58 = vmul.f32 %v12017_v31, %v12017_v31  ;;  %v9204_v31 = vld [vmem:[#allocation11 + $0x74] sm:$0xf] }
 0x3e1   : > { %4733 = vmatpush.bf16.msrb.mxu0 %v8675_v56 }
 0x3e2   : > { %4822 = vmatpush.bf16.msrb.mxu1 %v8739_v7 }
 0x3e4   : > { %v12426_v46 = vpop.f32.mrf.mxu0  ;;  %v12428_v21 = vpop.f32.mrf.mxu1 }
 0x3e5   : > { %15404 = vst [vmem:[#allocation186_spill] sm:$0xff] %v12426_v46 }
 0x3e6   : > { %15405 = vst [vmem:[#allocation187_spill] sm:$0xff] %v12428_v21 }
 0x3e7   : > { %3269 = vmatmul.f32.gmra.mxu0 %v3175_v34  ;;  %3382 = vmatmul.f32.gmra.mxu1 %v3176_v1  ;;  %v12446_v1 = vpop.f32.mrf.mxu2  ;;  %v12448_v34 = vpop.f32.mrf.mxu3 }
 0x3e8   : > { %15410 = vst [vmem:[#allocation192_spill] sm:$0xff] %v12446_v1  ;;  %v3181_v1 = vmul.f32 %v12019_v45, %v12019_v45 }
 0x3e9   : > { %15411 = vst [vmem:[#allocation193_spill] sm:$0xff] %v12448_v34 }
 0x3ec   : > { %v12438_v46 = vpop.f32.mrf.mxu0  ;;  %v12440_v21 = vpop.f32.mrf.mxu1 }
 0x3ed   : > { %15408 = vst [vmem:[#allocation190_spill] sm:$0xff] %v12438_v46 }
 0x3ee   : > { %15409 = vst [vmem:[#allocation191_spill] sm:$0xff] %v12440_v21  ;;  %v3179_v21 = vmul.f32 %v12005_v39, %v12005_v39  ;;  %v3182_v39 = vmul.f32 %v12021_v47, %v12021_v47 }
 0x3ef   : > { %3272 = vmatmul.f32.gmra.mxu0 %v3177_v23  ;;  %3385 = vmatmul.f32.gmra.mxu1 %v3178_v41  ;;  %v12454_v7 = vpop.f32.mrf.mxu2  ;;  %v12456_v23 = vpop.f32.mrf.mxu3 }
 0x3f0   : > { %15412 = vst [vmem:[#allocation194_spill] sm:$0xff] %v12454_v7 }
 0x3f1   : > { %15413 = vst [vmem:[#allocation195_spill] sm:$0xff] %v12456_v23 }
 0x3f4   : > { %v3228_v10 = vpop.f32.mrf.mxu0  ;;  %v3341_v50 = vpop.f32.mrf.mxu1 }
 0x3f5   : > { %v3342_v18 = vadd.f32 %v3341_v50, %v3228_v10  ;;  %v8708_v10 = vld [vmem:[#allocation11 + $0x78] sm:$0xf0]  ;;  %v9220_v50 = vld [vmem:[#allocation11 + $0xf4] sm:$0xf] }
 0x3f7   : > { %v3437_v46 = vmul.f32 0.0078125, %v3342_v18  ;;  %3275 = vmatmul.f32.gmra.mxu0 %v3179_v21  ;;  %3388 = vmatmul.f32.gmra.mxu1 %v3180_v58  ;;  %v8772_v58 = vld [vmem:[#allocation11 + $0xf8] sm:$0xf0] }
 0x3f8   : > { %v8775_v18 = vor.u32 %v9220_v50, %v8772_v58  ;;  %v9195_v50 = vld [vmem:[#allocation11 + $0x24] sm:$0xf0] }
 0x3f9   : > { %v3469_v56 = vadd.f32 1.1920929e-07, %v3437_v46  ;;  %v8711_v46 = vor.u32 %v9204_v31, %v8708_v10  ;;  %v8666_v10 = vld [vmem:[#allocation11 + $0x20] sm:$0xf]  ;;  %v9211_v58 = vld [vmem:[#allocation11 + $0xa4] sm:$0xf0] }
 0x3fa   : > { %4996 = vmatpush.bf16.msrb.mxu3 %v8775_v18 }
 0x3fb   : > { %9501 = vrsqrt.f32 %v3469_v56  ;;  %4907 = vmatpush.bf16.msrb.mxu2 %v8711_v46  ;;  %v8730_v46 = vld [vmem:[#allocation11 + $0xa0] sm:$0xf]  ;;  %vm3507_vm3 = vweird.f32 %v3469_v56 }
 0x3fc   : > { %v3231_v41 = vpop.f32.mrf.mxu0  ;;  %v3344_v34 = vpop.f32.mrf.mxu1 }
 0x3fd   : > { %v3345_v27 = vadd.f32 %v3344_v34, %v3231_v41  ;;  %v3183_v34 = vmul.f32 %v12023_v3, %v12023_v3  ;;  %v8731_v3 = vor.u32 %v9211_v58, %v8730_v46 }
 0x3ff   : > { %v3438_v21 = vmul.f32 0.0078125, %v3345_v27  ;;  %3278 = vmatmul.f32.gmra.mxu0 %v3181_v1  ;;  %3391 = vmatmul.f32.gmra.mxu1 %v3182_v39  ;;  %v3184_v27 = vmul.f32 %v12035_v12, %v12035_v12  ;;  %v12466_v1 = vpop.f32.mrf.mxu2  ;;  %v12468_v39 = vpop.f32.mrf.mxu3 }
 0x400   : > { %15414 = vst [vmem:[#allocation196_spill] sm:$0xff] %v12466_v1  ;;  %4823 = vmatpush.bf16.msrb.mxu1 %v8731_v3 }
 0x401   : > { %v9502_v23 = vpop.eup %9501  ;;  %v3470_v7 = vadd.f32 1.1920929e-07, %v3438_v21 }
 0x402   : > { %v3502_v35 = vmul.f32 %v9502_v23, %v3469_v56  ;;  %vm3508_vm2 = vweird.f32 %v9502_v23 }
 0x403   : > { %9503 = vrsqrt.f32 %v3470_v7  ;;  %vm3509_vm5 = vmor %vm3507_vm3, %vm3508_vm2  ;;  %vm3517_vm7 = vweird.f32 %v3470_v7 }
 0x404   : > { %v3503_v45 = vmul.f32 %v9502_v23, %v3502_v35  ;;  %v3234_v54 = vpop.f32.mrf.mxu0  ;;  %v3347_v33 = vpop.f32.mrf.mxu1  ;;  %v8667_v35 = vor.u32 %v9195_v50, %v8666_v10 }
 0x405   : > { %v3348_v31 = vadd.f32 %v3347_v33, %v3234_v54 }
 0x406   : > { %v3504_v41 = vmul.f32 0.5, %v3503_v45  ;;  %4734 = vmatpush.bf16.msrb.mxu0 %v8667_v35 }
 0x407   : > { %v3439_v21 = vmul.f32 0.0078125, %v3348_v31  ;;  %3281 = vmatmul.f32.gmra.mxu0 %v3183_v34  ;;  %3394 = vmatmul.f32.gmra.mxu1 %v3184_v27  ;;  %v3185_v27 = vmul.f32 %v12037_v57, %v12037_v57  ;;  %v3186_v31 = vmul.f32 %v12039_v53, %v12039_v53  ;;  %v12476_v10 = vpop.f32.mrf.mxu2  ;;  %v12478_v3 = vpop.f32.mrf.mxu3 }
 0x408   : > { %v3505_v18 = vsub.f32 1.5, %v3504_v41 }
 0x409   : > { %v9504_v47 = vpop.eup %9503  ;;  %v3471_v48 = vadd.f32 1.1920929e-07, %v3439_v21 }
 0x40a   : > { %v3506_v12 = vmul.f32 %v9502_v23, %v3505_v18  ;;  %v3512_v1 = vmul.f32 %v9504_v47, %v3470_v7  ;;  %vm3518_vm6 = vweird.f32 %v9504_v47 }
 0x40b   : > { %9505 = vrsqrt.f32 %v3471_v48  ;;  %vm3519_vm8 = vmor %vm3517_vm7, %vm3518_vm6  ;;  %vm3527_vm10 = vweird.f32 %v3471_v48 }
 0x40c   : > { %v3513_v54 = vmul.f32 %v9504_v47, %v3512_v1  ;;  %v3237_v33 = vpop.f32.mrf.mxu0  ;;  %v3350_v45 = vpop.f32.mrf.mxu1  ;;  %v3510_v34 = vsel %vm3509_vm5, %v9502_v23, %v3506_v12 }
 0x40d   : > { %v3351_v41 = vadd.f32 %v3350_v45, %v3237_v33  ;;  %8583 = vmatmul.msk.f32.vlgmr.msra.gmra.mxu2 %vm3825_vm4, %v3510_v34  ;;  %8616 = vmatmul.msk.f32.vlgmr.msra.gmra.mxu3 %vm3825_vm4, %v3510_v34  ;;  %v3187_v33 = vmul.f32 %v12041_v61, %v12041_v61  ;;  %v3188_v45 = vmul.f32 %v12053_v55, %v12053_v55  ;;  %v9218_v55 = vld [vmem:[#allocation11 + $0xe4] sm:$0xf] }
 0x40e   : > { %v3514_v56 = vmul.f32 0.5, %v3513_v54 }
 0x40f   : > { %v3440_v1 = vmul.f32 0.0078125, %v3351_v41  ;;  %3284 = vmatmul.f32.gmra.mxu0 %v3185_v27  ;;  %3397 = vmatmul.f32.gmra.mxu1 %v3186_v31 }
 0x410   : > { %v3515_v12 = vsub.f32 1.5, %v3514_v56  ;;  %v12486_v56 = vpop.f32.mrf.mxu2 }
 0x411   : > { %v9506_v23 = vpop.eup %9505  ;;  %v3472_v50 = vadd.f32 1.1920929e-07, %v3440_v1 }
 0x412   : > { %v3522_v21 = vmul.f32 %v9506_v23, %v3471_v48  ;;  %v3516_v35 = vmul.f32 %v9504_v47, %v3515_v12  ;;  %vm3528_vm9 = vweird.f32 %v9506_v23  ;;  %v9202_v48 = vld [vmem:[#allocation11 + $0x64] sm:$0xf] }
 0x413   : > { %9507 = vrsqrt.f32 %v3472_v50  ;;  %vm3529_vm11 = vmor %vm3527_vm10, %vm3528_vm9  ;;  %vm3537_vm13 = vweird.f32 %v3472_v50 }
 0x414   : > { %v3523_v46 = vmul.f32 %v9506_v23, %v3522_v21  ;;  %v3240_v58 = vpop.f32.mrf.mxu0  ;;  %v3353_v18 = vpop.f32.mrf.mxu1  ;;  %v3520_v54 = vsel %vm3519_vm8, %v9504_v47, %v3516_v35 }
 0x415   : > { %v3354_v34 = vadd.f32 %v3353_v18, %v3240_v58  ;;  %8584 = vmatmul.msk.f32.gmra.mxu2 %vm3825_vm4, %v3520_v54  ;;  %8617 = vmatmul.msk.f32.gmra.mxu3 %vm3825_vm4, %v3520_v54  ;;  %v12488_v47 = vpop.f32.mrf.mxu3  ;;  %v3189_v54 = vmul.f32 %v12055_v37, %v12055_v37 }
 0x416   : > { %v3524_v27 = vmul.f32 0.5, %v3523_v46  ;;  %15415 = vst [vmem:[#allocation197_spill] sm:$0xff] %v12488_v47 }
 0x417   : > { %v3441_v31 = vmul.f32 0.0078125, %v3354_v34  ;;  %3287 = vmatmul.f32.gmra.mxu0 %v3187_v33  ;;  %3400 = vmatmul.f32.gmra.mxu1 %v3188_v45  ;;  %v15416_v33 = vld [vmem:[#allocation110_spill] sm:$0xff] }
 0x418   : > { %v3525_v7 = vsub.f32 1.5, %v3524_v27  ;;  %v3190_v45 = vmul.f32 %v15416_v33, %v15416_v33  ;;  %v9209_v33 = vld [vmem:[#allocation11 + $0x94] sm:$0xf0] }
 0x419   : > { %v9508_v41 = vpop.eup %9507  ;;  %v12490_v1 = vadd.f32 1.1920929e-07, %v3441_v31  ;;  %v8700_v31 = vld [vmem:[#allocation11 + $0x68] sm:$0xf0] }
 0x41a   : > { %v3532_v12 = vmul.f32 %v9508_v41, %v3472_v50  ;;  %v3526_v21 = vmul.f32 %v9506_v23, %v3525_v7  ;;  %vm3538_vm12 = vweird.f32 %v9508_v41 }
 0x41b   : > { %9509 = vrsqrt.f32 %v12490_v1  ;;  %vm3539_vm14 = vmor %vm3537_vm13, %vm3538_vm12  ;;  %vm3547_vm0 = vweird.f32 %v12490_v1 }
 0x41c   : > { %v3533_v35 = vmul.f32 %v9508_v41, %v3532_v12  ;;  %v3243_v46 = vpop.f32.mrf.mxu0  ;;  %v3356_v58 = vpop.f32.mrf.mxu1  ;;  %v3530_v18 = vsel %vm3529_vm11, %v9506_v23, %v3526_v21  ;;  %v8703_v12 = vor.u32 %v9202_v48, %v8700_v31  ;;  %v8764_v23 = vld [vmem:[#allocation11 + $0xe8] sm:$0xf0]  ;;  %v3192_v31 = vmul.f32 %v12071_v62, %v12071_v62 }
 0x41d   : > { %v3357_v34 = vadd.f32 %v3356_v58, %v3243_v46  ;;  %8585 = vmatmul.msk.f32.gmra.mxu2 %vm3825_vm4, %v3530_v18  ;;  %8618 = vmatmul.msk.f32.gmra.mxu3 %vm3825_vm4, %v3530_v18  ;;  %v8767_v37 = vor.u32 %v9218_v55, %v8764_v23  ;;  %v12504_v18 = vpop.f32.mrf.mxu3  ;;  %v8658_v23 = vld [vmem:[#allocation11 + $0x10] sm:$0xf] }
 0x41e   : > { %v3534_v27 = vmul.f32 0.5, %v3533_v35  ;;  %4908 = vmatpush.bf16.msrb.mxu2 %v8703_v12  ;;  %v12502_v35 = vpop.f32.mrf.mxu2 }
 0x41f   : > { %v3442_v7 = vmul.f32 0.0078125, %v3357_v34  ;;  %3290 = vmatmul.f32.gmra.mxu0 %v3189_v54  ;;  %3403 = vmatmul.f32.gmra.mxu1 %v3190_v45 }
 0x420   : > { %v3535_v21 = vsub.f32 1.5, %v3534_v27  ;;  %4997 = vmatpush.bf16.msrb.mxu3 %v8767_v37  ;;  %v15417_v27 = vld [vmem:[#allocation111_spill] sm:$0xff] }
 0x421   : > { %v9510_v61 = vpop.eup %9509  ;;  %v12499_v47 = vadd.f32 1.1920929e-07, %v3442_v7  ;;  %v3191_v48 = vmul.f32 %v15417_v27, %v15417_v27  ;;  %v8722_v27 = vld [vmem:[#allocation11 + $0x90] sm:$0xf] }
 0x422   : > { %v3542_v46 = vmul.f32 %v9510_v61, %v12490_v1  ;;  %v3536_v58 = vmul.f32 %v9508_v41, %v3535_v21  ;;  %vm3548_vm15 = vweird.f32 %v9510_v61  ;;  %v9193_v21 = vld [vmem:[#allocation11 + $0x14] sm:$0xf0] }
 0x423   : > { %9511 = vrsqrt.f32 %v12499_v47  ;;  %vm3549_vm2 = vmor %vm3547_vm0, %vm3548_vm15  ;;  %vm3557_vm5 = vweird.f32 %v12499_v47 }
 0x424   : > { %v3543_v54 = vmul.f32 %v9510_v61, %v3542_v46  ;;  %v3246_v45 = vpop.f32.mrf.mxu0  ;;  %v3359_v34 = vpop.f32.mrf.mxu1  ;;  %v3540_v55 = vsel %vm3539_vm14, %v9508_v41, %v3536_v58  ;;  %v8659_v58 = vor.u32 %v9193_v21, %v8658_v23 }
 0x425   : > { %v3360_v7 = vadd.f32 %v3359_v34, %v3246_v45  ;;  %8586 = vmatmul.msk.f32.gmra.mxu2 %vm3825_vm4, %v3540_v55  ;;  %8619 = vmatmul.msk.f32.gmra.mxu3 %vm3825_vm4, %v3540_v55  ;;  %v8723_v34 = vor.u32 %v9209_v33, %v8722_v27 }
 0x426   : > { %v3544_v37 = vmul.f32 0.5, %v3543_v54  ;;  %4735 = vmatpush.bf16.msrb.mxu0 %v8659_v58  ;;  %v12519_v23 = vpop.f32.mrf.mxu2 }
 0x427   : > { %v3443_v50 = vmul.f32 0.0078125, %v3360_v7  ;;  %3293 = vmatmul.f32.gmra.mxu0 %v3191_v48  ;;  %3406 = vmatmul.f32.gmra.mxu1 %v3192_v31  ;;  %v3193_v7 = vmul.f32 %v12073_v44, %v12073_v44  ;;  %v15419_v44 = vld [vmem:[#allocation115_spill] sm:$0xff] }
 0x428   : > { %v3545_v12 = vsub.f32 1.5, %v3544_v37  ;;  %4824 = vmatpush.bf16.msrb.mxu1 %v8723_v34  ;;  %v15418_v37 = vld [vmem:[#allocation114_spill] sm:$0xff] }
 0x429   : > { %v9512_v41 = vpop.eup %9511  ;;  %v3475_v46 = vadd.f32 1.1920929e-07, %v3443_v50  ;;  %v3194_v50 = vmul.f32 %v15418_v37, %v15418_v37 }
 0x42a   : > { %v3552_v62 = vmul.f32 %v9512_v41, %v12499_v47  ;;  %v3546_v45 = vmul.f32 %v9510_v61, %v3545_v12  ;;  %v12521_v12 = vpop.f32.mrf.mxu3  ;;  %vm3558_vm3 = vweird.f32 %v9512_v41 }
 0x42b   : > { %9513 = vrsqrt.f32 %v3475_v46  ;;  %vm3559_vm6 = vmor %vm3557_vm5, %vm3558_vm3  ;;  %vm3567_vm8 = vweird.f32 %v3475_v46 }
 0x42c   : > { %v3553_v54 = vmul.f32 %v9512_v41, %v3552_v62  ;;  %v3249_v55 = vpop.f32.mrf.mxu0  ;;  %v3362_v48 = vpop.f32.mrf.mxu1  ;;  %v3550_v31 = vsel %vm3549_vm2, %v9510_v61, %v3546_v45 }
 0x42d   : > { %v3363_v1 = vadd.f32 %v3362_v48, %v3249_v55  ;;  %8587 = vmatmul.msk.f32.gmra.mxu2 %vm3825_vm4, %v3550_v31  ;;  %8620 = vmatmul.msk.f32.gmra.mxu3 %vm3825_vm4, %v3550_v31  ;;  %v3196_v31 = vmul.f32 %v12089_v52, %v12089_v52 }
 0x42e   : > { %v3554_v62 = vmul.f32 0.5, %v3553_v54  ;;  %v3195_v54 = vmul.f32 %v15419_v44, %v15419_v44  ;;  %v9216_v44 = vld [vmem:[#allocation11 + $0xd4] sm:$0xf] }
 0x42f   : > { %v3444_v33 = vmul.f32 0.0078125, %v3363_v1  ;;  %3296 = vmatmul.f32.gmra.mxu0 %v3193_v7  ;;  %3409 = vmatmul.f32.gmra.mxu1 %v3194_v50  ;;  %v12532_v1 = vpop.f32.mrf.mxu2 }
 0x430   : > { %v3555_v61 = vsub.f32 1.5, %v3554_v62  ;;  %15420 = vst [vmem:[#allocation198_spill] sm:$0xff] %v12532_v1 }
 0x431   : > { %v9514_v27 = vpop.eup %9513  ;;  %v3476_v21 = vadd.f32 1.1920929e-07, %v3444_v33 }
 0x432   : > { %v3562_v58 = vmul.f32 %v9514_v27, %v3475_v46  ;;  %v3556_v45 = vmul.f32 %v9512_v41, %v3555_v61  ;;  %v12534_v47 = vpop.f32.mrf.mxu3  ;;  %vm3568_vm7 = vweird.f32 %v9514_v27  ;;  %v9200_v46 = vld [vmem:[#allocation11 + $0x54] sm:$0xf] }
 0x433   : > { %9515 = vrsqrt.f32 %v3476_v21  ;;  %15421 = vst [vmem:[#allocation199_spill] sm:$0xff] %v12534_v47  ;;  %vm3569_vm9 = vmor %vm3567_vm8, %vm3568_vm7  ;;  %vm3577_vm11 = vweird.f32 %v3476_v21 }
 0x434   : > { %v3563_v34 = vmul.f32 %v9514_v27, %v3562_v58  ;;  %v3252_v55 = vpop.f32.mrf.mxu0  ;;  %v3365_v48 = vpop.f32.mrf.mxu1  ;;  %v3560_v37 = vsel %vm3559_vm6, %v9512_v41, %v3556_v45 }
 0x435   : > { %v3366_v7 = vadd.f32 %v3365_v48, %v3252_v55  ;;  %8588 = vmatmul.msk.f32.gmra.mxu2 %vm3825_vm4, %v3560_v37  ;;  %8621 = vmatmul.msk.f32.gmra.mxu3 %vm3825_vm4, %v3560_v37 }
 0x436   : > { %v3564_v50 = vmul.f32 0.5, %v3563_v34 }
 0x437   : > { %v3445_v62 = vmul.f32 0.0078125, %v3366_v7  ;;  %3299 = vmatmul.f32.gmra.mxu0 %v3195_v54  ;;  %3412 = vmatmul.f32.gmra.mxu1 %v3196_v31  ;;  %v3197_v7 = vmul.f32 %v12091_v59, %v12091_v59  ;;  %v15422_v54 = vld [vmem:[#allocation118_spill] sm:$0xff]  ;;  %v12545_v1 = vpop.f32.mrf.mxu2 }
 0x438   : > { %v3565_v41 = vsub.f32 1.5, %v3564_v50  ;;  %v3198_v31 = vmul.f32 %v15422_v54, %v15422_v54  ;;  %v9207_v54 = vld [vmem:[#allocation11 + $0x84] sm:$0xf0] }
 0x439   : > { %v9516_v33 = vpop.eup %9515  ;;  %v12536_v61 = vadd.f32 1.1920929e-07, %v3445_v62 }
 0x43a   : > { %v3572_v58 = vmul.f32 %v9516_v33, %v3476_v21  ;;  %v3566_v45 = vmul.f32 %v9514_v27, %v3565_v41  ;;  %v8692_v41 = vld [vmem:[#allocation11 + $0x58] sm:$0xf0]  ;;  %vm3578_vm10 = vweird.f32 %v9516_v33 }
 0x43b   : > { %9517 = vrsqrt.f32 %v12536_v61  ;;  %vm3579_vm12 = vmor %vm3577_vm11, %vm3578_vm10  ;;  %vm3587_vm14 = vweird.f32 %v12536_v61 }
 0x43c   : > { %v3573_v37 = vmul.f32 %v9516_v33, %v3572_v58  ;;  %v3255_v34 = vpop.f32.mrf.mxu0  ;;  %v3368_v55 = vpop.f32.mrf.mxu1  ;;  %v3570_v48 = vsel %vm3569_vm9, %v9514_v27, %v3566_v45  ;;  %v8695_v58 = vor.u32 %v9200_v46, %v8692_v41  ;;  %v8756_v27 = vld [vmem:[#allocation11 + $0xd8] sm:$0xf0]  ;;  %v3200_v41 = vmul.f32 %v12107_v51, %v12107_v51 }
 0x43d   : > { %v3369_v50 = vadd.f32 %v3368_v55, %v3255_v34  ;;  %8589 = vmatmul.msk.f32.gmra.mxu2 %vm3825_vm4, %v3570_v48  ;;  %8622 = vmatmul.msk.f32.gmra.mxu3 %vm3825_vm4, %v3570_v48  ;;  %v8759_v59 = vor.u32 %v9216_v44, %v8756_v27  ;;  %v12547_v34 = vpop.f32.mrf.mxu3  ;;  %v15424_v46 = vld [vmem:[#allocation119_spill] sm:$0xff] }
 0x43e   : > { %v3574_v62 = vmul.f32 0.5, %v3573_v37  ;;  %15423 = vst [vmem:[#allocation200_spill] sm:$0xff] %v12547_v34  ;;  %4909 = vmatpush.bf16.msrb.mxu2 %v8695_v58  ;;  %v3199_v44 = vmul.f32 %v15424_v46, %v15424_v46  ;;  %v8650_v58 = vld [vmem:[#allocation11] sm:$0xf] }
 0x43f   : > { %v3446_v52 = vmul.f32 0.0078125, %v3369_v50  ;;  %3302 = vmatmul.f32.gmra.mxu0 %v3197_v7  ;;  %3415 = vmatmul.f32.gmra.mxu1 %v3198_v31  ;;  %v8714_v46 = vld [vmem:[#allocation11 + $0x80] sm:$0xf]  ;;  %v12557_v34 = vpop.f32.mrf.mxu2 }
 0x440   : > { %v3575_v45 = vsub.f32 1.5, %v3574_v62  ;;  %4998 = vmatpush.bf16.msrb.mxu3 %v8759_v59  ;;  %v8715_v51 = vor.u32 %v9207_v54, %v8714_v46  ;;  %15425 = vst [vmem:[#allocation201_spill] sm:$0xff] %v12557_v34 }
 0x441   : > { %v9518_v47 = vpop.eup %9517  ;;  %v3478_v55 = vadd.f32 1.1920929e-07, %v3446_v52 }
 0x442   : > { %v3582_v37 = vmul.f32 %v9518_v47, %v12536_v61  ;;  %v3576_v48 = vmul.f32 %v9516_v33, %v3575_v45  ;;  %vm3588_vm13 = vweird.f32 %v9518_v47  ;;  %v9191_v45 = vld [vmem:[#allocation11 + $0x4] sm:$0xf0]  ;;  %4825 = vmatpush.bf16.msrb.mxu1 %v8715_v51  ;;  %v15427_v61 = vld [vmem:[#allocation122_spill] sm:$0xff] }
 0x443   : > { %9519 = vrsqrt.f32 %v3478_v55  ;;  %vm3589_vm15 = vmor %vm3587_vm14, %vm3588_vm13  ;;  %vm3597_vm2 = vweird.f32 %v3478_v55 }
 0x444   : > { %v3583_v7 = vmul.f32 %v9518_v47, %v3582_v37  ;;  %v3258_v31 = vpop.f32.mrf.mxu0  ;;  %v3371_v50 = vpop.f32.mrf.mxu1  ;;  %v3580_v62 = vsel %vm3579_vm12, %v9516_v33, %v3576_v48  ;;  %v8651_v48 = vor.u32 %v9191_v45, %v8650_v58 }
 0x445   : > { %v3372_v27 = vadd.f32 %v3371_v50, %v3258_v31  ;;  %8590 = vmatmul.msk.f32.gmra.mxu2 %vm3825_vm4, %v3580_v62  ;;  %8623 = vmatmul.msk.f32.gmra.mxu3 %vm3825_vm4, %v3580_v62 }
 0x446   : > { %v3584_v52 = vmul.f32 0.5, %v3583_v7  ;;  %v12559_v7 = vpop.f32.mrf.mxu3  ;;  %4736 = vmatpush.bf16.msrb.mxu0 %v8651_v48 }
 0x447   : > { %v3447_v21 = vmul.f32 0.0078125, %v3372_v27  ;;  %3305 = vmatmul.f32.gmra.mxu0 %v3199_v44  ;;  %3418 = vmatmul.f32.gmra.mxu1 %v3200_v41  ;;  %15426 = vst [vmem:[#allocation202_spill] sm:$0xff] %v12559_v7 }
 0x448   : > { %v3585_v59 = vsub.f32 1.5, %v3584_v52  ;;  %v3201_v52 = vmul.f32 %v12109_v24, %v12109_v24  ;;  %v9212_v24 = vld [vmem:[#allocation11 + $0xb4] sm:$0xf] }
 0x449   : > { %v9520_v33 = vpop.eup %9519  ;;  %v3479_v37 = vadd.f32 1.1920929e-07, %v3447_v21  ;;  %v3202_v21 = vmul.f32 %v15427_v61, %v15427_v61  ;;  %v15428_v61 = vld [vmem:[#allocation123_spill] sm:$0xff] }
 0x44a   : > { %v3592_v31 = vmul.f32 %v9520_v33, %v3478_v55  ;;  %v3586_v50 = vmul.f32 %v9518_v47, %v3585_v59  ;;  %vm3598_vm0 = vweird.f32 %v9520_v33 }
 0x44b   : > { %9521 = vrsqrt.f32 %v3479_v37  ;;  %vm3599_vm3 = vmor %vm3597_vm2, %vm3598_vm0  ;;  %vm3607_vm6 = vweird.f32 %v3479_v37 }
 0x44c   : > { %v3593_v62 = vmul.f32 %v9520_v33, %v3592_v31  ;;  %v3261_v44 = vpop.f32.mrf.mxu0  ;;  %v3374_v41 = vpop.f32.mrf.mxu1  ;;  %v3590_v27 = vsel %vm3589_vm15, %v9518_v47, %v3586_v50 }
 0x44d   : > { %v3375_v54 = vadd.f32 %v3374_v41, %v3261_v44  ;;  %8591 = vmatmul.msk.f32.gmra.mxu2 %vm3825_vm4, %v3590_v27  ;;  %8624 = vmatmul.msk.f32.gmra.mxu3 %vm3825_vm4, %v3590_v27  ;;  %v3203_v27 = vmul.f32 %v15428_v61, %v15428_v61 }
 0x44e   : > { %v3594_v46 = vmul.f32 0.5, %v3593_v62  ;;  %v3204_v62 = vmul.f32 %v12125_v20, %v12125_v20 }
 0x44f   : > { %v3448_v59 = vmul.f32 0.0078125, %v3375_v54  ;;  %3308 = vmatmul.f32.gmra.mxu0 %v3201_v52  ;;  %3421 = vmatmul.f32.gmra.mxu1 %v3202_v21  ;;  %v12572_v52 = vpop.f32.mrf.mxu2  ;;  %v12574_v21 = vpop.f32.mrf.mxu3 }
 0x450   : > { %v3595_v58 = vsub.f32 1.5, %v3594_v46  ;;  %15429 = vst [vmem:[#allocation203_spill] sm:$0xff] %v12572_v52 }
 0x451   : > { %v9522_v45 = vpop.eup %9521  ;;  %v3480_v47 = vadd.f32 1.1920929e-07, %v3448_v59  ;;  %15430 = vst [vmem:[#allocation204_spill] sm:$0xff] %v12574_v21 }
 0x452   : > { %v3602_v51 = vmul.f32 %v9522_v45, %v3479_v37  ;;  %v3596_v48 = vmul.f32 %v9520_v33, %v3595_v58  ;;  %vm3608_vm5 = vweird.f32 %v9522_v45 }
 0x453   : > { %9523 = vrsqrt.f32 %v3480_v47  ;;  %vm3609_vm7 = vmor %vm3607_vm6, %vm3608_vm5  ;;  %vm3617_vm9 = vweird.f32 %v3480_v47 }
 0x454   : > { %v3603_v31 = vmul.f32 %v9522_v45, %v3602_v51  ;;  %v3264_v50 = vpop.f32.mrf.mxu0  ;;  %v3377_v44 = vpop.f32.mrf.mxu1  ;;  %v3600_v41 = vsel %vm3599_vm3, %v9520_v33, %v3596_v48 }
 0x455   : > { %v3378_v54 = vadd.f32 %v3377_v44, %v3264_v50  ;;  %8592 = vmatmul.msk.f32.gmra.mxu2 %vm3825_vm4, %v3600_v41  ;;  %8625 = vmatmul.msk.f32.gmra.mxu3 %vm3825_vm4, %v3600_v41  ;;  %v3206_v41 = vmul.f32 %v12129_v25, %v12129_v25 }
 0x456   : > { %v3604_v55 = vmul.f32 0.5, %v3603_v31  ;;  %v3205_v31 = vmul.f32 %v12127_v9, %v12127_v9 }
 0x457   : > { %v3449_v46 = vmul.f32 0.0078125, %v3378_v54  ;;  %3311 = vmatmul.f32.gmra.mxu0 %v3203_v27  ;;  %3424 = vmatmul.f32.gmra.mxu1 %v3204_v62  ;;  %v9198_v62 = vld [vmem:[#allocation11 + $0x44] sm:$0xf]  ;;  %v8684_v54 = vld [vmem:[#allocation11 + $0x48] sm:$0xf0] }
 0x458   : > { %v3605_v33 = vsub.f32 1.5, %v3604_v55  ;;  %v12587_v55 = vpop.f32.mrf.mxu2 }
 0x459   : > { %v9524_v59 = vpop.eup %9523  ;;  %v12578_v58 = vadd.f32 1.1920929e-07, %v3449_v46  ;;  %15431 = vst [vmem:[#allocation205_spill] sm:$0xff] %v12587_v55  ;;  %v12589_v46 = vpop.f32.mrf.mxu3 }
 0x45a   : > { %v3612_v51 = vmul.f32 %v9524_v59, %v3480_v47  ;;  %v3606_v48 = vmul.f32 %v9522_v45, %v3605_v33  ;;  %15432 = vst [vmem:[#allocation206_spill] sm:$0xff] %v12589_v46  ;;  %vm3618_vm8 = vweird.f32 %v9524_v59  ;;  %v8740_v46 = vld [vmem:[#allocation11 + $0xb8] sm:$0xf0] }
 0x45b   : > { %9525 = vrsqrt.f32 %v12578_v58  ;;  %vm3619_vm10 = vmor %vm3617_vm9, %vm3618_vm8  ;;  %vm3627_vm12 = vweird.f32 %v12578_v58  ;;  %v8743_v55 = vor.u32 %v9212_v24, %v8740_v46 }
 0x45c   : > { %v3613_v50 = vmul.f32 %v9524_v59, %v3612_v51  ;;  %v3267_v44 = vpop.f32.mrf.mxu0  ;;  %v3380_v20 = vpop.f32.mrf.mxu1  ;;  %v3610_v61 = vsel %vm3609_vm7, %v9522_v45, %v3606_v48  ;;  %v8687_v45 = vor.u32 %v9198_v62, %v8684_v54  ;;  %v9214_v51 = vld [vmem:[#allocation11 + $0xc4] sm:$0xf]  ;;  %v8748_v48 = vld [vmem:[#allocation11 + $0xc8] sm:$0xf0]  ;;  %v15433_v54 = vld [vmem:[#allocation127_spill] sm:$0xff] }
 0x45d   : > { %v3381_v27 = vadd.f32 %v3380_v20, %v3267_v44  ;;  %8593 = vmatmul.msk.f32.gmra.mxu2 %vm3825_vm4, %v3610_v61  ;;  %8626 = vmatmul.msk.f32.gmra.mxu3 %vm3825_vm4, %v3610_v61  ;;  %v8751_v20 = vor.u32 %v9214_v51, %v8748_v48  ;;  %v8834_v48 = vld [vmem:[#allocation16 + $0x70] sm:$0xf] }
 0x45e   : > { %v3614_v37 = vmul.f32 0.5, %v3613_v50  ;;  %4910 = vmatpush.bf16.msrb.mxu2 %v8687_v45 }
 0x45f   : > { %v3450_v33 = vmul.f32 0.0078125, %v3381_v27  ;;  %3314 = vmatmul.f32.gmra.mxu0 %v3205_v31  ;;  %3427 = vmatmul.f32.gmra.mxu1 %v3206_v41 }
 0x460   : > { %v3615_v9 = vsub.f32 1.5, %v3614_v37  ;;  %4999 = vmatpush.bf16.msrb.mxu3 %v8751_v20  ;;  %v3207_v37 = vmul.f32 %v15433_v54, %v15433_v54  ;;  %v9237_v20 = vld [vmem:[#allocation16 + $0x74] sm:$0xf0] }
 0x461   : > { %v9526_v44 = vpop.eup %9525  ;;  %v12591_v25 = vadd.f32 1.1920929e-07, %v3450_v33  ;;  %v3208_v33 = vmul.f32 %v12143_v16, %v12143_v16  ;;  %v8835_v16 = vor.u32 %v9237_v20, %v8834_v48  ;;  %v15437_v48 = vld [vmem:[#allocation130_spill] sm:$0xff] }
 0x462   : > { %v3622_v61 = vmul.f32 %v9526_v44, %v12578_v58  ;;  %v3616_v50 = vmul.f32 %v9524_v59, %v3615_v9  ;;  %vm3628_vm11 = vweird.f32 %v9526_v44  ;;  %v3210_v20 = vmul.f32 %v15437_v48, %v15437_v48 }
 0x463   : > { %9527 = vrsqrt.f32 %v12591_v25  ;;  %vm3629_vm13 = vmor %vm3627_vm12, %vm3628_vm11  ;;  %5277 = vmatpush.bf16.msra.mxu0 %v8835_v16  ;;  %vm3637_vm15 = vweird.f32 %v12591_v25 }
 0x464   : > { %v3623_v31 = vmul.f32 %v9526_v44, %v3622_v61  ;;  %v3270_v41 = vpop.f32.mrf.mxu0  ;;  %v3383_v27 = vpop.f32.mrf.mxu1  ;;  %v3620_v62 = vsel %vm3619_vm10, %v9524_v59, %v3616_v50  ;;  %5000 = vmatpush.bf16.msrb.mxu3 %v8743_v55 }
 0x465   : > { %v3384_v51 = vadd.f32 %v3383_v27, %v3270_v41  ;;  %8594 = vmatmul.msk.f32.gmra.mxu2 %vm3825_vm4, %v3620_v62  ;;  %8627 = vmatmul.msk.f32.gmra.mxu3 %vm3825_vm4, %v3620_v62  ;;  %v12601_v61 = vpop.f32.mrf.mxu2  ;;  %v12603_v50 = vpop.f32.mrf.mxu3  ;;  %v8898_v41 = vld [vmem:[#allocation16 + $0xf0] sm:$0xf]  ;;  %v9253_v27 = vld [vmem:[#allocation16 + $0xf4] sm:$0xf0] }
 0x466   : > { %v3624_v9 = vmul.f32 0.5, %v3623_v31  ;;  %15434 = vst [vmem:[#allocation207_spill] sm:$0xff] %v12601_v61 }
 0x467   : > { %v3451_v47 = vmul.f32 0.0078125, %v3384_v51  ;;  %3317 = vmatmul.f32.gmra.mxu0 %v3207_v37  ;;  %3430 = vmatmul.f32.gmra.mxu1 %v3208_v33  ;;  %15435 = vst [vmem:[#allocation208_spill] sm:$0xff] %v12603_v50  ;;  %v8899_v37 = vor.u32 %v9253_v27, %v8898_v41  ;;  %v15436_v50 = vld [vmem:[#allocation129_spill] sm:$0xff] }
 0x468   : > { %v3625_v45 = vsub.f32 1.5, %v3624_v9 }
 0x469   : > { %v9528_v59 = vpop.eup %9527  ;;  %v3483_v54 = vadd.f32 1.1920929e-07, %v3451_v47  ;;  %5366 = vmatpush.bf16.msra.mxu1 %v8899_v37  ;;  %v3209_v47 = vmul.f32 %v15436_v50, %v15436_v50 }
 0x46a   : > { %v3632_v31 = vmul.f32 %v9528_v59, %v12591_v25  ;;  %v3626_v62 = vmul.f32 %v9526_v44, %v3625_v45  ;;  %vm3638_vm14 = vweird.f32 %v9528_v59  ;;  %v15441_v25 = vld [vmem:[#allocation45_spill] sm:$0xff] }
 0x46b   : > { %9529 = vrsqrt.f32 %v3483_v54  ;;  %vm3639_vm0 = vmor %vm3637_vm15, %vm3638_vm14  ;;  %vm3647_vm3 = vweird.f32 %v3483_v54 }
 0x46c   : > { %v3633_v33 = vmul.f32 %v9528_v59, %v3632_v31  ;;  %v3273_v51 = vpop.f32.mrf.mxu0  ;;  %v3386_v9 = vpop.f32.mrf.mxu1  ;;  %v3630_v61 = vsel %vm3629_vm13, %v9526_v44, %v3626_v62 }
 0x46d   : > { %v3387_v58 = vadd.f32 %v3386_v9, %v3273_v51  ;;  %8595 = vmatmul.msk.f32.gmra.mxu2 %vm3825_vm4, %v3630_v61  ;;  %8628 = vmatmul.msk.f32.gmra.mxu3 %vm3825_vm4, %v3630_v61  ;;  %v12615_v37 = vpop.f32.mrf.mxu2  ;;  %v12617_v48 = vpop.f32.mrf.mxu3 }
 0x46e   : > { %v3634_v45 = vmul.f32 0.5, %v3633_v33  ;;  %15438 = vst [vmem:[#allocation209_spill] sm:$0xff] %v12615_v37 }
 0x46f   : > { %v3452_v41 = vmul.f32 0.0078125, %v3387_v58  ;;  %3320 = vmatmul.f32.gmra.mxu0 %v3209_v47  ;;  %3433 = vmatmul.f32.gmra.mxu1 %v3210_v20  ;;  %15439 = vst [vmem:[#allocation210_spill] sm:$0xff] %v12617_v48 }
 0x470   : > { %v3635_v16 = vsub.f32 1.5, %v3634_v45  ;;  %v15440_v45 = vld [vmem:[#allocation44_spill] sm:$0xff] }
 0x471   : > { %v9530_v27 = vpop.eup %9529  ;;  %v3484_v44 = vadd.f32 1.1920929e-07, %v3452_v41 }
 0x472   : > { %v3642_v31 = vmul.f32 %v9530_v27, %v3483_v54  ;;  %v3636_v62 = vmul.f32 %v9528_v59, %v3635_v16  ;;  %vm3648_vm2 = vweird.f32 %v9530_v27  ;;  %v8676_v54 = vld [vmem:[#allocation11 + $0x38] sm:$0xf0] }
 0x473   : > { %9531 = vrsqrt.f32 %v3484_v44  ;;  %vm3649_vm5 = vmor %vm3647_vm3, %vm3648_vm2  ;;  %vm3657_vm7 = vweird.f32 %v3484_v44 }
 0x474   : > { %v3643_v51 = vmul.f32 %v9530_v27, %v3642_v31  ;;  %v3276_v61 = vpop.f32.mrf.mxu0  ;;  %v3389_v33 = vpop.f32.mrf.mxu1  ;;  %v3640_v9 = vsel %vm3639_vm0, %v9528_v59, %v3636_v62 }
 0x475   : > { %v3390_v47 = vadd.f32 %v3389_v33, %v3276_v61  ;;  %8596 = vmatmul.msk.f32.gmra.mxu2 %vm3825_vm4, %v3640_v9  ;;  %8629 = vmatmul.msk.f32.gmra.mxu3 %vm3825_vm4, %v3640_v9 }
 0x476   : > { %v3644_v20 = vmul.f32 0.5, %v3643_v51  ;;  %v12625_v51 = vpop.f32.mrf.mxu2 }
 0x477   : > { %v3453_v58 = vmul.f32 0.0078125, %v3390_v47  ;;  %4737 = vmatmul.bf16.vlgmr.msrb.gmra.mxu0 %v15440_v45  ;;  %4826 = vmatmul.bf16.vlgmr.msrb.gmra.mxu1 %v15441_v25  ;;  %15442 = vst [vmem:[#allocation211_spill] sm:$0xff] %v12625_v51  ;;  %v12627_v47 = vpop.f32.mrf.mxu3  ;;  %v1924_v51 = vld [vmem:[%s10701_s24 + $0x8] sm:$0xff] }
 0x478   : > { %v3645_v41 = vsub.f32 1.5, %v3644_v20  ;;  %15443 = vst [vmem:[#allocation212_spill] sm:$0xff] %v12627_v47 }
 0x479   : > { %v9532_v16 = vpop.eup %9531  ;;  %v3485_v50 = vadd.f32 1.1920929e-07, %v3453_v58  ;;  %v9196_v58 = vld [vmem:[#allocation11 + $0x34] sm:$0xf] }
 0x47a   : > { %v3652_v31 = vmul.f32 %v9532_v16, %v3484_v44  ;;  %v3646_v48 = vmul.f32 %v9530_v27, %v3645_v41  ;;  %v8679_v41 = vor.u32 %v9196_v58, %v8676_v54  ;;  %vm3658_vm6 = vweird.f32 %v9532_v16 }
 0x47b   : > { %9533 = vrsqrt.f32 %v3485_v50  ;;  %vm3659_vm8 = vmor %vm3657_vm7, %vm3658_vm6  ;;  %vm3667_vm10 = vweird.f32 %v3485_v50 }
 0x47c   : > { %v3653_v59 = vmul.f32 %v9532_v16, %v3652_v31  ;;  %v3279_v62 = vpop.f32.mrf.mxu0  ;;  %v3392_v61 = vpop.f32.mrf.mxu1  ;;  %v3650_v33 = vsel %vm3649_vm5, %v9530_v27, %v3646_v48  ;;  %4911 = vmatpush.bf16.msrb.mxu2 %v8679_v41 }
 0x47d   : > { %v3393_v9 = vadd.f32 %v3392_v61, %v3279_v62  ;;  %8597 = vmatmul.msk.f32.gmra.mxu2 %vm3825_vm4, %v3650_v33  ;;  %8630 = vmatmul.msk.f32.gmra.mxu3 %vm3825_vm4, %v3650_v33 }
 0x47e   : > { %v3654_v20 = vmul.f32 0.5, %v3653_v59  ;;  %v12636_v44 = vpop.f32.mrf.mxu2 }
 0x47f   : > { %v3454_v37 = vmul.f32 0.0078125, %v3393_v9  ;;  %v12638_v55 = vpop.f32.mrf.mxu3 }
 0x480   : > { %v3655_v31 = vsub.f32 1.5, %v3654_v20  ;;  %v15445_v20 = vld [vmem:[#allocation47_spill] sm:$0xff]  ;;  %15447 = vst [vmem:[#allocation213_spill] sm:$0xff] %v12638_v55 }
 0x481   : > { %v9534_v48 = vpop.eup %9533  ;;  %v12629_v27 = vadd.f32 1.1920929e-07, %v3454_v37  ;;  %v15444_v37 = vld [vmem:[#allocation46_spill] sm:$0xff]  ;;  %15446 = vst [vmem:[#allocation47_spill] sm:$0xff] %v12636_v44 }
 0x482   : > { %v3662_v62 = vmul.f32 %v9534_v48, %v3485_v50  ;;  %v3656_v61 = vmul.f32 %v9532_v16, %v3655_v31  ;;  %vm3668_vm9 = vweird.f32 %v9534_v48  ;;  %v8826_v31 = vld [vmem:[#allocation16 + $0x60] sm:$0xf] }
 0x483   : > { %9535 = vrsqrt.f32 %v12629_v27  ;;  %vm3669_vm11 = vmor %vm3667_vm10, %vm3668_vm9  ;;  %vm3677_vm13 = vweird.f32 %v12629_v27 }
 0x484   : > { %v3663_v59 = vmul.f32 %v9534_v48, %v3662_v62  ;;  %v3282_v33 = vpop.f32.mrf.mxu0  ;;  %v3395_v9 = vpop.f32.mrf.mxu1  ;;  %v3660_v58 = vsel %vm3659_vm8, %v9532_v16, %v3656_v61  ;;  %v9235_v62 = vld [vmem:[#allocation16 + $0x64] sm:$0xf0] }
 0x485   : > { %v3396_v54 = vadd.f32 %v3395_v9, %v3282_v33  ;;  %8598 = vmatmul.msk.f32.gmra.mxu2 %vm3825_vm4, %v3660_v58  ;;  %8631 = vmatmul.msk.f32.gmra.mxu3 %vm3825_vm4, %v3660_v58  ;;  %v8827_v33 = vor.u32 %v9235_v62, %v8826_v31  ;;  %v8890_v9 = vld [vmem:[#allocation16 + $0xe0] sm:$0xf]  ;;  %v9251_v58 = vld [vmem:[#allocation16 + $0xe4] sm:$0xf0] }
 0x486   : > { %v3664_v24 = vmul.f32 0.5, %v3663_v59  ;;  %v8891_v47 = vor.u32 %v9251_v58, %v8890_v9  ;;  %v1923_v62 = vld [vmem:[%s10701_s24] sm:$0xff] }
 0x487   : > { %v3455_v46 = vmul.f32 0.0078125, %v3396_v54  ;;  %4742 = vmatmul.bf16.gmra.mxu0 %v15444_v37  ;;  %4831 = vmatmul.bf16.gmra.mxu1 %v15445_v20  ;;  %v1987_v9 = vld [vmem:[%s10708_s16] sm:$0xff] }
 0x488   : > { %v3665_v41 = vsub.f32 1.5, %v3664_v24  ;;  %5278 = vmatpush.bf16.msra.mxu0 %v8827_v33  ;;  %5367 = vmatpush.bf16.msra.mxu1 %v8891_v47 }
 0x489   : > { %v9536_v16 = vpop.eup %9535  ;;  %v12640_v61 = vadd.f32 1.1920929e-07, %v3455_v46 }
 0x48a   : > { %v3672_v59 = vmul.f32 %v9536_v16, %v12629_v27  ;;  %v3666_v54 = vmul.f32 %v9534_v48, %v3665_v41  ;;  %vm3678_vm12 = vweird.f32 %v9536_v16 }
 0x48b   : > { %9537 = vrsqrt.f32 %v12640_v61  ;;  %vm3679_vm14 = vmor %vm3677_vm13, %vm3678_vm12  ;;  %vm3687_vm0 = vweird.f32 %v12640_v61 }
 0x48c   : > { %v3673_v24 = vmul.f32 %v9536_v16, %v3672_v59  ;;  %v3285_v55 = vpop.f32.mrf.mxu0  ;;  %v3398_v44 = vpop.f32.mrf.mxu1  ;;  %v3670_v46 = vsel %vm3669_vm11, %v9534_v48, %v3666_v54  ;;  %v15448_v48 = vld [vmem:[#allocation131_spill] sm:$0xff] }
 0x48d   : > { %v3399_v31 = vadd.f32 %v3398_v44, %v3285_v55  ;;  %8599 = vmatmul.msk.f32.gmra.mxu2 %vm3825_vm4, %v3670_v46  ;;  %8632 = vmatmul.msk.f32.gmra.mxu3 %vm3825_vm4, %v3670_v46  ;;  %v1988_v55 = vld [vmem:[%s10708_s16 + $0x8] sm:$0xff] }
 0x48e   : > { %v3674_v50 = vmul.f32 0.5, %v3673_v24 }
 0x48f   : > { %v3456_v41 = vmul.f32 0.0078125, %v3399_v31 }
 0x490   : > { %v3944_v58 = vpop.f32.mrf.mxu2  ;;  %v4057_v21 = vpop.f32.mrf.mxu3  ;;  %v3675_v52 = vsub.f32 1.5, %v3674_v50 }
 0x491   : > { %v9538_v33 = vpop.eup %9537  ;;  %v12649_v59 = vadd.f32 1.1920929e-07, %v3456_v41  ;;  %v4153_v47 = vmul.f32 %v3944_v58, %v11649_v4  ;;  %v4281_v44 = vmul.f32 %v3944_v58, %v15448_v48  ;;  %v4154_v54 = vmul.f32 %v4057_v21, %v11679_v8 }
 0x492   : > { %v3682_v24 = vmul.f32 %v9538_v33, %v12640_v61  ;;  %v4282_v46 = vmul.f32 %v4057_v21, %v12166_v5  ;;  %v3676_v31 = vmul.f32 %v9536_v16, %v3675_v52  ;;  %vm3688_vm15 = vweird.f32 %v9538_v33 }
 0x493   : > { %9539 = vrsqrt.f32 %v12649_v59  ;;  %v4217_v50 = vmul.f32 %v4153_v47, %v1923_v62  ;;  %v4345_v7 = vmul.f32 %v4281_v44, %v1987_v9  ;;  %v4218_v41 = vmul.f32 %v4154_v54, %v1924_v51  ;;  %v15449_v62 = vld [vmem:[#allocation48_spill] sm:$0xff]  ;;  %v15450_v9 = vld [vmem:[#allocation49_spill] sm:$0xff]  ;;  %vm3689_vm2 = vmor %vm3687_vm0, %vm3688_vm15 }
 0x494   : > { %v3683_v4 = vmul.f32 %v9538_v33, %v3682_v24  ;;  %v4346_v58 = vmul.f32 %v4282_v46, %v1988_v55  ;;  %v3288_v8 = vpop.f32.mrf.mxu0  ;;  %v3401_v48 = vpop.f32.mrf.mxu1  ;;  %v3680_v34 = vsel %vm3679_vm14, %v9536_v16, %v3676_v31  ;;  %v1925_v55 = vld [vmem:[%s10701_s24 + $0x10] sm:$0xff]  ;;  %vm3697_vm5 = vweird.f32 %v12649_v59 }
 0x495   : > { %v4409_v5 = vadd.f32 %v4345_v7, %v4217_v50  ;;  %v3402_v52 = vadd.f32 %v3401_v48, %v3288_v8  ;;  %8600 = vmatmul.msk.f32.gmra.mxu2 %vm3825_vm4, %v3680_v34  ;;  %8633 = vmatmul.msk.f32.gmra.mxu3 %vm3825_vm4, %v3680_v34  ;;  %v1989_v16 = vld [vmem:[%s10708_s16 + $0x10] sm:$0xff]  ;;  %v1926_v50 = vld [vmem:[%s10701_s24 + $0x18] sm:$0xff]  ;;  %v15451_v8 = vld [vmem:[#allocation132_spill] sm:$0xff] }
 0x496   : > { %v3684_v21 = vmul.f32 0.5, %v3683_v4  ;;  %v4410_v51 = vadd.f32 %v4346_v58, %v4218_v41  ;;  %v1990_v41 = vld [vmem:[%s10708_s16 + $0x18] sm:$0xff] }
 0x497   : > { %v3457_v27 = vmul.f32 0.0078125, %v3402_v52  ;;  %4747 = vmatmul.bf16.gmra.mxu0 %v15449_v62  ;;  %4836 = vmatmul.bf16.gmra.mxu1 %v15450_v9 }
 0x498   : > { %v3685_v47 = vsub.f32 1.5, %v3684_v21  ;;  %v4473_v44 = vpack.c.bf16 %v4410_v51, %v4409_v5  ;;  %v3947_v7 = vpop.f32.mrf.mxu2  ;;  %v4060_v54 = vpop.f32.mrf.mxu3 }
 0x499   : > { %v12669_v24 = vpop.eup %9539  ;;  %v12671_v34 = vadd.f32 1.1920929e-07, %v3457_v27  ;;  %v4155_v46 = vmul.f32 %v3947_v7, %v11685_v60  ;;  %v4283_v31 = vmul.f32 %v3947_v7, %v12168_v29  ;;  %v4156_v4 = vmul.f32 %v4060_v54, %v11697_v28 }
 0x49a   : > { %v3692_v58 = vmul.f32 %v12669_v24, %v12649_v59  ;;  %4505 = vst [vmem:[%s12682_s30] sm:$0xff] %v4473_v44  ;;  %v4284_v48 = vmul.f32 %v4060_v54, %v15451_v8  ;;  %v3686_v5 = vmul.f32 %v9538_v33, %v3685_v47  ;;  %v8668_v54 = vld [vmem:[#allocation11 + $0x28] sm:$0xf0]  ;;  %vm3698_vm3 = vweird.f32 %v12669_v24 }
 0x49b   : > { %9541 = vrsqrt.f32 %v12671_v34  ;;  %v4219_v60 = vmul.f32 %v4155_v46, %v1925_v55  ;;  %v4347_v29 = vmul.f32 %v4283_v31, %v1989_v16  ;;  %v4220_v52 = vmul.f32 %v4156_v4, %v1926_v50  ;;  %v9194_v16 = vld [vmem:[#allocation11 + $0x24] sm:$0xf]  ;;  %vm3699_vm6 = vmor %vm3697_vm5, %vm3698_vm3 }
 0x49c   : > { %v3693_v28 = vmul.f32 %v12669_v24, %v3692_v58  ;;  %v4348_v61 = vmul.f32 %v4284_v48, %v1990_v41  ;;  %v3291_v21 = vpop.f32.mrf.mxu0  ;;  %v3404_v51 = vpop.f32.mrf.mxu1  ;;  %v3690_v27 = vsel %vm3689_vm2, %v9538_v33, %v3686_v5  ;;  %v8671_v31 = vor.u32 %v9194_v16, %v8668_v54  ;;  %v9210_v50 = vld [vmem:[#allocation11 + $0xa4] sm:$0xf]  ;;  %v8732_v41 = vld [vmem:[#allocation11 + $0xa8] sm:$0xf0] }
 0x49d   : > { %v4411_v7 = vadd.f32 %v4347_v29, %v4219_v60  ;;  %v3405_v44 = vadd.f32 %v3404_v51, %v3291_v21  ;;  %8601 = vmatmul.msk.f32.gmra.mxu2 %vm3825_vm4, %v3690_v27  ;;  %8634 = vmatmul.msk.f32.gmra.mxu3 %vm3825_vm4, %v3690_v27  ;;  %v1927_v58 = vld [vmem:[%s10701_s24 + $0x20] sm:$0xff]  ;;  %v1928_v48 = vld [vmem:[%s10701_s24 + $0x28] sm:$0xff]  ;;  %v8735_v29 = vor.u32 %v9210_v50, %v8732_v41  ;;  %vm3707_vm8 = vweird.f32 %v12671_v34 }
 0x49e   : > { %v3694_v47 = vmul.f32 0.5, %v3693_v28  ;;  %v4412_v55 = vadd.f32 %v4348_v61, %v4220_v52  ;;  %v1991_v33 = vld [vmem:[%s10708_s16 + $0x20] sm:$0xff]  ;;  %v15452_v21 = vld [vmem:[#allocation133_spill] sm:$0xff]  ;;  %4912 = vmatpush.bf16.msrb.mxu2 %v8671_v31 }
 0x49f   : > { %v3458_v46 = vmul.f32 0.0078125, %v3405_v44  ;;  %v1992_v27 = vld [vmem:[%s10708_s16 + $0x28] sm:$0xff]  ;;  %5001 = vmatpush.bf16.msrb.mxu3 %v8735_v29  ;;  %v1929_v29 = vld [vmem:[%s10701_s24 + $0x30] sm:$0xff] }
 0x4a0   : > { %v4474_v4 = vpack.c.bf16 %v4412_v55, %v4411_v7  ;;  %v3950_v8 = vpop.f32.mrf.mxu2  ;;  %v4063_v5 = vpop.f32.mrf.mxu3  ;;  %v3695_v60 = vsub.f32 1.5, %v3694_v47 }
 0x4a1   : > { %v12695_v28 = vpop.eup %9541  ;;  %v12697_v52 = vadd.f32 1.1920929e-07, %v3458_v46  ;;  %v4157_v61 = vmul.f32 %v3950_v8, %v11703_v26  ;;  %v4285_v51 = vmul.f32 %v3950_v8, %v15452_v21  ;;  %v4158_v7 = vmul.f32 %v4063_v5, %v11727_v43  ;;  %v15453_v8 = vld [vmem:[#allocation50_spill] sm:$0xff] }
 0x4a2   : > { %v3702_v44 = vmul.f32 %v12695_v28, %v12671_v34  ;;  %4506 = vst [vmem:[%s12682_s30 + $0x8] sm:$0xff] %v4474_v4  ;;  %v4286_v47 = vmul.f32 %v4063_v5, %v12184_v11  ;;  %v3696_v55 = vmul.f32 %v12669_v24, %v3695_v60  ;;  %vm3708_vm7 = vweird.f32 %v12695_v28 }
 0x4a3   : > { %9543 = vrsqrt.f32 %v12697_v52  ;;  %v4221_v26 = vmul.f32 %v4157_v61, %v1927_v58  ;;  %v4349_v16 = vmul.f32 %v4285_v51, %v1991_v33  ;;  %v4222_v54 = vmul.f32 %v4158_v7, %v1928_v48  ;;  %v15454_v48 = vld [vmem:[#allocation51_spill] sm:$0xff]  ;;  %vm3709_vm9 = vmor %vm3707_vm8, %vm3708_vm7 }
 0x4a4   : > { %v3703_v43 = vmul.f32 %v12695_v28, %v3702_v44  ;;  %v4350_v46 = vmul.f32 %v4286_v47, %v1992_v27  ;;  %v3294_v31 = vpop.f32.mrf.mxu0  ;;  %v3407_v11 = vpop.f32.mrf.mxu1  ;;  %v3700_v50 = vsel %vm3699_vm6, %v12669_v24, %v3696_v55  ;;  %v1993_v24 = vld [vmem:[%s10708_s16 + $0x30] sm:$0xff]  ;;  %v1930_v47 = vld [vmem:[%s10701_s24 + $0x38] sm:$0xff]  ;;  %vm3717_vm11 = vweird.f32 %v12697_v52 }
 0x4a5   : > { %v4413_v41 = vadd.f32 %v4349_v16, %v4221_v26  ;;  %v3408_v59 = vadd.f32 %v3407_v11, %v3294_v31  ;;  %8602 = vmatmul.msk.f32.gmra.mxu2 %vm3825_vm4, %v3700_v50  ;;  %8635 = vmatmul.msk.f32.gmra.mxu3 %vm3825_vm4, %v3700_v50  ;;  %v1994_v55 = vld [vmem:[%s10708_s16 + $0x38] sm:$0xff]  ;;  %v8818_v31 = vld [vmem:[#allocation16 + $0x50] sm:$0xf] }
 0x4a6   : > { %v3704_v4 = vmul.f32 0.5, %v3703_v43  ;;  %v4414_v58 = vadd.f32 %v4350_v46, %v4222_v54  ;;  %v15455_v54 = vld [vmem:[#allocation134_spill] sm:$0xff]  ;;  %v9233_v11 = vld [vmem:[#allocation16 + $0x54] sm:$0xf0] }
 0x4a7   : > { %v3459_v33 = vmul.f32 0.0078125, %v3408_v59  ;;  %4752 = vmatmul.bf16.gmra.mxu0 %v15453_v8  ;;  %4841 = vmatmul.bf16.gmra.mxu1 %v15454_v48  ;;  %v9249_v50 = vld [vmem:[#allocation16 + $0xd4] sm:$0xf0] }
 0x4a8   : > { %v3705_v5 = vsub.f32 1.5, %v3704_v4  ;;  %v4475_v60 = vpack.c.bf16 %v4414_v58, %v4413_v41  ;;  %v3953_v61 = vpop.f32.mrf.mxu2  ;;  %v4066_v21 = vpop.f32.mrf.mxu3 }
 0x4a9   : > { %v12721_v51 = vpop.eup %9543  ;;  %v12723_v27 = vadd.f32 1.1920929e-07, %v3459_v33  ;;  %v4159_v7 = vmul.f32 %v3953_v61, %v15353_v30  ;;  %v4287_v44 = vmul.f32 %v3953_v61, %v12186_v32  ;;  %v4160_v26 = vmul.f32 %v4066_v21, %v15354_v0  ;;  %v8882_v0 = vld [vmem:[#allocation16 + $0xd0] sm:$0xf] }
 0x4aa   : > { %v3712_v16 = vmul.f32 %v12721_v51, %v12697_v52  ;;  %4507 = vst [vmem:[%s12682_s30 + $0x10] sm:$0xff] %v4475_v60  ;;  %v4288_v43 = vmul.f32 %v4066_v21, %v15455_v54  ;;  %v3706_v46 = vmul.f32 %v12695_v28, %v3705_v5  ;;  %v8883_v21 = vor.u32 %v9249_v50, %v8882_v0 }
 0x4ab   : > { %9545 = vrsqrt.f32 %v12723_v27  ;;  %v4223_v30 = vmul.f32 %v4159_v7, %v1929_v29  ;;  %v4351_v32 = vmul.f32 %v4287_v44, %v1993_v24  ;;  %v4224_v41 = vmul.f32 %v4160_v26, %v1930_v47  ;;  %v1931_v47 = vld [vmem:[%s10701_s24 + $0x40] sm:$0xff] }
 0x4ac   : > { %v3713_v34 = vmul.f32 %v12721_v51, %v3712_v16  ;;  %v4352_v59 = vmul.f32 %v4288_v43, %v1994_v55  ;;  %v3297_v4 = vpop.f32.mrf.mxu0  ;;  %v3410_v58 = vpop.f32.mrf.mxu1  ;;  %v3710_v33 = vsel %vm3709_vm9, %v12695_v28, %v3706_v46  ;;  %v8819_v29 = vor.u32 %v9233_v11, %v8818_v31  ;;  %v1995_v55 = vld [vmem:[%s10708_s16 + $0x40] sm:$0xff]  ;;  %v1932_v16 = vld [vmem:[%s10701_s24 + $0x48] sm:$0xff]  ;;  %5368 = vmatpush.bf16.msra.mxu1 %v8883_v21  ;;  %v15456_v11 = vld [vmem:[#allocation135_spill] sm:$0xff] }
 0x4ad   : > { %v4415_v5 = vadd.f32 %v4351_v32, %v4223_v30  ;;  %v3411_v60 = vadd.f32 %v3410_v58, %v3297_v4  ;;  %8603 = vmatmul.msk.f32.gmra.mxu2 %vm3825_vm4, %v3710_v33  ;;  %8636 = vmatmul.msk.f32.gmra.mxu3 %vm3825_vm4, %v3710_v33  ;;  %vm3718_vm10 = vweird.f32 %v12721_v51  ;;  %v1996_v32 = vld [vmem:[%s10708_s16 + $0x48] sm:$0xff]  ;;  %v15457_v21 = vld [vmem:[#allocation52_spill] sm:$0xff]  ;;  %vm3727_vm14 = vweird.f32 %v12723_v27 }
 0x4ae   : > { %v3714_v24 = vmul.f32 0.5, %v3713_v34  ;;  %v4416_v61 = vadd.f32 %v4352_v59, %v4224_v41  ;;  %5279 = vmatpush.bf16.msra.mxu0 %v8819_v29  ;;  %vm3719_vm12 = vmor %vm3717_vm11, %vm3718_vm10 }
 0x4af   : > { %v3460_v7 = vmul.f32 0.0078125, %v3411_v60 }
 0x4b0   : > { %v4476_v44 = vpack.c.bf16 %v4416_v61, %v4415_v5  ;;  %v3956_v26 = vpop.f32.mrf.mxu2  ;;  %v4069_v28 = vpop.f32.mrf.mxu3  ;;  %v3715_v54 = vsub.f32 1.5, %v3714_v24 }
 0x4b1   : > { %v9546_v43 = vpop.eup %9545  ;;  %v12747_v46 = vadd.f32 1.1920929e-07, %v3460_v7  ;;  %v4161_v31 = vmul.f32 %v3956_v26, %v15357_v19  ;;  %v4289_v30 = vmul.f32 %v3956_v26, %v15456_v11  ;;  %v4162_v0 = vmul.f32 %v4069_v28, %v15358_v36  ;;  %v15458_v7 = vld [vmem:[#allocation53_spill] sm:$0xff] }
 0x4b2   : > { %v3722_v50 = vmul.f32 %v9546_v43, %v12723_v27  ;;  %4508 = vst [vmem:[%s12682_s30 + $0x18] sm:$0xff] %v4476_v44  ;;  %v4290_v34 = vmul.f32 %v4069_v28, %v12202_v40  ;;  %v3716_v41 = vmul.f32 %v12721_v51, %v3715_v54  ;;  %vm3728_vm13 = vweird.f32 %v9546_v43 }
 0x4b3   : > { %9547 = vrsqrt.f32 %v12747_v46  ;;  %v4225_v59 = vmul.f32 %v4161_v31, %v1931_v47  ;;  %v4353_v4 = vmul.f32 %v4289_v30, %v1995_v55  ;;  %v4226_v58 = vmul.f32 %v4162_v0, %v1932_v16  ;;  %v1933_v55 = vld [vmem:[%s10701_s24 + $0x50] sm:$0xff]  ;;  %v1934_v30 = vld [vmem:[%s10701_s24 + $0x58] sm:$0xff]  ;;  %vm3729_vm15 = vmor %vm3727_vm14, %vm3728_vm13 }
 0x4b4   : > { %v3723_v19 = vmul.f32 %v9546_v43, %v3722_v50  ;;  %v4354_v36 = vmul.f32 %v4290_v34, %v1996_v32  ;;  %v3300_v33 = vpop.f32.mrf.mxu0  ;;  %v3413_v5 = vpop.f32.mrf.mxu1  ;;  %v3720_v40 = vsel %vm3719_vm12, %v12721_v51, %v3716_v41  ;;  %v1997_v51 = vld [vmem:[%s10708_s16 + $0x50] sm:$0xff]  ;;  %v1998_v32 = vld [vmem:[%s10708_s16 + $0x58] sm:$0xff]  ;;  %vm3737_vm2 = vweird.f32 %v12747_v46 }
 0x4b5   : > { %v4417_v60 = vadd.f32 %v4353_v4, %v4225_v59  ;;  %v3414_v29 = vadd.f32 %v3413_v5, %v3300_v33  ;;  %8604 = vmatmul.msk.f32.gmra.mxu2 %vm3825_vm4, %v3720_v40  ;;  %8637 = vmatmul.msk.f32.gmra.mxu3 %vm3825_vm4, %v3720_v40  ;;  %v9192_v40 = vld [vmem:[#allocation11 + $0x14] sm:$0xf] }
 0x4b6   : > { %v3724_v52 = vmul.f32 0.5, %v3723_v19  ;;  %v4418_v24 = vadd.f32 %v4354_v36, %v4226_v58 }
 0x4b7   : > { %v3461_v61 = vmul.f32 0.0078125, %v3414_v29  ;;  %4757 = vmatmul.bf16.gmra.mxu0 %v15457_v21  ;;  %4846 = vmatmul.bf16.gmra.mxu1 %v15458_v7 }
 0x4b8   : > { %v3725_v44 = vsub.f32 1.5, %v3724_v52  ;;  %v4477_v47 = vpack.c.bf16 %v4418_v24, %v4417_v60  ;;  %v3959_v26 = vpop.f32.mrf.mxu2  ;;  %v4072_v16 = vpop.f32.mrf.mxu3  ;;  %v8660_v60 = vld [vmem:[#allocation11 + $0x18] sm:$0xf0]  ;;  %v9208_v24 = vld [vmem:[#allocation11 + $0x94] sm:$0xf] }
 0x4b9   : > { %v12768_v28 = vpop.eup %9547  ;;  %v12770_v54 = vadd.f32 1.1920929e-07, %v3461_v61  ;;  %v4163_v31 = vmul.f32 %v3959_v26, %v15361_v22  ;;  %v4291_v11 = vmul.f32 %v3959_v26, %v12204_v49  ;;  %v4164_v0 = vmul.f32 %v4072_v16, %v15362_v63  ;;  %v8724_v61 = vld [vmem:[#allocation11 + $0x98] sm:$0xf0] }
 0x4ba   : > { %v3732_v50 = vmul.f32 %v12768_v28, %v12747_v46  ;;  %4509 = vst [vmem:[%s12682_s30 + $0x20] sm:$0xff] %v4477_v47  ;;  %v4292_v34 = vmul.f32 %v4072_v16, %v12206_v14  ;;  %v3726_v41 = vmul.f32 %v9546_v43, %v3725_v44  ;;  %v8663_v52 = vor.u32 %v9192_v40, %v8660_v60  ;;  %v1935_v47 = vld [vmem:[%s10701_s24 + $0x60] sm:$0xff] }
 0x4bb   : > { %9549 = vrsqrt.f32 %v12770_v54  ;;  %v4227_v59 = vmul.f32 %v4163_v31, %v1933_v55  ;;  %v4355_v4 = vmul.f32 %v4291_v11, %v1997_v51  ;;  %v4228_v22 = vmul.f32 %v4164_v0, %v1934_v30  ;;  %v1936_v51 = vld [vmem:[%s10701_s24 + $0x68] sm:$0xff]  ;;  %v15459_v0 = vld [vmem:[#allocation136_spill] sm:$0xff] }
 0x4bc   : > { %v3733_v49 = vmul.f32 %v12768_v28, %v3732_v50  ;;  %v4356_v58 = vmul.f32 %v4292_v34, %v1998_v32  ;;  %v3303_v63 = vpop.f32.mrf.mxu0  ;;  %v3416_v27 = vpop.f32.mrf.mxu1  ;;  %v3730_v19 = vsel %vm3729_vm15, %v9546_v43, %v3726_v41  ;;  %v1999_v43 = vld [vmem:[%s10708_s16 + $0x60] sm:$0xff]  ;;  %vm3738_vm0 = vweird.f32 %v12768_v28  ;;  %v2000_v34 = vld [vmem:[%s10708_s16 + $0x68] sm:$0xff]  ;;  %v15460_v41 = vld [vmem:[#allocation75_spill] sm:$0xff]  ;;  %4913 = vmatpush.bf16.msrb.mxu2 %v8663_v52 }
 0x4bd   : > { %v4419_v36 = vadd.f32 %v4355_v4, %v4227_v59  ;;  %v3417_v33 = vadd.f32 %v3416_v27, %v3303_v63  ;;  %8605 = vmatmul.msk.f32.gmra.mxu2 %vm3825_vm4, %v3730_v19  ;;  %8638 = vmatmul.msk.f32.gmra.mxu3 %vm3825_vm4, %v3730_v19  ;;  %v8727_v31 = vor.u32 %v9208_v24, %v8724_v61  ;;  %vm3739_vm3 = vmor %vm3737_vm2, %vm3738_vm0  ;;  %v15462_v24 = vld [vmem:[#allocation54_spill] sm:$0xff]  ;;  %v15463_v61 = vld [vmem:[#allocation55_spill] sm:$0xff]  ;;  %vm3747_vm6 = vweird.f32 %v12770_v54 }
 0x4be   : > { %v3734_v14 = vmul.f32 0.5, %v3733_v49  ;;  %v4420_v5 = vadd.f32 %v4356_v58, %v4228_v22  ;;  %v15461_v49 = vld [vmem:[#allocation137_spill] sm:$0xff] }
 0x4bf   : > { %v3462_v29 = vmul.f32 0.0078125, %v3417_v33  ;;  %5002 = vmatpush.bf16.msrb.mxu3 %v8727_v31  ;;  %v15464_v31 = vld [vmem:[#allocation76_spill] sm:$0xff] }
 0x4c0   : > { %v4478_v44 = vpack.c.bf16 %v4420_v5, %v4419_v36  ;;  %v3962_v55 = vpop.f32.mrf.mxu2  ;;  %v4075_v26 = vpop.f32.mrf.mxu3  ;;  %v3735_v16 = vsub.f32 1.5, %v3734_v14 }
 0x4c1   : > { %v12791_v11 = vpop.eup %9549  ;;  %v12793_v30 = vadd.f32 1.1920929e-07, %v3462_v29  ;;  %v4165_v32 = vmul.f32 %v3962_v55, %v15367_v13  ;;  %v4293_v50 = vmul.f32 %v3962_v55, %v15459_v0  ;;  %v4166_v59 = vmul.f32 %v4075_v26, %v15460_v41  ;;  %v15465_v0 = vld [vmem:[#allocation138_spill] sm:$0xff]  ;;  %v2002_v41 = vld [vmem:[%s10708_s16 + $0x78] sm:$0xff] }
 0x4c2   : > { %v3742_v4 = vmul.f32 %v12791_v11, %v12770_v54  ;;  %4510 = vst [vmem:[%s12682_s30 + $0x28] sm:$0xff] %v4478_v44  ;;  %v4294_v22 = vmul.f32 %v4075_v26, %v15461_v49  ;;  %v3736_v58 = vmul.f32 %v12768_v28, %v3735_v16  ;;  %vm3748_vm5 = vweird.f32 %v12791_v11 }
 0x4c3   : > { %9551 = vrsqrt.f32 %v12793_v30  ;;  %v4229_v13 = vmul.f32 %v4165_v32, %v1935_v47  ;;  %v4357_v63 = vmul.f32 %v4293_v50, %v1999_v43  ;;  %v4230_v27 = vmul.f32 %v4166_v59, %v1936_v51  ;;  %v1937_v43 = vld [vmem:[%s10701_s24 + $0x70] sm:$0xff]  ;;  %v15466_v59 = vld [vmem:[#allocation77_spill] sm:$0xff]  ;;  %vm3749_vm7 = vmor %vm3747_vm6, %vm3748_vm5 }
 0x4c4   : > { %v3743_v19 = vmul.f32 %v12791_v11, %v3742_v4  ;;  %v4358_v36 = vmul.f32 %v4294_v22, %v2000_v34  ;;  %v3306_v33 = vpop.f32.mrf.mxu0  ;;  %v3419_v14 = vpop.f32.mrf.mxu1  ;;  %v3740_v5 = vsel %vm3739_vm3, %v12768_v28, %v3736_v58  ;;  %v2001_v28 = vld [vmem:[%s10708_s16 + $0x70] sm:$0xff]  ;;  %v1938_v34 = vld [vmem:[%s10701_s24 + $0x78] sm:$0xff]  ;;  %vm3757_vm9 = vweird.f32 %v12793_v30 }
 0x4c5   : > { %v4421_v40 = vadd.f32 %v4357_v63, %v4229_v13  ;;  %v3420_v46 = vadd.f32 %v3419_v14, %v3306_v33  ;;  %8606 = vmatmul.msk.f32.gmra.mxu2 %vm3825_vm4, %v3740_v5  ;;  %8639 = vmatmul.msk.f32.gmra.mxu3 %vm3825_vm4, %v3740_v5  ;;  %v15467_v22 = vld [vmem:[#allocation139_spill] sm:$0xff]  ;;  %v8810_v63 = vld [vmem:[#allocation16 + $0x40] sm:$0xf]  ;;  %v9247_v14 = vld [vmem:[#allocation16 + $0xc4] sm:$0xf0] }
 0x4c6   : > { %v3744_v60 = vmul.f32 0.5, %v3743_v19  ;;  %v4422_v29 = vadd.f32 %v4358_v36, %v4230_v27  ;;  %v9231_v27 = vld [vmem:[#allocation16 + $0x44] sm:$0xf0]  ;;  %v8874_v33 = vld [vmem:[#allocation16 + $0xc0] sm:$0xf] }
 0x4c7   : > { %v3463_v52 = vmul.f32 0.0078125, %v3420_v46  ;;  %4762 = vmatmul.bf16.gmra.mxu0 %v15462_v24  ;;  %4851 = vmatmul.bf16.gmra.mxu1 %v15463_v61 }
 0x4c8   : > { %v3745_v44 = vsub.f32 1.5, %v3744_v60  ;;  %v4479_v47 = vpack.c.bf16 %v4422_v29, %v4421_v40  ;;  %v3965_v55 = vpop.f32.mrf.mxu2  ;;  %v4078_v51 = vpop.f32.mrf.mxu3 }
 0x4c9   : > { %v12817_v26 = vpop.eup %9551  ;;  %v12819_v16 = vadd.f32 1.1920929e-07, %v3463_v52  ;;  %v4167_v32 = vmul.f32 %v3965_v55, %v15464_v31  ;;  %v4295_v50 = vmul.f32 %v3965_v55, %v15465_v0  ;;  %v4168_v4 = vmul.f32 %v4078_v51, %v15466_v59  ;;  %v15469_v31 = vld [vmem:[#allocation141_spill] sm:$0xff]  ;;  %v1939_v59 = vld [vmem:[%s10701_s24 + $0x80] sm:$0xff] }
 0x4ca   : > { %v3752_v49 = vmul.f32 %v12817_v26, %v12793_v30  ;;  %4511 = vst [vmem:[%s12682_s30 + $0x30] sm:$0xff] %v4479_v47  ;;  %v4296_v58 = vmul.f32 %v4078_v51, %v15467_v22  ;;  %v3746_v13 = vmul.f32 %v12791_v11, %v3745_v44  ;;  %v8811_v47 = vor.u32 %v9231_v27, %v8810_v63  ;;  %v15468_v51 = vld [vmem:[#allocation140_spill] sm:$0xff]  ;;  %v1940_v22 = vld [vmem:[%s10701_s24 + $0x88] sm:$0xff] }
 0x4cb   : > { %9553 = vrsqrt.f32 %v12819_v16  ;;  %v4231_v19 = vmul.f32 %v4167_v32, %v1937_v43  ;;  %v4359_v36 = vmul.f32 %v4295_v50, %v2001_v28  ;;  %v4232_v5 = vmul.f32 %v4168_v4, %v1938_v34  ;;  %v15470_v50 = vld [vmem:[#allocation70_spill] sm:$0xff]  ;;  %v15471_v34 = vld [vmem:[#allocation71_spill] sm:$0xff]  ;;  %v2003_v4 = vld [vmem:[%s10708_s16 + $0x80] sm:$0xff] }
 0x4cc   : > { %v3753_v54 = vmul.f32 %v12817_v26, %v3752_v49  ;;  %v4360_v40 = vmul.f32 %v4296_v58, %v2002_v41  ;;  %v3309_v46 = vpop.f32.mrf.mxu0  ;;  %v3422_v60 = vpop.f32.mrf.mxu1  ;;  %v3750_v29 = vsel %vm3749_vm7, %v12791_v11, %v3746_v13  ;;  %v8875_v55 = vor.u32 %v9247_v14, %v8874_v33  ;;  %5280 = vmatpush.bf16.msra.mxu0 %v8811_v47  ;;  %v2004_v14 = vld [vmem:[%s10708_s16 + $0x88] sm:$0xff] }
 0x4cd   : > { %v4423_v52 = vadd.f32 %v4359_v36, %v4231_v19  ;;  %v3423_v44 = vadd.f32 %v3422_v60, %v3309_v46  ;;  %8607 = vmatmul.msk.f32.gmra.mxu2 %vm3825_vm4, %v3750_v29  ;;  %8640 = vmatmul.msk.f32.gmra.mxu3 %vm3825_vm4, %v3750_v29  ;;  %v2910_v32 = vadd.f32 %v15469_v31, %v15468_v51  ;;  %vm3758_vm8 = vweird.f32 %v12817_v26  ;;  %v15472_v19 = vld [vmem:[#allocation80_spill] sm:$0xff] }
 0x4ce   : > { %v3754_v43 = vmul.f32 0.5, %v3753_v54  ;;  %v4424_v28 = vadd.f32 %v4360_v40, %v4232_v5  ;;  %v3088_v11 = vadd.f32 %v15471_v34, %v15470_v50  ;;  %5369 = vmatpush.bf16.msra.mxu1 %v8875_v55  ;;  %v15473_v54 = vld [vmem:[#allocation81_spill] sm:$0xff]  ;;  %vm3759_vm10 = vmor %vm3757_vm9, %vm3758_vm8  ;;  %v15474_v50 = vld [vmem:[#allocation142_spill] sm:$0xff]  ;;  %vm3767_vm12 = vweird.f32 %v12819_v16 }
 0x4cf   : > { %v3464_v0 = vmul.f32 0.0078125, %v3423_v44  ;;  %v15475_v34 = vld [vmem:[#allocation143_spill] sm:$0xff] }
 0x4d0   : > { %v4480_v41 = vpack.c.bf16 %v4424_v28, %v4423_v52  ;;  %v3968_v49 = vpop.f32.mrf.mxu2  ;;  %v4081_v58 = vpop.f32.mrf.mxu3  ;;  %v3755_v13 = vsub.f32 1.5, %v3754_v43 }
 0x4d1   : > { %v9554_v63 = vpop.eup %9553  ;;  %v12847_v27 = vadd.f32 1.1920929e-07, %v3464_v0  ;;  %v4169_v36 = vmul.f32 %v3968_v49, %v15472_v19  ;;  %v4297_v33 = vmul.f32 %v3968_v49, %v2910_v32  ;;  %v4170_v5 = vmul.f32 %v4081_v58, %v15473_v54  ;;  %v15478_v49 = vld [vmem:[#allocation74_spill] sm:$0xff] }
 0x4d2   : > { %v3762_v40 = vmul.f32 %v9554_v63, %v12819_v16  ;;  %4512 = vst [vmem:[%s12682_s30 + $0x38] sm:$0xff] %v4480_v41  ;;  %v4298_v46 = vmul.f32 %v4081_v58, %v3088_v11  ;;  %v3756_v60 = vmul.f32 %v12817_v26, %v3755_v13  ;;  %v2912_v11 = vadd.f32 %v15475_v34, %v15474_v50  ;;  %v1941_v19 = vld [vmem:[%s10701_s24 + $0x90] sm:$0xff] }
 0x4d3   : > { %9555 = vrsqrt.f32 %v12847_v27  ;;  %v4233_v29 = vmul.f32 %v4169_v36, %v1939_v59  ;;  %v4361_v52 = vmul.f32 %v4297_v33, %v2003_v4  ;;  %v4234_v44 = vmul.f32 %v4170_v5, %v1940_v22  ;;  %v15476_v59 = vld [vmem:[#allocation56_spill] sm:$0xff]  ;;  %v15477_v4 = vld [vmem:[#allocation57_spill] sm:$0xff]  ;;  %v2005_v36 = vld [vmem:[%s10708_s16 + $0x90] sm:$0xff] }
 0x4d4   : > { %v3763_v47 = vmul.f32 %v9554_v63, %v3762_v40  ;;  %v4362_v43 = vmul.f32 %v4298_v46, %v2004_v14  ;;  %v3312_v28 = vpop.f32.mrf.mxu0  ;;  %v3425_v55 = vpop.f32.mrf.mxu1  ;;  %v3760_v51 = vsel %vm3759_vm10, %v12817_v26, %v3756_v60  ;;  %v15479_v26 = vld [vmem:[#allocation166_spill] sm:$0xff]  ;;  %vm3768_vm11 = vweird.f32 %v9554_v63  ;;  %v1942_v60 = vld [vmem:[%s10701_s24 + $0x98] sm:$0xff] }
 0x4d5   : > { %v4425_v31 = vadd.f32 %v4361_v52, %v4233_v29  ;;  %v3426_v32 = vadd.f32 %v3425_v55, %v3312_v28  ;;  %8608 = vmatmul.msk.f32.gmra.mxu2 %vm3825_vm4, %v3760_v51  ;;  %8641 = vmatmul.msk.f32.gmra.mxu3 %vm3825_vm4, %v3760_v51  ;;  %v3090_v22 = vadd.f32 %v15479_v26, %v15478_v49  ;;  %v2006_v29 = vld [vmem:[%s10708_s16 + $0x98] sm:$0xff]  ;;  %vm3769_vm13 = vmor %vm3767_vm12, %vm3768_vm11  ;;  %v15480_v49 = vld [vmem:[#allocation144_spill] sm:$0xff]  ;;  %vm3777_vm15 = vweird.f32 %v12847_v27 }
 0x4d6   : > { %v3764_v30 = vmul.f32 0.5, %v3763_v47  ;;  %v4426_v0 = vadd.f32 %v4362_v43, %v4234_v44  ;;  %v15481_v26 = vld [vmem:[#allocation145_spill] sm:$0xff] }
 0x4d7   : > { %v3465_v41 = vmul.f32 0.0078125, %v3426_v32  ;;  %4767 = vmatmul.bf16.gmra.mxu0 %v15476_v59  ;;  %4856 = vmatmul.bf16.gmra.mxu1 %v15477_v4 }
 0x4d8   : > { %v3765_v58 = vsub.f32 1.5, %v3764_v30  ;;  %v4481_v13 = vpack.c.bf16 %v4426_v0, %v4425_v31  ;;  %v3971_v33 = vpop.f32.mrf.mxu2  ;;  %v4084_v14 = vpop.f32.mrf.mxu3 }
 0x4d9   : > { %v12870_v54 = vpop.eup %9555  ;;  %v12872_v5 = vadd.f32 1.1920929e-07, %v3465_v41  ;;  %v4171_v40 = vmul.f32 %v3971_v33, %v15383_v42  ;;  %v4299_v46 = vmul.f32 %v3971_v33, %v2912_v11  ;;  %v4172_v52 = vmul.f32 %v4084_v14, %v15384_v17  ;;  %v9190_v11 = vld [vmem:[#allocation11 + $0x4] sm:$0xf]  ;;  %v8652_v41 = vld [vmem:[#allocation11 + $0x8] sm:$0xf0] }
 0x4da   : > { %v3772_v44 = vmul.f32 %v12870_v54, %v12847_v27  ;;  %4513 = vst [vmem:[%s12682_s30 + $0x40] sm:$0xff] %v4481_v13  ;;  %v4300_v47 = vmul.f32 %v4084_v14, %v3090_v22  ;;  %v3766_v43 = vmul.f32 %v9554_v63, %v3765_v58  ;;  %v2915_v22 = vadd.f32 %v15481_v26, %v15480_v49  ;;  %v15482_v58 = vld [vmem:[#allocation171_spill] sm:$0xff]  ;;  %v15483_v13 = vld [vmem:[#allocation172_spill] sm:$0xff]  ;;  %v8716_v14 = vld [vmem:[#allocation11 + $0x88] sm:$0xf0] }
 0x4db   : > { %9557 = vrsqrt.f32 %v12872_v5  ;;  %v4235_v28 = vmul.f32 %v4171_v40, %v1941_v19  ;;  %v4363_v55 = vmul.f32 %v4299_v46, %v2005_v36  ;;  %v4236_v51 = vmul.f32 %v4172_v52, %v1942_v60  ;;  %v9206_v33 = vld [vmem:[#allocation11 + $0x84] sm:$0xf]  ;;  %v1944_v52 = vld [vmem:[%s10701_s24 + $0xa8] sm:$0xff] }
 0x4dc   : > { %v3773_v42 = vmul.f32 %v12870_v54, %v3772_v44  ;;  %v4364_v31 = vmul.f32 %v4300_v47, %v2006_v29  ;;  %v3315_v32 = vpop.f32.mrf.mxu0  ;;  %v3428_v17 = vpop.f32.mrf.mxu1  ;;  %v3770_v30 = vsel %vm3769_vm13, %v9554_v63, %v3766_v43  ;;  %v3093_v19 = vadd.f32 %v15483_v13, %v15482_v58  ;;  %v1943_v46 = vld [vmem:[%s10701_s24 + $0xa0] sm:$0xff] }
 0x4dd   : > { %v4427_v16 = vadd.f32 %v4363_v55, %v4235_v28  ;;  %v3429_v0 = vadd.f32 %v3428_v17, %v3315_v32  ;;  %8609 = vmatmul.msk.f32.gmra.mxu2 %vm3825_vm4, %v3770_v30  ;;  %8642 = vmatmul.msk.f32.gmra.mxu3 %vm3825_vm4, %v3770_v30  ;;  %v8655_v36 = vor.u32 %v9190_v11, %v8652_v41  ;;  %v2007_v60 = vld [vmem:[%s10708_s16 + $0xa0] sm:$0xff]  ;;  %vm3778_vm14 = vweird.f32 %v12870_v54  ;;  %v9245_v41 = vld [vmem:[#allocation16 + $0xb4] sm:$0xf0] }
 0x4de   : > { %v3774_v50 = vmul.f32 0.5, %v3773_v42  ;;  %v4428_v34 = vadd.f32 %v4364_v31, %v4236_v51  ;;  %v8719_v43 = vor.u32 %v9206_v33, %v8716_v14  ;;  %v2008_v31 = vld [vmem:[%s10708_s16 + $0xa8] sm:$0xff]  ;;  %vm3779_vm0 = vmor %vm3777_vm15, %vm3778_vm14  ;;  %vm3787_vm3 = vweird.f32 %v12872_v5 }
 0x4df   : > { %v3466_v63 = vmul.f32 0.0078125, %v3429_v0  ;;  %4914 = vmatpush.bf16.msrb.mxu2 %v8655_v36  ;;  %v8802_v0 = vld [vmem:[#allocation16 + $0x30] sm:$0xf] }
 0x4e0   : > { %v4482_v40 = vpack.c.bf16 %v4428_v34, %v4427_v16  ;;  %v3974_v29 = vpop.f32.mrf.mxu2  ;;  %v4087_v44 = vpop.f32.mrf.mxu3  ;;  %v3775_v47 = vsub.f32 1.5, %v3774_v50  ;;  %5003 = vmatpush.bf16.msrb.mxu3 %v8719_v43  ;;  %v9229_v50 = vld [vmem:[#allocation16 + $0x34] sm:$0xf0] }
 0x4e1   : > { %v12895_v28 = vpop.eup %9557  ;;  %v12897_v55 = vadd.f32 1.1920929e-07, %v3466_v63  ;;  %v4173_v42 = vmul.f32 %v3974_v29, %v15389_v2  ;;  %v4301_v51 = vmul.f32 %v3974_v29, %v2915_v22  ;;  %v4174_v32 = vmul.f32 %v4087_v44, %v15390_v38  ;;  %v8866_v38 = vld [vmem:[#allocation16 + $0xb0] sm:$0xf] }
 0x4e2   : > { %v3782_v17 = vmul.f32 %v12895_v28, %v12872_v5  ;;  %4514 = vst [vmem:[%s12682_s30 + $0x48] sm:$0xff] %v4482_v40  ;;  %v4302_v30 = vmul.f32 %v4087_v44, %v3093_v19  ;;  %v3776_v16 = vmul.f32 %v12870_v54, %v3775_v47  ;;  %v8803_v63 = vor.u32 %v9229_v50, %v8802_v0  ;;  %v15484_v40 = vld [vmem:[#allocation146_spill] sm:$0xff]  ;;  %v15487_v44 = vld [vmem:[#allocation59_spill] sm:$0xff]  ;;  %v15489_v47 = vld [vmem:[#allocation84_spill] sm:$0xff] }
 0x4e3   : > { %9559 = vrsqrt.f32 %v12897_v55  ;;  %v4237_v2 = vmul.f32 %v4173_v42, %v1943_v46  ;;  %v4365_v34 = vmul.f32 %v4301_v51, %v2007_v60  ;;  %v4238_v11 = vmul.f32 %v4174_v32, %v1944_v52  ;;  %v15485_v46 = vld [vmem:[#allocation147_spill] sm:$0xff]  ;;  %v15486_v52 = vld [vmem:[#allocation58_spill] sm:$0xff] }
 0x4e4   : > { %v3783_v49 = vmul.f32 %v12895_v28, %v3782_v17  ;;  %v4366_v26 = vmul.f32 %v4302_v30, %v2008_v31  ;;  %v3318_v22 = vpop.f32.mrf.mxu0  ;;  %v3431_v58 = vpop.f32.mrf.mxu1  ;;  %v3780_v27 = vsel %vm3779_vm0, %v12870_v54, %v3776_v16  ;;  %v8867_v14 = vor.u32 %v9245_v41, %v8866_v38  ;;  %v15488_v54 = vld [vmem:[#allocation82_spill] sm:$0xff]  ;;  %5281 = vmatpush.bf16.msra.mxu0 %v8803_v63 }
 0x4e5   : > { %v4429_v13 = vadd.f32 %v4365_v34, %v4237_v2  ;;  %v3432_v19 = vadd.f32 %v3431_v58, %v3318_v22  ;;  %8610 = vmatmul.msk.f32.gmra.mxu2 %vm3825_vm4, %v3780_v27  ;;  %8643 = vmatmul.msk.f32.gmra.mxu3 %vm3825_vm4, %v3780_v27  ;;  %v2917_v60 = vadd.f32 %v15485_v46, %v15484_v40  ;;  %v1945_v31 = vld [vmem:[%s10701_s24 + $0xb0] sm:$0xff]  ;;  %vm3788_vm2 = vweird.f32 %v12895_v28  ;;  %v1946_v34 = vld [vmem:[%s10701_s24 + $0xb8] sm:$0xff]  ;;  %v15490_v40 = vld [vmem:[#allocation148_spill] sm:$0xff] }
 0x4e6   : > { %v3784_v36 = vmul.f32 0.5, %v3783_v49  ;;  %v4430_v33 = vadd.f32 %v4366_v26, %v4238_v11  ;;  %v3095_v43 = vadd.f32 %v15489_v47, %v15488_v54  ;;  %v2009_v32 = vld [vmem:[%s10708_s16 + $0xb0] sm:$0xff]  ;;  %5370 = vmatpush.bf16.msra.mxu1 %v8867_v14  ;;  %v2010_v11 = vld [vmem:[%s10708_s16 + $0xb8] sm:$0xff]  ;;  %vm3789_vm5 = vmor %vm3787_vm3, %vm3788_vm2  ;;  %vm3797_vm7 = vweird.f32 %v12897_v55 }
 0x4e7   : > { %v3467_v29 = vmul.f32 0.0078125, %v3432_v19  ;;  %4772 = vmatmul.bf16.gmra.mxu0 %v15486_v52  ;;  %4861 = vmatmul.bf16.gmra.mxu1 %v15487_v44  ;;  %v15491_v46 = vld [vmem:[#allocation149_spill] sm:$0xff]  ;;  %v15492_v54 = vld [vmem:[#allocation86_spill] sm:$0xff]  ;;  %v15493_v47 = vld [vmem:[#allocation87_spill] sm:$0xff] }
 0x4e8   : > { %v3785_v42 = vsub.f32 1.5, %v3784_v36  ;;  %v4483_v51 = vpack.c.bf16 %v4430_v33, %v4429_v13  ;;  %v3977_v17 = vpop.f32.mrf.mxu2  ;;  %v4090_v30 = vpop.f32.mrf.mxu3 }
 0x4e9   : > { %v12923_v16 = vpop.eup %9559  ;;  %v12925_v0 = vadd.f32 1.1920929e-07, %v3467_v29  ;;  %v4175_v50 = vmul.f32 %v3977_v17, %v15395_v15  ;;  %v4303_v2 = vmul.f32 %v3977_v17, %v2917_v60  ;;  %v4176_v38 = vmul.f32 %v4090_v30, %v11947_v6 }
 0x4ea   : > { %v3792_v41 = vmul.f32 %v12923_v16, %v12897_v55  ;;  %4515 = vst [vmem:[%s12682_s30 + $0x50] sm:$0xff] %v4483_v51  ;;  %v4304_v49 = vmul.f32 %v4090_v30, %v3095_v43  ;;  %v3786_v26 = vmul.f32 %v12895_v28, %v3785_v42  ;;  %v2920_v60 = vadd.f32 %v15491_v46, %v15490_v40  ;;  %v1947_v51 = vld [vmem:[%s10701_s24 + $0xc0] sm:$0xff] }
 0x4eb   : > { %9561 = vrsqrt.f32 %v12925_v0  ;;  %v4239_v22 = vmul.f32 %v4175_v50, %v1945_v31  ;;  %v4367_v58 = vmul.f32 %v4303_v2, %v2009_v32  ;;  %v4240_v6 = vmul.f32 %v4176_v38, %v1946_v34  ;;  %v1948_v32 = vld [vmem:[%s10701_s24 + $0xc8] sm:$0xff]  ;;  %v15494_v34 = vld [vmem:[#allocation91_spill] sm:$0xff] }
 0x4ec   : > { %v3793_v15 = vmul.f32 %v12923_v16, %v3792_v41  ;;  %v4368_v5 = vmul.f32 %v4304_v49, %v2010_v11  ;;  %v3321_v27 = vpop.f32.mrf.mxu0  ;;  %v3434_v13 = vpop.f32.mrf.mxu1  ;;  %v3790_v19 = vsel %vm3789_vm5, %v12895_v28, %v3786_v26  ;;  %v3098_v43 = vadd.f32 %v15493_v47, %v15492_v54  ;;  %v2011_v28 = vld [vmem:[%s10708_s16 + $0xc0] sm:$0xff]  ;;  %v2012_v41 = vld [vmem:[%s10708_s16 + $0xc8] sm:$0xff] }
 0x4ed   : > { %v4431_v63 = vadd.f32 %v4367_v58, %v4239_v22  ;;  %v3435_v36 = vadd.f32 %v3434_v13, %v3321_v27  ;;  %8611 = vmatmul.msk.f32.gmra.mxu2 %vm3825_vm4, %v3790_v19  ;;  %8644 = vmatmul.msk.f32.gmra.mxu3 %vm3825_vm4, %v3790_v19  ;;  %vm3798_vm6 = vweird.f32 %v12923_v16  ;;  %v15495_v49 = vld [vmem:[#allocation92_spill] sm:$0xff]  ;;  %vm3807_vm10 = vweird.f32 %v12925_v0 }
 0x4ee   : > { %v3794_v33 = vmul.f32 0.5, %v3793_v15  ;;  %v4432_v14 = vadd.f32 %v4368_v5, %v4240_v6  ;;  %v9236_v6 = vld [vmem:[#allocation16 + $0x74] sm:$0xf]  ;;  %v8836_v5 = vld [vmem:[#allocation16 + $0x78] sm:$0xf0]  ;;  %vm3799_vm8 = vmor %vm3797_vm7, %vm3798_vm6 }
 0x4ef   : > { %v3468_v29 = vmul.f32 0.0078125, %v3435_v36  ;;  %v8900_v36 = vld [vmem:[#allocation16 + $0xf8] sm:$0xf0]  ;;  %v8839_v54 = vor.u32 %v9236_v6, %v8836_v5  ;;  %v15502_v5 = vld [vmem:[#allocation93_spill] sm:$0xff] }
 0x4f0   : > { %v4484_v42 = vpack.c.bf16 %v4432_v14, %v4431_v63  ;;  %v3980_v31 = vpop.f32.mrf.mxu2  ;;  %v4093_v17 = vpop.f32.mrf.mxu3  ;;  %v3795_v30 = vsub.f32 1.5, %v3794_v33  ;;  %v9252_v63 = vld [vmem:[#allocation16 + $0xf4] sm:$0xf] }
 0x4f1   : > { %v12951_v50 = vpop.eup %9561  ;;  %v12953_v2 = vadd.f32 1.1920929e-07, %v3468_v29  ;;  %v4177_v11 = vmul.f32 %v3980_v31, %v15494_v34  ;;  %v4305_v38 = vmul.f32 %v3980_v31, %v2920_v60  ;;  %v4178_v26 = vmul.f32 %v4093_v17, %v15495_v49  ;;  %v15501_v34 = vld [vmem:[#allocation61_spill] sm:$0xff]  ;;  %v2013_v49 = vld [vmem:[%s10708_s16 + $0xd0] sm:$0xff]  ;;  %5455 = vmatpush.bf16.msra.mxu2 %v8839_v54 }
 0x4f2   : > { %v3802_v22 = vmul.f32 %v12951_v50, %v12925_v0  ;;  %4516 = vst [vmem:[%s12682_s30 + $0x58] sm:$0xff] %v4484_v42  ;;  %v4306_v58 = vmul.f32 %v4093_v17, %v3098_v43  ;;  %v3796_v15 = vmul.f32 %v12923_v16, %v3795_v30  ;;  %v8903_v42 = vor.u32 %v9252_v63, %v8900_v36  ;;  %v15499_v17 = vld [vmem:[#allocation179_spill] sm:$0xff]  ;;  %v15500_v30 = vld [vmem:[#allocation60_spill] sm:$0xff]  ;;  %v9243_v54 = vld [vmem:[#allocation16 + $0xa4] sm:$0xf0] }
 0x4f3   : > { %9563 = vrsqrt.f32 %v12953_v2  ;;  %v4241_v27 = vmul.f32 %v4177_v11, %v1947_v51  ;;  %v4369_v13 = vmul.f32 %v4305_v38, %v2011_v28  ;;  %v4242_v19 = vmul.f32 %v4178_v26, %v1948_v32  ;;  %v15496_v51 = vld [vmem:[#allocation150_spill] sm:$0xff]  ;;  %v15497_v28 = vld [vmem:[#allocation151_spill] sm:$0xff]  ;;  %v15498_v32 = vld [vmem:[#allocation88_spill] sm:$0xff] }
 0x4f4   : > { %v3803_v33 = vmul.f32 %v12951_v50, %v3802_v22  ;;  %v4370_v14 = vmul.f32 %v4306_v58, %v2012_v41  ;;  %v4738_v40 = vpop.f32.mrf.mxu0  ;;  %v4827_v46 = vpop.f32.mrf.mxu1  ;;  %v3800_v55 = vsel %vm3799_vm8, %v12923_v16, %v3796_v15  ;;  %v2922_v31 = vadd.f32 %v15497_v28, %v15496_v51  ;;  %v1949_v11 = vld [vmem:[%s10701_s24 + $0xd0] sm:$0xff]  ;;  %v1950_v22 = vld [vmem:[%s10701_s24 + $0xd8] sm:$0xff]  ;;  %5544 = vmatpush.bf16.msra.mxu3 %v8903_v42 }
 0x4f5   : > { %v4433_v60 = vadd.f32 %v4369_v13, %v4241_v27  ;;  %v12968_v29 = vadd.f32 %v4827_v46, %v4738_v40  ;;  %8612 = vmatmul.msk.f32.gmra.mxu2 %vm3825_vm4, %v3800_v55  ;;  %8645 = vmatmul.msk.f32.gmra.mxu3 %vm3825_vm4, %v3800_v55  ;;  %v3100_v16 = vadd.f32 %v15499_v17, %v15498_v32  ;;  %v2014_v58 = vld [vmem:[%s10708_s16 + $0xd8] sm:$0xff]  ;;  %vm3808_vm9 = vweird.f32 %v12951_v50  ;;  %v8858_v40 = vld [vmem:[#allocation16 + $0xa0] sm:$0xf] }
 0x4f6   : > { %v3804_v47 = vmul.f32 0.5, %v3803_v33  ;;  %v4434_v43 = vadd.f32 %v4370_v14, %v4242_v19  ;;  %v15503_v19 = vld [vmem:[#allocation94_spill] sm:$0xff]  ;;  %v8794_v33 = vld [vmem:[#allocation16 + $0x20] sm:$0xf]  ;;  %v9227_v14 = vld [vmem:[#allocation16 + $0x24] sm:$0xf0]  ;;  %v8859_v17 = vor.u32 %v9243_v54, %v8858_v40  ;;  %vm3817_vm13 = vweird.f32 %v12953_v2 }
 0x4f7   : > { %4777 = vmatmul.bf16.gmra.mxu0 %v15500_v30  ;;  %4866 = vmatmul.bf16.gmra.mxu1 %v15501_v34  ;;  %vm3809_vm11 = vmor %vm3807_vm10, %vm3808_vm9  ;;  %v15508_v40 = vld [vmem:[#allocation97_spill] sm:$0xff] }
 0x4f8   : > { %v3805_v38 = vsub.f32 1.5, %v3804_v47  ;;  %v4485_v41 = vpack.c.bf16 %v4434_v43, %v4433_v60  ;;  %v3983_v26 = vpop.f32.mrf.mxu2  ;;  %v4096_v15 = vpop.f32.mrf.mxu3  ;;  %v8795_v60 = vor.u32 %v9227_v14, %v8794_v33  ;;  %5371 = vmatpush.bf16.msra.mxu1 %v8859_v17 }
 0x4f9   : > { %v9564_v6 = vpop.eup %9563  ;;  %v4179_v27 = vmul.f32 %v3983_v26, %v15502_v5  ;;  %v4307_v13 = vmul.f32 %v3983_v26, %v2922_v31  ;;  %v4180_v63 = vmul.f32 %v4096_v15, %v15503_v19  ;;  %v4308_v36 = vmul.f32 %v4096_v15, %v3100_v16  ;;  %v15505_v26 = vld [vmem:[#allocation153_spill] sm:$0xff] }
 0x4fa   : > { %v3812_v46 = vmul.f32 %v9564_v6, %v12953_v2  ;;  %4517 = vst [vmem:[%s12682_s30 + $0x60] sm:$0xff] %v4485_v41  ;;  %v3806_v55 = vmul.f32 %v12951_v50, %v3805_v38  ;;  %5282 = vmatpush.bf16.msra.mxu0 %v8795_v60  ;;  %vm3818_vm12 = vweird.f32 %v9564_v6  ;;  %v15509_v60 = vld [vmem:[#allocation98_spill] sm:$0xff] }
 0x4fb   : > { %v4243_v47 = vmul.f32 %v4179_v27, %v1949_v11  ;;  %v4371_v43 = vmul.f32 %v4307_v13, %v2013_v49  ;;  %v4244_v42 = vmul.f32 %v4180_v63, %v1950_v22  ;;  %v4372_v51 = vmul.f32 %v4308_v36, %v2014_v58  ;;  %v15504_v49 = vld [vmem:[#allocation152_spill] sm:$0xff]  ;;  %v1952_v63 = vld [vmem:[%s10701_s24 + $0xe8] sm:$0xff]  ;;  %vm3819_vm14 = vmor %vm3817_vm13, %vm3818_vm12 }
 0x4fc   : > { %v3813_v28 = vmul.f32 %v9564_v6, %v3812_v46  ;;  %v4740_v31 = vpop.f32.mrf.mxu0  ;;  %v4829_v32 = vpop.f32.mrf.mxu1  ;;  %v3810_v0 = vsel %vm3809_vm11, %v12951_v50, %v3806_v55  ;;  %v2925_v22 = vadd.f32 %v15505_v26, %v15504_v49  ;;  %v15506_v58 = vld [vmem:[#allocation184_spill] sm:$0xff]  ;;  %v15507_v50 = vld [vmem:[#allocation185_spill] sm:$0xff]  ;;  %v15510_v2 = vld [vmem:[#allocation154_spill] sm:$0xff] }
 0x4fd   : > { %v4435_v16 = vadd.f32 %v4371_v43, %v4243_v47  ;;  %v4436_v38 = vadd.f32 %v4372_v51, %v4244_v42  ;;  %v12992_v11 = vadd.f32 %v4829_v32, %v4740_v31  ;;  %8613 = vmatmul.msk.f32.gmra.mxu2 %vm3825_vm4, %v3810_v0  ;;  %8646 = vmatmul.msk.f32.gmra.mxu3 %vm3825_vm4, %v3810_v0  ;;  %v1951_v27 = vld [vmem:[%s10701_s24 + $0xe0] sm:$0xff]  ;;  %v2016_v36 = vld [vmem:[%s10708_s16 + $0xe8] sm:$0xff]  ;;  %v15511_v49 = vld [vmem:[#allocation155_spill] sm:$0xff] }
 0x4fe   : > { %v3814_v41 = vmul.f32 0.5, %v3813_v28  ;;  %v3103_v15 = vadd.f32 %v15507_v50, %v15506_v58  ;;  %v2015_v13 = vld [vmem:[%s10708_s16 + $0xe0] sm:$0xff]  ;;  %v2927_v26 = vadd.f32 %v15511_v49, %v15510_v2  ;;  %v15513_v58 = vld [vmem:[#allocation189_spill] sm:$0xff] }
 0x4ff   : > { %v4486_v5 = vpack.c.bf16 %v4436_v38, %v4435_v16  ;;  %v15520_v49 = vld [vmem:[#allocation192_spill] sm:$0xff] }
 0x500   : > { %v3986_v19 = vpop.f32.mrf.mxu2  ;;  %v4099_v33 = vpop.f32.mrf.mxu3  ;;  %v3815_v14 = vsub.f32 1.5, %v3814_v41 }
 0x501   : > { %4518 = vst [vmem:[%s12682_s30 + $0x68] sm:$0xff] %v4486_v5  ;;  %v4181_v46 = vmul.f32 %v3986_v19, %v15508_v40  ;;  %v4309_v55 = vmul.f32 %v3986_v19, %v2925_v22  ;;  %v4182_v54 = vmul.f32 %v4099_v33, %v15509_v60  ;;  %v4310_v47 = vmul.f32 %v4099_v33, %v3103_v15  ;;  %v15512_v22 = vld [vmem:[#allocation188_spill] sm:$0xff]  ;;  %v15514_v5 = vld [vmem:[#allocation62_spill] sm:$0xff] }
 0x502   : > { %v3816_v43 = vmul.f32 %v9564_v6, %v3815_v14  ;;  %v3105_v50 = vadd.f32 %v15513_v58, %v15512_v22  ;;  %v15516_v14 = vld [vmem:[#allocation99_spill] sm:$0xff] }
 0x503   : > { %v4245_v42 = vmul.f32 %v4181_v46, %v1951_v27  ;;  %v4373_v51 = vmul.f32 %v4309_v55, %v2015_v13  ;;  %v4246_v28 = vmul.f32 %v4182_v54, %v1952_v63  ;;  %v4374_v31 = vmul.f32 %v4310_v47, %v2016_v36  ;;  %v15515_v27 = vld [vmem:[#allocation63_spill] sm:$0xff]  ;;  %v2017_v13 = vld [vmem:[%s10708_s16 + $0xf0] sm:$0xff]  ;;  %v15517_v55 = vld [vmem:[#allocation100_spill] sm:$0xff] }
 0x504   : > { %v4743_v32 = vpop.f32.mrf.mxu0  ;;  %v4832_v0 = vpop.f32.mrf.mxu1  ;;  %v3820_v17 = vsel %vm3819_vm14, %v9564_v6, %v3816_v43  ;;  %v1953_v6 = vld [vmem:[%s10701_s24 + $0xf0] sm:$0xff]  ;;  %v1954_v63 = vld [vmem:[%s10701_s24 + $0xf8] sm:$0xff] }
 0x505   : > { %v4437_v16 = vadd.f32 %v4373_v51, %v4245_v42  ;;  %v4438_v38 = vadd.f32 %v4374_v31, %v4246_v28  ;;  %v13008_v41 = vadd.f32 %v4832_v0, %v4743_v32  ;;  %8614 = vmatmul.msk.f32.gmra.mxu2 %vm3825_vm4, %v3820_v17  ;;  %8647 = vmatmul.msk.f32.gmra.mxu3 %vm3825_vm4, %v3820_v17  ;;  %v2018_v36 = vld [vmem:[%s10708_s16 + $0xf8] sm:$0xff] }
 0x507   : > { %v4487_v15 = vpack.c.bf16 %v4438_v38, %v4437_v16  ;;  %4782 = vmatmul.bf16.gmra.mxu0 %v15514_v5  ;;  %4871 = vmatmul.bf16.gmra.mxu1 %v15515_v27  ;;  %v15518_v16 = vld [vmem:[#allocation156_spill] sm:$0xff]  ;;  %v15519_v38 = vld [vmem:[#allocation157_spill] sm:$0xff] }
 0x508   : > { %v3989_v19 = vpop.f32.mrf.mxu2  ;;  %v4102_v33 = vpop.f32.mrf.mxu3  ;;  %v2930_v2 = vadd.f32 %v15519_v38, %v15518_v16 }
 0x509   : > { %4519 = vst [vmem:[%s12682_s30 + $0x70] sm:$0xff] %v4487_v15  ;;  %v4183_v40 = vmul.f32 %v3989_v19, %v15516_v14  ;;  %v4311_v46 = vmul.f32 %v3989_v19, %v2927_v26  ;;  %v4184_v60 = vmul.f32 %v4102_v33, %v15517_v55  ;;  %v4312_v54 = vmul.f32 %v4102_v33, %v3105_v50  ;;  %v15521_v26 = vld [vmem:[#allocation193_spill] sm:$0xff]  ;;  %v1955_v50 = vld [vmem:[%s10701_s24 + $0x100] sm:$0xff] }
 0x50a   : > { %v3108_v22 = vadd.f32 %v15521_v26, %v15520_v49  ;;  %v2019_v15 = vld [vmem:[%s10708_s16 + $0x100] sm:$0xff]  ;;  %v2020_v19 = vld [vmem:[%s10708_s16 + $0x108] sm:$0xff] }
 0x50b   : > { %v4247_v47 = vmul.f32 %v4183_v40, %v1953_v6  ;;  %v4375_v43 = vmul.f32 %v4311_v46, %v2017_v13  ;;  %v4248_v42 = vmul.f32 %v4184_v60, %v1954_v63  ;;  %v4376_v51 = vmul.f32 %v4312_v54, %v2018_v36  ;;  %v1956_v13 = vld [vmem:[%s10701_s24 + $0x108] sm:$0xff]  ;;  %v15523_v40 = vld [vmem:[#allocation102_spill] sm:$0xff]  ;;  %v9234_v60 = vld [vmem:[#allocation16 + $0x64] sm:$0xf] }
 0x50c   : > { %v4745_v28 = vpop.f32.mrf.mxu0  ;;  %v4834_v31 = vpop.f32.mrf.mxu1  ;;  %v15522_v36 = vld [vmem:[#allocation101_spill] sm:$0xff] }
 0x50d   : > { %v4439_v32 = vadd.f32 %v4375_v43, %v4247_v47  ;;  %v4440_v0 = vadd.f32 %v4376_v51, %v4248_v42  ;;  %v13025_v17 = vadd.f32 %v4834_v31, %v4745_v28  ;;  %4915 = vmatmul.bf16.vlgmr.msrb.gmra.mxu2 %v15440_v45  ;;  %5004 = vmatmul.bf16.vlgmr.msrb.gmra.mxu3 %v15441_v25  ;;  %v8828_v54 = vld [vmem:[#allocation16 + $0x68] sm:$0xf0]  ;;  %v9250_v43 = vld [vmem:[#allocation16 + $0xe4] sm:$0xf] }
 0x50e   : > { %v8831_v47 = vor.u32 %v9234_v60, %v8828_v54  ;;  %v8892_v42 = vld [vmem:[#allocation16 + $0xe8] sm:$0xf0]  ;;  %v15530_v54 = vld [vmem:[#allocation103_spill] sm:$0xff] }
 0x50f   : > { %v4488_v58 = vpack.c.bf16 %v4440_v0, %v4439_v32  ;;  %v8895_v38 = vor.u32 %v9250_v43, %v8892_v42  ;;  %v15531_v42 = vld [vmem:[#allocation104_spill] sm:$0xff] }
 0x510   : > { %v3992_v6 = vpop.f32.mrf.mxu2  ;;  %v4105_v63 = vpop.f32.mrf.mxu3  ;;  %5456 = vmatpush.bf16.msra.mxu2 %v8831_v47 }
 0x511   : > { %4520 = vst [vmem:[%s12682_s30 + $0x78] sm:$0xff] %v4488_v58  ;;  %v4185_v33 = vmul.f32 %v3992_v6, %v15522_v36  ;;  %v4313_v14 = vmul.f32 %v3992_v6, %v2930_v2  ;;  %v4186_v46 = vmul.f32 %v4105_v63, %v15523_v40  ;;  %v4314_v55 = vmul.f32 %v4105_v63, %v3108_v22  ;;  %v15524_v22 = vld [vmem:[#allocation158_spill] sm:$0xff]  ;;  %v15525_v58 = vld [vmem:[#allocation159_spill] sm:$0xff] }
 0x512   : > { %5545 = vmatpush.bf16.msra.mxu3 %v8895_v38  ;;  %v15527_v6 = vld [vmem:[#allocation195_spill] sm:$0xff] }
 0x513   : > { %v4249_v51 = vmul.f32 %v4185_v33, %v1955_v50  ;;  %v4377_v28 = vmul.f32 %v4313_v14, %v2019_v15  ;;  %v4250_v31 = vmul.f32 %v4186_v46, %v1956_v13  ;;  %v4378_v32 = vmul.f32 %v4314_v55, %v2020_v19  ;;  %v15526_v15 = vld [vmem:[#allocation194_spill] sm:$0xff]  ;;  %v15529_v36 = vld [vmem:[#allocation67_spill] sm:$0xff] }
 0x514   : > { %v4748_v0 = vpop.f32.mrf.mxu0  ;;  %v4837_v16 = vpop.f32.mrf.mxu1  ;;  %v2932_v50 = vadd.f32 %v15525_v58, %v15524_v22  ;;  %v3110_v13 = vadd.f32 %v15527_v6, %v15526_v15  ;;  %v15528_v19 = vld [vmem:[#allocation66_spill] sm:$0xff]  ;;  %v1958_v46 = vld [vmem:[%s10701_s24 + $0x118] sm:$0xff] }
 0x515   : > { %v4441_v2 = vadd.f32 %v4377_v28, %v4249_v51  ;;  %v4442_v49 = vadd.f32 %v4378_v32, %v4250_v31  ;;  %v13040_v26 = vadd.f32 %v4837_v16, %v4748_v0  ;;  %v1957_v33 = vld [vmem:[%s10701_s24 + $0x110] sm:$0xff]  ;;  %v2022_v55 = vld [vmem:[%s10708_s16 + $0x118] sm:$0xff] }
 0x516   : > { %v2021_v14 = vld [vmem:[%s10708_s16 + $0x110] sm:$0xff]  ;;  %v9225_v32 = vld [vmem:[#allocation16 + $0x14] sm:$0xf0] }
 0x517   : > { %v4489_v63 = vpack.c.bf16 %v4442_v49, %v4441_v2  ;;  %4787 = vmatmul.bf16.gmra.mxu0 %v15528_v19  ;;  %4876 = vmatmul.bf16.gmra.mxu1 %v15529_v36  ;;  %v8786_v31 = vld [vmem:[#allocation16 + $0x10] sm:$0xf]  ;;  %v9241_v38 = vld [vmem:[#allocation16 + $0x94] sm:$0xf0] }
 0x518   : > { %v3995_v40 = vpop.f32.mrf.mxu2  ;;  %v4108_v60 = vpop.f32.mrf.mxu3  ;;  %v8787_v0 = vor.u32 %v9225_v32, %v8786_v31  ;;  %v8850_v16 = vld [vmem:[#allocation16 + $0x90] sm:$0xf]  ;;  %v15535_v32 = vld [vmem:[#allocation105_spill] sm:$0xff] }
 0x519   : > { %4521 = vst [vmem:[%s12682_s30 + $0x80] sm:$0xff] %v4489_v63  ;;  %v4187_v47 = vmul.f32 %v3995_v40, %v15530_v54  ;;  %v4315_v43 = vmul.f32 %v3995_v40, %v2932_v50  ;;  %v4188_v51 = vmul.f32 %v4108_v60, %v15531_v42  ;;  %v4316_v28 = vmul.f32 %v4108_v60, %v3110_v13 }
 0x51a   : > { %5283 = vmatpush.bf16.msra.mxu0 %v8787_v0  ;;  %v8851_v50 = vor.u32 %v9241_v38, %v8850_v16  ;;  %v15536_v38 = vld [vmem:[#allocation106_spill] sm:$0xff] }
 0x51b   : > { %v4251_v2 = vmul.f32 %v4187_v47, %v1957_v33  ;;  %v4379_v49 = vmul.f32 %v4315_v43, %v2021_v14  ;;  %v4252_v22 = vmul.f32 %v4188_v51, %v1958_v46  ;;  %v4380_v58 = vmul.f32 %v4316_v28, %v2022_v55  ;;  %v15532_v33 = vld [vmem:[#allocation160_spill] sm:$0xff]  ;;  %v15533_v14 = vld [vmem:[#allocation161_spill] sm:$0xff] }
 0x51c   : > { %v4750_v15 = vpop.f32.mrf.mxu0  ;;  %v4839_v6 = vpop.f32.mrf.mxu1  ;;  %5372 = vmatpush.bf16.msra.mxu1 %v8851_v50  ;;  %v2935_v46 = vadd.f32 %v15533_v14, %v15532_v33  ;;  %v15534_v55 = vld [vmem:[#allocation196_spill] sm:$0xff]  ;;  %v1960_v51 = vld [vmem:[%s10701_s24 + $0x128] sm:$0xff]  ;;  %v15537_v14 = vld [vmem:[#allocation162_spill] sm:$0xff] }
 0x51d   : > { %v4443_v63 = vadd.f32 %v4379_v49, %v4251_v2  ;;  %v4444_v13 = vadd.f32 %v4380_v58, %v4252_v22  ;;  %v13055_v40 = vadd.f32 %v4839_v6, %v4750_v15  ;;  %4920 = vmatmul.bf16.gmra.mxu2 %v15444_v37  ;;  %5009 = vmatmul.bf16.gmra.mxu3 %v15445_v20  ;;  %v1959_v47 = vld [vmem:[%s10701_s24 + $0x120] sm:$0xff]  ;;  %v2024_v28 = vld [vmem:[%s10708_s16 + $0x128] sm:$0xff] }
 0x51e   : > { %v3113_v60 = vadd.f32 %v12468_v39, %v15534_v55  ;;  %v2023_v43 = vld [vmem:[%s10708_s16 + $0x120] sm:$0xff] }
 0x51f   : > { %v4490_v54 = vpack.c.bf16 %v4444_v13, %v4443_v63 }
 0x520   : > { %v3998_v42 = vpop.f32.mrf.mxu2  ;;  %v4111_v31 = vpop.f32.mrf.mxu3 }
 0x521   : > { %4522 = vst [vmem:[%s12682_s30 + $0x88] sm:$0xff] %v4490_v54  ;;  %v4189_v0 = vmul.f32 %v3998_v42, %v15535_v32  ;;  %v4317_v16 = vmul.f32 %v3998_v42, %v2935_v46  ;;  %v4190_v2 = vmul.f32 %v4111_v31, %v15536_v38  ;;  %v4318_v49 = vmul.f32 %v4111_v31, %v3113_v60  ;;  %v15538_v46 = vld [vmem:[#allocation163_spill] sm:$0xff]  ;;  %v1961_v42 = vld [vmem:[%s10701_s24 + $0x130] sm:$0xff] }
 0x522   : > { %v2937_v55 = vadd.f32 %v15538_v46, %v15537_v14  ;;  %v3115_v60 = vadd.f32 %v12478_v3, %v12476_v10  ;;  %v1962_v31 = vld [vmem:[%s10701_s24 + $0x138] sm:$0xff]  ;;  %v15544_v14 = vld [vmem:[#allocation197_spill] sm:$0xff] }
 0x523   : > { %v4253_v22 = vmul.f32 %v4189_v0, %v1959_v47  ;;  %v4381_v58 = vmul.f32 %v4317_v16, %v2023_v43  ;;  %v4254_v39 = vmul.f32 %v4190_v2, %v1960_v51  ;;  %v4382_v15 = vmul.f32 %v4318_v49, %v2024_v28  ;;  %v15539_v47 = vld [vmem:[#allocation72_spill] sm:$0xff]  ;;  %v15540_v43 = vld [vmem:[#allocation73_spill] sm:$0xff]  ;;  %v2025_v51 = vld [vmem:[%s10708_s16 + $0x130] sm:$0xff] }
 0x524   : > { %v4753_v6 = vpop.f32.mrf.mxu0  ;;  %v4842_v50 = vpop.f32.mrf.mxu1  ;;  %v2026_v32 = vld [vmem:[%s10708_s16 + $0x138] sm:$0xff]  ;;  %v3118_v46 = vadd.f32 %v15544_v14, %v12486_v56 }
 0x525   : > { %v4445_v63 = vadd.f32 %v4381_v58, %v4253_v22  ;;  %v4446_v13 = vadd.f32 %v4382_v15, %v4254_v39  ;;  %v13070_v33 = vadd.f32 %v4842_v50, %v4753_v6 }
 0x527   : > { %v4491_v54 = vpack.c.bf16 %v4446_v13, %v4445_v63  ;;  %4792 = vmatmul.bf16.gmra.mxu0 %v15539_v47  ;;  %4881 = vmatmul.bf16.gmra.mxu1 %v15540_v43 }
 0x528   : > { %v4001_v28 = vpop.f32.mrf.mxu2  ;;  %v4114_v0 = vpop.f32.mrf.mxu3 }
 0x529   : > { %4523 = vst [vmem:[%s12682_s30 + $0x90] sm:$0xff] %v4491_v54  ;;  %v4191_v16 = vmul.f32 %v4001_v28, %v12037_v57  ;;  %v4319_v38 = vmul.f32 %v4001_v28, %v2937_v55  ;;  %v4192_v2 = vmul.f32 %v4114_v0, %v12039_v53  ;;  %v4320_v49 = vmul.f32 %v4114_v0, %v3115_v60  ;;  %v15542_v57 = vld [vmem:[#allocation64_spill] sm:$0xff]  ;;  %v15543_v53 = vld [vmem:[#allocation65_spill] sm:$0xff] }
 0x52a   : > { %v2940_v13 = vadd.f32 %v15543_v53, %v15542_v57  ;;  %v1963_v60 = vld [vmem:[%s10701_s24 + $0x140] sm:$0xff]  ;;  %v2028_v28 = vld [vmem:[%s10708_s16 + $0x148] sm:$0xff] }
 0x52b   : > { %v4255_v10 = vmul.f32 %v4191_v16, %v1961_v42  ;;  %v4383_v3 = vmul.f32 %v4319_v38, %v2025_v51  ;;  %v4256_v22 = vmul.f32 %v4192_v2, %v1962_v31  ;;  %v4384_v58 = vmul.f32 %v4320_v49, %v2026_v32  ;;  %v2027_v54 = vld [vmem:[%s10708_s16 + $0x140] sm:$0xff]  ;;  %v1964_v51 = vld [vmem:[%s10701_s24 + $0x148] sm:$0xff]  ;;  %v15545_v32 = vld [vmem:[#allocation107_spill] sm:$0xff] }
 0x52c   : > { %v4755_v39 = vpop.f32.mrf.mxu0  ;;  %v4844_v15 = vpop.f32.mrf.mxu1  ;;  %v15546_v38 = vld [vmem:[#allocation108_spill] sm:$0xff] }
 0x52d   : > { %v4447_v6 = vadd.f32 %v4383_v3, %v4255_v10  ;;  %v4448_v50 = vadd.f32 %v4384_v58, %v4256_v22  ;;  %v13085_v63 = vadd.f32 %v4844_v15, %v4755_v39  ;;  %4925 = vmatmul.bf16.gmra.mxu2 %v15449_v62  ;;  %5014 = vmatmul.bf16.gmra.mxu3 %v15450_v9  ;;  %v9232_v10 = vld [vmem:[#allocation16 + $0x54] sm:$0xf]  ;;  %v8820_v3 = vld [vmem:[#allocation16 + $0x58] sm:$0xf0] }
 0x52e   : > { %v8823_v22 = vor.u32 %v9232_v10, %v8820_v3  ;;  %v9248_v58 = vld [vmem:[#allocation16 + $0xd4] sm:$0xf]  ;;  %v8884_v39 = vld [vmem:[#allocation16 + $0xd8] sm:$0xf0]  ;;  %v15552_v3 = vld [vmem:[#allocation109_spill] sm:$0xff] }
 0x52f   : > { %15541 = vst [vmem:[#allocation131_spill] sm:$0xff] %v13085_v63  ;;  %v4492_v55 = vpack.c.bf16 %v4448_v50, %v4447_v6 }
 0x530   : > { %v4004_v42 = vpop.f32.mrf.mxu2  ;;  %v4117_v31 = vpop.f32.mrf.mxu3  ;;  %5457 = vmatpush.bf16.msra.mxu2 %v8823_v22 }
 0x531   : > { %4524 = vst [vmem:[%s12682_s30 + $0x98] sm:$0xff] %v4492_v55  ;;  %v4193_v0 = vmul.f32 %v4004_v42, %v15545_v32  ;;  %v4321_v16 = vmul.f32 %v4004_v42, %v2940_v13  ;;  %v4194_v2 = vmul.f32 %v4117_v31, %v15546_v38  ;;  %v4322_v49 = vmul.f32 %v4117_v31, %v3118_v46  ;;  %v15548_v42 = vld [vmem:[#allocation68_spill] sm:$0xff]  ;;  %v15549_v31 = vld [vmem:[#allocation69_spill] sm:$0xff]  ;;  %v15551_v32 = vld [vmem:[#allocation79_spill] sm:$0xff] }
 0x532   : > { %v8887_v13 = vor.u32 %v9248_v58, %v8884_v39  ;;  %v15553_v39 = vld [vmem:[#allocation110_spill] sm:$0xff] }
 0x533   : > { %v4257_v56 = vmul.f32 %v4193_v0, %v1963_v60  ;;  %v4385_v15 = vmul.f32 %v4321_v16, %v2027_v54  ;;  %v4258_v6 = vmul.f32 %v4194_v2, %v1964_v51  ;;  %v4386_v50 = vmul.f32 %v4322_v49, %v2028_v28  ;;  %v15550_v28 = vld [vmem:[#allocation78_spill] sm:$0xff]  ;;  %v1966_v2 = vld [vmem:[%s10701_s24 + $0x158] sm:$0xff] }
 0x534   : > { %v4758_v57 = vpop.f32.mrf.mxu0  ;;  %v4847_v53 = vpop.f32.mrf.mxu1  ;;  %5546 = vmatpush.bf16.msra.mxu3 %v8887_v13  ;;  %v2942_v60 = vadd.f32 %v15549_v31, %v15548_v42  ;;  %v3120_v54 = vadd.f32 %v12504_v18, %v12502_v35  ;;  %v1965_v0 = vld [vmem:[%s10701_s24 + $0x150] sm:$0xff]  ;;  %v2030_v49 = vld [vmem:[%s10708_s16 + $0x158] sm:$0xff]  ;;  %v9223_v35 = vld [vmem:[#allocation16 + $0x4] sm:$0xf0] }
 0x535   : > { %v4449_v14 = vadd.f32 %v4385_v15, %v4257_v56  ;;  %v4450_v46 = vadd.f32 %v4386_v50, %v4258_v6  ;;  %v13100_v55 = vadd.f32 %v4847_v53, %v4758_v57  ;;  %v2029_v16 = vld [vmem:[%s10708_s16 + $0x150] sm:$0xff]  ;;  %v8778_v6 = vld [vmem:[#allocation16] sm:$0xf]  ;;  %v9239_v57 = vld [vmem:[#allocation16 + $0x84] sm:$0xf0] }
 0x536   : > { %v8779_v18 = vor.u32 %v9223_v35, %v8778_v6  ;;  %v8842_v50 = vld [vmem:[#allocation16 + $0x80] sm:$0xf]  ;;  %v2032_v6 = vld [vmem:[%s10708_s16 + $0x168] sm:$0xff] }
 0x537   : > { %15547 = vst [vmem:[#allocation48_spill] sm:$0xff] %v13100_v55  ;;  %v4493_v51 = vpack.c.bf16 %v4450_v46, %v4449_v14  ;;  %4797 = vmatmul.bf16.gmra.mxu0 %v15550_v28  ;;  %4886 = vmatmul.bf16.gmra.mxu1 %v15551_v32  ;;  %v8868_v55 = vld [vmem:[#allocation16 + $0xb8] sm:$0xf0] }
 0x538   : > { %v4007_v38 = vpop.f32.mrf.mxu2  ;;  %v4120_v10 = vpop.f32.mrf.mxu3  ;;  %5284 = vmatpush.bf16.msra.mxu0 %v8779_v18  ;;  %v9693_v18 = vld [vmem:[%s15279_s3 + $0x70] sm:$0xff] }
 0x539   : > { %4525 = vst [vmem:[%s12682_s30 + $0xa0] sm:$0xff] %v4493_v51  ;;  %v4195_v22 = vmul.f32 %v4007_v38, %v15552_v3  ;;  %v4323_v58 = vmul.f32 %v4007_v38, %v2942_v60  ;;  %v4196_v56 = vmul.f32 %v4120_v10, %v15553_v39  ;;  %v4324_v15 = vmul.f32 %v4120_v10, %v3120_v54  ;;  %v15556_v38 = vld [vmem:[#allocation165_spill] sm:$0xff]  ;;  %v2031_v39 = vld [vmem:[%s10708_s16 + $0x160] sm:$0xff] }
 0x53a   : > { %v8843_v51 = vor.u32 %v9239_v57, %v8842_v50  ;;  %v15557_v50 = vld [vmem:[#allocation111_spill] sm:$0xff]  ;;  %v15558_v57 = vld [vmem:[#allocation112_spill] sm:$0xff] }
 0x53b   : > { %v4259_v53 = vmul.f32 %v4195_v22, %v1965_v0  ;;  %v4387_v13 = vmul.f32 %v4323_v58, %v2029_v16  ;;  %v4260_v14 = vmul.f32 %v4196_v56, %v1966_v2  ;;  %v4388_v46 = vmul.f32 %v4324_v15, %v2030_v49  ;;  %v9691_v0 = vld [vmem:[%s15279_s3 + $0x78] sm:$0xff]  ;;  %v15555_v16 = vld [vmem:[#allocation164_spill] sm:$0xff]  ;;  %v1968_v15 = vld [vmem:[%s10701_s24 + $0x168] sm:$0xff] }
 0x53c   : > { %v4760_v42 = vpop.f32.mrf.mxu0  ;;  %v4849_v31 = vpop.f32.mrf.mxu1  ;;  %5373 = vmatpush.bf16.msra.mxu1 %v8843_v51  ;;  %5697 = vmatpush.msrb.mxu0 %v9691_v0  ;;  %v2945_v2 = vadd.f32 %v15556_v38, %v15555_v16  ;;  %v3123_v49 = vadd.f32 %v12521_v12, %v12519_v23  ;;  %v1967_v22 = vld [vmem:[%s10701_s24 + $0x160] sm:$0xff]  ;;  %v9692_v58 = vld [vmem:[%s15279_s3 + $0xf8] sm:$0xff]  ;;  %v9697_v38 = vld [vmem:[%s15279_s3 + $0x60] sm:$0xff] }
 0x53d   : > { %v4451_v3 = vadd.f32 %v4387_v13, %v4259_v53  ;;  %v4452_v60 = vadd.f32 %v4388_v46, %v4260_v14  ;;  %v13115_v54 = vadd.f32 %v4849_v31, %v4760_v42  ;;  %4930 = vmatmul.bf16.gmra.mxu2 %v15453_v8  ;;  %5019 = vmatmul.bf16.gmra.mxu3 %v15454_v48  ;;  %v9694_v14 = vld [vmem:[%s15279_s3 + $0xf0] sm:$0xff]  ;;  %v9695_v46 = vld [vmem:[%s15279_s3 + $0x68] sm:$0xff] }
 0x53e   : > { %5698 = vmatpush.msrb.mxu0 %v9693_v18  ;;  %v9696_v16 = vld [vmem:[%s15279_s3 + $0xe8] sm:$0xff] }
 0x53f   : > { %15554 = vst [vmem:[#allocation132_spill] sm:$0xff] %v13115_v54  ;;  %v4494_v10 = vpack.c.bf16 %v4452_v60, %v4451_v3 }
 0x540   : > { %5810 = vmatpush.msrb.mxu1 %v9692_v58  ;;  %v4010_v56 = vpop.f32.mrf.mxu2  ;;  %v4123_v35 = vpop.f32.mrf.mxu3  ;;  %5699 = vmatpush.msrb.mxu0 %v9695_v46  ;;  %v9699_v58 = vld [vmem:[%s15279_s3 + $0x58] sm:$0xff]  ;;  %v2034_v46 = vld [vmem:[%s10708_s16 + $0x178] sm:$0xff] }
 0x541   : > { %4526 = vst [vmem:[%s12682_s30 + $0xa8] sm:$0xff] %v4494_v10  ;;  %v4197_v23 = vmul.f32 %v4010_v56, %v15557_v50  ;;  %v4325_v12 = vmul.f32 %v4010_v56, %v2945_v2  ;;  %v4198_v53 = vmul.f32 %v4123_v35, %v15558_v57  ;;  %v4326_v13 = vmul.f32 %v4123_v35, %v3123_v49  ;;  %v15561_v56 = vld [vmem:[#allocation168_spill] sm:$0xff]  ;;  %v15563_v35 = vld [vmem:[#allocation199_spill] sm:$0xff]  ;;  %v1969_v57 = vld [vmem:[%s10701_s24 + $0x170] sm:$0xff] }
 0x542   : > { %5811 = vmatpush.msrb.mxu1 %v9694_v14  ;;  %5700 = vmatpush.msrb.mxu0 %v9697_v38  ;;  %v1970_v14 = vld [vmem:[%s10701_s24 + $0x178] sm:$0xff] }
 0x543   : > { %v4261_v42 = vmul.f32 %v4197_v23, %v1967_v22  ;;  %v4389_v31 = vmul.f32 %v4325_v12, %v2031_v39  ;;  %v4262_v51 = vmul.f32 %v4198_v53, %v1968_v15  ;;  %v4390_v3 = vmul.f32 %v4326_v13, %v2032_v6  ;;  %v9698_v22 = vld [vmem:[%s15279_s3 + $0xe0] sm:$0xff]  ;;  %v15562_v6 = vld [vmem:[#allocation198_spill] sm:$0xff]  ;;  %v15565_v12 = vld [vmem:[#allocation85_spill] sm:$0xff] }
 0x544   : > { %v4763_v60 = vpop.f32.mrf.mxu0  ;;  %v4852_v0 = vpop.f32.mrf.mxu1  ;;  %5812 = vmatpush.msrb.mxu1 %v9696_v16  ;;  %5701 = vmatpush.msrb.mxu0 %v9699_v58  ;;  %v15560_v39 = vld [vmem:[#allocation167_spill] sm:$0xff]  ;;  %v3125_v18 = vadd.f32 %v15563_v35, %v15562_v6  ;;  %v2033_v53 = vld [vmem:[%s10708_s16 + $0x170] sm:$0xff] }
 0x545   : > { %v4453_v2 = vadd.f32 %v4389_v31, %v4261_v42  ;;  %v4454_v49 = vadd.f32 %v4390_v3, %v4262_v51  ;;  %v13151_v10 = vadd.f32 %v4852_v0, %v4763_v60  ;;  %v2947_v15 = vadd.f32 %v15561_v56, %v15560_v39  ;;  %v15564_v23 = vld [vmem:[#allocation83_spill] sm:$0xff]  ;;  %v9700_v31 = vld [vmem:[%s15279_s3 + $0xd8] sm:$0xff]  ;;  %v9701_v51 = vld [vmem:[%s15279_s3 + $0x50] sm:$0xff] }
 0x546   : > { %5813 = vmatpush.msrb.mxu1 %v9698_v22  ;;  %5702 = vmatpush.msrb.mxu0 %v9701_v51  ;;  %v15566_v3 = vld [vmem:[#allocation113_spill] sm:$0xff]  ;;  %v15567_v16 = vld [vmem:[#allocation114_spill] sm:$0xff]  ;;  %v9703_v22 = vld [vmem:[%s15279_s3 + $0x48] sm:$0xff] }
 0x547   : > { %15559 = vst [vmem:[#allocation133_spill] sm:$0xff] %v13151_v10  ;;  %v4495_v50 = vpack.c.bf16 %v4454_v49, %v4453_v2  ;;  %4802 = vmatmul.bf16.gmra.mxu0 %v15564_v23  ;;  %4891 = vmatmul.bf16.gmra.mxu1 %v15565_v12  ;;  %v9702_v49 = vld [vmem:[%s15279_s3 + $0xd0] sm:$0xff]  ;;  %v15594_v10 = vld [vmem:[#allocation206_spill] sm:$0xff] }
 0x548   : > { %v4013_v13 = vpop.f32.mrf.mxu2  ;;  %v4126_v42 = vpop.f32.mrf.mxu3  ;;  %5814 = vmatpush.msrb.mxu1 %v9700_v31  ;;  %5703 = vmatpush.msrb.mxu0 %v9703_v22  ;;  %v15570_v31 = vld [vmem:[#allocation170_spill] sm:$0xff]  ;;  %v2036_v22 = vld [vmem:[%s10708_s16 + $0x188] sm:$0xff] }
 0x549   : > { %4527 = vst [vmem:[%s12682_s30 + $0xb0] sm:$0xff] %v4495_v50  ;;  %v4199_v60 = vmul.f32 %v4013_v13, %v15566_v3  ;;  %v4327_v0 = vmul.f32 %v4013_v13, %v2947_v15  ;;  %v4200_v38 = vmul.f32 %v4126_v42, %v15567_v16  ;;  %v4328_v2 = vmul.f32 %v4126_v42, %v3125_v18  ;;  %v9704_v15 = vld [vmem:[%s15279_s3 + $0xc8] sm:$0xff]  ;;  %v9705_v18 = vld [vmem:[%s15279_s3 + $0x40] sm:$0xff]  ;;  %v15569_v42 = vld [vmem:[#allocation169_spill] sm:$0xff] }
 0x54a   : > { %5815 = vmatpush.msrb.mxu1 %v9702_v49  ;;  %5704 = vmatpush.msrb.mxu0 %v9705_v18  ;;  %v2950_v51 = vadd.f32 %v15570_v31, %v15569_v42  ;;  %v15571_v3 = vld [vmem:[#allocation200_spill] sm:$0xff]  ;;  %v1972_v49 = vld [vmem:[%s10701_s24 + $0x188] sm:$0xff] }
 0x54b   : > { %v4263_v58 = vmul.f32 %v4199_v60, %v1969_v57  ;;  %v4391_v39 = vmul.f32 %v4327_v0, %v2033_v53  ;;  %v4264_v56 = vmul.f32 %v4200_v38, %v1970_v14  ;;  %v4392_v6 = vmul.f32 %v4328_v2, %v2034_v46  ;;  %v9706_v14 = vld [vmem:[%s15279_s3 + $0xc0] sm:$0xff]  ;;  %v9707_v46 = vld [vmem:[%s15279_s3 + $0x38] sm:$0xff]  ;;  %v1971_v16 = vld [vmem:[%s10701_s24 + $0x180] sm:$0xff] }
 0x54c   : > { %v4765_v35 = vpop.f32.mrf.mxu0  ;;  %v4854_v50 = vpop.f32.mrf.mxu1  ;;  %5816 = vmatpush.msrb.mxu1 %v9704_v15  ;;  %5705 = vmatpush.msrb.mxu0 %v9707_v46  ;;  %v3128_v60 = vadd.f32 %v15571_v3, %v12545_v1  ;;  %v2035_v38 = vld [vmem:[%s10708_s16 + $0x180] sm:$0xff]  ;;  %v8876_v42 = vld [vmem:[#allocation16 + $0xc8] sm:$0xf0] }
 0x54d   : > { %v4455_v13 = vadd.f32 %v4391_v39, %v4263_v58  ;;  %v4456_v57 = vadd.f32 %v4392_v6, %v4264_v56  ;;  %v13190_v53 = vadd.f32 %v4854_v50, %v4765_v35  ;;  %4935 = vmatmul.bf16.gmra.mxu2 %v15457_v21  ;;  %5024 = vmatmul.bf16.gmra.mxu3 %v15458_v7  ;;  %v9708_v39 = vld [vmem:[%s15279_s3 + $0xb8] sm:$0xff]  ;;  %v9709_v56 = vld [vmem:[%s15279_s3 + $0x30] sm:$0xff]  ;;  %v15572_v6 = vld [vmem:[#allocation115_spill] sm:$0xff] }
 0x54e   : > { %5817 = vmatpush.msrb.mxu1 %v9706_v14  ;;  %5706 = vmatpush.msrb.mxu0 %v9709_v56  ;;  %v15573_v50 = vld [vmem:[#allocation116_spill] sm:$0xff]  ;;  %v9710_v31 = vld [vmem:[%s15279_s3 + $0xb0] sm:$0xff] }
 0x54f   : > { %15568 = vst [vmem:[#allocation134_spill] sm:$0xff] %v13190_v53  ;;  %v4496_v0 = vpack.c.bf16 %v4456_v57, %v4455_v13  ;;  %v9230_v13 = vld [vmem:[#allocation16 + $0x44] sm:$0xf]  ;;  %v8812_v57 = vld [vmem:[#allocation16 + $0x48] sm:$0xf0] }
 0x550   : > { %v4016_v2 = vpop.f32.mrf.mxu2  ;;  %v4129_v58 = vpop.f32.mrf.mxu3  ;;  %5818 = vmatpush.msrb.mxu1 %v9708_v39  ;;  %v8815_v14 = vor.u32 %v9230_v13, %v8812_v57  ;;  %v9246_v46 = vld [vmem:[#allocation16 + $0xc4] sm:$0xf] }
 0x551   : > { %4528 = vst [vmem:[%s12682_s30 + $0xb8] sm:$0xff] %v4496_v0  ;;  %v4201_v1 = vmul.f32 %v4016_v2, %v15572_v6  ;;  %v4329_v35 = vmul.f32 %v4016_v2, %v2950_v51  ;;  %v4202_v15 = vmul.f32 %v4129_v58, %v15573_v50  ;;  %v4330_v18 = vmul.f32 %v4129_v58, %v3128_v60  ;;  %v9711_v3 = vld [vmem:[%s15279_s3 + $0x28] sm:$0xff] }
 0x552   : > { %5819 = vmatpush.msrb.mxu1 %v9710_v31  ;;  %5707 = vmatpush.msrb.mxu0 %v9711_v3  ;;  %v8879_v56 = vor.u32 %v9246_v46, %v8876_v42  ;;  %v9712_v6 = vld [vmem:[%s15279_s3 + $0xa8] sm:$0xff]  ;;  %v15579_v46 = vld [vmem:[#allocation89_spill] sm:$0xff]  ;;  %v15580_v42 = vld [vmem:[#allocation90_spill] sm:$0xff] }
 0x553   : > { %v4265_v0 = vmul.f32 %v4201_v1, %v1971_v16  ;;  %v4393_v51 = vmul.f32 %v4329_v35, %v2035_v38  ;;  %v4266_v2 = vmul.f32 %v4202_v15, %v1972_v49  ;;  %v4394_v39 = vmul.f32 %v4330_v18, %v2036_v22  ;;  %5458 = vmatpush.bf16.msra.mxu2 %v8815_v14  ;;  %v9713_v16 = vld [vmem:[%s15279_s3 + $0x20] sm:$0xff]  ;;  %v15575_v49 = vld [vmem:[#allocation173_spill] sm:$0xff]  ;;  %v15576_v22 = vld [vmem:[#allocation174_spill] sm:$0xff] }
 0x554   : > { %v4768_v60 = vpop.f32.mrf.mxu0  ;;  %v4857_v58 = vpop.f32.mrf.mxu1  ;;  %5820 = vmatpush.msrb.mxu1 %v9712_v6  ;;  %5708 = vmatpush.msrb.mxu0 %v9713_v16  ;;  %v9714_v38 = vld [vmem:[%s15279_s3 + $0xa0] sm:$0xff]  ;;  %v2952_v1 = vadd.f32 %v15576_v22, %v15575_v49  ;;  %v15577_v35 = vld [vmem:[#allocation201_spill] sm:$0xff]  ;;  %v15578_v15 = vld [vmem:[#allocation202_spill] sm:$0xff] }
 0x555   : > { %v4457_v50 = vadd.f32 %v4393_v51, %v4265_v0  ;;  %v4458_v13 = vadd.f32 %v4394_v39, %v4266_v2  ;;  %v13226_v57 = vadd.f32 %v4857_v58, %v4768_v60  ;;  %5547 = vmatpush.bf16.msra.mxu3 %v8879_v56  ;;  %v3130_v18 = vadd.f32 %v15578_v15, %v15577_v35  ;;  %v1973_v31 = vld [vmem:[%s10701_s24 + $0x190] sm:$0xff]  ;;  %v1974_v51 = vld [vmem:[%s10701_s24 + $0x198] sm:$0xff]  ;;  %v15581_v56 = vld [vmem:[#allocation117_spill] sm:$0xff] }
 0x556   : > { %5821 = vmatpush.msrb.mxu1 %v9714_v38  ;;  %v2037_v3 = vld [vmem:[%s10708_s16 + $0x190] sm:$0xff]  ;;  %v2038_v2 = vld [vmem:[%s10708_s16 + $0x198] sm:$0xff]  ;;  %v9717_v49 = vld [vmem:[%s15279_s3 + $0x10] sm:$0xff] }
 0x557   : > { %15574 = vst [vmem:[#allocation135_spill] sm:$0xff] %v13226_v57  ;;  %v4497_v14 = vpack.c.bf16 %v4458_v13, %v4457_v50  ;;  %4807 = vmatmul.bf16.gmra.mxu0 %v15579_v46  ;;  %4896 = vmatmul.bf16.gmra.mxu1 %v15580_v42  ;;  %v9715_v60 = vld [vmem:[%s15279_s3 + $0x18] sm:$0xff]  ;;  %v9718_v22 = vld [vmem:[%s15279_s3 + $0x90] sm:$0xff] }
 0x558   : > { %v4019_v0 = vpop.f32.mrf.mxu2  ;;  %v4132_v39 = vpop.f32.mrf.mxu3  ;;  %5709 = vmatpush.msrb.mxu0 %v9715_v60  ;;  %v9716_v58 = vld [vmem:[%s15279_s3 + $0x98] sm:$0xff] }
 0x559   : > { %5822 = vmatpush.msrb.mxu1 %v9716_v58  ;;  %4529 = vst [vmem:[%s12682_s30 + $0xc0] sm:$0xff] %v4497_v14  ;;  %v4203_v6 = vmul.f32 %v4019_v0, %v15581_v56  ;;  %v4331_v50 = vmul.f32 %v4019_v0, %v2952_v1  ;;  %v15582_v13 = vld [vmem:[#allocation118_spill] sm:$0xff]  ;;  %v4332_v38 = vmul.f32 %v4132_v39, %v3130_v18  ;;  %v9719_v1 = vld [vmem:[%s15279_s3 + $0x8] sm:$0xff] }
 0x55a   : > { %v4204_v16 = vmul.f32 %v4132_v39, %v15582_v13  ;;  %5710 = vmatpush.msrb.mxu0 %v9717_v49  ;;  %v9720_v18 = vld [vmem:[%s15279_s3 + $0x88] sm:$0xff]  ;;  %v15584_v39 = vld [vmem:[#allocation175_spill] sm:$0xff] }
 0x55b   : > { %5823 = vmatpush.msrb.mxu1 %v9718_v22  ;;  %v4267_v35 = vmul.f32 %v4203_v6, %v1973_v31  ;;  %v4395_v15 = vmul.f32 %v4331_v50, %v2037_v3  ;;  %v4396_v14 = vmul.f32 %v4332_v38, %v2038_v2  ;;  %v9722_v2 = vld [vmem:[%s15279_s3 + $0x80] sm:$0xff]  ;;  %v15585_v6 = vld [vmem:[#allocation176_spill] sm:$0xff] }
 0x55c   : > { %v4268_v60 = vmul.f32 %v4204_v16, %v1974_v51  ;;  %v4770_v58 = vpop.f32.mrf.mxu0  ;;  %v4859_v56 = vpop.f32.mrf.mxu1  ;;  %5711 = vmatpush.msrb.mxu0 %v9719_v1  ;;  %v9721_v51 = vld [vmem:[%s15279_s3] sm:$0xff]  ;;  %v2955_v50 = vadd.f32 %v15585_v6, %v15584_v39  ;;  %v15587_v16 = vld [vmem:[#allocation204_spill] sm:$0xff] }
 0x55d   : > { %5824 = vmatpush.msrb.mxu1 %v9720_v18  ;;  %v4459_v0 = vadd.f32 %v4395_v15, %v4267_v35  ;;  %v13265_v3 = vadd.f32 %v4859_v56, %v4770_v58  ;;  %4940 = vmatmul.bf16.gmra.mxu2 %v15462_v24  ;;  %v15586_v13 = vld [vmem:[#allocation203_spill] sm:$0xff]  ;;  %v1975_v22 = vld [vmem:[%s10701_s24 + $0x1a0] sm:$0xff] }
 0x55e   : > { %v4460_v31 = vadd.f32 %v4396_v14, %v4268_v60  ;;  %5029 = vmatmul.bf16.gmra.mxu3 %v15463_v61  ;;  %5712 = vmatpush.msrb.mxu0 %v9721_v51  ;;  %v3133_v38 = vadd.f32 %v15587_v16, %v15586_v13  ;;  %v2039_v35 = vld [vmem:[%s10708_s16 + $0x1a0] sm:$0xff]  ;;  %v1976_v60 = vld [vmem:[%s10701_s24 + $0x1a8] sm:$0xff]  ;;  %v15588_v56 = vld [vmem:[#allocation119_spill] sm:$0xff] }
 0x55f   : > { %15583 = vst [vmem:[#allocation136_spill] sm:$0xff] %v13265_v3  ;;  %5825 = vmatpush.msrb.mxu1 %v9722_v2  ;;  %v2040_v14 = vld [vmem:[%s10708_s16 + $0x1a8] sm:$0xff]  ;;  %v15589_v51 = vld [vmem:[#allocation120_spill] sm:$0xff] }
 0x560   : > { %v4498_v49 = vpack.c.bf16 %v4460_v31, %v4459_v0  ;;  %v4022_v15 = vpop.f32.mrf.mxu2  ;;  %v4135_v58 = vpop.f32.mrf.mxu3 }
 0x561   : > { %v4205_v1 = vmul.f32 %v4022_v15, %v15588_v56  ;;  %v4333_v18 = vmul.f32 %v4022_v15, %v2955_v50  ;;  %v4206_v3 = vmul.f32 %v4135_v58, %v15589_v51  ;;  %v4334_v2 = vmul.f32 %v4135_v58, %v3133_v38  ;;  %v15591_v56 = vld [vmem:[#allocation177_spill] sm:$0xff]  ;;  %v15592_v50 = vld [vmem:[#allocation178_spill] sm:$0xff] }
 0x562   : > { %4530 = vst [vmem:[%s12682_s30 + $0xc8] sm:$0xff] %v4498_v49  ;;  %v2957_v15 = vadd.f32 %v15592_v50, %v15591_v56  ;;  %v15593_v51 = vld [vmem:[#allocation205_spill] sm:$0xff] }
 0x563   : > { %v4269_v39 = vmul.f32 %v4205_v1, %v1975_v22  ;;  %v4397_v6 = vmul.f32 %v4333_v18, %v2039_v35  ;;  %v4270_v13 = vmul.f32 %v4206_v3, %v1976_v60  ;;  %v4398_v0 = vmul.f32 %v4334_v2, %v2040_v14  ;;  %v15595_v22 = vld [vmem:[#allocation95_spill] sm:$0xff]  ;;  %v15596_v35 = vld [vmem:[#allocation96_spill] sm:$0xff]  ;;  %v1977_v3 = vld [vmem:[%s10701_s24 + $0x1b0] sm:$0xff] }
 0x564   : > { %v4773_v31 = vpop.f32.mrf.mxu0  ;;  %v4862_v16 = vpop.f32.mrf.mxu1  ;;  %v3135_v38 = vadd.f32 %v15594_v10, %v15593_v51  ;;  %v2041_v60 = vld [vmem:[%s10708_s16 + $0x1b0] sm:$0xff]  ;;  %v1978_v1 = vld [vmem:[%s10701_s24 + $0x1b8] sm:$0xff] }
 0x565   : > { %v4461_v57 = vadd.f32 %v4397_v6, %v4269_v39  ;;  %v4462_v53 = vadd.f32 %v4398_v0, %v4270_v13  ;;  %v13286_v49 = vadd.f32 %v4862_v16, %v4773_v31  ;;  %v2042_v18 = vld [vmem:[%s10708_s16 + $0x1b8] sm:$0xff]  ;;  %v15597_v39 = vld [vmem:[#allocation121_spill] sm:$0xff]  ;;  %v15598_v0 = vld [vmem:[#allocation122_spill] sm:$0xff] }
 0x567   : > { %15590 = vst [vmem:[#allocation75_spill] sm:$0xff] %v13286_v49  ;;  %v4499_v58 = vpack.c.bf16 %v4462_v53, %v4461_v57  ;;  %4812 = vmatmul.bf16.gmra.mxu0 %v15595_v22  ;;  %4901 = vmatmul.bf16.gmra.mxu1 %v15596_v35 }
 0x568   : > { %v4025_v14 = vpop.f32.mrf.mxu2  ;;  %v4138_v2 = vpop.f32.mrf.mxu3 }
 0x569   : > { %4531 = vst [vmem:[%s12682_s30 + $0xd0] sm:$0xff] %v4499_v58  ;;  %v4207_v6 = vmul.f32 %v4025_v14, %v15597_v39  ;;  %v4335_v13 = vmul.f32 %v4025_v14, %v2957_v15  ;;  %v4208_v31 = vmul.f32 %v4138_v2, %v15598_v0  ;;  %v4336_v16 = vmul.f32 %v4138_v2, %v3135_v38  ;;  %v15600_v15 = vld [vmem:[#allocation180_spill] sm:$0xff]  ;;  %v15601_v38 = vld [vmem:[#allocation181_spill] sm:$0xff] }
 0x56a   : > { %v2960_v14 = vadd.f32 %v15601_v38, %v15600_v15  ;;  %v1979_v39 = vld [vmem:[%s10701_s24 + $0x1c0] sm:$0xff]  ;;  %v2044_v0 = vld [vmem:[%s10708_s16 + $0x1c8] sm:$0xff]  ;;  %v9244_v38 = vld [vmem:[#allocation16 + $0xb4] sm:$0xf] }
 0x56b   : > { %v4271_v10 = vmul.f32 %v4207_v6, %v1977_v3  ;;  %v4399_v53 = vmul.f32 %v4335_v13, %v2041_v60  ;;  %v4272_v57 = vmul.f32 %v4208_v31, %v1978_v1  ;;  %v4400_v56 = vmul.f32 %v4336_v16, %v2042_v18  ;;  %v15602_v3 = vld [vmem:[#allocation207_spill] sm:$0xff]  ;;  %v15603_v60 = vld [vmem:[#allocation208_spill] sm:$0xff]  ;;  %v1980_v13 = vld [vmem:[%s10701_s24 + $0x1c8] sm:$0xff] }
 0x56c   : > { %v4775_v50 = vpop.f32.mrf.mxu0  ;;  %v4864_v51 = vpop.f32.mrf.mxu1  ;;  %v3138_v2 = vadd.f32 %v15603_v60, %v15602_v3  ;;  %v2043_v18 = vld [vmem:[%s10708_s16 + $0x1c0] sm:$0xff]  ;;  %v15604_v16 = vld [vmem:[#allocation123_spill] sm:$0xff] }
 0x56d   : > { %v4463_v49 = vadd.f32 %v4399_v53, %v4271_v10  ;;  %v4464_v54 = vadd.f32 %v4400_v56, %v4272_v57  ;;  %v13301_v58 = vadd.f32 %v4864_v51, %v4775_v50  ;;  %4945 = vmatmul.bf16.gmra.mxu2 %v15476_v59  ;;  %v15605_v57 = vld [vmem:[#allocation124_spill] sm:$0xff]  ;;  %v9228_v51 = vld [vmem:[#allocation16 + $0x34] sm:$0xf] }
 0x56e   : > { %5034 = vmatmul.bf16.gmra.mxu3 %v15477_v4 }
 0x56f   : > { %15599 = vst [vmem:[#allocation137_spill] sm:$0xff] %v13301_v58  ;;  %v4500_v1 = vpack.c.bf16 %v4464_v54, %v4463_v49  ;;  %v8804_v58 = vld [vmem:[#allocation16 + $0x38] sm:$0xf0] }
 0x570   : > { %v4028_v6 = vpop.f32.mrf.mxu2  ;;  %v4141_v31 = vpop.f32.mrf.mxu3  ;;  %v8807_v15 = vor.u32 %v9228_v51, %v8804_v58  ;;  %v15607_v58 = vld [vmem:[#allocation182_spill] sm:$0xff] }
 0x571   : > { %4532 = vst [vmem:[%s12682_s30 + $0xd8] sm:$0xff] %v4500_v1  ;;  %v4209_v10 = vmul.f32 %v4028_v6, %v15604_v16  ;;  %v4337_v53 = vmul.f32 %v4028_v6, %v2960_v14  ;;  %v4210_v56 = vmul.f32 %v4141_v31, %v15605_v57  ;;  %v4338_v50 = vmul.f32 %v4141_v31, %v3138_v2  ;;  %v15608_v16 = vld [vmem:[#allocation183_spill] sm:$0xff]  ;;  %v2045_v57 = vld [vmem:[%s10708_s16 + $0x1d0] sm:$0xff] }
 0x572   : > { %5459 = vmatpush.bf16.msra.mxu2 %v8807_v15  ;;  %v8871_v14 = vor.u32 %v9244_v38, %v8868_v55 }
 0x573   : > { %v4273_v3 = vmul.f32 %v4209_v10, %v1979_v39  ;;  %v4401_v54 = vmul.f32 %v4337_v53, %v2043_v18  ;;  %v4274_v49 = vmul.f32 %v4210_v56, %v1980_v13  ;;  %v4402_v60 = vmul.f32 %v4338_v50, %v2044_v0  ;;  %v15609_v18 = vld [vmem:[#allocation209_spill] sm:$0xff]  ;;  %v15610_v10 = vld [vmem:[#allocation210_spill] sm:$0xff]  ;;  %v1982_v56 = vld [vmem:[%s10701_s24 + $0x1d8] sm:$0xff] }
 0x574   : > { %v4778_v63 = vpop.f32.mrf.mxu0  ;;  %v4867_v1 = vpop.f32.mrf.mxu1  ;;  %5548 = vmatpush.bf16.msra.mxu3 %v8871_v14  ;;  %v2962_v39 = vadd.f32 %v15608_v16, %v15607_v58  ;;  %v3140_v13 = vadd.f32 %v15610_v10, %v15609_v18  ;;  %v1981_v0 = vld [vmem:[%s10701_s24 + $0x1d0] sm:$0xff]  ;;  %v2046_v50 = vld [vmem:[%s10708_s16 + $0x1d8] sm:$0xff] }
 0x575   : > { %v4465_v6 = vadd.f32 %v4401_v54, %v4273_v3  ;;  %v4466_v2 = vadd.f32 %v4402_v60, %v4274_v49  ;;  %v13316_v31 = vadd.f32 %v4867_v1, %v4778_v63  ;;  %v15611_v63 = vld [vmem:[#allocation125_spill] sm:$0xff]  ;;  %v15612_v3 = vld [vmem:[#allocation126_spill] sm:$0xff] }
 0x577   : > { %15606 = vst [vmem:[#allocation76_spill] sm:$0xff] %v13316_v31  ;;  %v4501_v53 = vpack.c.bf16 %v4466_v2, %v4465_v6  ;;  %5285 = vmatmul.bf16.vlgmr.msra.gmra.mxu0 %v15440_v45  ;;  %5374 = vmatmul.bf16.vlgmr.msra.gmra.mxu1 %v15441_v25 }
 0x578   : > { %v4031_v55 = vpop.f32.mrf.mxu2  ;;  %v4144_v51 = vpop.f32.mrf.mxu3 }
 0x579   : > { %4533 = vst [vmem:[%s12682_s30 + $0xe0] sm:$0xff] %v4501_v53  ;;  %v4211_v15 = vmul.f32 %v4031_v55, %v15611_v63  ;;  %v4339_v38 = vmul.f32 %v4031_v55, %v2962_v39  ;;  %v4212_v54 = vmul.f32 %v4144_v51, %v15612_v3  ;;  %v4340_v49 = vmul.f32 %v4144_v51, %v3140_v13  ;;  %v15614_v39 = vld [vmem:[#allocation186_spill] sm:$0xff]  ;;  %v15615_v13 = vld [vmem:[#allocation187_spill] sm:$0xff]  ;;  %v1983_v51 = vld [vmem:[%s10701_s24 + $0x1e0] sm:$0xff] }
 0x57a   : > { %v2965_v53 = vadd.f32 %v15615_v13, %v15614_v39 }
 0x57b   : > { %v4275_v60 = vmul.f32 %v4211_v15, %v1981_v0  ;;  %v4403_v1 = vmul.f32 %v4339_v38, %v2045_v57  ;;  %v4276_v14 = vmul.f32 %v4212_v54, %v1982_v56  ;;  %v4404_v6 = vmul.f32 %v4340_v49, %v2046_v50  ;;  %v15616_v0 = vld [vmem:[#allocation211_spill] sm:$0xff]  ;;  %v15617_v57 = vld [vmem:[#allocation212_spill] sm:$0xff]  ;;  %v1984_v15 = vld [vmem:[%s10701_s24 + $0x1e8] sm:$0xff] }
 0x57c   : > { %v4780_v2 = vpop.f32.mrf.mxu0  ;;  %v4869_v58 = vpop.f32.mrf.mxu1  ;;  %v3143_v55 = vadd.f32 %v15617_v57, %v15616_v0  ;;  %v2047_v50 = vld [vmem:[%s10708_s16 + $0x1e0] sm:$0xff]  ;;  %v2048_v38 = vld [vmem:[%s10708_s16 + $0x1e8] sm:$0xff]  ;;  %v15618_v54 = vld [vmem:[#allocation127_spill] sm:$0xff] }
 0x57d   : > { %v4467_v16 = vadd.f32 %v4403_v1, %v4275_v60  ;;  %v4468_v18 = vadd.f32 %v4404_v6, %v4276_v14  ;;  %v13331_v10 = vadd.f32 %v4869_v58, %v4780_v2  ;;  %4950 = vmatmul.bf16.gmra.mxu2 %v15486_v52  ;;  %v15619_v1 = vld [vmem:[#allocation128_spill] sm:$0xff] }
 0x57e   : > { %5039 = vmatmul.bf16.gmra.mxu3 %v15487_v44 }
 0x57f   : > { %15613 = vst [vmem:[#allocation138_spill] sm:$0xff] %v13331_v10  ;;  %v4502_v56 = vpack.c.bf16 %v4468_v18, %v4467_v16  ;;  %v15624_v10 = vld [vmem:[#allocation213_spill] sm:$0xff] }
 0x580   : > { %v4034_v63 = vpop.f32.mrf.mxu2  ;;  %v4147_v3 = vpop.f32.mrf.mxu3 }
 0x581   : > { %4534 = vst [vmem:[%s12682_s30 + $0xe8] sm:$0xff] %v4502_v56  ;;  %v4213_v49 = vmul.f32 %v4034_v63, %v15618_v54  ;;  %v4341_v60 = vmul.f32 %v4034_v63, %v2965_v53  ;;  %v4214_v14 = vmul.f32 %v4147_v3, %v15619_v1  ;;  %v4342_v6 = vmul.f32 %v4147_v3, %v3143_v55  ;;  %v15621_v54 = vld [vmem:[#allocation190_spill] sm:$0xff]  ;;  %v15622_v53 = vld [vmem:[#allocation191_spill] sm:$0xff] }
 0x582   : > { %v2967_v63 = vadd.f32 %v15622_v53, %v15621_v54  ;;  %v15623_v1 = vld [vmem:[#allocation47_spill] sm:$0xff] }
 0x583   : > { %v4277_v2 = vmul.f32 %v4213_v49, %v1983_v51  ;;  %v4405_v58 = vmul.f32 %v4341_v60, %v2047_v50  ;;  %v4278_v39 = vmul.f32 %v4214_v14, %v1984_v15  ;;  %v4406_v16 = vmul.f32 %v4342_v6, %v2048_v38  ;;  %v1985_v51 = vld [vmem:[%s10701_s24 + $0x1f0] sm:$0xff]  ;;  %v1986_v38 = vld [vmem:[%s10701_s24 + $0x1f8] sm:$0xff]  ;;  %v15625_v14 = vld [vmem:[#allocation129_spill] sm:$0xff] }
 0x584   : > { %v4783_v18 = vpop.f32.mrf.mxu0  ;;  %v4872_v13 = vpop.f32.mrf.mxu1  ;;  %v3145_v55 = vadd.f32 %v15624_v10, %v15623_v1  ;;  %v2049_v50 = vld [vmem:[%s10708_s16 + $0x1f0] sm:$0xff]  ;;  %v2050_v49 = vld [vmem:[%s10708_s16 + $0x1f8] sm:$0xff] }
 0x585   : > { %v4469_v0 = vadd.f32 %v4405_v58, %v4277_v2  ;;  %v4470_v57 = vadd.f32 %v4406_v16, %v4278_v39  ;;  %v13346_v56 = vadd.f32 %v4872_v13, %v4783_v18  ;;  %v15626_v58 = vld [vmem:[#allocation130_spill] sm:$0xff] }
 0x587   : > { %15620 = vst [vmem:[#allocation77_spill] sm:$0xff] %v13346_v56  ;;  %v4503_v3 = vpack.c.bf16 %v4470_v57, %v4469_v0  ;;  %5290 = vmatmul.bf16.gmra.mxu0 %v15444_v37  ;;  %5379 = vmatmul.bf16.gmra.mxu1 %v15445_v20 }
 0x588   : > { %v4037_v15 = vpop.f32.mrf.mxu2  ;;  %v4150_v60 = vpop.f32.mrf.mxu3 }
 0x589   : > { %4535 = vst [vmem:[%s12682_s30 + $0xf0] sm:$0xff] %v4503_v3  ;;  %v4215_v6 = vmul.f32 %v4037_v15, %v15625_v14  ;;  %v4343_v2 = vmul.f32 %v4037_v15, %v2967_v63  ;;  %v4216_v39 = vmul.f32 %v4150_v60, %v15626_v58  ;;  %v4344_v16 = vmul.f32 %v4150_v60, %v3145_v55  ;;  %v9226_v63 = vld [vmem:[#allocation16 + $0x24] sm:$0xf]  ;;  %v8796_v15 = vld [vmem:[#allocation16 + $0x28] sm:$0xf0] }
 0x58a   : > { %v9242_v14 = vld [vmem:[#allocation16 + $0xa4] sm:$0xf] }
 0x58b   : > { %v4279_v18 = vmul.f32 %v4215_v6, %v1985_v51  ;;  %v4407_v10 = vmul.f32 %v4343_v2, %v2049_v50  ;;  %v4280_v13 = vmul.f32 %v4216_v39, %v1986_v38  ;;  %v4408_v0 = vmul.f32 %v4344_v16, %v2050_v49  ;;  %v8860_v38 = vld [vmem:[#allocation16 + $0xa8] sm:$0xf0] }
 0x58c   : > { %v4785_v57 = vpop.f32.mrf.mxu0  ;;  %v4874_v54 = vpop.f32.mrf.mxu1  ;;  %v8799_v50 = vor.u32 %v9226_v63, %v8796_v15  ;;  %v8863_v60 = vor.u32 %v9242_v14, %v8860_v38 }
 0x58d   : > { %v4471_v53 = vadd.f32 %v4407_v10, %v4279_v18  ;;  %v4472_v1 = vadd.f32 %v4408_v0, %v4280_v13  ;;  %v13361_v56 = vadd.f32 %v4874_v54, %v4785_v57  ;;  %4955 = vmatmul.bf16.gmra.mxu2 %v15500_v30 }
 0x58e   : > { %5044 = vmatmul.bf16.gmra.mxu3 %v15501_v34  ;;  %5460 = vmatpush.bf16.msra.mxu2 %v8799_v50 }
 0x58f   : > { %15627 = vst [vmem:[#allocation139_spill] sm:$0xff] %v13361_v56  ;;  %v4504_v3 = vpack.c.bf16 %v4472_v1, %v4471_v53  ;;  %5549 = vmatpush.bf16.msra.mxu3 %v8863_v60  ;;  %v9224_v60 = vld [vmem:[#allocation16 + $0x14] sm:$0xf] }
 0x590   : > { %v4916_v55 = vpop.f32.mrf.mxu2  ;;  %v5005_v51 = vpop.f32.mrf.mxu3 }
 0x591   : > { %4536 = vst [vmem:[%s12682_s30 + $0xf8] sm:$0xff] %v4504_v3  ;;  %v13366_v49 = vadd.f32 %v5005_v51, %v4916_v55 }
 0x594   : > { %v4788_v6 = vpop.f32.mrf.mxu0  ;;  %v4877_v2 = vpop.f32.mrf.mxu1 }
 0x595   : > { %v13368_v58 = vadd.f32 %v4877_v2, %v4788_v6  ;;  %v8788_v6 = vld [vmem:[#allocation16 + $0x18] sm:$0xf0]  ;;  %v9240_v2 = vld [vmem:[#allocation16 + $0x94] sm:$0xf] }
 0x597   : > { %15628 = vst [vmem:[#allocation140_spill] sm:$0xff] %v13368_v58  ;;  %5295 = vmatmul.bf16.gmra.mxu0 %v15449_v62  ;;  %5384 = vmatmul.bf16.gmra.mxu1 %v15450_v9 }
 0x598   : > { %v4918_v39 = vpop.f32.mrf.mxu2  ;;  %v5007_v16 = vpop.f32.mrf.mxu3 }
 0x599   : > { %v13372_v18 = vadd.f32 %v5007_v16, %v4918_v39 }
 0x59c   : > { %v4790_v10 = vpop.f32.mrf.mxu0  ;;  %v4879_v13 = vpop.f32.mrf.mxu1 }
 0x59d   : > { %v13374_v0 = vadd.f32 %v4879_v13, %v4790_v10  ;;  %4960 = vmatmul.bf16.gmra.mxu2 %v15514_v5  ;;  %v8791_v10 = vor.u32 %v9224_v60, %v8788_v6  ;;  %v8852_v13 = vld [vmem:[#allocation16 + $0x98] sm:$0xf0] }
 0x59e   : > { %5049 = vmatmul.bf16.gmra.mxu3 %v15515_v27 }
 0x59f   : > { %15629 = vst [vmem:[#allocation141_spill] sm:$0xff] %v13374_v0  ;;  %5461 = vmatpush.bf16.msra.mxu2 %v8791_v10 }
 0x5a0   : > { %v4921_v57 = vpop.f32.mrf.mxu2  ;;  %v5010_v54 = vpop.f32.mrf.mxu3 }
 0x5a1   : > { %v13378_v53 = vadd.f32 %v5010_v54, %v4921_v57  ;;  %v8855_v54 = vor.u32 %v9240_v2, %v8852_v13 }
 0x5a3   : > { %5550 = vmatpush.bf16.msra.mxu3 %v8855_v54 }
 0x5a4   : > { %v4793_v1 = vpop.f32.mrf.mxu0  ;;  %v4882_v3 = vpop.f32.mrf.mxu1 }
 0x5a5   : > { %v13380_v63 = vadd.f32 %v4882_v3, %v4793_v1 }
 0x5a7   : > { %15630 = vst [vmem:[#allocation70_spill] sm:$0xff] %v13380_v63  ;;  %5300 = vmatmul.bf16.gmra.mxu0 %v15453_v8  ;;  %5389 = vmatmul.bf16.gmra.mxu1 %v15454_v48 }
 0x5a8   : > { %v4923_v15 = vpop.f32.mrf.mxu2  ;;  %v5012_v14 = vpop.f32.mrf.mxu3 }
 0x5a9   : > { %v13384_v55 = vadd.f32 %v5012_v14, %v4923_v15 }
 0x5ac   : > { %v4795_v51 = vpop.f32.mrf.mxu0  ;;  %v4884_v50 = vpop.f32.mrf.mxu1 }
 0x5ad   : > { %v13386_v38 = vadd.f32 %v4884_v50, %v4795_v51  ;;  %4965 = vmatmul.bf16.gmra.mxu2 %v15528_v19 }
 0x5ae   : > { %5054 = vmatmul.bf16.gmra.mxu3 %v15529_v36 }
 0x5af   : > { %15631 = vst [vmem:[#allocation71_spill] sm:$0xff] %v13386_v38 }
 0x5b0   : > { %v4926_v39 = vpop.f32.mrf.mxu2  ;;  %v5015_v16 = vpop.f32.mrf.mxu3 }
 0x5b1   : > { %v13390_v57 = vadd.f32 %v5015_v16, %v4926_v39 }
 0x5b4   : > { %v4798_v1 = vpop.f32.mrf.mxu0  ;;  %v4887_v3 = vpop.f32.mrf.mxu1 }
 0x5b5   : > { %v13392_v15 = vadd.f32 %v4887_v3, %v4798_v1 }
 0x5b7   : > { %15632 = vst [vmem:[#allocation80_spill] sm:$0xff] %v13392_v15  ;;  %5305 = vmatmul.bf16.gmra.mxu0 %v15457_v21  ;;  %5394 = vmatmul.bf16.gmra.mxu1 %v15458_v7  ;;  %v8844_v15 = vld [vmem:[#allocation16 + $0x88] sm:$0xf0] }
 0x5b8   : > { %v4928_v14 = vpop.f32.mrf.mxu2  ;;  %v5017_v51 = vpop.f32.mrf.mxu3 }
 0x5b9   : > { %v13396_v50 = vadd.f32 %v5017_v51, %v4928_v14 }
 0x5bc   : > { %v4800_v38 = vpop.f32.mrf.mxu0  ;;  %v4889_v60 = vpop.f32.mrf.mxu1 }
 0x5bd   : > { %v13398_v6 = vadd.f32 %v4889_v60, %v4800_v38  ;;  %4970 = vmatmul.bf16.gmra.mxu2 %v15539_v47 }
 0x5be   : > { %5059 = vmatmul.bf16.gmra.mxu3 %v15540_v43 }
 0x5bf   : > { %15633 = vst [vmem:[#allocation81_spill] sm:$0xff] %v13398_v6 }
 0x5c0   : > { %v4931_v2 = vpop.f32.mrf.mxu2  ;;  %v5020_v39 = vpop.f32.mrf.mxu3 }
 0x5c1   : > { %v13402_v16 = vadd.f32 %v5020_v39, %v4931_v2  ;;  %v9222_v2 = vld [vmem:[#allocation16 + $0x4] sm:$0xf]  ;;  %v8780_v39 = vld [vmem:[#allocation16 + $0x8] sm:$0xf0] }
 0x5c2   : > { %v8783_v6 = vor.u32 %v9222_v2, %v8780_v39 }
 0x5c4   : > { %v4803_v10 = vpop.f32.mrf.mxu0  ;;  %v4892_v13 = vpop.f32.mrf.mxu1  ;;  %5462 = vmatpush.bf16.msra.mxu2 %v8783_v6 }
 0x5c5   : > { %v13404_v54 = vadd.f32 %v4892_v13, %v4803_v10  ;;  %v9238_v10 = vld [vmem:[#allocation16 + $0x84] sm:$0xf] }
 0x5c6   : > { %v8847_v0 = vor.u32 %v9238_v10, %v8844_v15 }
 0x5c7   : > { %15634 = vst [vmem:[#allocation142_spill] sm:$0xff] %v13404_v54  ;;  %5310 = vmatmul.bf16.gmra.mxu0 %v15462_v24  ;;  %5399 = vmatmul.bf16.gmra.mxu1 %v15463_v61 }
 0x5c8   : > { %v4933_v1 = vpop.f32.mrf.mxu2  ;;  %v5022_v3 = vpop.f32.mrf.mxu3  ;;  %5551 = vmatpush.bf16.msra.mxu3 %v8847_v0 }
 0x5c9   : > { %v13408_v38 = vadd.f32 %v5022_v3, %v4933_v1 }
 0x5cb   : > { %15635 = vst [vmem:[#allocation143_spill] sm:$0xff] %v13408_v38 }
 0x5cc   : > { %v4805_v14 = vpop.f32.mrf.mxu0  ;;  %v4894_v51 = vpop.f32.mrf.mxu1 }
 0x5cd   : > { %v13410_v60 = vadd.f32 %v4894_v51, %v4805_v14  ;;  %4975 = vmatmul.bf16.gmra.mxu2 %v15550_v28 }
 0x5ce   : > { %5064 = vmatmul.bf16.gmra.mxu3 %v15551_v32 }
 0x5cf   : > { %15636 = vst [vmem:[#allocation74_spill] sm:$0xff] %v13410_v60 }
 0x5d0   : > { %v4936_v13 = vpop.f32.mrf.mxu2  ;;  %v5025_v54 = vpop.f32.mrf.mxu3 }
 0x5d1   : > { %v13414_v63 = vadd.f32 %v5025_v54, %v4936_v13 }
 0x5d4   : > { %v4808_v1 = vpop.f32.mrf.mxu0  ;;  %v4897_v3 = vpop.f32.mrf.mxu1 }
 0x5d5   : > { %v13416_v14 = vadd.f32 %v4897_v3, %v4808_v1 }
 0x5d7   : > { %15637 = vst [vmem:[#allocation166_spill] sm:$0xff] %v13416_v14  ;;  %5315 = vmatmul.bf16.gmra.mxu0 %v15476_v59  ;;  %5404 = vmatmul.bf16.gmra.mxu1 %v15477_v4 }
 0x5d8   : > { %v4938_v51 = vpop.f32.mrf.mxu2  ;;  %v5027_v60 = vpop.f32.mrf.mxu3 }
 0x5d9   : > { %v13420_v58 = vadd.f32 %v5027_v60, %v4938_v51 }
 0x5db   : > { %15638 = vst [vmem:[#allocation144_spill] sm:$0xff] %v13420_v58 }
 0x5dc   : > { %v4810_v56 = vpop.f32.mrf.mxu0  ;;  %v4899_v2 = vpop.f32.mrf.mxu1 }
 0x5dd   : > { %v13422_v39 = vadd.f32 %v4899_v2, %v4810_v56  ;;  %4980 = vmatmul.bf16.gmra.mxu2 %v15564_v23 }
 0x5de   : > { %5069 = vmatmul.bf16.gmra.mxu3 %v15565_v12 }
 0x5df   : > { %15639 = vst [vmem:[#allocation145_spill] sm:$0xff] %v13422_v39 }
 0x5e0   : > { %v4941_v0 = vpop.f32.mrf.mxu2 }
 0x5e1   : > { %v5030_v15 = vpop.f32.mrf.mxu3 }
 0x5e2   : > { %v13426_v6 = vadd.f32 %v5030_v15, %v4941_v0  ;;  %v6308_v0 = vld.sshfl [vmem:[#allocation1] sm:$0xff pattern:$0x73625140]  ;;  %v6309_v15 = vld.sshfl [vmem:[#allocation1 + $0x8] sm:$0xff pattern:$0x73625140] }
 0x5e3   : > { %8904 = vmatpush.msk.msrb.mxu2 %vm3922_vm1, %v6308_v0  ;;  %8937 = vmatpush.msk.msrb.mxu3 %vm3922_vm1, %v6309_v15 }
 0x5e4   : > { %15640 = vst [vmem:[#allocation171_spill] sm:$0xff] %v13426_v6  ;;  %v4813_v54 = vpop.f32.mrf.mxu0  ;;  %v4902_v10 = vpop.f32.mrf.mxu1 }
 0x5e5   : > { %v13428_v13 = vadd.f32 %v4902_v10, %v4813_v54 }
 0x5e7   : > { %15641 = vst [vmem:[#allocation172_spill] sm:$0xff] %v13428_v13  ;;  %5320 = vmatmul.bf16.gmra.mxu0 %v15486_v52  ;;  %5409 = vmatmul.bf16.gmra.mxu1 %v15487_v44 }
 0x5e8   : > { %v4943_v60 = vpop.f32.mrf.mxu2 }
 0x5e9   : > { %v5032_v1 = vpop.f32.mrf.mxu3 }
 0x5ea   : > { %v13432_v56 = vadd.f32 %v5032_v1, %v4943_v60 }
 0x5ec   : > { %15642 = vst [vmem:[#allocation146_spill] sm:$0xff] %v13432_v56  ;;  %v4815_v3 = vpop.f32.mrf.mxu0  ;;  %v4904_v51 = vpop.f32.mrf.mxu1 }
 0x5ed   : > { %v13434_v2 = vadd.f32 %v4904_v51, %v4815_v3  ;;  %4985 = vmatmul.bf16.gmra.mxu2 %v15579_v46 }
 0x5ee   : > { %5074 = vmatmul.bf16.gmra.mxu3 %v15580_v42 }
 0x5ef   : > { %15643 = vst [vmem:[#allocation147_spill] sm:$0xff] %v13434_v2 }
 0x5f0   : > { %v4946_v54 = vpop.f32.mrf.mxu2 }
 0x5f1   : > { %v5035_v10 = vpop.f32.mrf.mxu3 }
 0x5f2   : > { %v13440_v13 = vadd.f32 %v5035_v10, %v4946_v54 }
 0x5f4   : > { %15644 = vst [vmem:[#allocation82_spill] sm:$0xff] %v13440_v13  ;;  %v5286_v60 = vpop.f32.mrf.mxu0  ;;  %v5375_v1 = vpop.f32.mrf.mxu1 }
 0x5f5   : > { %v13442_v39 = vadd.f32 %v5375_v1, %v5286_v60 }
 0x5f7   : > { %15645 = vst [vmem:[#allocation84_spill] sm:$0xff] %v13442_v39  ;;  %5325 = vmatmul.bf16.gmra.mxu0 %v15500_v30  ;;  %5414 = vmatmul.bf16.gmra.mxu1 %v15501_v34 }
 0x5f8   : > { %v4948_v3 = vpop.f32.mrf.mxu2 }
 0x5f9   : > { %v5037_v51 = vpop.f32.mrf.mxu3 }
 0x5fa   : > { %v13446_v2 = vadd.f32 %v5037_v51, %v4948_v3 }
 0x5fc   : > { %15646 = vst [vmem:[#allocation148_spill] sm:$0xff] %v13446_v2  ;;  %v5288_v14 = vpop.f32.mrf.mxu0  ;;  %v5377_v0 = vpop.f32.mrf.mxu1 }
 0x5fd   : > { %v13448_v31 = vadd.f32 %v5377_v0, %v5288_v14  ;;  %4990 = vmatmul.bf16.gmra.mxu2 %v15595_v22 }
 0x5fe   : > { %5079 = vmatmul.bf16.gmra.mxu3 %v15596_v35 }
 0x5ff   : > { %15647 = vst [vmem:[#allocation149_spill] sm:$0xff] %v13448_v31 }
 0x600   : > { %v4951_v15 = vpop.f32.mrf.mxu2 }
 0x601   : > { %v5040_v54 = vpop.f32.mrf.mxu3 }
 0x602   : > { %v13452_v10 = vadd.f32 %v5040_v54, %v4951_v15 }
 0x604   : > { %15648 = vst [vmem:[#allocation86_spill] sm:$0xff] %v13452_v10  ;;  %v5291_v60 = vpop.f32.mrf.mxu0  ;;  %v5380_v1 = vpop.f32.mrf.mxu1 }
 0x605   : > { %v13454_v39 = vadd.f32 %v5380_v1, %v5291_v60 }
 0x607   : > { %15649 = vst [vmem:[#allocation87_spill] sm:$0xff] %v13454_v39  ;;  %5330 = vmatmul.bf16.gmra.mxu0 %v15514_v5  ;;  %5419 = vmatmul.bf16.gmra.mxu1 %v15515_v27 }
 0x608   : > { %v4953_v3 = vpop.f32.mrf.mxu2 }
 0x609   : > { %v5042_v51 = vpop.f32.mrf.mxu3 }
 0x60a   : > { %v13458_v14 = vadd.f32 %v5042_v51, %v4953_v3 }
 0x60c   : > { %15650 = vst [vmem:[#allocation91_spill] sm:$0xff] %v13458_v14  ;;  %v5293_v0 = vpop.f32.mrf.mxu0  ;;  %v5382_v31 = vpop.f32.mrf.mxu1 }
 0x60d   : > { %v13460_v2 = vadd.f32 %v5382_v31, %v5293_v0  ;;  %5463 = vmatmul.bf16.vlgmr.msra.gmra.mxu2 %v15440_v45 }
 0x60e   : > { %5552 = vmatmul.bf16.vlgmr.msra.gmra.mxu3 %v15441_v25 }
 0x60f   : > { %15651 = vst [vmem:[#allocation92_spill] sm:$0xff] %v13460_v2 }
 0x610   : > { %v4956_v15 = vpop.f32.mrf.mxu2 }
 0x611   : > { %v5045_v54 = vpop.f32.mrf.mxu3 }
 0x612   : > { %v13464_v60 = vadd.f32 %v5045_v54, %v4956_v15 }
 0x614   : > { %15652 = vst [vmem:[#allocation150_spill] sm:$0xff] %v13464_v60  ;;  %v5296_v1 = vpop.f32.mrf.mxu0  ;;  %v5385_v39 = vpop.f32.mrf.mxu1 }
 0x615   : > { %v13466_v10 = vadd.f32 %v5385_v39, %v5296_v1 }
 0x617   : > { %15653 = vst [vmem:[#allocation151_spill] sm:$0xff] %v13466_v10  ;;  %5335 = vmatmul.bf16.gmra.mxu0 %v15528_v19  ;;  %5424 = vmatmul.bf16.gmra.mxu1 %v15529_v36 }
 0x618   : > { %v4958_v3 = vpop.f32.mrf.mxu2 }
 0x619   : > { %v5047_v51 = vpop.f32.mrf.mxu3 }
 0x61a   : > { %v13470_v31 = vadd.f32 %v5047_v51, %v4958_v3 }
 0x61c   : > { %15654 = vst [vmem:[#allocation88_spill] sm:$0xff] %v13470_v31  ;;  %v5298_v0 = vpop.f32.mrf.mxu0  ;;  %v5387_v2 = vpop.f32.mrf.mxu1 }
 0x61d   : > { %v13472_v45 = vadd.f32 %v5387_v2, %v5298_v0  ;;  %5468 = vmatmul.bf16.gmra.mxu2 %v15444_v37 }
 0x61e   : > { %5557 = vmatmul.bf16.gmra.mxu3 %v15445_v20 }
 0x61f   : > { %15655 = vst [vmem:[#allocation179_spill] sm:$0xff] %v13472_v45 }
 0x620   : > { %v4961_v15 = vpop.f32.mrf.mxu2 }
 0x621   : > { %v5050_v54 = vpop.f32.mrf.mxu3 }
 0x622   : > { %v13476_v39 = vadd.f32 %v5050_v54, %v4961_v15 }
 0x624   : > { %15656 = vst [vmem:[#allocation93_spill] sm:$0xff] %v13476_v39  ;;  %v5301_v1 = vpop.f32.mrf.mxu0  ;;  %v5390_v10 = vpop.f32.mrf.mxu1 }
 0x625   : > { %v13478_v25 = vadd.f32 %v5390_v10, %v5301_v1 }
 0x627   : > { %15657 = vst [vmem:[#allocation94_spill] sm:$0xff] %v13478_v25  ;;  %5340 = vmatmul.bf16.gmra.mxu0 %v15539_v47  ;;  %5429 = vmatmul.bf16.gmra.mxu1 %v15540_v43 }
 0x628   : > { %v4963_v3 = vpop.f32.mrf.mxu2 }
 0x629   : > { %v5052_v51 = vpop.f32.mrf.mxu3 }
 0x62a   : > { %v13482_v2 = vadd.f32 %v5052_v51, %v4963_v3 }
 0x62c   : > { %15658 = vst [vmem:[#allocation152_spill] sm:$0xff] %v13482_v2  ;;  %v5303_v0 = vpop.f32.mrf.mxu0  ;;  %v5392_v45 = vpop.f32.mrf.mxu1 }
 0x62d   : > { %v13484_v37 = vadd.f32 %v5392_v45, %v5303_v0  ;;  %5473 = vmatmul.bf16.gmra.mxu2 %v15449_v62 }
 0x62e   : > { %5562 = vmatmul.bf16.gmra.mxu3 %v15450_v9 }
 0x62f   : > { %15659 = vst [vmem:[#allocation153_spill] sm:$0xff] %v13484_v37 }
 0x630   : > { %v4966_v15 = vpop.f32.mrf.mxu2 }
 0x631   : > { %v5055_v54 = vpop.f32.mrf.mxu3 }
 0x632   : > { %v13488_v10 = vadd.f32 %v5055_v54, %v4966_v15 }
 0x634   : > { %15660 = vst [vmem:[#allocation184_spill] sm:$0xff] %v13488_v10  ;;  %v13490_v1 = vpop.f32.mrf.mxu0  ;;  %v13492_v25 = vpop.f32.mrf.mxu1 }
 0x635   : > { %15661 = vst [vmem:[#allocation185_spill] sm:$0xff] %v13490_v1 }
 0x636   : > { %15662 = vst [vmem:[#allocation97_spill] sm:$0xff] %v13492_v25 }
 0x637   : > { %5345 = vmatmul.bf16.gmra.mxu0 %v15550_v28  ;;  %5434 = vmatmul.bf16.gmra.mxu1 %v15551_v32 }
 0x638   : > { %v4968_v3 = vpop.f32.mrf.mxu2 }
 0x639   : > { %v5057_v51 = vpop.f32.mrf.mxu3 }
 0x63a   : > { %v13496_v45 = vadd.f32 %v5057_v51, %v4968_v3 }
 0x63c   : > { %15663 = vst [vmem:[#allocation98_spill] sm:$0xff] %v13496_v45  ;;  %v13498_v0 = vpop.f32.mrf.mxu0  ;;  %v13500_v37 = vpop.f32.mrf.mxu1 }
 0x63d   : > { %15664 = vst [vmem:[#allocation154_spill] sm:$0xff] %v13498_v0  ;;  %5478 = vmatmul.bf16.gmra.mxu2 %v15453_v8 }
 0x63e   : > { %15665 = vst [vmem:[#allocation155_spill] sm:$0xff] %v13500_v37  ;;  %5567 = vmatmul.bf16.gmra.mxu3 %v15454_v48 }
 0x640   : > { %v4971_v15 = vpop.f32.mrf.mxu2 }
 0x641   : > { %v5060_v54 = vpop.f32.mrf.mxu3 }
 0x642   : > { %v13504_v1 = vadd.f32 %v5060_v54, %v4971_v15 }
 0x644   : > { %15666 = vst [vmem:[#allocation188_spill] sm:$0xff] %v13504_v1  ;;  %v13506_v25 = vpop.f32.mrf.mxu0  ;;  %v13508_v9 = vpop.f32.mrf.mxu1 }
 0x645   : > { %15667 = vst [vmem:[#allocation189_spill] sm:$0xff] %v13506_v25 }
 0x646   : > { %15668 = vst [vmem:[#allocation99_spill] sm:$0xff] %v13508_v9 }
 0x647   : > { %5350 = vmatmul.bf16.gmra.mxu0 %v15564_v23  ;;  %5439 = vmatmul.bf16.gmra.mxu1 %v15565_v12 }
 0x648   : > { %v4973_v3 = vpop.f32.mrf.mxu2 }
 0x649   : > { %v5062_v51 = vpop.f32.mrf.mxu3 }
 0x64a   : > { %v13512_v0 = vadd.f32 %v5062_v51, %v4973_v3 }
 0x64c   : > { %15669 = vst [vmem:[#allocation100_spill] sm:$0xff] %v13512_v0  ;;  %v13514_v37 = vpop.f32.mrf.mxu0  ;;  %v13516_v8 = vpop.f32.mrf.mxu1 }
 0x64d   : > { %15670 = vst [vmem:[#allocation156_spill] sm:$0xff] %v13514_v37  ;;  %5483 = vmatmul.bf16.gmra.mxu2 %v15457_v21 }
 0x64e   : > { %15671 = vst [vmem:[#allocation157_spill] sm:$0xff] %v13516_v8  ;;  %5572 = vmatmul.bf16.gmra.mxu3 %v15458_v7 }
 0x650   : > { %v4976_v15 = vpop.f32.mrf.mxu2 }
 0x651   : > { %v5065_v54 = vpop.f32.mrf.mxu3 }
 0x652   : > { %v13520_v25 = vadd.f32 %v5065_v54, %v4976_v15 }
 0x654   : > { %15672 = vst [vmem:[#allocation192_spill] sm:$0xff] %v13520_v25  ;;  %v13522_v9 = vpop.f32.mrf.mxu0  ;;  %v13524_v48 = vpop.f32.mrf.mxu1 }
 0x655   : > { %15673 = vst [vmem:[#allocation193_spill] sm:$0xff] %v13522_v9 }
 0x656   : > { %15674 = vst [vmem:[#allocation101_spill] sm:$0xff] %v13524_v48 }
 0x657   : > { %5355 = vmatmul.bf16.gmra.mxu0 %v15579_v46  ;;  %5444 = vmatmul.bf16.gmra.mxu1 %v15580_v42 }
 0x658   : > { %v4978_v3 = vpop.f32.mrf.mxu2 }
 0x659   : > { %v5067_v51 = vpop.f32.mrf.mxu3 }
 0x65a   : > { %v13528_v37 = vadd.f32 %v5067_v51, %v4978_v3 }
 0x65c   : > { %15675 = vst [vmem:[#allocation102_spill] sm:$0xff] %v13528_v37  ;;  %v13530_v8 = vpop.f32.mrf.mxu0  ;;  %v13532_v21 = vpop.f32.mrf.mxu1 }
 0x65d   : > { %15676 = vst [vmem:[#allocation158_spill] sm:$0xff] %v13530_v8  ;;  %5488 = vmatmul.bf16.gmra.mxu2 %v15462_v24 }
 0x65e   : > { %15677 = vst [vmem:[#allocation159_spill] sm:$0xff] %v13532_v21  ;;  %5577 = vmatmul.bf16.gmra.mxu3 %v15463_v61 }
 0x660   : > { %v4981_v15 = vpop.f32.mrf.mxu2 }
 0x661   : > { %v5070_v54 = vpop.f32.mrf.mxu3 }
 0x662   : > { %v13536_v9 = vadd.f32 %v5070_v54, %v4981_v15 }
 0x664   : > { %15678 = vst [vmem:[#allocation194_spill] sm:$0xff] %v13536_v9  ;;  %v13538_v48 = vpop.f32.mrf.mxu0  ;;  %v13540_v7 = vpop.f32.mrf.mxu1 }
 0x665   : > { %15679 = vst [vmem:[#allocation195_spill] sm:$0xff] %v13538_v48 }
 0x666   : > { %15680 = vst [vmem:[#allocation103_spill] sm:$0xff] %v13540_v7 }
 0x667   : > { %5360 = vmatmul.bf16.gmra.mxu0 %v15595_v22  ;;  %5449 = vmatmul.bf16.gmra.mxu1 %v15596_v35 }
 0x668   : > { %v4983_v3 = vpop.f32.mrf.mxu2 }
 0x669   : > { %v5072_v51 = vpop.f32.mrf.mxu3 }
 0x66a   : > { %v13544_v8 = vadd.f32 %v5072_v51, %v4983_v3  ;;  %v5633_v3 = vmul.f32 %v12968_v29, %v12968_v29  ;;  %v5634_v51 = vmul.f32 %v13366_v49, %v13366_v49 }
 0x66c   : > { %15681 = vst [vmem:[#allocation104_spill] sm:$0xff] %v13544_v8  ;;  %v13546_v21 = vpop.f32.mrf.mxu0  ;;  %v13548_v24 = vpop.f32.mrf.mxu1 }
 0x66d   : > { %15682 = vst [vmem:[#allocation160_spill] sm:$0xff] %v13546_v21  ;;  %5493 = vmatmul.bf16.gmra.mxu2 %v15476_v59 }
 0x66e   : > { %15683 = vst [vmem:[#allocation161_spill] sm:$0xff] %v13548_v24  ;;  %5582 = vmatmul.bf16.gmra.mxu3 %v15477_v4 }
 0x670   : > { %v4986_v15 = vpop.f32.mrf.mxu2 }
 0x671   : > { %v5075_v54 = vpop.f32.mrf.mxu3 }
 0x672   : > { %v13552_v48 = vadd.f32 %v5075_v54, %v4986_v15  ;;  %v5635_v54 = vmul.f32 %v12992_v11, %v12992_v11 }
 0x674   : > { %15684 = vst [vmem:[#allocation196_spill] sm:$0xff] %v13552_v48  ;;  %v13554_v7 = vpop.f32.mrf.mxu0  ;;  %v13556_v61 = vpop.f32.mrf.mxu1 }
 0x675   : > { %15685 = vst [vmem:[#allocation105_spill] sm:$0xff] %v13554_v7  ;;  %v5638_v7 = vmul.f32 %v13378_v53, %v13378_v53 }
 0x676   : > { %15686 = vst [vmem:[#allocation106_spill] sm:$0xff] %v13556_v61  ;;  %v5636_v61 = vmul.f32 %v13372_v18, %v13372_v18 }
 0x677   : > { %5713 = vmatmul.f32.vlgmr.msrb.gmra.mxu0 %v5633_v3  ;;  %5826 = vmatmul.f32.vlgmr.msrb.gmra.mxu1 %v5634_v51 }
 0x678   : > { %v4988_v24 = vpop.f32.mrf.mxu2 }
 0x679   : > { %v5077_v21 = vpop.f32.mrf.mxu3 }
 0x67a   : > { %v13562_v59 = vadd.f32 %v5077_v21, %v4988_v24 }
 0x67c   : > { %15687 = vst [vmem:[#allocation162_spill] sm:$0xff] %v13562_v59  ;;  %v13564_v4 = vpop.f32.mrf.mxu0  ;;  %v13566_v15 = vpop.f32.mrf.mxu1 }
 0x67d   : > { %15688 = vst [vmem:[#allocation163_spill] sm:$0xff] %v13564_v4  ;;  %5498 = vmatmul.bf16.gmra.mxu2 %v15486_v52 }
 0x67e   : > { %15689 = vst [vmem:[#allocation64_spill] sm:$0xff] %v13566_v15  ;;  %5587 = vmatmul.bf16.gmra.mxu3 %v15487_v44  ;;  %v5637_v15 = vmul.f32 %v13008_v41, %v13008_v41 }
 0x67f   : > { %5716 = vmatmul.f32.gmra.mxu0 %v5635_v54  ;;  %5829 = vmatmul.f32.gmra.mxu1 %v5636_v61 }
 0x680   : > { %v4991_v3 = vpop.f32.mrf.mxu2 }
 0x681   : > { %v5080_v51 = vpop.f32.mrf.mxu3 }
 0x682   : > { %v13574_v21 = vadd.f32 %v5080_v51, %v4991_v3  ;;  %v5639_v51 = vmul.f32 %v13025_v17, %v13025_v17 }
 0x684   : > { %15690 = vst [vmem:[#allocation65_spill] sm:$0xff] %v13574_v21  ;;  %v13576_v24 = vpop.f32.mrf.mxu0  ;;  %v13578_v4 = vpop.f32.mrf.mxu1 }
 0x685   : > { %15691 = vst [vmem:[#allocation197_spill] sm:$0xff] %v13576_v24  ;;  %v5642_v24 = vmul.f32 %v13390_v57, %v13390_v57 }
 0x686   : > { %15692 = vst [vmem:[#allocation107_spill] sm:$0xff] %v13578_v4  ;;  %v5640_v4 = vmul.f32 %v13384_v55, %v13384_v55 }
 0x687   : > { %5719 = vmatmul.f32.gmra.mxu0 %v5637_v15  ;;  %5832 = vmatmul.f32.gmra.mxu1 %v5638_v7 }
 0x688   : > { %v4993_v52 = vpop.f32.mrf.mxu2 }
 0x689   : > { %v5082_v44 = vpop.f32.mrf.mxu3 }
 0x68a   : > { %v13584_v54 = vadd.f32 %v5082_v44, %v4993_v52 }
 0x68c   : > { %15693 = vst [vmem:[#allocation108_spill] sm:$0xff] %v13584_v54  ;;  %v13586_v61 = vpop.f32.mrf.mxu0  ;;  %v13588_v3 = vpop.f32.mrf.mxu1 }
 0x68d   : > { %15694 = vst [vmem:[#allocation68_spill] sm:$0xff] %v13586_v61  ;;  %5503 = vmatmul.bf16.gmra.mxu2 %v15500_v30 }
 0x68e   : > { %15695 = vst [vmem:[#allocation69_spill] sm:$0xff] %v13588_v3  ;;  %5592 = vmatmul.bf16.gmra.mxu3 %v15501_v34  ;;  %v5641_v3 = vmul.f32 %v13040_v26, %v13040_v26 }
 0x68f   : > { %5722 = vmatmul.f32.gmra.mxu0 %v5639_v51  ;;  %5835 = vmatmul.f32.gmra.mxu1 %v5640_v4 }
 0x690   : > { %v5464_v7 = vpop.f32.mrf.mxu2 }
 0x691   : > { %v5553_v15 = vpop.f32.mrf.mxu3 }
 0x692   : > { %v13596_v52 = vadd.f32 %v5553_v15, %v5464_v7  ;;  %v5643_v15 = vmul.f32 %v13055_v40, %v13055_v40 }
 0x694   : > { %v13598_v44 = vpop.f32.mrf.mxu0  ;;  %v13600_v61 = vpop.f32.mrf.mxu1 }
 0x695   : > { %15696 = vst [vmem:[#allocation109_spill] sm:$0xff] %v13598_v44  ;;  %v5646_v44 = vmul.f32 %v13402_v16, %v13402_v16 }
 0x696   : > { %15697 = vst [vmem:[#allocation110_spill] sm:$0xff] %v13600_v61  ;;  %v5644_v61 = vmul.f32 %v13396_v50, %v13396_v50 }
 0x697   : > { %5725 = vmatmul.f32.gmra.mxu0 %v5641_v3  ;;  %5838 = vmatmul.f32.gmra.mxu1 %v5642_v24 }
 0x698   : > { %v5466_v30 = vpop.f32.mrf.mxu2 }
 0x699   : > { %v5555_v34 = vpop.f32.mrf.mxu3 }
 0x69a   : > { %v13606_v51 = vadd.f32 %v5555_v34, %v5466_v30 }
 0x69c   : > { %v13608_v4 = vpop.f32.mrf.mxu0  ;;  %v13610_v7 = vpop.f32.mrf.mxu1 }
 0x69d   : > { %15698 = vst [vmem:[#allocation164_spill] sm:$0xff] %v13608_v4  ;;  %5508 = vmatmul.bf16.gmra.mxu2 %v15514_v5 }
 0x69e   : > { %15699 = vst [vmem:[#allocation165_spill] sm:$0xff] %v13610_v7  ;;  %5597 = vmatmul.bf16.gmra.mxu3 %v15515_v27  ;;  %v5645_v7 = vmul.f32 %v13070_v33, %v13070_v33 }
 0x69f   : > { %5728 = vmatmul.f32.gmra.mxu0 %v5643_v15  ;;  %5841 = vmatmul.f32.gmra.mxu1 %v5644_v61 }
 0x6a0   : > { %v5469_v24 = vpop.f32.mrf.mxu2 }
 0x6a1   : > { %v5558_v3 = vpop.f32.mrf.mxu3 }
 0x6a2   : > { %v13618_v30 = vadd.f32 %v5558_v3, %v5469_v24  ;;  %v15704_v3 = vld [vmem:[#allocation131_spill] sm:$0xff] }
 0x6a4   : > { %v13620_v34 = vpop.f32.mrf.mxu0  ;;  %v13622_v4 = vpop.f32.mrf.mxu1 }
 0x6a5   : > { %15700 = vst [vmem:[#allocation111_spill] sm:$0xff] %v13620_v34  ;;  %v5647_v34 = vmul.f32 %v15704_v3, %v15704_v3 }
 0x6a6   : > { %15701 = vst [vmem:[#allocation112_spill] sm:$0xff] %v13622_v4  ;;  %v5648_v4 = vmul.f32 %v13408_v38, %v13408_v38  ;;  %v5650_v38 = vmul.f32 %v13414_v63, %v13414_v63 }
 0x6a7   : > { %5731 = vmatmul.f32.gmra.mxu0 %v5645_v7  ;;  %5844 = vmatmul.f32.gmra.mxu1 %v5646_v44 }
 0x6a8   : > { %v5471_v5 = vpop.f32.mrf.mxu2 }
 0x6a9   : > { %v5560_v27 = vpop.f32.mrf.mxu3 }
 0x6aa   : > { %v13628_v15 = vadd.f32 %v5560_v27, %v5471_v5 }
 0x6ac   : > { %v13630_v61 = vpop.f32.mrf.mxu0  ;;  %v13632_v24 = vpop.f32.mrf.mxu1 }
 0x6ad   : > { %15702 = vst [vmem:[#allocation167_spill] sm:$0xff] %v13630_v61  ;;  %5513 = vmatmul.bf16.gmra.mxu2 %v15528_v19 }
 0x6ae   : > { %15703 = vst [vmem:[#allocation168_spill] sm:$0xff] %v13632_v24  ;;  %5602 = vmatmul.bf16.gmra.mxu3 %v15529_v36  ;;  %v15707_v24 = vld [vmem:[#allocation48_spill] sm:$0xff] }
 0x6af   : > { %5734 = vmatmul.f32.gmra.mxu0 %v5647_v34  ;;  %5847 = vmatmul.f32.gmra.mxu1 %v5648_v4  ;;  %v5649_v3 = vmul.f32 %v15707_v24, %v15707_v24 }
 0x6b0   : > { %v5474_v44 = vpop.f32.mrf.mxu2 }
 0x6b1   : > { %v5563_v7 = vpop.f32.mrf.mxu3 }
 0x6b2   : > { %v13640_v5 = vadd.f32 %v5563_v7, %v5474_v44  ;;  %v15710_v7 = vld [vmem:[#allocation132_spill] sm:$0xff] }
 0x6b4   : > { %v13642_v27 = vpop.f32.mrf.mxu0  ;;  %v13644_v61 = vpop.f32.mrf.mxu1 }
 0x6b5   : > { %15705 = vst [vmem:[#allocation198_spill] sm:$0xff] %v13642_v27  ;;  %v5651_v27 = vmul.f32 %v15710_v7, %v15710_v7 }
 0x6b6   : > { %15706 = vst [vmem:[#allocation199_spill] sm:$0xff] %v13644_v61  ;;  %v5652_v61 = vmul.f32 %v13420_v58, %v13420_v58  ;;  %v5654_v58 = vmul.f32 %v13426_v6, %v13426_v6 }
 0x6b7   : > { %5737 = vmatmul.f32.gmra.mxu0 %v5649_v3  ;;  %5850 = vmatmul.f32.gmra.mxu1 %v5650_v38 }
 0x6b8   : > { %v5476_v19 = vpop.f32.mrf.mxu2 }
 0x6b9   : > { %v5565_v36 = vpop.f32.mrf.mxu3 }
 0x6ba   : > { %v13650_v34 = vadd.f32 %v5565_v36, %v5476_v19 }
 0x6bc   : > { %v13652_v4 = vpop.f32.mrf.mxu0  ;;  %v13654_v44 = vpop.f32.mrf.mxu1 }
 0x6bd   : > { %15708 = vst [vmem:[#allocation113_spill] sm:$0xff] %v13652_v4  ;;  %5518 = vmatmul.bf16.gmra.mxu2 %v15539_v47 }
 0x6be   : > { %15709 = vst [vmem:[#allocation114_spill] sm:$0xff] %v13654_v44  ;;  %5607 = vmatmul.bf16.gmra.mxu3 %v15540_v43  ;;  %v15713_v44 = vld [vmem:[#allocation133_spill] sm:$0xff] }
 0x6bf   : > { %5740 = vmatmul.f32.gmra.mxu0 %v5651_v27  ;;  %5853 = vmatmul.f32.gmra.mxu1 %v5652_v61  ;;  %v5653_v7 = vmul.f32 %v15713_v44, %v15713_v44 }
 0x6c0   : > { %v5479_v38 = vpop.f32.mrf.mxu2 }
 0x6c1   : > { %v5568_v3 = vpop.f32.mrf.mxu3 }
 0x6c2   : > { %v13662_v19 = vadd.f32 %v5568_v3, %v5479_v38  ;;  %v15716_v3 = vld [vmem:[#allocation134_spill] sm:$0xff] }
 0x6c4   : > { %v13664_v36 = vpop.f32.mrf.mxu0  ;;  %v13666_v4 = vpop.f32.mrf.mxu1 }
 0x6c5   : > { %15711 = vst [vmem:[#allocation169_spill] sm:$0xff] %v13664_v36  ;;  %v5655_v36 = vmul.f32 %v15716_v3, %v15716_v3 }
 0x6c6   : > { %15712 = vst [vmem:[#allocation170_spill] sm:$0xff] %v13666_v4  ;;  %v5656_v4 = vmul.f32 %v13432_v56, %v13432_v56  ;;  %v5658_v56 = vmul.f32 %v13440_v13, %v13440_v13  ;;  %v15729_v13 = vld [vmem:[#allocation86_spill] sm:$0xff] }
 0x6c7   : > { %5743 = vmatmul.f32.gmra.mxu0 %v5653_v7  ;;  %5856 = vmatmul.f32.gmra.mxu1 %v5654_v58 }
 0x6c8   : > { %v5481_v47 = vpop.f32.mrf.mxu2 }
 0x6c9   : > { %v5570_v43 = vpop.f32.mrf.mxu3 }
 0x6ca   : > { %v13672_v27 = vadd.f32 %v5570_v43, %v5481_v47 }
 0x6cc   : > { %v13674_v61 = vpop.f32.mrf.mxu0  ;;  %v13676_v38 = vpop.f32.mrf.mxu1 }
 0x6cd   : > { %15714 = vst [vmem:[#allocation200_spill] sm:$0xff] %v13674_v61  ;;  %5523 = vmatmul.bf16.gmra.mxu2 %v15550_v28 }
 0x6ce   : > { %15715 = vst [vmem:[#allocation115_spill] sm:$0xff] %v13676_v38  ;;  %5612 = vmatmul.bf16.gmra.mxu3 %v15551_v32  ;;  %v15719_v38 = vld [vmem:[#allocation135_spill] sm:$0xff] }
 0x6cf   : > { %5746 = vmatmul.f32.gmra.mxu0 %v5655_v36  ;;  %5859 = vmatmul.f32.gmra.mxu1 %v5656_v4  ;;  %v5657_v3 = vmul.f32 %v15719_v38, %v15719_v38 }
 0x6d0   : > { %v5484_v58 = vpop.f32.mrf.mxu2 }
 0x6d1   : > { %v5573_v7 = vpop.f32.mrf.mxu3 }
 0x6d2   : > { %v13684_v47 = vadd.f32 %v5573_v7, %v5484_v58  ;;  %v15723_v7 = vld [vmem:[#allocation136_spill] sm:$0xff] }
 0x6d4   : > { %v13686_v43 = vpop.f32.mrf.mxu0  ;;  %v13688_v61 = vpop.f32.mrf.mxu1 }
 0x6d5   : > { %15717 = vst [vmem:[#allocation116_spill] sm:$0xff] %v13686_v43  ;;  %v5659_v43 = vmul.f32 %v15723_v7, %v15723_v7 }
 0x6d6   : > { %15718 = vst [vmem:[#allocation173_spill] sm:$0xff] %v13688_v61  ;;  %v15724_v61 = vld [vmem:[#allocation148_spill] sm:$0xff] }
 0x6d7   : > { %5749 = vmatmul.f32.gmra.mxu0 %v5657_v3  ;;  %5862 = vmatmul.f32.gmra.mxu1 %v5658_v56  ;;  %v5660_v6 = vmul.f32 %v15724_v61, %v15724_v61  ;;  %v5662_v61 = vmul.f32 %v15729_v13, %v15729_v13  ;;  %v15735_v13 = vld [vmem:[#allocation76_spill] sm:$0xff] }
 0x6d8   : > { %v5486_v28 = vpop.f32.mrf.mxu2 }
 0x6d9   : > { %v5575_v32 = vpop.f32.mrf.mxu3 }
 0x6da   : > { %v13694_v36 = vadd.f32 %v5575_v32, %v5486_v28 }
 0x6dc   : > { %15720 = vst [vmem:[#allocation174_spill] sm:$0xff] %v13694_v36  ;;  %v13696_v4 = vpop.f32.mrf.mxu0  ;;  %v13698_v58 = vpop.f32.mrf.mxu1 }
 0x6dd   : > { %15721 = vst [vmem:[#allocation201_spill] sm:$0xff] %v13696_v4  ;;  %5528 = vmatmul.bf16.gmra.mxu2 %v15564_v23 }
 0x6de   : > { %15722 = vst [vmem:[#allocation202_spill] sm:$0xff] %v13698_v58  ;;  %5617 = vmatmul.bf16.gmra.mxu3 %v15565_v12  ;;  %v15728_v58 = vld [vmem:[#allocation75_spill] sm:$0xff] }
 0x6df   : > { %5752 = vmatmul.f32.gmra.mxu0 %v5659_v43  ;;  %5865 = vmatmul.f32.gmra.mxu1 %v5660_v6  ;;  %v5661_v7 = vmul.f32 %v15728_v58, %v15728_v58 }
 0x6e0   : > { %v5489_v56 = vpop.f32.mrf.mxu2 }
 0x6e1   : > { %v5578_v3 = vpop.f32.mrf.mxu3 }
 0x6e2   : > { %v13706_v28 = vadd.f32 %v5578_v3, %v5489_v56  ;;  %v15733_v3 = vld [vmem:[#allocation137_spill] sm:$0xff] }
 0x6e4   : > { %15725 = vst [vmem:[#allocation117_spill] sm:$0xff] %v13706_v28  ;;  %v13708_v32 = vpop.f32.mrf.mxu0  ;;  %v13710_v4 = vpop.f32.mrf.mxu1  ;;  %v9092_v28 = vld [vmem:[#allocation13 + $0xf0] sm:$0xf] }
 0x6e5   : > { %15726 = vst [vmem:[#allocation118_spill] sm:$0xff] %v13708_v32  ;;  %v5663_v32 = vmul.f32 %v15733_v3, %v15733_v3  ;;  %v5666_v3 = vmul.f32 %v13464_v60, %v13464_v60 }
 0x6e6   : > { %15727 = vst [vmem:[#allocation175_spill] sm:$0xff] %v13710_v4  ;;  %v5664_v4 = vmul.f32 %v13458_v14, %v13458_v14 }
 0x6e7   : > { %5755 = vmatmul.f32.gmra.mxu0 %v5661_v7  ;;  %5868 = vmatmul.f32.gmra.mxu1 %v5662_v61 }
 0x6e8   : > { %v5491_v23 = vpop.f32.mrf.mxu2 }
 0x6e9   : > { %v5580_v12 = vpop.f32.mrf.mxu3 }
 0x6ea   : > { %v13716_v43 = vadd.f32 %v5580_v12, %v5491_v23 }
 0x6ec   : > { %15730 = vst [vmem:[#allocation176_spill] sm:$0xff] %v13716_v43  ;;  %v13718_v6 = vpop.f32.mrf.mxu0  ;;  %v13720_v56 = vpop.f32.mrf.mxu1 }
 0x6ed   : > { %15731 = vst [vmem:[#allocation203_spill] sm:$0xff] %v13718_v6  ;;  %5533 = vmatmul.bf16.gmra.mxu2 %v15579_v46 }
 0x6ee   : > { %15732 = vst [vmem:[#allocation204_spill] sm:$0xff] %v13720_v56  ;;  %5622 = vmatmul.bf16.gmra.mxu3 %v15580_v42  ;;  %v5665_v56 = vmul.f32 %v15735_v13, %v15735_v13  ;;  %v5668_v13 = vmul.f32 %v13470_v31, %v13470_v31  ;;  %v9285_v31 = vld [vmem:[#allocation13 + $0xf4] sm:$0xf0] }
 0x6ef   : > { %5758 = vmatmul.f32.gmra.mxu0 %v5663_v32  ;;  %5871 = vmatmul.f32.gmra.mxu1 %v5664_v4  ;;  %v9093_v44 = vor.u32 %v9285_v31, %v9092_v28 }
 0x6f0   : > { %v5494_v61 = vpop.f32.mrf.mxu2 }
 0x6f1   : > { %v5583_v7 = vpop.f32.mrf.mxu3  ;;  %7301 = vmatpush.bf16.msra.mxu1 %v9093_v44 }
 0x6f2   : > { %v13728_v23 = vadd.f32 %v5583_v7, %v5494_v61 }
 0x6f4   : > { %15734 = vst [vmem:[#allocation119_spill] sm:$0xff] %v13728_v23  ;;  %v5714_v12 = vpop.f32.mrf.mxu0  ;;  %v5827_v6 = vpop.f32.mrf.mxu1  ;;  %v15737_v23 = vld [vmem:[#allocation138_spill] sm:$0xff] }
 0x6f5   : > { %v5828_v58 = vadd.f32 %v5827_v6, %v5714_v12  ;;  %v5667_v38 = vmul.f32 %v15737_v23, %v15737_v23  ;;  %v9030_v6 = vld [vmem:[#allocation13 + $0x78] sm:$0xf0] }
 0x6f7   : > { %v5923_v14 = vmul.f32 0.0078125, %v5828_v58  ;;  %5761 = vmatmul.f32.gmra.mxu0 %v5665_v56  ;;  %5874 = vmatmul.f32.gmra.mxu1 %v5666_v3  ;;  %v9268_v58 = vld [vmem:[#allocation13 + $0x74] sm:$0xf]  ;;  %v9028_v3 = vld [vmem:[#allocation13 + $0x70] sm:$0xf] }
 0x6f8   : > { %v5496_v46 = vpop.f32.mrf.mxu2  ;;  %v9284_v56 = vld [vmem:[#allocation13 + $0xf4] sm:$0xf] }
 0x6f9   : > { %v5585_v42 = vpop.f32.mrf.mxu3  ;;  %v5955_v32 = vadd.f32 1.1920929e-07, %v5923_v14 }
 0x6fa   : > { %v13734_v4 = vadd.f32 %v5585_v42, %v5496_v46  ;;  %v9033_v46 = vor.u32 %v9268_v58, %v9030_v6  ;;  %v9094_v42 = vld [vmem:[#allocation13 + $0xf8] sm:$0xf0]  ;;  %v15738_v58 = vld [vmem:[#allocation77_spill] sm:$0xff] }
 0x6fb   : > { %9565 = vrsqrt.f32 %v5955_v32  ;;  %v9097_v23 = vor.u32 %v9284_v56, %v9094_v42  ;;  %v5669_v6 = vmul.f32 %v15738_v58, %v15738_v58  ;;  %v5670_v56 = vmul.f32 %v13476_v39, %v13476_v39 }
 0x6fc   : > { %15736 = vst [vmem:[#allocation120_spill] sm:$0xff] %v13734_v4  ;;  %v5717_v61 = vpop.f32.mrf.mxu0  ;;  %v5830_v7 = vpop.f32.mrf.mxu1  ;;  %v9269_v4 = vld [vmem:[#allocation13 + $0x74] sm:$0xf0]  ;;  %7390 = vmatpush.bf16.msra.mxu2 %v9033_v46  ;;  %vm5993_vm15 = vweird.f32 %v5955_v32 }
 0x6fd   : > { %v5831_v43 = vadd.f32 %v5830_v7, %v5717_v61  ;;  %5538 = vmatmul.bf16.gmra.mxu2 %v15595_v22  ;;  %7479 = vmatpush.bf16.msra.mxu3 %v9097_v23 }
 0x6fe   : > { %5627 = vmatmul.bf16.gmra.mxu3 %v15596_v35  ;;  %v9029_v35 = vor.u32 %v9269_v4, %v9028_v3 }
 0x6ff   : > { %v5924_v14 = vmul.f32 0.0078125, %v5831_v43  ;;  %5764 = vmatmul.f32.gmra.mxu0 %v5667_v38  ;;  %5877 = vmatmul.f32.gmra.mxu1 %v5668_v13 }
 0x700   : > { %v5499_v12 = vpop.f32.mrf.mxu2  ;;  %7212 = vmatpush.bf16.msra.mxu0 %v9029_v35 }
 0x701   : > { %v5588_v60 = vpop.f32.mrf.mxu3  ;;  %v9566_v61 = vpop.eup %9565  ;;  %v5956_v7 = vadd.f32 1.1920929e-07, %v5924_v14 }
 0x702   : > { %v13742_v22 = vadd.f32 %v5588_v60, %v5499_v12  ;;  %v5988_v36 = vmul.f32 %v9566_v61, %v5955_v32  ;;  %vm5994_vm1 = vweird.f32 %v9566_v61 }
 0x703   : > { %9567 = vrsqrt.f32 %v5956_v7  ;;  %vm5995_vm0 = vmor %vm5993_vm15, %vm5994_vm1  ;;  %vm6003_vm3 = vweird.f32 %v5956_v7 }
 0x704   : > { %v5989_v13 = vmul.f32 %v9566_v61, %v5988_v36  ;;  %v5720_v38 = vpop.f32.mrf.mxu0  ;;  %v5833_v43 = vpop.f32.mrf.mxu1 }
 0x705   : > { %v5834_v14 = vadd.f32 %v5833_v43, %v5720_v38  ;;  %v15739_v43 = vld [vmem:[#allocation139_spill] sm:$0xff] }
 0x706   : > { %v5990_v60 = vmul.f32 0.5, %v5989_v13 }
 0x707   : > { %v5925_v42 = vmul.f32 0.0078125, %v5834_v14  ;;  %5767 = vmatmul.f32.gmra.mxu0 %v5669_v6  ;;  %5880 = vmatmul.f32.gmra.mxu1 %v5670_v56  ;;  %v5671_v6 = vmul.f32 %v15739_v43, %v15739_v43  ;;  %v5672_v56 = vmul.f32 %v13482_v2, %v13482_v2 }
 0x708   : > { %v5991_v31 = vsub.f32 1.5, %v5990_v60  ;;  %v5501_v28 = vpop.f32.mrf.mxu2 }
 0x709   : > { %v5590_v23 = vpop.f32.mrf.mxu3  ;;  %v9568_v35 = vpop.eup %9567  ;;  %v5957_v44 = vadd.f32 1.1920929e-07, %v5925_v42 }
 0x70a   : > { %v13748_v36 = vadd.f32 %v5590_v23, %v5501_v28  ;;  %v5992_v4 = vmul.f32 %v9566_v61, %v5991_v31  ;;  %v5998_v46 = vmul.f32 %v9568_v35, %v5956_v7  ;;  %vm6004_vm2 = vweird.f32 %v9568_v35 }
 0x70b   : > { %9569 = vrsqrt.f32 %v5957_v44  ;;  %vm6005_vm5 = vmor %vm6003_vm3, %vm6004_vm2  ;;  %vm6013_vm7 = vweird.f32 %v5957_v44 }
 0x70c   : > { %v5999_v3 = vmul.f32 %v9568_v35, %v5998_v46  ;;  %v5723_v12 = vpop.f32.mrf.mxu0  ;;  %v5836_v38 = vpop.f32.mrf.mxu1  ;;  %v5996_v13 = vsel %vm5995_vm0, %v9566_v61, %v5992_v4 }
 0x70d   : > { %v5837_v14 = vadd.f32 %v5836_v38, %v5723_v12  ;;  %8905 = vmatmul.msk.f32.vlgmr.msrb.gmra.mxu2 %vm3825_vm4, %v5996_v13 }
 0x70e   : > { %8938 = vmatmul.msk.f32.vlgmr.msrb.gmra.mxu3 %vm3825_vm4, %v5996_v13  ;;  %v6000_v60 = vmul.f32 0.5, %v5999_v3 }
 0x70f   : > { %v5926_v32 = vmul.f32 0.0078125, %v5837_v14  ;;  %5770 = vmatmul.f32.gmra.mxu0 %v5671_v6  ;;  %5883 = vmatmul.f32.gmra.mxu1 %v5672_v56  ;;  %v15740_v6 = vld [vmem:[#allocation140_spill] sm:$0xff]  ;;  %v5674_v14 = vmul.f32 %v13488_v10, %v13488_v10 }
 0x710   : > { %v5504_v42 = vpop.f32.mrf.mxu2  ;;  %v6001_v28 = vsub.f32 1.5, %v6000_v60  ;;  %v5673_v56 = vmul.f32 %v15740_v6, %v15740_v6  ;;  %v9282_v6 = vld [vmem:[#allocation13 + $0xe4] sm:$0xf] }
 0x711   : > { %v5593_v31 = vpop.f32.mrf.mxu3  ;;  %v9570_v61 = vpop.eup %9569  ;;  %v13756_v23 = vadd.f32 1.1920929e-07, %v5926_v32 }
 0x712   : > { %v13758_v4 = vadd.f32 %v5593_v31, %v5504_v42  ;;  %v6008_v46 = vmul.f32 %v9570_v61, %v5957_v44  ;;  %v6002_v2 = vmul.f32 %v9568_v35, %v6001_v28  ;;  %vm6014_vm6 = vweird.f32 %v9570_v61  ;;  %v9266_v44 = vld [vmem:[#allocation13 + $0x64] sm:$0xf] }
 0x713   : > { %9571 = vrsqrt.f32 %v13756_v23  ;;  %vm6015_vm8 = vmor %vm6013_vm7, %vm6014_vm6  ;;  %vm6023_vm10 = vweird.f32 %v13756_v23 }
 0x714   : > { %v6009_v12 = vmul.f32 %v9570_v61, %v6008_v46  ;;  %v5726_v3 = vpop.f32.mrf.mxu0  ;;  %v5839_v38 = vpop.f32.mrf.mxu1  ;;  %v6006_v13 = vsel %vm6005_vm5, %v9568_v35, %v6002_v2 }
 0x715   : > { %v5840_v60 = vadd.f32 %v5839_v38, %v5726_v3  ;;  %8906 = vmatmul.msk.f32.gmra.mxu2 %vm3825_vm4, %v6006_v13 }
 0x716   : > { %8939 = vmatmul.msk.f32.gmra.mxu3 %vm3825_vm4, %v6006_v13  ;;  %v6010_v32 = vmul.f32 0.5, %v6009_v12 }
 0x717   : > { %v5927_v7 = vmul.f32 0.0078125, %v5840_v60  ;;  %5773 = vmatmul.f32.gmra.mxu0 %v5673_v56  ;;  %5886 = vmatmul.f32.gmra.mxu1 %v5674_v14  ;;  %v15741_v14 = vld [vmem:[#allocation141_spill] sm:$0xff] }
 0x718   : > { %v5506_v42 = vpop.f32.mrf.mxu2  ;;  %v6011_v28 = vsub.f32 1.5, %v6010_v32  ;;  %v5675_v60 = vmul.f32 %v15741_v14, %v15741_v14  ;;  %v5676_v32 = vmul.f32 %v13496_v45, %v13496_v45  ;;  %v9020_v45 = vld [vmem:[#allocation13 + $0x60] sm:$0xf] }
 0x719   : > { %v5595_v31 = vpop.f32.mrf.mxu3  ;;  %v9572_v2 = vpop.eup %9571  ;;  %v13767_v35 = vadd.f32 1.1920929e-07, %v5927_v7 }
 0x71a   : > { %v13769_v46 = vadd.f32 %v5595_v31, %v5506_v42  ;;  %v6018_v10 = vmul.f32 %v9572_v2, %v13756_v23  ;;  %v6012_v3 = vmul.f32 %v9570_v61, %v6011_v28  ;;  %v9022_v31 = vld [vmem:[#allocation13 + $0x68] sm:$0xf0]  ;;  %vm6024_vm9 = vweird.f32 %v9572_v2 }
 0x71b   : > { %9573 = vrsqrt.f32 %v13767_v35  ;;  %vm6025_vm11 = vmor %vm6023_vm10, %vm6024_vm9  ;;  %vm6033_vm13 = vweird.f32 %v13767_v35 }
 0x71c   : > { %v6019_v12 = vmul.f32 %v9572_v2, %v6018_v10  ;;  %v5729_v38 = vpop.f32.mrf.mxu0  ;;  %v5842_v13 = vpop.f32.mrf.mxu1  ;;  %v6016_v56 = vsel %vm6015_vm8, %v9570_v61, %v6012_v3  ;;  %v9025_v10 = vor.u32 %v9266_v44, %v9022_v31  ;;  %v9086_v61 = vld [vmem:[#allocation13 + $0xe8] sm:$0xf0] }
 0x71d   : > { %v5843_v7 = vadd.f32 %v5842_v13, %v5729_v38  ;;  %8907 = vmatmul.msk.f32.gmra.mxu2 %vm3825_vm4, %v6016_v56  ;;  %v9089_v39 = vor.u32 %v9282_v6, %v9086_v61  ;;  %v9267_v38 = vld [vmem:[#allocation13 + $0x64] sm:$0xf0] }
 0x71e   : > { %8940 = vmatmul.msk.f32.gmra.mxu3 %vm3825_vm4, %v6016_v56  ;;  %v6020_v42 = vmul.f32 0.5, %v6019_v12  ;;  %7391 = vmatpush.bf16.msra.mxu2 %v9025_v10  ;;  %v9021_v12 = vor.u32 %v9267_v38, %v9020_v45  ;;  %v15742_v45 = vld [vmem:[#allocation70_spill] sm:$0xff] }
 0x71f   : > { %v5928_v28 = vmul.f32 0.0078125, %v5843_v7  ;;  %5776 = vmatmul.f32.gmra.mxu0 %v5675_v60  ;;  %5889 = vmatmul.f32.gmra.mxu1 %v5676_v32  ;;  %v9084_v7 = vld [vmem:[#allocation13 + $0xe0] sm:$0xf]  ;;  %v9283_v60 = vld [vmem:[#allocation13 + $0xe4] sm:$0xf0]  ;;  %v5677_v10 = vmul.f32 %v15742_v45, %v15742_v45 }
 0x720   : > { %v5509_v3 = vpop.f32.mrf.mxu2  ;;  %v6021_v14 = vsub.f32 1.5, %v6020_v42  ;;  %7480 = vmatpush.bf16.msra.mxu3 %v9089_v39  ;;  %v9085_v42 = vor.u32 %v9283_v60, %v9084_v7  ;;  %7213 = vmatpush.bf16.msra.mxu0 %v9021_v12 }
 0x721   : > { %v5598_v43 = vpop.f32.mrf.mxu3  ;;  %v9574_v13 = vpop.eup %9573  ;;  %v13779_v58 = vadd.f32 1.1920929e-07, %v5928_v28 }
 0x722   : > { %v13781_v56 = vadd.f32 %v5598_v43, %v5509_v3  ;;  %v6028_v32 = vmul.f32 %v9574_v13, %v13767_v35  ;;  %v6022_v44 = vmul.f32 %v9572_v2, %v6021_v14  ;;  %7302 = vmatpush.bf16.msra.mxu1 %v9085_v42  ;;  %v5678_v14 = vmul.f32 %v13504_v1, %v13504_v1 }
 0x723   : > { %9575 = vrsqrt.f32 %v13779_v58  ;;  %vm6034_vm12 = vweird.f32 %v9574_v13  ;;  %vm6043_vm15 = vweird.f32 %v13779_v58 }
 0x724   : > { %v6029_v6 = vmul.f32 %v9574_v13, %v6028_v32  ;;  %v5732_v31 = vpop.f32.mrf.mxu0  ;;  %v5845_v43 = vpop.f32.mrf.mxu1  ;;  %v6026_v28 = vsel %vm6025_vm11, %v9572_v2, %v6022_v44  ;;  %vm6035_vm14 = vmor %vm6033_vm13, %vm6034_vm12 }
 0x725   : > { %v5846_v61 = vadd.f32 %v5845_v43, %v5732_v31  ;;  %8908 = vmatmul.msk.f32.gmra.mxu2 %vm3825_vm4, %v6026_v28 }
 0x726   : > { %8941 = vmatmul.msk.f32.gmra.mxu3 %vm3825_vm4, %v6026_v28  ;;  %v6030_v39 = vmul.f32 0.5, %v6029_v6  ;;  %v15743_v28 = vld [vmem:[#allocation71_spill] sm:$0xff] }
 0x727   : > { %v5929_v23 = vmul.f32 0.0078125, %v5846_v61  ;;  %5779 = vmatmul.f32.gmra.mxu0 %v5677_v10  ;;  %5892 = vmatmul.f32.gmra.mxu1 %v5678_v14  ;;  %v5679_v10 = vmul.f32 %v15743_v28, %v15743_v28  ;;  %v5680_v14 = vmul.f32 %v13512_v0, %v13512_v0 }
 0x728   : > { %v5511_v3 = vpop.f32.mrf.mxu2  ;;  %v6031_v12 = vsub.f32 1.5, %v6030_v39 }
 0x729   : > { %v5600_v38 = vpop.f32.mrf.mxu3  ;;  %v9576_v2 = vpop.eup %9575  ;;  %v5961_v7 = vadd.f32 1.1920929e-07, %v5929_v23 }
 0x72a   : > { %v13793_v60 = vadd.f32 %v5600_v38, %v5511_v3  ;;  %v6038_v32 = vmul.f32 %v9576_v2, %v13779_v58  ;;  %v6032_v44 = vmul.f32 %v9574_v13, %v6031_v12  ;;  %vm6044_vm1 = vweird.f32 %v9576_v2 }
 0x72b   : > { %9577 = vrsqrt.f32 %v5961_v7  ;;  %vm6045_vm0 = vmor %vm6043_vm15, %vm6044_vm1  ;;  %vm6053_vm3 = vweird.f32 %v5961_v7 }
 0x72c   : > { %v6039_v42 = vmul.f32 %v9576_v2, %v6038_v32  ;;  %v5735_v6 = vpop.f32.mrf.mxu0  ;;  %v5848_v31 = vpop.f32.mrf.mxu1  ;;  %v6036_v43 = vsel %vm6035_vm14, %v9574_v13, %v6032_v44 }
 0x72d   : > { %v5849_v61 = vadd.f32 %v5848_v31, %v5735_v6  ;;  %8909 = vmatmul.msk.f32.gmra.mxu2 %vm3825_vm4, %v6036_v43 }
 0x72e   : > { %8942 = vmatmul.msk.f32.gmra.mxu3 %vm3825_vm4, %v6036_v43  ;;  %v6040_v39 = vmul.f32 0.5, %v6039_v42 }
 0x72f   : > { %v5930_v23 = vmul.f32 0.0078125, %v5849_v61  ;;  %5782 = vmatmul.f32.gmra.mxu0 %v5679_v10  ;;  %5895 = vmatmul.f32.gmra.mxu1 %v5680_v14  ;;  %v15744_v10 = vld [vmem:[#allocation80_spill] sm:$0xff]  ;;  %v5682_v61 = vmul.f32 %v13520_v25, %v13520_v25 }
 0x730   : > { %v5514_v35 = vpop.f32.mrf.mxu2  ;;  %v6041_v38 = vsub.f32 1.5, %v6040_v39  ;;  %v5681_v14 = vmul.f32 %v15744_v10, %v15744_v10  ;;  %v9280_v10 = vld [vmem:[#allocation13 + $0xd4] sm:$0xf] }
 0x731   : > { %v5603_v3 = vpop.f32.mrf.mxu3  ;;  %v9578_v13 = vpop.eup %9577  ;;  %v13803_v12 = vadd.f32 1.1920929e-07, %v5930_v23 }
 0x732   : > { %v13805_v32 = vadd.f32 %v5603_v3, %v5514_v35  ;;  %v6048_v44 = vmul.f32 %v9578_v13, %v5961_v7  ;;  %v6042_v0 = vmul.f32 %v9576_v2, %v6041_v38  ;;  %vm6054_vm2 = vweird.f32 %v9578_v13  ;;  %v9264_v7 = vld [vmem:[#allocation13 + $0x54] sm:$0xf] }
 0x733   : > { %9579 = vrsqrt.f32 %v13803_v12  ;;  %vm6055_vm5 = vmor %vm6053_vm3, %vm6054_vm2  ;;  %vm6063_vm7 = vweird.f32 %v13803_v12 }
 0x734   : > { %v6049_v42 = vmul.f32 %v9578_v13, %v6048_v44  ;;  %v5738_v6 = vpop.f32.mrf.mxu0  ;;  %v5851_v31 = vpop.f32.mrf.mxu1  ;;  %v6046_v43 = vsel %vm6045_vm0, %v9576_v2, %v6042_v0 }
 0x735   : > { %v5852_v39 = vadd.f32 %v5851_v31, %v5738_v6  ;;  %8910 = vmatmul.msk.f32.gmra.mxu2 %vm3825_vm4, %v6046_v43 }
 0x736   : > { %8943 = vmatmul.msk.f32.gmra.mxu3 %vm3825_vm4, %v6046_v43  ;;  %v6050_v23 = vmul.f32 0.5, %v6049_v42 }
 0x737   : > { %v5931_v58 = vmul.f32 0.0078125, %v5852_v39  ;;  %5785 = vmatmul.f32.gmra.mxu0 %v5681_v14  ;;  %5898 = vmatmul.f32.gmra.mxu1 %v5682_v61  ;;  %v15746_v61 = vld [vmem:[#allocation81_spill] sm:$0xff] }
 0x738   : > { %v5516_v35 = vpop.f32.mrf.mxu2  ;;  %v6051_v38 = vsub.f32 1.5, %v6050_v23  ;;  %v5683_v39 = vmul.f32 %v15746_v61, %v15746_v61  ;;  %v5684_v23 = vmul.f32 %v13528_v37, %v13528_v37  ;;  %v9012_v37 = vld [vmem:[#allocation13 + $0x50] sm:$0xf] }
 0x739   : > { %v5605_v3 = vpop.f32.mrf.mxu3  ;;  %v9580_v0 = vpop.eup %9579  ;;  %v13815_v2 = vadd.f32 1.1920929e-07, %v5931_v58 }
 0x73a   : > { %v13817_v44 = vadd.f32 %v5605_v3, %v5516_v35  ;;  %v6058_v25 = vmul.f32 %v9580_v0, %v13803_v12  ;;  %v6052_v6 = vmul.f32 %v9578_v13, %v6051_v38  ;;  %v9014_v3 = vld [vmem:[#allocation13 + $0x58] sm:$0xf0]  ;;  %vm6064_vm6 = vweird.f32 %v9580_v0  ;;  %v15748_v12 = vld [vmem:[#allocation142_spill] sm:$0xff] }
 0x73b   : > { %9581 = vrsqrt.f32 %v13815_v2  ;;  %vm6065_vm8 = vmor %vm6063_vm7, %vm6064_vm6  ;;  %vm6073_vm10 = vweird.f32 %v13815_v2 }
 0x73c   : > { %15745 = vst [vmem:[#allocation177_spill] sm:$0xff] %v13817_v44  ;;  %v6059_v42 = vmul.f32 %v9580_v0, %v6058_v25  ;;  %v5741_v31 = vpop.f32.mrf.mxu0  ;;  %v5854_v43 = vpop.f32.mrf.mxu1  ;;  %v6056_v14 = vsel %vm6055_vm5, %v9578_v13, %v6052_v6  ;;  %v9017_v25 = vor.u32 %v9264_v7, %v9014_v3  ;;  %v9078_v13 = vld [vmem:[#allocation13 + $0xd8] sm:$0xf0]  ;;  %v9263_v3 = vld [vmem:[#allocation13 + $0x44] sm:$0xf0] }
 0x73d   : > { %v5855_v58 = vadd.f32 %v5854_v43, %v5741_v31  ;;  %8911 = vmatmul.msk.f32.gmra.mxu2 %vm3825_vm4, %v6056_v14  ;;  %v9081_v1 = vor.u32 %v9280_v10, %v9078_v13  ;;  %v9265_v31 = vld [vmem:[#allocation13 + $0x54] sm:$0xf0]  ;;  %v9068_v13 = vld [vmem:[#allocation13 + $0xc0] sm:$0xf] }
 0x73e   : > { %8944 = vmatmul.msk.f32.gmra.mxu3 %vm3825_vm4, %v6056_v14  ;;  %v6060_v35 = vmul.f32 0.5, %v6059_v42  ;;  %7392 = vmatpush.bf16.msra.mxu2 %v9017_v25  ;;  %v9013_v14 = vor.u32 %v9265_v31, %v9012_v37 }
 0x73f   : > { %v5932_v38 = vmul.f32 0.0078125, %v5855_v58  ;;  %5788 = vmatmul.f32.gmra.mxu0 %v5683_v39  ;;  %5901 = vmatmul.f32.gmra.mxu1 %v5684_v23  ;;  %v9076_v39 = vld [vmem:[#allocation13 + $0xd0] sm:$0xf]  ;;  %v9281_v23 = vld [vmem:[#allocation13 + $0xd4] sm:$0xf0] }
 0x740   : > { %v5519_v6 = vpop.f32.mrf.mxu2  ;;  %v6061_v61 = vsub.f32 1.5, %v6060_v35  ;;  %7481 = vmatpush.bf16.msra.mxu3 %v9081_v1  ;;  %v9077_v10 = vor.u32 %v9281_v23, %v9076_v39  ;;  %v9004_v35 = vld [vmem:[#allocation13 + $0x40] sm:$0xf]  ;;  %7214 = vmatpush.bf16.msra.mxu0 %v9013_v14  ;;  %v5685_v1 = vmul.f32 %v15748_v12, %v15748_v12  ;;  %v5686_v39 = vmul.f32 %v13536_v9, %v13536_v9 }
 0x741   : > { %v5608_v28 = vpop.f32.mrf.mxu3  ;;  %v13827_v43 = vpop.eup %9581  ;;  %v13829_v45 = vadd.f32 1.1920929e-07, %v5932_v38 }
 0x742   : > { %v13831_v42 = vadd.f32 %v5608_v28, %v5519_v6  ;;  %v6068_v58 = vmul.f32 %v13827_v43, %v13815_v2  ;;  %v6062_v7 = vmul.f32 %v9580_v0, %v6061_v61  ;;  %v9279_v28 = vld [vmem:[#allocation13 + $0xc4] sm:$0xf0]  ;;  %7303 = vmatpush.bf16.msra.mxu1 %v9077_v10  ;;  %v9005_v61 = vor.u32 %v9263_v3, %v9004_v35 }
 0x743   : > { %9583 = vrsqrt.f32 %v13829_v45  ;;  %v9069_v31 = vor.u32 %v9279_v28, %v9068_v13  ;;  %vm6074_vm9 = vweird.f32 %v13827_v43  ;;  %vm6083_vm13 = vweird.f32 %v13829_v45 }
 0x744   : > { %15747 = vst [vmem:[#allocation178_spill] sm:$0xff] %v13831_v42  ;;  %v6069_v37 = vmul.f32 %v13827_v43, %v6068_v58  ;;  %v5744_v38 = vpop.f32.mrf.mxu0  ;;  %v5857_v25 = vpop.f32.mrf.mxu1  ;;  %v6066_v6 = vsel %vm6065_vm8, %v9580_v0, %v6062_v7  ;;  %v8996_v42 = vld [vmem:[#allocation13 + $0x30] sm:$0xf]  ;;  %v9261_v58 = vld [vmem:[#allocation13 + $0x34] sm:$0xf0]  ;;  %7215 = vmatpush.bf16.msra.mxu0 %v9005_v61  ;;  %vm6075_vm11 = vmor %vm6073_vm10, %vm6074_vm9 }
 0x745   : > { %v5858_v23 = vadd.f32 %v5857_v25, %v5744_v38  ;;  %8912 = vmatmul.msk.f32.gmra.mxu2 %vm3825_vm4, %v6066_v6  ;;  %v9060_v0 = vld [vmem:[#allocation13 + $0xb0] sm:$0xf]  ;;  %v9277_v7 = vld [vmem:[#allocation13 + $0xb4] sm:$0xf0]  ;;  %v8997_v13 = vor.u32 %v9261_v58, %v8996_v42  ;;  %v9275_v61 = vld [vmem:[#allocation13 + $0xa4] sm:$0xf0] }
 0x746   : > { %8945 = vmatmul.msk.f32.gmra.mxu3 %vm3825_vm4, %v6066_v6  ;;  %v6070_v14 = vmul.f32 0.5, %v6069_v37  ;;  %7304 = vmatpush.bf16.msra.mxu1 %v9069_v31  ;;  %v9061_v28 = vor.u32 %v9277_v7, %v9060_v0  ;;  %v15749_v7 = vld [vmem:[#allocation74_spill] sm:$0xff] }
 0x747   : > { %v5933_v44 = vmul.f32 0.0078125, %v5858_v23  ;;  %5791 = vmatmul.f32.gmra.mxu0 %v5685_v1  ;;  %5904 = vmatmul.f32.gmra.mxu1 %v5686_v39  ;;  %v8988_v39 = vld [vmem:[#allocation13 + $0x20] sm:$0xf]  ;;  %v9259_v23 = vld [vmem:[#allocation13 + $0x24] sm:$0xf0] }
 0x748   : > { %v6071_v10 = vsub.f32 1.5, %v6070_v14  ;;  %v5521_v35 = vpop.f32.mrf.mxu2  ;;  %v9052_v14 = vld [vmem:[#allocation13 + $0xa0] sm:$0xf]  ;;  %v8989_v42 = vor.u32 %v9259_v23, %v8988_v39  ;;  %7216 = vmatpush.bf16.msra.mxu0 %v8997_v13  ;;  %v9257_v23 = vld [vmem:[#allocation13 + $0x14] sm:$0xf0] }
 0x749   : > { %v5610_v3 = vpop.f32.mrf.mxu3  ;;  %v9584_v38 = vpop.eup %9583  ;;  %v13846_v25 = vadd.f32 1.1920929e-07, %v5933_v44  ;;  %v9053_v2 = vor.u32 %v9275_v61, %v9052_v14  ;;  %v9273_v13 = vld [vmem:[#allocation13 + $0x94] sm:$0xf0] }
 0x74a   : > { %v13848_v37 = vadd.f32 %v5610_v3, %v5521_v35  ;;  %v6078_v6 = vmul.f32 %v9584_v38, %v13829_v45  ;;  %v6072_v1 = vmul.f32 %v13827_v43, %v6071_v10  ;;  %7305 = vmatpush.bf16.msra.mxu1 %v9061_v28  ;;  %v5687_v10 = vmul.f32 %v15749_v7, %v15749_v7  ;;  %v9036_v7 = vld [vmem:[#allocation13 + $0x80] sm:$0xf] }
 0x74b   : > { %9585 = vrsqrt.f32 %v13846_v25  ;;  %v5688_v35 = vmul.f32 %v13544_v8, %v13544_v8  ;;  %vm6084_vm12 = vweird.f32 %v9584_v38  ;;  %v5690_v45 = vmul.f32 %v13552_v48, %v13552_v48 }
 0x74c   : > { %v6079_v44 = vmul.f32 %v9584_v38, %v6078_v6  ;;  %v5747_v31 = vpop.f32.mrf.mxu0  ;;  %v5860_v58 = vpop.f32.mrf.mxu1  ;;  %v6076_v0 = vsel %vm6075_vm11, %v13827_v43, %v6072_v1  ;;  %v8980_v6 = vld [vmem:[#allocation13 + $0x10] sm:$0xf]  ;;  %7217 = vmatpush.bf16.msra.mxu0 %v8989_v42  ;;  %vm6085_vm14 = vmor %vm6083_vm13, %vm6084_vm12  ;;  %vm6093_vm15 = vweird.f32 %v13846_v25 }
 0x74d   : > { %v5861_v3 = vadd.f32 %v5860_v58, %v5747_v31  ;;  %8913 = vmatmul.msk.f32.gmra.mxu2 %vm3825_vm4, %v6076_v0  ;;  %v9044_v43 = vld [vmem:[#allocation13 + $0x90] sm:$0xf]  ;;  %v8981_v61 = vor.u32 %v9257_v23, %v8980_v6 }
 0x74e   : > { %8946 = vmatmul.msk.f32.gmra.mxu3 %vm3825_vm4, %v6076_v0  ;;  %v6080_v39 = vmul.f32 0.5, %v6079_v44  ;;  %7306 = vmatpush.bf16.msra.mxu1 %v9053_v2  ;;  %v9045_v31 = vor.u32 %v9273_v13, %v9044_v43  ;;  %v9271_v2 = vld [vmem:[#allocation13 + $0x84] sm:$0xf0]  ;;  %v15750_v13 = vld [vmem:[#allocation166_spill] sm:$0xff] }
 0x74f   : > { %v5934_v9 = vmul.f32 0.0078125, %v5861_v3  ;;  %5794 = vmatmul.f32.gmra.mxu0 %v5687_v10  ;;  %5907 = vmatmul.f32.gmra.mxu1 %v5688_v35  ;;  %v8972_v10 = vld [vmem:[#allocation13] sm:$0xf]  ;;  %v9255_v35 = vld [vmem:[#allocation13 + $0x4] sm:$0xf0]  ;;  %v9037_v43 = vor.u32 %v9271_v2, %v9036_v7 }
 0x750   : > { %v5524_v28 = vpop.f32.mrf.mxu2  ;;  %v6081_v14 = vsub.f32 1.5, %v6080_v39  ;;  %v8973_v42 = vor.u32 %v9255_v35, %v8972_v10  ;;  %7218 = vmatpush.bf16.msra.mxu0 %v8981_v61 }
 0x751   : > { %v5613_v1 = vpop.f32.mrf.mxu3  ;;  %v9586_v58 = vpop.eup %9585  ;;  %v13863_v8 = vadd.f32 1.1920929e-07, %v5934_v9 }
 0x752   : > { %v13865_v0 = vadd.f32 %v5613_v1, %v5524_v28  ;;  %v6088_v44 = vmul.f32 %v9586_v58, %v13846_v25  ;;  %v6082_v3 = vmul.f32 %v9584_v38, %v6081_v14  ;;  %7307 = vmatpush.bf16.msra.mxu1 %v9045_v31  ;;  %v5689_v28 = vmul.f32 %v15750_v13, %v15750_v13 }
 0x753   : > { %9587 = vrsqrt.f32 %v13863_v8  ;;  %vm6094_vm1 = vweird.f32 %v9586_v58  ;;  %vm6103_vm3 = vweird.f32 %v13863_v8 }
 0x754   : > { %v6089_v39 = vmul.f32 %v9586_v58, %v6088_v44  ;;  %v5750_v6 = vpop.f32.mrf.mxu0  ;;  %v5863_v9 = vpop.f32.mrf.mxu1  ;;  %v6086_v23 = vsel %vm6085_vm14, %v9584_v38, %v6082_v3  ;;  %7219 = vmatpush.bf16.msra.mxu0 %v8973_v42  ;;  %vm6095_vm0 = vmor %vm6093_vm15, %vm6094_vm1 }
 0x755   : > { %v5864_v1 = vadd.f32 %v5863_v9, %v5750_v6  ;;  %8914 = vmatmul.msk.f32.gmra.mxu2 %vm3825_vm4, %v6086_v23 }
 0x756   : > { %8947 = vmatmul.msk.f32.gmra.mxu3 %vm3825_vm4, %v6086_v23  ;;  %v6090_v14 = vmul.f32 0.5, %v6089_v39  ;;  %7308 = vmatpush.bf16.msra.mxu1 %v9037_v43  ;;  %v5692_v43 = vmul.f32 %v13562_v59, %v13562_v59 }
 0x757   : > { %v5935_v10 = vmul.f32 0.0078125, %v5864_v1  ;;  %5797 = vmatmul.f32.gmra.mxu0 %v5689_v28  ;;  %5910 = vmatmul.f32.gmra.mxu1 %v5690_v45  ;;  %v15751_v28 = vld [vmem:[#allocation145_spill] sm:$0xff]  ;;  %v9262_v1 = vld [vmem:[#allocation13 + $0x44] sm:$0xf] }
 0x758   : > { %v6091_v44 = vsub.f32 1.5, %v6090_v14  ;;  %v5526_v38 = vpop.f32.mrf.mxu2  ;;  %v5691_v42 = vmul.f32 %v15751_v28, %v15751_v28  ;;  %v9006_v14 = vld [vmem:[#allocation13 + $0x48] sm:$0xf0] }
 0x759   : > { %v5615_v61 = vpop.f32.mrf.mxu3  ;;  %v9588_v7 = vpop.eup %9587  ;;  %v13877_v31 = vadd.f32 1.1920929e-07, %v5935_v10 }
 0x75a   : > { %v13879_v3 = vadd.f32 %v5615_v61, %v5526_v38  ;;  %v6098_v35 = vmul.f32 %v9588_v7, %v13863_v8  ;;  %v6092_v2 = vmul.f32 %v9586_v58, %v6091_v44  ;;  %v9009_v44 = vor.u32 %v9262_v1, %v9006_v14  ;;  %v9278_v38 = vld [vmem:[#allocation13 + $0xc4] sm:$0xf] }
 0x75b   : > { %9589 = vrsqrt.f32 %v13877_v31  ;;  %vm6104_vm2 = vweird.f32 %v9588_v7  ;;  %vm6113_vm7 = vweird.f32 %v13877_v31 }
 0x75c   : > { %v6099_v39 = vmul.f32 %v9588_v7, %v6098_v35  ;;  %v5753_v6 = vpop.f32.mrf.mxu0  ;;  %v5866_v9 = vpop.f32.mrf.mxu1  ;;  %v6096_v23 = vsel %vm6095_vm0, %v9586_v58, %v6092_v2  ;;  %v9070_v58 = vld [vmem:[#allocation13 + $0xc8] sm:$0xf0]  ;;  %7393 = vmatpush.bf16.msra.mxu2 %v9009_v44  ;;  %vm6105_vm5 = vmor %vm6103_vm3, %vm6104_vm2 }
 0x75d   : > { %v5867_v45 = vadd.f32 %v5866_v9, %v5753_v6  ;;  %8915 = vmatmul.msk.f32.gmra.mxu2 %vm3825_vm4, %v6096_v23  ;;  %v9073_v28 = vor.u32 %v9278_v38, %v9070_v58 }
 0x75e   : > { %8948 = vmatmul.msk.f32.gmra.mxu3 %vm3825_vm4, %v6096_v23  ;;  %v6100_v25 = vmul.f32 0.5, %v6099_v39 }
 0x75f   : > { %v5936_v10 = vmul.f32 0.0078125, %v5867_v45  ;;  %5800 = vmatmul.f32.gmra.mxu0 %v5691_v42  ;;  %5913 = vmatmul.f32.gmra.mxu1 %v5692_v43 }
 0x760   : > { %v5529_v61 = vpop.f32.mrf.mxu2  ;;  %v6101_v2 = vsub.f32 1.5, %v6100_v25  ;;  %7482 = vmatpush.bf16.msra.mxu3 %v9073_v28  ;;  %v15753_v25 = vld [vmem:[#allocation172_spill] sm:$0xff] }
 0x761   : > { %v5618_v35 = vpop.f32.mrf.mxu3  ;;  %v9590_v59 = vpop.eup %9589  ;;  %v5968_v6 = vadd.f32 1.1920929e-07, %v5936_v10  ;;  %v5693_v14 = vmul.f32 %v15753_v25, %v15753_v25  ;;  %v5694_v10 = vmul.f32 %v13574_v21, %v13574_v21  ;;  %v9260_v25 = vld [vmem:[#allocation13 + $0x34] sm:$0xf] }
 0x762   : > { %v13890_v9 = vadd.f32 %v5618_v35, %v5529_v61  ;;  %v6108_v39 = vmul.f32 %v9590_v59, %v13877_v31  ;;  %v6102_v23 = vmul.f32 %v9588_v7, %v6101_v2  ;;  %vm6114_vm6 = vweird.f32 %v9590_v59 }
 0x763   : > { %9591 = vrsqrt.f32 %v5968_v6  ;;  %vm6115_vm8 = vmor %vm6113_vm7, %vm6114_vm6  ;;  %vm6123_vm10 = vweird.f32 %v5968_v6 }
 0x764   : > { %15752 = vst [vmem:[#allocation205_spill] sm:$0xff] %v13890_v9  ;;  %v6109_v42 = vmul.f32 %v9590_v59, %v6108_v39  ;;  %v5756_v43 = vpop.f32.mrf.mxu0  ;;  %v5869_v45 = vpop.f32.mrf.mxu1  ;;  %v6106_v1 = vsel %vm6105_vm5, %v9588_v7, %v6102_v23 }
 0x765   : > { %v5870_v38 = vadd.f32 %v5869_v45, %v5756_v43  ;;  %8916 = vmatmul.msk.f32.gmra.mxu2 %vm3825_vm4, %v6106_v1 }
 0x766   : > { %8949 = vmatmul.msk.f32.gmra.mxu3 %vm3825_vm4, %v6106_v1  ;;  %v6110_v44 = vmul.f32 0.5, %v6109_v42 }
 0x767   : > { %v5937_v8 = vmul.f32 0.0078125, %v5870_v38  ;;  %5803 = vmatmul.f32.gmra.mxu0 %v5693_v14  ;;  %5916 = vmatmul.f32.gmra.mxu1 %v5694_v10  ;;  %v15755_v14 = vld [vmem:[#allocation147_spill] sm:$0xff]  ;;  %v5696_v38 = vmul.f32 %v13584_v54, %v13584_v54 }
 0x768   : > { %v6111_v28 = vsub.f32 1.5, %v6110_v44  ;;  %v5531_v58 = vpop.f32.mrf.mxu2  ;;  %v5695_v10 = vmul.f32 %v15755_v14, %v15755_v14 }
 0x769   : > { %v5620_v61 = vpop.f32.mrf.mxu3  ;;  %v9592_v7 = vpop.eup %9591  ;;  %v5969_v35 = vadd.f32 1.1920929e-07, %v5937_v8 }
 0x76a   : > { %v13900_v2 = vadd.f32 %v5620_v61, %v5531_v58  ;;  %v6118_v39 = vmul.f32 %v9592_v7, %v5968_v6  ;;  %v6112_v23 = vmul.f32 %v9590_v59, %v6111_v28  ;;  %vm6124_vm9 = vweird.f32 %v9592_v7 }
 0x76b   : > { %9593 = vrsqrt.f32 %v5969_v35  ;;  %vm6125_vm11 = vmor %vm6123_vm10, %vm6124_vm9  ;;  %vm6133_vm13 = vweird.f32 %v5969_v35 }
 0x76c   : > { %15754 = vst [vmem:[#allocation206_spill] sm:$0xff] %v13900_v2  ;;  %v6119_v43 = vmul.f32 %v9592_v7, %v6118_v39  ;;  %v5759_v45 = vpop.f32.mrf.mxu0  ;;  %v5872_v42 = vpop.f32.mrf.mxu1  ;;  %v6116_v1 = vsel %vm6115_vm8, %v9590_v59, %v6112_v23 }
 0x76d   : > { %v5873_v44 = vadd.f32 %v5872_v42, %v5759_v45  ;;  %8917 = vmatmul.msk.f32.gmra.mxu2 %vm3825_vm4, %v6116_v1 }
 0x76e   : > { %8950 = vmatmul.msk.f32.gmra.mxu3 %vm3825_vm4, %v6116_v1  ;;  %v6120_v31 = vmul.f32 0.5, %v6119_v43 }
 0x76f   : > { %v5938_v8 = vmul.f32 0.0078125, %v5873_v44  ;;  %5806 = vmatmul.f32.gmra.mxu0 %v5695_v10  ;;  %5919 = vmatmul.f32.gmra.mxu1 %v5696_v38 }
 0x770   : > { %v5534_v28 = vpop.f32.mrf.mxu2  ;;  %v6121_v61 = vsub.f32 1.5, %v6120_v31  ;;  %v15757_v31 = vld [vmem:[#allocation44_spill] sm:$0xff] }
 0x771   : > { %v5623_v58 = vpop.f32.mrf.mxu3  ;;  %v9594_v59 = vpop.eup %9593  ;;  %v5970_v39 = vadd.f32 1.1920929e-07, %v5938_v8  ;;  %v15758_v8 = vld [vmem:[#allocation45_spill] sm:$0xff] }
 0x772   : > { %v13909_v23 = vadd.f32 %v5623_v58, %v5534_v28  ;;  %v6128_v14 = vmul.f32 %v9594_v59, %v5969_v35  ;;  %v6122_v21 = vmul.f32 %v9592_v7, %v6121_v61  ;;  %vm6134_vm12 = vweird.f32 %v9594_v59  ;;  %v9062_v35 = vld [vmem:[#allocation13 + $0xb8] sm:$0xf0] }
 0x773   : > { %9595 = vrsqrt.f32 %v5970_v39  ;;  %vm6135_vm14 = vmor %vm6133_vm13, %vm6134_vm12  ;;  %vm6143_vm15 = vweird.f32 %v5970_v39 }
 0x774   : > { %15756 = vst [vmem:[#allocation121_spill] sm:$0xff] %v13909_v23  ;;  %v6129_v45 = vmul.f32 %v9594_v59, %v6128_v14  ;;  %v5762_v42 = vpop.f32.mrf.mxu0  ;;  %v5875_v1 = vpop.f32.mrf.mxu1  ;;  %v6126_v43 = vsel %vm6125_vm11, %v9592_v7, %v6122_v21  ;;  %v8998_v23 = vld [vmem:[#allocation13 + $0x38] sm:$0xf0] }
 0x775   : > { %v5876_v44 = vadd.f32 %v5875_v1, %v5762_v42  ;;  %8918 = vmatmul.msk.f32.gmra.mxu2 %vm3825_vm4, %v6126_v43 }
 0x776   : > { %8951 = vmatmul.msk.f32.gmra.mxu3 %vm3825_vm4, %v6126_v43  ;;  %v6130_v10 = vmul.f32 0.5, %v6129_v45 }
 0x777   : > { %v5939_v38 = vmul.f32 0.0078125, %v5876_v44  ;;  %7220 = vmatmul.bf16.vlgmr.msra.gmra.mxu0 %v15757_v31  ;;  %7309 = vmatmul.bf16.vlgmr.msra.gmra.mxu1 %v15758_v8 }
 0x778   : > { %v6131_v28 = vsub.f32 1.5, %v6130_v10  ;;  %v5536_v58 = vpop.f32.mrf.mxu2 }
 0x779   : > { %v5625_v6 = vpop.f32.mrf.mxu3  ;;  %v9596_v61 = vpop.eup %9595  ;;  %v5971_v14 = vadd.f32 1.1920929e-07, %v5939_v38 }
 0x77a   : > { %v13915_v54 = vadd.f32 %v5625_v6, %v5536_v58  ;;  %v6138_v21 = vmul.f32 %v9596_v61, %v5970_v39  ;;  %v6132_v7 = vmul.f32 %v9594_v59, %v6131_v28  ;;  %v9001_v58 = vor.u32 %v9260_v25, %v8998_v23  ;;  %v9276_v6 = vld [vmem:[#allocation13 + $0xb4] sm:$0xf] }
 0x77b   : > { %9597 = vrsqrt.f32 %v5971_v14  ;;  %vm6144_vm1 = vweird.f32 %v9596_v61  ;;  %vm6153_vm3 = vweird.f32 %v5971_v14 }
 0x77c   : > { %15759 = vst [vmem:[#allocation122_spill] sm:$0xff] %v13915_v54  ;;  %v6139_v42 = vmul.f32 %v9596_v61, %v6138_v21  ;;  %v5765_v45 = vpop.f32.mrf.mxu0  ;;  %v5878_v1 = vpop.f32.mrf.mxu1  ;;  %v6136_v43 = vsel %vm6135_vm14, %v9594_v59, %v6132_v7  ;;  %v9065_v21 = vor.u32 %v9276_v6, %v9062_v35  ;;  %7394 = vmatpush.bf16.msra.mxu2 %v9001_v58  ;;  %vm6145_vm0 = vmor %vm6143_vm15, %vm6144_vm1 }
 0x77d   : > { %v5879_v44 = vadd.f32 %v5878_v1, %v5765_v45  ;;  %8919 = vmatmul.msk.f32.gmra.mxu2 %vm3825_vm4, %v6136_v43 }
 0x77e   : > { %8952 = vmatmul.msk.f32.gmra.mxu3 %vm3825_vm4, %v6136_v43  ;;  %v6140_v10 = vmul.f32 0.5, %v6139_v42 }
 0x77f   : > { %v5940_v38 = vmul.f32 0.0078125, %v5879_v44  ;;  %7483 = vmatpush.bf16.msra.mxu3 %v9065_v21 }
 0x780   : > { %v5539_v54 = vpop.f32.mrf.mxu2  ;;  %v6141_v48 = vsub.f32 1.5, %v6140_v10 }
 0x781   : > { %v5628_v28 = vpop.f32.mrf.mxu3  ;;  %v9598_v13 = vpop.eup %9597  ;;  %v5972_v2 = vadd.f32 1.1920929e-07, %v5940_v38 }
 0x782   : > { %v13919_v59 = vadd.f32 %v5628_v28, %v5539_v54  ;;  %v6148_v7 = vmul.f32 %v9598_v13, %v5971_v14  ;;  %v6142_v45 = vmul.f32 %v9596_v61, %v6141_v48  ;;  %v15761_v54 = vld [vmem:[#allocation46_spill] sm:$0xff]  ;;  %vm6154_vm2 = vweird.f32 %v9598_v13 }
 0x783   : > { %9599 = vrsqrt.f32 %v5972_v2  ;;  %vm6155_vm5 = vmor %vm6153_vm3, %vm6154_vm2  ;;  %vm6163_vm7 = vweird.f32 %v5972_v2 }
 0x784   : > { %15760 = vst [vmem:[#allocation180_spill] sm:$0xff] %v13919_v59  ;;  %v6149_v42 = vmul.f32 %v9598_v13, %v6148_v7  ;;  %v5768_v25 = vpop.f32.mrf.mxu0  ;;  %v5881_v23 = vpop.f32.mrf.mxu1  ;;  %v6146_v1 = vsel %vm6145_vm0, %v9596_v61, %v6142_v45 }
 0x785   : > { %v5882_v43 = vadd.f32 %v5881_v23, %v5768_v25  ;;  %8920 = vmatmul.msk.f32.gmra.mxu2 %vm3825_vm4, %v6146_v1 }
 0x786   : > { %8953 = vmatmul.msk.f32.gmra.mxu3 %vm3825_vm4, %v6146_v1  ;;  %v6150_v44 = vmul.f32 0.5, %v6149_v42 }
 0x787   : > { %v5941_v10 = vmul.f32 0.0078125, %v5882_v43  ;;  %7225 = vmatmul.bf16.gmra.mxu0 %v15761_v54  ;;  %7314 = vmatmul.bf16.gmra.mxu1 %v15445_v20 }
 0x788   : > { %v6151_v48 = vsub.f32 1.5, %v6150_v44  ;;  %v5541_v39 = vpop.f32.mrf.mxu2 }
 0x789   : > { %v5630_v38 = vpop.f32.mrf.mxu3  ;;  %v9600_v58 = vpop.eup %9599  ;;  %v13925_v6 = vadd.f32 1.1920929e-07, %v5941_v10 }
 0x78a   : > { %v13927_v35 = vadd.f32 %v5630_v38, %v5541_v39  ;;  %v6158_v61 = vmul.f32 %v9600_v58, %v5972_v2  ;;  %v6152_v28 = vmul.f32 %v9598_v13, %v6151_v48  ;;  %vm6164_vm6 = vweird.f32 %v9600_v58 }
 0x78b   : > { %9601 = vrsqrt.f32 %v13925_v6  ;;  %vm6165_vm8 = vmor %vm6163_vm7, %vm6164_vm6  ;;  %vm6173_vm10 = vweird.f32 %v13925_v6 }
 0x78c   : > { %15762 = vst [vmem:[#allocation181_spill] sm:$0xff] %v13927_v35  ;;  %v6159_v21 = vmul.f32 %v9600_v58, %v6158_v61  ;;  %v5771_v7 = vpop.f32.mrf.mxu0  ;;  %v5884_v45 = vpop.f32.mrf.mxu1  ;;  %v6156_v42 = vsel %vm6155_vm5, %v9598_v13, %v6152_v28  ;;  %v15763_v13 = vld [vmem:[#allocation84_spill] sm:$0xff] }
 0x78d   : > { %v5885_v25 = vadd.f32 %v5884_v45, %v5771_v7  ;;  %8921 = vmatmul.msk.f32.gmra.mxu2 %vm3825_vm4, %v6156_v42  ;;  %v9723_v45 = vld [vmem:[%s10701_s24] sm:$0xff] }
 0x78e   : > { %8954 = vmatmul.msk.f32.gmra.mxu3 %vm3825_vm4, %v6156_v42  ;;  %v6160_v23 = vmul.f32 0.5, %v6159_v21 }
 0x78f   : > { %v5942_v1 = vmul.f32 0.0078125, %v5885_v25  ;;  %v9724_v25 = vld [vmem:[%s10708_s16] sm:$0xff] }
 0x790   : > { %v6427_v43 = vpop.f32.mrf.mxu2  ;;  %v6161_v44 = vsub.f32 1.5, %v6160_v23 }
 0x791   : > { %v6540_v14 = vpop.f32.mrf.mxu3  ;;  %v9602_v10 = vpop.eup %9601  ;;  %v13932_v48 = vadd.f32 1.1920929e-07, %v5942_v1  ;;  %v6636_v39 = vmul.f32 %v6427_v43, %v12968_v29  ;;  %v6764_v38 = vmul.f32 %v6427_v43, %v15763_v13  ;;  %v9725_v1 = vld [vmem:[%s10701_s24 + $0x8] sm:$0xff] }
 0x792   : > { %v6637_v61 = vmul.f32 %v6540_v14, %v13366_v49  ;;  %v6168_v28 = vmul.f32 %v9602_v10, %v13925_v6  ;;  %v6765_v21 = vmul.f32 %v6540_v14, %v13596_v52  ;;  %v6162_v7 = vmul.f32 %v9600_v58, %v6161_v44  ;;  %v9726_v43 = vld [vmem:[%s10708_s16 + $0x8] sm:$0xff]  ;;  %v9729_v6 = vld [vmem:[%s10701_s24 + $0x18] sm:$0xff] }
 0x793   : > { %9603 = vrsqrt.f32 %v13932_v48  ;;  %v6700_v42 = vmul.f32 %v9723_v45, %v6636_v39  ;;  %v6828_v23 = vmul.f32 %v9724_v25, %v6764_v38  ;;  %v15764_v39 = vld [vmem:[#allocation49_spill] sm:$0xff]  ;;  %vm6174_vm9 = vweird.f32 %v9602_v10 }
 0x794   : > { %v6701_v35 = vmul.f32 %v9725_v1, %v6637_v61  ;;  %v6169_v29 = vmul.f32 %v9602_v10, %v6168_v28  ;;  %v6829_v13 = vmul.f32 %v9726_v43, %v6765_v21  ;;  %v5774_v49 = vpop.f32.mrf.mxu0  ;;  %v5887_v59 = vpop.f32.mrf.mxu1  ;;  %v6166_v9 = vsel %vm6165_vm8, %v9600_v58, %v6162_v7  ;;  %v9728_v1 = vld [vmem:[%s10708_s16 + $0x10] sm:$0xff]  ;;  %vm6175_vm11 = vmor %vm6173_vm10, %vm6174_vm9 }
 0x795   : > { %v6892_v12 = vadd.f32 %v6828_v23, %v6700_v42  ;;  %v5888_v52 = vadd.f32 %v5887_v59, %v5774_v49  ;;  %8922 = vmatmul.msk.f32.gmra.mxu2 %vm3825_vm4, %v6166_v9  ;;  %vm6183_vm13 = vweird.f32 %v13932_v48 }
 0x796   : > { %8955 = vmatmul.msk.f32.gmra.mxu3 %vm3825_vm4, %v6166_v9  ;;  %v6170_v2 = vmul.f32 0.5, %v6169_v29  ;;  %v6893_v14 = vadd.f32 %v6829_v13, %v6701_v35  ;;  %v15765_v35 = vld [vmem:[#allocation149_spill] sm:$0xff]  ;;  %v9730_v13 = vld [vmem:[%s10708_s16 + $0x18] sm:$0xff] }
 0x797   : > { %v5943_v44 = vmul.f32 0.0078125, %v5888_v52  ;;  %7230 = vmatmul.bf16.gmra.mxu0 %v15449_v62  ;;  %7319 = vmatmul.bf16.gmra.mxu1 %v15764_v39 }
 0x798   : > { %v6171_v38 = vsub.f32 1.5, %v6170_v2  ;;  %v6956_v61 = vpack.c.bf16 %v6893_v14, %v6892_v12  ;;  %v6430_v28 = vpop.f32.mrf.mxu2 }
 0x799   : > { %v6543_v21 = vpop.f32.mrf.mxu3  ;;  %v13949_v59 = vpop.eup %9603  ;;  %v13951_v58 = vadd.f32 1.1920929e-07, %v5943_v44  ;;  %v6638_v9 = vmul.f32 %v6430_v28, %v12992_v11  ;;  %v6766_v7 = vmul.f32 %v6430_v28, %v15765_v35  ;;  %v9727_v11 = vld [vmem:[%s10701_s24 + $0x10] sm:$0xff]  ;;  %v9258_v28 = vld [vmem:[#allocation13 + $0x24] sm:$0xf] }
 0x79a   : > { %v6639_v45 = vmul.f32 %v6543_v21, %v13372_v18  ;;  %v6178_v12 = vmul.f32 %v13949_v59, %v13932_v48  ;;  %6988 = vst [vmem:[%s13960_s26] sm:$0xff] %v6956_v61  ;;  %v6767_v42 = vmul.f32 %v6543_v21, %v13606_v51  ;;  %v6172_v25 = vmul.f32 %v9602_v10, %v6171_v38  ;;  %v8990_v21 = vld [vmem:[#allocation13 + $0x28] sm:$0xf0] }
 0x79b   : > { %9605 = vrsqrt.f32 %v13951_v58  ;;  %v6702_v23 = vmul.f32 %v9727_v11, %v6638_v9  ;;  %v6830_v29 = vmul.f32 %v9728_v1, %v6766_v7  ;;  %v8993_v35 = vor.u32 %v9258_v28, %v8990_v21  ;;  %v9274_v7 = vld [vmem:[#allocation13 + $0xa4] sm:$0xf] }
 0x79c   : > { %v6179_v18 = vmul.f32 %v13949_v59, %v6178_v12  ;;  %v6703_v43 = vmul.f32 %v9729_v6, %v6639_v45  ;;  %v6831_v49 = vmul.f32 %v9730_v13, %v6767_v42  ;;  %v5777_v52 = vpop.f32.mrf.mxu0  ;;  %v5890_v2 = vpop.f32.mrf.mxu1  ;;  %v6176_v14 = vsel %vm6175_vm11, %v9602_v10, %v6172_v25  ;;  %v9054_v45 = vld [vmem:[#allocation13 + $0xa8] sm:$0xf0] }
 0x79d   : > { %v6894_v44 = vadd.f32 %v6830_v29, %v6702_v23  ;;  %v5891_v51 = vadd.f32 %v5890_v2, %v5777_v52  ;;  %8923 = vmatmul.msk.f32.gmra.mxu2 %vm3825_vm4, %v6176_v14  ;;  %vm6184_vm12 = vweird.f32 %v13949_v59  ;;  %v9057_v10 = vor.u32 %v9274_v7, %v9054_v45 }
 0x79e   : > { %8956 = vmatmul.msk.f32.gmra.mxu3 %vm3825_vm4, %v6176_v14  ;;  %v6180_v38 = vmul.f32 0.5, %v6179_v18  ;;  %v6895_v61 = vadd.f32 %v6831_v49, %v6703_v43  ;;  %v15766_v18 = vld [vmem:[#allocation87_spill] sm:$0xff]  ;;  %7395 = vmatpush.bf16.msra.mxu2 %v8993_v35  ;;  %v9732_v14 = vld [vmem:[%s10708_s16 + $0x20] sm:$0xff]  ;;  %vm6185_vm14 = vmor %vm6183_vm13, %vm6184_vm12  ;;  %vm6193_vm15 = vweird.f32 %v13951_v58 }
 0x79f   : > { %v5944_v9 = vmul.f32 0.0078125, %v5891_v51  ;;  %7484 = vmatpush.bf16.msra.mxu3 %v9057_v10 }
 0x7a0   : > { %v6957_v12 = vpack.c.bf16 %v6895_v61, %v6894_v44  ;;  %v6433_v42 = vpop.f32.mrf.mxu2  ;;  %v6181_v1 = vsub.f32 1.5, %v6180_v38  ;;  %v9734_v61 = vld [vmem:[%s10708_s16 + $0x28] sm:$0xff] }
 0x7a1   : > { %v6546_v11 = vpop.f32.mrf.mxu3  ;;  %v13974_v25 = vpop.eup %9605  ;;  %v13976_v23 = vadd.f32 1.1920929e-07, %v5944_v9  ;;  %v6640_v29 = vmul.f32 %v6433_v42, %v13008_v41  ;;  %v6768_v6 = vmul.f32 %v6433_v42, %v15766_v18  ;;  %v9731_v41 = vld [vmem:[%s10701_s24 + $0x20] sm:$0xff]  ;;  %v15767_v42 = vld [vmem:[#allocation50_spill] sm:$0xff] }
 0x7a2   : > { %v6641_v43 = vmul.f32 %v6546_v11, %v13378_v53  ;;  %v6188_v13 = vmul.f32 %v13974_v25, %v13951_v58  ;;  %6989 = vst [vmem:[%s13960_s26 + $0x8] sm:$0xff] %v6957_v12  ;;  %v6769_v49 = vmul.f32 %v6546_v11, %v13618_v30  ;;  %v6182_v52 = vmul.f32 %v13949_v59, %v6181_v1  ;;  %v9733_v53 = vld [vmem:[%s10701_s24 + $0x28] sm:$0xff]  ;;  %v15768_v11 = vld [vmem:[#allocation51_spill] sm:$0xff] }
 0x7a3   : > { %9607 = vrsqrt.f32 %v13976_v23  ;;  %v6704_v2 = vmul.f32 %v9731_v41, %v6640_v29  ;;  %v6832_v44 = vmul.f32 %v9732_v14, %v6768_v6  ;;  %vm6194_vm1 = vweird.f32 %v13974_v25  ;;  %v9738_v58 = vld [vmem:[%s10708_s16 + $0x38] sm:$0xff] }
 0x7a4   : > { %v6705_v51 = vmul.f32 %v9733_v53, %v6641_v43  ;;  %v6189_v38 = vmul.f32 %v13974_v25, %v6188_v13  ;;  %v6833_v30 = vmul.f32 %v9734_v61, %v6769_v49  ;;  %v5780_v28 = vpop.f32.mrf.mxu0  ;;  %v5893_v21 = vpop.f32.mrf.mxu1  ;;  %v6186_v48 = vsel %vm6185_vm14, %v13949_v59, %v6182_v52  ;;  %v15769_v13 = vld [vmem:[#allocation92_spill] sm:$0xff]  ;;  %vm6195_vm0 = vmor %vm6193_vm15, %vm6194_vm1 }
 0x7a5   : > { %v6896_v9 = vadd.f32 %v6832_v44, %v6704_v2  ;;  %v5894_v35 = vadd.f32 %v5893_v21, %v5780_v28  ;;  %8924 = vmatmul.msk.f32.gmra.mxu2 %vm3825_vm4, %v6186_v48  ;;  %v9735_v44 = vld [vmem:[%s10701_s24 + $0x30] sm:$0xff]  ;;  %vm6203_vm3 = vweird.f32 %v13976_v23 }
 0x7a6   : > { %8957 = vmatmul.msk.f32.gmra.mxu3 %vm3825_vm4, %v6186_v48  ;;  %v6190_v7 = vmul.f32 0.5, %v6189_v38  ;;  %v6897_v45 = vadd.f32 %v6833_v30, %v6705_v51  ;;  %v9736_v51 = vld [vmem:[%s10708_s16 + $0x30] sm:$0xff] }
 0x7a7   : > { %v5945_v12 = vmul.f32 0.0078125, %v5894_v35  ;;  %7235 = vmatmul.bf16.gmra.mxu0 %v15767_v42  ;;  %7324 = vmatmul.bf16.gmra.mxu1 %v15768_v11 }
 0x7a8   : > { %v6191_v1 = vsub.f32 1.5, %v6190_v7  ;;  %v6958_v10 = vpack.c.bf16 %v6897_v45, %v6896_v9  ;;  %v6436_v29 = vpop.f32.mrf.mxu2 }
 0x7a9   : > { %v6549_v59 = vpop.f32.mrf.mxu3  ;;  %v9608_v18 = vpop.eup %9607  ;;  %v14001_v6 = vadd.f32 1.1920929e-07, %v5945_v12  ;;  %v6642_v43 = vmul.f32 %v6436_v29, %v13025_v17  ;;  %v6770_v49 = vmul.f32 %v6436_v29, %v15769_v13  ;;  %v15770_v13 = vld [vmem:[#allocation151_spill] sm:$0xff] }
 0x7aa   : > { %v6643_v52 = vmul.f32 %v6549_v59, %v13384_v55  ;;  %v6198_v41 = vmul.f32 %v9608_v18, %v13976_v23  ;;  %6990 = vst [vmem:[%s13960_s26 + $0x10] sm:$0xff] %v6958_v10  ;;  %v6771_v2 = vmul.f32 %v6549_v59, %v13628_v15  ;;  %v6192_v14 = vmul.f32 %v13974_v25, %v6191_v1  ;;  %v9737_v55 = vld [vmem:[%s10701_s24 + $0x38] sm:$0xff] }
 0x7ab   : > { %9609 = vrsqrt.f32 %v14001_v6  ;;  %v6706_v53 = vmul.f32 %v9735_v44, %v6642_v43  ;;  %v6834_v17 = vmul.f32 %v9736_v51, %v6770_v49  ;;  %vm6204_vm2 = vweird.f32 %v9608_v18  ;;  %v9739_v44 = vld [vmem:[%s10701_s24 + $0x40] sm:$0xff] }
 0x7ac   : > { %v6199_v38 = vmul.f32 %v9608_v18, %v6198_v41  ;;  %v6707_v61 = vmul.f32 %v9737_v55, %v6643_v52  ;;  %v6835_v30 = vmul.f32 %v9738_v58, %v6771_v2  ;;  %v5783_v28 = vpop.f32.mrf.mxu0  ;;  %v5896_v21 = vpop.f32.mrf.mxu1  ;;  %v6196_v15 = vsel %vm6195_vm0, %v13974_v25, %v6192_v14  ;;  %v9740_v51 = vld [vmem:[%s10708_s16 + $0x40] sm:$0xff]  ;;  %vm6205_vm5 = vmor %vm6203_vm3, %vm6204_vm2 }
 0x7ad   : > { %v6898_v48 = vadd.f32 %v6834_v17, %v6706_v53  ;;  %v5897_v9 = vadd.f32 %v5896_v21, %v5783_v28  ;;  %8925 = vmatmul.msk.f32.gmra.mxu2 %vm3825_vm4, %v6196_v15  ;;  %vm6213_vm7 = vweird.f32 %v14001_v6 }
 0x7ae   : > { %8958 = vmatmul.msk.f32.gmra.mxu3 %vm3825_vm4, %v6196_v15  ;;  %v6200_v35 = vmul.f32 0.5, %v6199_v38  ;;  %v6899_v7 = vadd.f32 %v6835_v30, %v6707_v61 }
 0x7af   : > { %v5946_v45 = vmul.f32 0.0078125, %v5897_v9  ;;  %v15771_v9 = vld [vmem:[#allocation52_spill] sm:$0xff] }
 0x7b0   : > { %v6959_v12 = vpack.c.bf16 %v6899_v7, %v6898_v48  ;;  %v6439_v1 = vpop.f32.mrf.mxu2  ;;  %v6201_v29 = vsub.f32 1.5, %v6200_v35  ;;  %v15772_v35 = vld [vmem:[#allocation53_spill] sm:$0xff] }
 0x7b1   : > { %v6552_v10 = vpop.f32.mrf.mxu3  ;;  %v9610_v59 = vpop.eup %9609  ;;  %v14021_v25 = vadd.f32 1.1920929e-07, %v5946_v45  ;;  %v6644_v43 = vmul.f32 %v6439_v1, %v13040_v26  ;;  %v6772_v49 = vmul.f32 %v6439_v1, %v15770_v13  ;;  %v9741_v26 = vld [vmem:[%s10701_s24 + $0x48] sm:$0xff] }
 0x7b2   : > { %v6645_v52 = vmul.f32 %v6552_v10, %v13390_v57  ;;  %v6208_v41 = vmul.f32 %v9610_v59, %v14001_v6  ;;  %6991 = vst [vmem:[%s13960_s26 + $0x18] sm:$0xff] %v6959_v12  ;;  %v6773_v2 = vmul.f32 %v6552_v10, %v13640_v5  ;;  %v6202_v14 = vmul.f32 %v9608_v18, %v6201_v29  ;;  %v9742_v57 = vld [vmem:[%s10708_s16 + $0x48] sm:$0xff]  ;;  %v9746_v6 = vld [vmem:[%s10708_s16 + $0x58] sm:$0xff] }
 0x7b3   : > { %9611 = vrsqrt.f32 %v14021_v25  ;;  %v6708_v53 = vmul.f32 %v9739_v44, %v6644_v43  ;;  %v6836_v17 = vmul.f32 %v9740_v51, %v6772_v49  ;;  %vm6214_vm6 = vweird.f32 %v9610_v59  ;;  %v15773_v43 = vld [vmem:[#allocation179_spill] sm:$0xff] }
 0x7b4   : > { %v6709_v38 = vmul.f32 %v9741_v26, %v6645_v52  ;;  %v6209_v55 = vmul.f32 %v9610_v59, %v6208_v41  ;;  %v6837_v61 = vmul.f32 %v9742_v57, %v6773_v2  ;;  %v5786_v58 = vpop.f32.mrf.mxu0  ;;  %v5899_v30 = vpop.f32.mrf.mxu1  ;;  %v6206_v28 = vsel %vm6205_vm5, %v9608_v18, %v6202_v14  ;;  %v9743_v14 = vld [vmem:[%s10701_s24 + $0x50] sm:$0xff]  ;;  %vm6215_vm8 = vmor %vm6213_vm7, %vm6214_vm6 }
 0x7b5   : > { %v6900_v5 = vadd.f32 %v6836_v17, %v6708_v53  ;;  %v5900_v21 = vadd.f32 %v5899_v30, %v5786_v58  ;;  %8926 = vmatmul.msk.f32.gmra.mxu2 %vm3825_vm4, %v6206_v28  ;;  %v9744_v53 = vld [vmem:[%s10708_s16 + $0x50] sm:$0xff]  ;;  %vm6223_vm10 = vweird.f32 %v14021_v25 }
 0x7b6   : > { %8959 = vmatmul.msk.f32.gmra.mxu3 %vm3825_vm4, %v6206_v28  ;;  %v6210_v23 = vmul.f32 0.5, %v6209_v55  ;;  %v6901_v15 = vadd.f32 %v6837_v61, %v6709_v38  ;;  %v9256_v28 = vld [vmem:[#allocation13 + $0x14] sm:$0xf] }
 0x7b7   : > { %v5947_v48 = vmul.f32 0.0078125, %v5900_v21  ;;  %7240 = vmatmul.bf16.gmra.mxu0 %v15771_v9  ;;  %7329 = vmatmul.bf16.gmra.mxu1 %v15772_v35 }
 0x7b8   : > { %v6211_v7 = vsub.f32 1.5, %v6210_v23  ;;  %v6960_v45 = vpack.c.bf16 %v6901_v15, %v6900_v5  ;;  %v6442_v12 = vpop.f32.mrf.mxu2  ;;  %v8982_v5 = vld [vmem:[#allocation13 + $0x18] sm:$0xf0]  ;;  %v9272_v15 = vld [vmem:[#allocation13 + $0x94] sm:$0xf] }
 0x7b9   : > { %v6555_v18 = vpop.f32.mrf.mxu3  ;;  %v14040_v1 = vpop.eup %9611  ;;  %v14042_v10 = vadd.f32 1.1920929e-07, %v5947_v48  ;;  %v6646_v29 = vmul.f32 %v6442_v12, %v13055_v40  ;;  %v6774_v13 = vmul.f32 %v6442_v12, %v15773_v43  ;;  %v8985_v23 = vor.u32 %v9256_v28, %v8982_v5  ;;  %v9046_v48 = vld [vmem:[#allocation13 + $0x98] sm:$0xf0] }
 0x7ba   : > { %v6647_v49 = vmul.f32 %v6555_v18, %v13396_v50  ;;  %v6218_v52 = vmul.f32 %v14040_v1, %v14021_v25  ;;  %6992 = vst [vmem:[%s13960_s26 + $0x20] sm:$0xff] %v6960_v45  ;;  %v6775_v41 = vmul.f32 %v6555_v18, %v13650_v34  ;;  %v6212_v2 = vmul.f32 %v9610_v59, %v6211_v7  ;;  %v9745_v50 = vld [vmem:[%s10701_s24 + $0x58] sm:$0xff] }
 0x7bb   : > { %9613 = vrsqrt.f32 %v14042_v10  ;;  %v6710_v44 = vmul.f32 %v9743_v14, %v6646_v29  ;;  %v6838_v40 = vmul.f32 %v9744_v53, %v6774_v13  ;;  %vm6224_vm9 = vweird.f32 %v14040_v1  ;;  %7396 = vmatpush.bf16.msra.mxu2 %v8985_v23  ;;  %v15776_v28 = vld [vmem:[#allocation55_spill] sm:$0xff] }
 0x7bc   : > { %v6219_v51 = vmul.f32 %v14040_v1, %v6218_v52  ;;  %v6711_v17 = vmul.f32 %v9745_v50, %v6647_v49  ;;  %v6839_v26 = vmul.f32 %v9746_v6, %v6775_v41  ;;  %v5789_v38 = vpop.f32.mrf.mxu0  ;;  %v5902_v55 = vpop.f32.mrf.mxu1  ;;  %v6216_v57 = vsel %vm6215_vm8, %v9610_v59, %v6212_v2  ;;  %v15774_v49 = vld [vmem:[#allocation94_spill] sm:$0xff]  ;;  %vm6225_vm11 = vmor %vm6223_vm10, %vm6224_vm9  ;;  %v9750_v6 = vld [vmem:[%s10708_s16 + $0x68] sm:$0xff] }
 0x7bd   : > { %v6902_v61 = vadd.f32 %v6838_v40, %v6710_v44  ;;  %v5903_v34 = vadd.f32 %v5902_v55, %v5789_v38  ;;  %8927 = vmatmul.msk.f32.gmra.mxu2 %vm3825_vm4, %v6216_v57  ;;  %v9049_v59 = vor.u32 %v9272_v15, %v9046_v48  ;;  %v9748_v40 = vld [vmem:[%s10708_s16 + $0x60] sm:$0xff]  ;;  %vm6233_vm13 = vweird.f32 %v14042_v10 }
 0x7be   : > { %8960 = vmatmul.msk.f32.gmra.mxu3 %vm3825_vm4, %v6216_v57  ;;  %v6220_v58 = vmul.f32 0.5, %v6219_v51  ;;  %v6903_v30 = vadd.f32 %v6839_v26, %v6711_v17 }
 0x7bf   : > { %v5948_v21 = vmul.f32 0.0078125, %v5903_v34  ;;  %7485 = vmatpush.bf16.msra.mxu3 %v9049_v59  ;;  %v15779_v59 = vld [vmem:[#allocation143_spill] sm:$0xff] }
 0x7c0   : > { %v6961_v7 = vpack.c.bf16 %v6903_v30, %v6902_v61  ;;  %v6445_v45 = vpop.f32.mrf.mxu2  ;;  %v6221_v18 = vsub.f32 1.5, %v6220_v58  ;;  %v15775_v30 = vld [vmem:[#allocation54_spill] sm:$0xff] }
 0x7c1   : > { %v6558_v12 = vpop.f32.mrf.mxu3  ;;  %v14062_v29 = vpop.eup %9613  ;;  %v14064_v43 = vadd.f32 1.1920929e-07, %v5948_v21  ;;  %v6648_v13 = vmul.f32 %v6445_v45, %v13070_v33  ;;  %v6776_v52 = vmul.f32 %v6445_v45, %v15774_v49  ;;  %v9747_v33 = vld [vmem:[%s10701_s24 + $0x60] sm:$0xff] }
 0x7c2   : > { %v6649_v41 = vmul.f32 %v6558_v12, %v13402_v16  ;;  %v6228_v2 = vmul.f32 %v14062_v29, %v14042_v10  ;;  %6993 = vst [vmem:[%s13960_s26 + $0x28] sm:$0xff] %v6961_v7  ;;  %v6777_v14 = vmul.f32 %v6558_v12, %v13662_v19  ;;  %v6222_v44 = vmul.f32 %v14040_v1, %v6221_v18  ;;  %v9749_v16 = vld [vmem:[%s10701_s24 + $0x68] sm:$0xff]  ;;  %v15777_v7 = vld [vmem:[#allocation131_spill] sm:$0xff] }
 0x7c3   : > { %9615 = vrsqrt.f32 %v14064_v43  ;;  %v6712_v53 = vmul.f32 %v9747_v33, %v6648_v13  ;;  %v6840_v51 = vmul.f32 %v9748_v40, %v6776_v52  ;;  %vm6234_vm12 = vweird.f32 %v14062_v29  ;;  %v15778_v12 = vld [vmem:[#allocation153_spill] sm:$0xff]  ;;  %v9753_v40 = vld [vmem:[%s10701_s24 + $0x78] sm:$0xff] }
 0x7c4   : > { %v6713_v50 = vmul.f32 %v9749_v16, %v6649_v41  ;;  %v6229_v17 = vmul.f32 %v14062_v29, %v6228_v2  ;;  %v6841_v19 = vmul.f32 %v9750_v6, %v6777_v14  ;;  %v5792_v26 = vpop.f32.mrf.mxu0  ;;  %v5905_v38 = vpop.f32.mrf.mxu1  ;;  %v6226_v25 = vsel %vm6225_vm11, %v14040_v1, %v6222_v44  ;;  %v9751_v2 = vld [vmem:[%s10701_s24 + $0x70] sm:$0xff]  ;;  %vm6235_vm14 = vmor %vm6233_vm13, %vm6234_vm12  ;;  %v9754_v10 = vld [vmem:[%s10708_s16 + $0x78] sm:$0xff] }
 0x7c5   : > { %v6904_v55 = vadd.f32 %v6840_v51, %v6712_v53  ;;  %v5906_v57 = vadd.f32 %v5905_v38, %v5792_v26  ;;  %8928 = vmatmul.msk.f32.gmra.mxu2 %vm3825_vm4, %v6226_v25  ;;  %v9752_v44 = vld [vmem:[%s10708_s16 + $0x70] sm:$0xff]  ;;  %vm6243_vm15 = vweird.f32 %v14064_v43 }
 0x7c6   : > { %8961 = vmatmul.msk.f32.gmra.mxu3 %vm3825_vm4, %v6226_v25  ;;  %v6230_v61 = vmul.f32 0.5, %v6229_v17  ;;  %v6905_v34 = vadd.f32 %v6841_v19, %v6713_v50  ;;  %v15780_v25 = vld [vmem:[#allocation185_spill] sm:$0xff] }
 0x7c7   : > { %v5949_v58 = vmul.f32 0.0078125, %v5906_v57  ;;  %7245 = vmatmul.bf16.gmra.mxu0 %v15775_v30  ;;  %7334 = vmatmul.bf16.gmra.mxu1 %v15776_v28 }
 0x7c8   : > { %v6231_v5 = vsub.f32 1.5, %v6230_v61  ;;  %v6962_v21 = vpack.c.bf16 %v6905_v34, %v6904_v55  ;;  %v6448_v23 = vpop.f32.mrf.mxu2  ;;  %v15781_v55 = vld [vmem:[#allocation97_spill] sm:$0xff] }
 0x7c9   : > { %v6561_v1 = vpop.f32.mrf.mxu3  ;;  %v9616_v15 = vpop.eup %9615  ;;  %v14089_v48 = vadd.f32 1.1920929e-07, %v5949_v58  ;;  %v6650_v45 = vmul.f32 %v6448_v23, %v15777_v7  ;;  %v6778_v18 = vmul.f32 %v6448_v23, %v15778_v12  ;;  %v5396_v57 = vadd.f32 %v15781_v55, %v15780_v25 }
 0x7ca   : > { %v6651_v13 = vmul.f32 %v6561_v1, %v15779_v59  ;;  %v6238_v49 = vmul.f32 %v9616_v15, %v14064_v43  ;;  %6994 = vst [vmem:[%s13960_s26 + $0x30] sm:$0xff] %v6962_v21  ;;  %v6779_v52 = vmul.f32 %v6561_v1, %v13672_v27  ;;  %v6232_v41 = vmul.f32 %v14062_v29, %v6231_v5 }
 0x7cb   : > { %9617 = vrsqrt.f32 %v14089_v48  ;;  %v6714_v14 = vmul.f32 %v9751_v2, %v6650_v45  ;;  %v6842_v33 = vmul.f32 %v9752_v44, %v6778_v18  ;;  %vm6244_vm1 = vweird.f32 %v9616_v15 }
 0x7cc   : > { %v6239_v53 = vmul.f32 %v9616_v15, %v6238_v49  ;;  %v6715_v51 = vmul.f32 %v9753_v40, %v6651_v13  ;;  %v6843_v16 = vmul.f32 %v9754_v10, %v6779_v52  ;;  %v5795_v50 = vpop.f32.mrf.mxu0  ;;  %v5908_v17 = vpop.f32.mrf.mxu1  ;;  %v6236_v27 = vsel %vm6235_vm14, %v14062_v29, %v6232_v41  ;;  %v9755_v13 = vld [vmem:[%s10701_s24 + $0x80] sm:$0xff]  ;;  %vm6245_vm0 = vmor %vm6243_vm15, %vm6244_vm1 }
 0x7cd   : > { %v6906_v6 = vadd.f32 %v6842_v33, %v6714_v14  ;;  %v5909_v19 = vadd.f32 %v5908_v17, %v5795_v50  ;;  %8929 = vmatmul.msk.f32.gmra.mxu2 %vm3825_vm4, %v6236_v27  ;;  %v9756_v52 = vld [vmem:[%s10708_s16 + $0x80] sm:$0xff]  ;;  %v9758_v14 = vld [vmem:[%s10708_s16 + $0x88] sm:$0xff]  ;;  %v15783_v50 = vld [vmem:[#allocation155_spill] sm:$0xff]  ;;  %vm6253_vm3 = vweird.f32 %v14089_v48 }
 0x7ce   : > { %8962 = vmatmul.msk.f32.gmra.mxu3 %vm3825_vm4, %v6236_v27  ;;  %v6240_v26 = vmul.f32 0.5, %v6239_v53  ;;  %v6907_v38 = vadd.f32 %v6843_v16, %v6715_v51  ;;  %v15782_v16 = vld [vmem:[#allocation154_spill] sm:$0xff] }
 0x7cf   : > { %v5950_v61 = vmul.f32 0.0078125, %v5909_v19  ;;  %v5398_v17 = vadd.f32 %v15783_v50, %v15782_v16  ;;  %v15785_v19 = vld [vmem:[#allocation57_spill] sm:$0xff]  ;;  %v15790_v16 = vld [vmem:[#allocation99_spill] sm:$0xff] }
 0x7d0   : > { %v6963_v34 = vpack.c.bf16 %v6907_v38, %v6906_v6  ;;  %v6451_v58 = vpop.f32.mrf.mxu2  ;;  %v6241_v21 = vsub.f32 1.5, %v6240_v26  ;;  %v15784_v6 = vld [vmem:[#allocation56_spill] sm:$0xff] }
 0x7d1   : > { %v6564_v5 = vpop.f32.mrf.mxu3  ;;  %v14111_v29 = vpop.eup %9617  ;;  %v14113_v23 = vadd.f32 1.1920929e-07, %v5950_v61  ;;  %v6652_v1 = vmul.f32 %v6451_v58, %v15707_v24  ;;  %v6780_v7 = vmul.f32 %v6451_v58, %v5396_v57  ;;  %v9757_v24 = vld [vmem:[%s10701_s24 + $0x88] sm:$0xff]  ;;  %v15786_v61 = vld [vmem:[#allocation132_spill] sm:$0xff] }
 0x7d2   : > { %v6653_v45 = vmul.f32 %v6564_v5, %v13414_v63  ;;  %v6248_v12 = vmul.f32 %v14111_v29, %v14089_v48  ;;  %6995 = vst [vmem:[%s13960_s26 + $0x38] sm:$0xff] %v6963_v34  ;;  %v6781_v18 = vmul.f32 %v6564_v5, %v13684_v47  ;;  %v6242_v59 = vmul.f32 %v9616_v15, %v6241_v21  ;;  %v15787_v5 = vld [vmem:[#allocation144_spill] sm:$0xff]  ;;  %v9761_v48 = vld [vmem:[%s10701_s24 + $0x98] sm:$0xff] }
 0x7d3   : > { %9619 = vrsqrt.f32 %v14113_v23  ;;  %v6716_v49 = vmul.f32 %v9755_v13, %v6652_v1  ;;  %v6844_v41 = vmul.f32 %v9756_v52, %v6780_v7  ;;  %vm6254_vm2 = vweird.f32 %v14111_v29  ;;  %v15788_v7 = vld [vmem:[#allocation174_spill] sm:$0xff] }
 0x7d4   : > { %v6717_v2 = vmul.f32 %v9757_v24, %v6653_v45  ;;  %v6249_v63 = vmul.f32 %v14111_v29, %v6248_v12  ;;  %v6845_v44 = vmul.f32 %v9758_v14, %v6781_v18  ;;  %v5798_v33 = vpop.f32.mrf.mxu0  ;;  %v5911_v53 = vpop.f32.mrf.mxu1  ;;  %v6246_v47 = vsel %vm6245_vm0, %v9616_v15, %v6242_v59  ;;  %v9759_v18 = vld [vmem:[%s10701_s24 + $0x90] sm:$0xff]  ;;  %vm6255_vm5 = vmor %vm6253_vm3, %vm6254_vm2  ;;  %v9762_v24 = vld [vmem:[%s10708_s16 + $0x98] sm:$0xff] }
 0x7d5   : > { %v6908_v40 = vadd.f32 %v6844_v41, %v6716_v49  ;;  %v5912_v51 = vadd.f32 %v5911_v53, %v5798_v33  ;;  %8930 = vmatmul.msk.f32.gmra.mxu2 %vm3825_vm4, %v6246_v47  ;;  %v9760_v13 = vld [vmem:[%s10708_s16 + $0x90] sm:$0xff]  ;;  %vm6263_vm7 = vweird.f32 %v14113_v23 }
 0x7d6   : > { %8963 = vmatmul.msk.f32.gmra.mxu3 %vm3825_vm4, %v6246_v47  ;;  %v6250_v43 = vmul.f32 0.5, %v6249_v63  ;;  %v6909_v10 = vadd.f32 %v6845_v44, %v6717_v2 }
 0x7d7   : > { %v5951_v27 = vmul.f32 0.0078125, %v5912_v51  ;;  %7250 = vmatmul.bf16.gmra.mxu0 %v15784_v6  ;;  %7339 = vmatmul.bf16.gmra.mxu1 %v15785_v19  ;;  %v9254_v51 = vld [vmem:[#allocation13 + $0x4] sm:$0xf] }
 0x7d8   : > { %v6251_v26 = vsub.f32 1.5, %v6250_v43  ;;  %v6964_v15 = vpack.c.bf16 %v6909_v10, %v6908_v40  ;;  %v6454_v38 = vpop.f32.mrf.mxu2  ;;  %v8974_v43 = vld [vmem:[#allocation13 + $0x8] sm:$0xf0] }
 0x7d9   : > { %v6567_v25 = vpop.f32.mrf.mxu3  ;;  %v14136_v55 = vpop.eup %9619  ;;  %v14138_v57 = vadd.f32 1.1920929e-07, %v5951_v27  ;;  %v6654_v34 = vmul.f32 %v6454_v38, %v15786_v61  ;;  %v6782_v58 = vmul.f32 %v6454_v38, %v5398_v17  ;;  %v15789_v10 = vld [vmem:[#allocation189_spill] sm:$0xff]  ;;  %v8977_v27 = vor.u32 %v9254_v51, %v8974_v43 }
 0x7da   : > { %v6655_v21 = vmul.f32 %v6567_v25, %v15787_v5  ;;  %v6258_v1 = vmul.f32 %v14136_v55, %v14113_v23  ;;  %6996 = vst [vmem:[%s13960_s26 + $0x40] sm:$0xff] %v6964_v15  ;;  %v6783_v45 = vmul.f32 %v6567_v25, %v15788_v7  ;;  %v6252_v12 = vmul.f32 %v14111_v29, %v6251_v26  ;;  %v9270_v26 = vld [vmem:[#allocation13 + $0x84] sm:$0xf]  ;;  %v9038_v15 = vld [vmem:[#allocation13 + $0x88] sm:$0xf0] }
 0x7db   : > { %9621 = vrsqrt.f32 %v14138_v57  ;;  %v6718_v59 = vmul.f32 %v9759_v18, %v6654_v34  ;;  %v6846_v49 = vmul.f32 %v9760_v13, %v6782_v58  ;;  %v5401_v50 = vadd.f32 %v15790_v16, %v15789_v10  ;;  %7397 = vmatpush.bf16.msra.mxu2 %v8977_v27  ;;  %v15794_v16 = vld [vmem:[#allocation156_spill] sm:$0xff] }
 0x7dc   : > { %v6259_v52 = vmul.f32 %v14136_v55, %v6258_v1  ;;  %v6719_v41 = vmul.f32 %v9761_v48, %v6655_v21  ;;  %v6847_v2 = vmul.f32 %v9762_v24, %v6783_v45  ;;  %v5801_v63 = vpop.f32.mrf.mxu0  ;;  %v5914_v14 = vpop.f32.mrf.mxu1  ;;  %v6256_v44 = vsel %vm6255_vm5, %v14111_v29, %v6252_v12  ;;  %v15791_v21 = vld [vmem:[#allocation133_spill] sm:$0xff]  ;;  %v15792_v45 = vld [vmem:[#allocation171_spill] sm:$0xff] }
 0x7dd   : > { %v6910_v33 = vadd.f32 %v6846_v49, %v6718_v59  ;;  %v5915_v53 = vadd.f32 %v5914_v14, %v5801_v63  ;;  %8931 = vmatmul.msk.f32.gmra.mxu2 %vm3825_vm4, %v6256_v44  ;;  %vm6264_vm6 = vweird.f32 %v14136_v55  ;;  %v9041_v34 = vor.u32 %v9270_v26, %v9038_v15  ;;  %v15793_v59 = vld [vmem:[#allocation117_spill] sm:$0xff]  ;;  %v15796_v26 = vld [vmem:[#allocation58_spill] sm:$0xff]  ;;  %v15797_v15 = vld [vmem:[#allocation59_spill] sm:$0xff] }
 0x7de   : > { %8964 = vmatmul.msk.f32.gmra.mxu3 %vm3825_vm4, %v6256_v44  ;;  %v6260_v47 = vmul.f32 0.5, %v6259_v52  ;;  %v6911_v40 = vadd.f32 %v6847_v2, %v6719_v41  ;;  %v9763_v52 = vld [vmem:[%s10701_s24 + $0xa0] sm:$0xff]  ;;  %v9765_v2 = vld [vmem:[%s10701_s24 + $0xa8] sm:$0xff]  ;;  %vm6265_vm8 = vmor %vm6263_vm7, %vm6264_vm6  ;;  %vm6273_vm10 = vweird.f32 %v14138_v57 }
 0x7df   : > { %v5952_v17 = vmul.f32 0.0078125, %v5915_v53  ;;  %7486 = vmatpush.bf16.msra.mxu3 %v9041_v34  ;;  %v9764_v41 = vld [vmem:[%s10708_s16 + $0xa0] sm:$0xff]  ;;  %v9766_v44 = vld [vmem:[%s10708_s16 + $0xa8] sm:$0xff] }
 0x7e0   : > { %v6965_v38 = vpack.c.bf16 %v6911_v40, %v6910_v33  ;;  %v6457_v29 = vpop.f32.mrf.mxu2  ;;  %v6261_v61 = vsub.f32 1.5, %v6260_v47 }
 0x7e1   : > { %v6570_v25 = vpop.f32.mrf.mxu3  ;;  %v14162_v58 = vpop.eup %9621  ;;  %v14164_v5 = vadd.f32 1.1920929e-07, %v5952_v17  ;;  %v6656_v1 = vmul.f32 %v6457_v29, %v15791_v21  ;;  %v6784_v7 = vmul.f32 %v6457_v29, %v5401_v50  ;;  %v15795_v50 = vld [vmem:[#allocation157_spill] sm:$0xff]  ;;  %v15798_v21 = vld [vmem:[#allocation134_spill] sm:$0xff] }
 0x7e2   : > { %v6657_v12 = vmul.f32 %v6570_v25, %v15792_v45  ;;  %v6268_v18 = vmul.f32 %v14162_v58, %v14138_v57  ;;  %6997 = vst [vmem:[%s13960_s26 + $0x48] sm:$0xff] %v6965_v38  ;;  %v6785_v13 = vmul.f32 %v6570_v25, %v15793_v59  ;;  %v6262_v49 = vmul.f32 %v14136_v55, %v6261_v61  ;;  %v15799_v45 = vld [vmem:[#allocation146_spill] sm:$0xff]  ;;  %v15800_v59 = vld [vmem:[#allocation176_spill] sm:$0xff]  ;;  %v9770_v57 = vld [vmem:[%s10708_s16 + $0xb8] sm:$0xff] }
 0x7e3   : > { %9623 = vrsqrt.f32 %v14164_v5  ;;  %v6720_v48 = vmul.f32 %v9763_v52, %v6656_v1  ;;  %v6848_v24 = vmul.f32 %v9764_v41, %v6784_v7  ;;  %v5403_v17 = vadd.f32 %v15795_v50, %v15794_v16  ;;  %v9767_v52 = vld [vmem:[%s10701_s24 + $0xb0] sm:$0xff]  ;;  %v15802_v16 = vld [vmem:[#allocation101_spill] sm:$0xff] }
 0x7e4   : > { %v6721_v63 = vmul.f32 %v9765_v2, %v6657_v12  ;;  %v6269_v14 = vmul.f32 %v14162_v58, %v6268_v18  ;;  %v6849_v33 = vmul.f32 %v9766_v44, %v6785_v13  ;;  %v5804_v53 = vpop.f32.mrf.mxu0  ;;  %v5917_v47 = vpop.f32.mrf.mxu1  ;;  %v6266_v23 = vsel %vm6265_vm8, %v14136_v55, %v6262_v49  ;;  %v9768_v41 = vld [vmem:[%s10708_s16 + $0xb0] sm:$0xff] }
 0x7e5   : > { %v6912_v40 = vadd.f32 %v6848_v24, %v6720_v48  ;;  %v5918_v51 = vadd.f32 %v5917_v47, %v5804_v53  ;;  %8932 = vmatmul.msk.f32.gmra.mxu2 %vm3825_vm4, %v6266_v23  ;;  %vm6274_vm9 = vweird.f32 %v14162_v58  ;;  %vm6283_vm13 = vweird.f32 %v14164_v5 }
 0x7e6   : > { %8965 = vmatmul.msk.f32.gmra.mxu3 %vm3825_vm4, %v6266_v23  ;;  %v6270_v43 = vmul.f32 0.5, %v6269_v14  ;;  %v6913_v10 = vadd.f32 %v6849_v33, %v6721_v63  ;;  %vm6275_vm11 = vmor %vm6273_vm10, %vm6274_vm9  ;;  %v9769_v63 = vld [vmem:[%s10701_s24 + $0xb8] sm:$0xff] }
 0x7e7   : > { %v5953_v27 = vmul.f32 0.0078125, %v5918_v51  ;;  %7255 = vmatmul.bf16.gmra.mxu0 %v15796_v26  ;;  %7344 = vmatmul.bf16.gmra.mxu1 %v15797_v15 }
 0x7e8   : > { %v6271_v38 = vsub.f32 1.5, %v6270_v43  ;;  %v6966_v55 = vpack.c.bf16 %v6913_v10, %v6912_v40  ;;  %v6460_v29 = vpop.f32.mrf.mxu2  ;;  %v15801_v10 = vld [vmem:[#allocation193_spill] sm:$0xff] }
 0x7e9   : > { %v6573_v25 = vpop.f32.mrf.mxu3  ;;  %v9624_v61 = vpop.eup %9623  ;;  %v14190_v34 = vadd.f32 1.1920929e-07, %v5953_v27  ;;  %v6658_v1 = vmul.f32 %v6460_v29, %v15798_v21  ;;  %v6786_v7 = vmul.f32 %v6460_v29, %v5403_v17  ;;  %v5406_v50 = vadd.f32 %v15802_v16, %v15801_v10  ;;  %v15803_v21 = vld [vmem:[#allocation135_spill] sm:$0xff] }
 0x7ea   : > { %v6659_v12 = vmul.f32 %v6573_v25, %v15799_v45  ;;  %v6278_v18 = vmul.f32 %v9624_v61, %v14164_v5  ;;  %6998 = vst [vmem:[%s13960_s26 + $0x50] sm:$0xff] %v6966_v55  ;;  %v6787_v13 = vmul.f32 %v6573_v25, %v15800_v59  ;;  %v6272_v49 = vmul.f32 %v14162_v58, %v6271_v38  ;;  %v15804_v45 = vld [vmem:[#allocation82_spill] sm:$0xff]  ;;  %v15805_v59 = vld [vmem:[#allocation119_spill] sm:$0xff] }
 0x7eb   : > { %9625 = vrsqrt.f32 %v14190_v34  ;;  %v6722_v48 = vmul.f32 %v9767_v52, %v6658_v1  ;;  %v6850_v24 = vmul.f32 %v9768_v41, %v6786_v7  ;;  %vm6284_vm12 = vweird.f32 %v9624_v61  ;;  %v9771_v52 = vld [vmem:[%s10701_s24 + $0xc0] sm:$0xff]  ;;  %v15807_v10 = vld [vmem:[#allocation159_spill] sm:$0xff] }
 0x7ec   : > { %v6279_v2 = vmul.f32 %v9624_v61, %v6278_v18  ;;  %v6723_v14 = vmul.f32 %v9769_v63, %v6659_v12  ;;  %v6851_v44 = vmul.f32 %v9770_v57, %v6787_v13  ;;  %v5807_v33 = vpop.f32.mrf.mxu0  ;;  %v5920_v53 = vpop.f32.mrf.mxu1  ;;  %v6276_v47 = vsel %vm6275_vm11, %v14162_v58, %v6272_v49  ;;  %v9772_v41 = vld [vmem:[%s10708_s16 + $0xc0] sm:$0xff]  ;;  %vm6285_vm14 = vmor %vm6283_vm13, %vm6284_vm12  ;;  %v9774_v57 = vld [vmem:[%s10708_s16 + $0xc8] sm:$0xff] }
 0x7ed   : > { %v6914_v23 = vadd.f32 %v6850_v24, %v6722_v48  ;;  %v5921_v40 = vadd.f32 %v5920_v53, %v5807_v33  ;;  %8933 = vmatmul.msk.f32.gmra.mxu2 %vm3825_vm4, %v6276_v47  ;;  %vm6293_vm15 = vweird.f32 %v14190_v34 }
 0x7ee   : > { %8966 = vmatmul.msk.f32.gmra.mxu3 %vm3825_vm4, %v6276_v47  ;;  %v6280_v51 = vmul.f32 0.5, %v6279_v2  ;;  %v6915_v43 = vadd.f32 %v6851_v44, %v6723_v14  ;;  %v9773_v2 = vld [vmem:[%s10701_s24 + $0xc8] sm:$0xff] }
 0x7ef   : > { %v5954_v17 = vmul.f32 0.0078125, %v5921_v40 }
 0x7f0   : > { %v6967_v27 = vpack.c.bf16 %v6915_v43, %v6914_v23  ;;  %v6463_v38 = vpop.f32.mrf.mxu2  ;;  %v6281_v29 = vsub.f32 1.5, %v6280_v51  ;;  %v15806_v43 = vld [vmem:[#allocation158_spill] sm:$0xff] }
 0x7f1   : > { %v6576_v55 = vpop.f32.mrf.mxu3  ;;  %v9626_v58 = vpop.eup %9625  ;;  %v14211_v25 = vadd.f32 1.1920929e-07, %v5954_v17  ;;  %v6660_v1 = vmul.f32 %v6463_v38, %v15803_v21  ;;  %v6788_v7 = vmul.f32 %v6463_v38, %v5406_v50  ;;  %v5408_v16 = vadd.f32 %v15807_v10, %v15806_v43  ;;  %v15808_v50 = vld [vmem:[#allocation60_spill] sm:$0xff]  ;;  %v15809_v17 = vld [vmem:[#allocation61_spill] sm:$0xff]  ;;  %v15813_v43 = vld [vmem:[#allocation195_spill] sm:$0xff] }
 0x7f2   : > { %v6661_v12 = vmul.f32 %v6576_v55, %v15804_v45  ;;  %v6288_v18 = vmul.f32 %v9626_v58, %v14190_v34  ;;  %6999 = vst [vmem:[%s13960_s26 + $0x58] sm:$0xff] %v6967_v27  ;;  %v6789_v13 = vmul.f32 %v6576_v55, %v15805_v59  ;;  %v6282_v49 = vmul.f32 %v9624_v61, %v6281_v29  ;;  %v15810_v21 = vld [vmem:[#allocation136_spill] sm:$0xff]  ;;  %v15814_v10 = vld [vmem:[#allocation103_spill] sm:$0xff] }
 0x7f3   : > { %9627 = vrsqrt.f32 %v14211_v25  ;;  %v6724_v48 = vmul.f32 %v9771_v52, %v6660_v1  ;;  %v6852_v24 = vmul.f32 %v9772_v41, %v6788_v7  ;;  %vm6294_vm1 = vweird.f32 %v9626_v58  ;;  %v15811_v45 = vld [vmem:[#allocation148_spill] sm:$0xff]  ;;  %v9775_v52 = vld [vmem:[%s10701_s24 + $0xd0] sm:$0xff] }
 0x7f4   : > { %v6725_v63 = vmul.f32 %v9773_v2, %v6661_v12  ;;  %v6289_v14 = vmul.f32 %v9626_v58, %v6288_v18  ;;  %v6853_v44 = vmul.f32 %v9774_v57, %v6789_v13  ;;  %v7221_v33 = vpop.f32.mrf.mxu0  ;;  %v7310_v53 = vpop.f32.mrf.mxu1  ;;  %v6286_v47 = vsel %vm6285_vm14, %v9624_v61, %v6282_v49  ;;  %v15812_v59 = vld [vmem:[#allocation120_spill] sm:$0xff]  ;;  %v9776_v41 = vld [vmem:[%s10708_s16 + $0xd0] sm:$0xff]  ;;  %v9777_v2 = vld [vmem:[%s10701_s24 + $0xd8] sm:$0xff] }
 0x7f5   : > { %v6916_v23 = vadd.f32 %v6852_v24, %v6724_v48  ;;  %v14225_v40 = vadd.f32 %v7310_v53, %v7221_v33  ;;  %8934 = vmatmul.msk.f32.gmra.mxu2 %vm3825_vm4, %v6286_v47  ;;  %vm6295_vm0 = vmor %vm6293_vm15, %vm6294_vm1  ;;  %v9778_v57 = vld [vmem:[%s10708_s16 + $0xd8] sm:$0xff]  ;;  %vm6303_vm3 = vweird.f32 %v14211_v25 }
 0x7f6   : > { %8967 = vmatmul.msk.f32.gmra.mxu3 %vm3825_vm4, %v6286_v47  ;;  %v6290_v5 = vmul.f32 0.5, %v6289_v14  ;;  %v6917_v51 = vadd.f32 %v6853_v44, %v6725_v63 }
 0x7f7   : > { %7260 = vmatmul.bf16.gmra.mxu0 %v15808_v50  ;;  %7349 = vmatmul.bf16.gmra.mxu1 %v15809_v17 }
 0x7f8   : > { %v6291_v27 = vsub.f32 1.5, %v6290_v5  ;;  %v6968_v61 = vpack.c.bf16 %v6917_v51, %v6916_v23  ;;  %v6466_v38 = vpop.f32.mrf.mxu2 }
 0x7f9   : > { %v6579_v55 = vpop.f32.mrf.mxu3  ;;  %v9628_v29 = vpop.eup %9627  ;;  %v6662_v1 = vmul.f32 %v6466_v38, %v15810_v21  ;;  %v6790_v7 = vmul.f32 %v6466_v38, %v5408_v16  ;;  %v5411_v16 = vadd.f32 %v15814_v10, %v15813_v43  ;;  %v15821_v10 = vld [vmem:[#allocation137_spill] sm:$0xff] }
 0x7fa   : > { %v6663_v12 = vmul.f32 %v6579_v55, %v15811_v45  ;;  %v6298_v18 = vmul.f32 %v9628_v29, %v14211_v25  ;;  %7000 = vst [vmem:[%s13960_s26 + $0x60] sm:$0xff] %v6968_v61  ;;  %v6791_v13 = vmul.f32 %v6579_v55, %v15812_v59  ;;  %v6292_v49 = vmul.f32 %v9626_v58, %v6291_v27  ;;  %v15815_v55 = vld [vmem:[#allocation75_spill] sm:$0xff]  ;;  %v9779_v59 = vld [vmem:[%s10701_s24 + $0xe0] sm:$0xff] }
 0x7fb   : > { %v6726_v48 = vmul.f32 %v9775_v52, %v6662_v1  ;;  %v6854_v24 = vmul.f32 %v9776_v41, %v6790_v7  ;;  %vm6304_vm2 = vweird.f32 %v9628_v29  ;;  %v15816_v7 = vld [vmem:[#allocation86_spill] sm:$0xff]  ;;  %v15817_v25 = vld [vmem:[#allocation160_spill] sm:$0xff] }
 0x7fc   : > { %v6727_v63 = vmul.f32 %v9777_v2, %v6663_v12  ;;  %v6299_v14 = vmul.f32 %v9628_v29, %v6298_v18  ;;  %v6855_v44 = vmul.f32 %v9778_v57, %v6791_v13  ;;  %v7223_v33 = vpop.f32.mrf.mxu0  ;;  %v7312_v53 = vpop.f32.mrf.mxu1  ;;  %v6296_v34 = vsel %vm6295_vm0, %v9626_v58, %v6292_v49  ;;  %v9780_v49 = vld [vmem:[%s10708_s16 + $0xe0] sm:$0xff]  ;;  %vm6305_vm5 = vmor %vm6303_vm3, %vm6304_vm2 }
 0x7fd   : > { %v6918_v47 = vadd.f32 %v6854_v24, %v6726_v48  ;;  %v14244_v23 = vadd.f32 %v7312_v53, %v7223_v33  ;;  %8935 = vmatmul.msk.f32.gmra.mxu2 %vm3825_vm4, %v6296_v34  ;;  %v9781_v48 = vld [vmem:[%s10701_s24 + $0xe8] sm:$0xff] }
 0x7fe   : > { %8968 = vmatmul.msk.f32.gmra.mxu3 %vm3825_vm4, %v6296_v34  ;;  %v6300_v5 = vmul.f32 0.5, %v6299_v14  ;;  %v6919_v51 = vadd.f32 %v6855_v44, %v6727_v63  ;;  %v9782_v24 = vld [vmem:[%s10708_s16 + $0xe8] sm:$0xff] }
 0x7ff   : > { %v15818_v53 = vld [vmem:[#allocation161_spill] sm:$0xff] }
 0x800   : > { %v6969_v27 = vpack.c.bf16 %v6919_v51, %v6918_v47  ;;  %v6469_v61 = vpop.f32.mrf.mxu2  ;;  %v6301_v58 = vsub.f32 1.5, %v6300_v5  ;;  %v5413_v34 = vadd.f32 %v15818_v53, %v15817_v25  ;;  %v15819_v47 = vld [vmem:[#allocation62_spill] sm:$0xff]  ;;  %v15820_v5 = vld [vmem:[#allocation63_spill] sm:$0xff] }
 0x801   : > { %v6582_v38 = vpop.f32.mrf.mxu3  ;;  %v6664_v21 = vmul.f32 %v6469_v61, %v15815_v55  ;;  %v6792_v1 = vmul.f32 %v6469_v61, %v5411_v16  ;;  %v15822_v61 = vld [vmem:[#allocation91_spill] sm:$0xff]  ;;  %v9783_v55 = vld [vmem:[%s10701_s24 + $0xf0] sm:$0xff] }
 0x802   : > { %v6665_v45 = vmul.f32 %v6582_v38, %v15816_v7  ;;  %7001 = vst [vmem:[%s13960_s26 + $0x68] sm:$0xff] %v6969_v27  ;;  %v6793_v12 = vmul.f32 %v6582_v38, %v13742_v22  ;;  %v6302_v18 = vmul.f32 %v9628_v29, %v6301_v58  ;;  %v15826_v53 = vld [vmem:[#allocation150_spill] sm:$0xff] }
 0x803   : > { %v6728_v13 = vmul.f32 %v9779_v59, %v6664_v21  ;;  %v6856_v52 = vmul.f32 %v9780_v49, %v6792_v1  ;;  %v9784_v1 = vld [vmem:[%s10708_s16 + $0xf0] sm:$0xff] }
 0x804   : > { %v6729_v41 = vmul.f32 %v9781_v48, %v6665_v45  ;;  %v6857_v2 = vmul.f32 %v9782_v24, %v6793_v12  ;;  %v7226_v63 = vpop.f32.mrf.mxu0  ;;  %v7315_v14 = vpop.f32.mrf.mxu1  ;;  %v6306_v57 = vsel %vm6305_vm5, %v9628_v29, %v6302_v18  ;;  %v9785_v45 = vld [vmem:[%s10701_s24 + $0xf8] sm:$0xff]  ;;  %v15824_v24 = vld [vmem:[#allocation106_spill] sm:$0xff] }
 0x805   : > { %v6920_v44 = vadd.f32 %v6856_v52, %v6728_v13  ;;  %v14259_v33 = vadd.f32 %v7315_v14, %v7226_v63  ;;  %8936 = vmatmul.msk.f32.gmra.mxu2 %vm3825_vm4, %v6306_v57  ;;  %v9786_v18 = vld [vmem:[%s10708_s16 + $0xf8] sm:$0xff] }
 0x806   : > { %8969 = vmatmul.msk.f32.gmra.mxu3 %vm3825_vm4, %v6306_v57  ;;  %v6921_v22 = vadd.f32 %v6857_v2, %v6729_v41  ;;  %v15823_v41 = vld [vmem:[#allocation105_spill] sm:$0xff] }
 0x807   : > { %7265 = vmatmul.bf16.gmra.mxu0 %v15819_v47  ;;  %7354 = vmatmul.bf16.gmra.mxu1 %v15820_v5  ;;  %v5416_v2 = vadd.f32 %v15824_v24, %v15823_v41  ;;  %v15832_v24 = vld [vmem:[#allocation88_spill] sm:$0xff] }
 0x808   : > { %v6970_v29 = vpack.c.bf16 %v6921_v22, %v6920_v44  ;;  %v6472_v51 = vpop.f32.mrf.mxu2  ;;  %v15825_v44 = vld [vmem:[#allocation76_spill] sm:$0xff] }
 0x809   : > { %v6585_v43 = vpop.f32.mrf.mxu3  ;;  %v6666_v16 = vmul.f32 %v6472_v51, %v15821_v10  ;;  %v6794_v27 = vmul.f32 %v6472_v51, %v5413_v34  ;;  %v9789_v10 = vld [vmem:[%s10701_s24 + $0x108] sm:$0xff] }
 0x80a   : > { %v6667_v38 = vmul.f32 %v6585_v43, %v15822_v61  ;;  %7002 = vst [vmem:[%s13960_s26 + $0x70] sm:$0xff] %v6970_v29  ;;  %v6795_v58 = vmul.f32 %v6585_v43, %v13748_v36  ;;  %v9788_v43 = vld [vmem:[%s10708_s16 + $0x100] sm:$0xff] }
 0x80b   : > { %v6730_v21 = vmul.f32 %v9783_v55, %v6666_v16  ;;  %v6858_v7 = vmul.f32 %v9784_v1, %v6794_v27  ;;  %v9790_v27 = vld [vmem:[%s10708_s16 + $0x108] sm:$0xff] }
 0x80c   : > { %v6731_v12 = vmul.f32 %v9785_v45, %v6667_v38  ;;  %v6859_v59 = vmul.f32 %v9786_v18, %v6795_v58  ;;  %v7228_v13 = vpop.f32.mrf.mxu0  ;;  %v7317_v49 = vpop.f32.mrf.mxu1  ;;  %v15828_v45 = vld [vmem:[#allocation64_spill] sm:$0xff]  ;;  %v15830_v18 = vld [vmem:[#allocation67_spill] sm:$0xff] }
 0x80d   : > { %v6922_v52 = vadd.f32 %v6858_v7, %v6730_v21  ;;  %v14275_v48 = vadd.f32 %v7317_v49, %v7228_v13  ;;  %7398 = vmatmul.bf16.vlgmr.msra.gmra.mxu2 %v15757_v31  ;;  %v9787_v31 = vld [vmem:[%s10701_s24 + $0x100] sm:$0xff]  ;;  %v15827_v7 = vld [vmem:[#allocation163_spill] sm:$0xff] }
 0x80e   : > { %7487 = vmatmul.bf16.vlgmr.msra.gmra.mxu3 %v15758_v8  ;;  %v6923_v36 = vadd.f32 %v6859_v59, %v6731_v12  ;;  %v15829_v12 = vld [vmem:[#allocation66_spill] sm:$0xff] }
 0x810   : > { %v6971_v63 = vpack.c.bf16 %v6923_v36, %v6922_v52  ;;  %v6475_v14 = vpop.f32.mrf.mxu2  ;;  %v15831_v52 = vld [vmem:[#allocation138_spill] sm:$0xff] }
 0x811   : > { %v6588_v57 = vpop.f32.mrf.mxu3  ;;  %v6668_v22 = vmul.f32 %v6475_v14, %v15825_v44  ;;  %v6796_v25 = vmul.f32 %v6475_v14, %v5416_v2  ;;  %v9791_v14 = vld [vmem:[%s10701_s24 + $0x110] sm:$0xff] }
 0x812   : > { %v6669_v34 = vmul.f32 %v6588_v57, %v15826_v53  ;;  %7003 = vst [vmem:[%s13960_s26 + $0x78] sm:$0xff] %v6971_v63  ;;  %v6797_v29 = vmul.f32 %v6588_v57, %v13758_v4  ;;  %v5418_v4 = vadd.f32 %v15828_v45, %v15827_v7  ;;  %v9792_v44 = vld [vmem:[%s10708_s16 + $0x110] sm:$0xff]  ;;  %v15836_v45 = vld [vmem:[#allocation93_spill] sm:$0xff] }
 0x813   : > { %v6732_v51 = vmul.f32 %v9787_v31, %v6668_v22  ;;  %v6860_v8 = vmul.f32 %v9788_v43, %v6796_v25  ;;  %v9793_v25 = vld [vmem:[%s10701_s24 + $0x118] sm:$0xff] }
 0x814   : > { %v6733_v16 = vmul.f32 %v9789_v10, %v6669_v34  ;;  %v6861_v61 = vmul.f32 %v9790_v27, %v6797_v29  ;;  %v7231_v38 = vpop.f32.mrf.mxu0  ;;  %v7320_v58 = vpop.f32.mrf.mxu1  ;;  %v9794_v34 = vld [vmem:[%s10708_s16 + $0x118] sm:$0xff]  ;;  %v15833_v10 = vld [vmem:[#allocation197_spill] sm:$0xff] }
 0x815   : > { %v6924_v55 = vadd.f32 %v6860_v8, %v6732_v51  ;;  %v14289_v21 = vadd.f32 %v7320_v58, %v7231_v38 }
 0x816   : > { %v6925_v1 = vadd.f32 %v6861_v61, %v6733_v16  ;;  %v15834_v16 = vld [vmem:[#allocation107_spill] sm:$0xff] }
 0x817   : > { %7270 = vmatmul.bf16.gmra.mxu0 %v15829_v12  ;;  %7359 = vmatmul.bf16.gmra.mxu1 %v15830_v18  ;;  %v5421_v27 = vadd.f32 %v15834_v16, %v15833_v10  ;;  %v15842_v16 = vld [vmem:[#allocation152_spill] sm:$0xff] }
 0x818   : > { %v6972_v59 = vpack.c.bf16 %v6925_v1, %v6924_v55  ;;  %v6478_v13 = vpop.f32.mrf.mxu2  ;;  %v15835_v55 = vld [vmem:[#allocation77_spill] sm:$0xff] }
 0x819   : > { %v6591_v49 = vpop.f32.mrf.mxu3  ;;  %v6670_v36 = vmul.f32 %v6478_v13, %v15831_v52  ;;  %v6798_v41 = vmul.f32 %v6478_v13, %v5418_v4  ;;  %v9797_v52 = vld [vmem:[%s10701_s24 + $0x128] sm:$0xff] }
 0x81a   : > { %v6671_v2 = vmul.f32 %v6591_v49, %v15832_v24  ;;  %7004 = vst [vmem:[%s13960_s26 + $0x80] sm:$0xff] %v6972_v59  ;;  %v6799_v63 = vmul.f32 %v6591_v49, %v13769_v46  ;;  %v9796_v49 = vld [vmem:[%s10708_s16 + $0x120] sm:$0xff] }
 0x81b   : > { %v6734_v57 = vmul.f32 %v9791_v14, %v6670_v36  ;;  %v6862_v22 = vmul.f32 %v9792_v44, %v6798_v41  ;;  %v9798_v41 = vld [vmem:[%s10708_s16 + $0x128] sm:$0xff] }
 0x81c   : > { %v6735_v53 = vmul.f32 %v9793_v25, %v6671_v2  ;;  %v6863_v29 = vmul.f32 %v9794_v34, %v6799_v63  ;;  %v7233_v31 = vpop.f32.mrf.mxu0  ;;  %v7322_v51 = vpop.f32.mrf.mxu1  ;;  %v15838_v25 = vld [vmem:[#allocation69_spill] sm:$0xff] }
 0x81d   : > { %v6926_v43 = vadd.f32 %v6862_v22, %v6734_v57  ;;  %v14303_v8 = vadd.f32 %v7322_v51, %v7233_v31  ;;  %7403 = vmatmul.bf16.gmra.mxu2 %v15761_v54  ;;  %v9795_v54 = vld [vmem:[%s10701_s24 + $0x120] sm:$0xff]  ;;  %v15840_v34 = vld [vmem:[#allocation73_spill] sm:$0xff] }
 0x81e   : > { %7492 = vmatmul.bf16.gmra.mxu3 %v15445_v20  ;;  %v6927_v46 = vadd.f32 %v6863_v29, %v6735_v53  ;;  %v15837_v22 = vld [vmem:[#allocation68_spill] sm:$0xff] }
 0x81f   : > { %v15839_v53 = vld [vmem:[#allocation72_spill] sm:$0xff] }
 0x820   : > { %v6973_v61 = vpack.c.bf16 %v6927_v46, %v6926_v43  ;;  %v6481_v38 = vpop.f32.mrf.mxu2  ;;  %v15841_v43 = vld [vmem:[#allocation139_spill] sm:$0xff] }
 0x821   : > { %v6594_v58 = vpop.f32.mrf.mxu3  ;;  %v6672_v1 = vmul.f32 %v6481_v38, %v15835_v55  ;;  %v6800_v7 = vmul.f32 %v6481_v38, %v5421_v27  ;;  %v9799_v38 = vld [vmem:[%s10701_s24 + $0x130] sm:$0xff] }
 0x822   : > { %v6673_v4 = vmul.f32 %v6594_v58, %v15836_v45  ;;  %7005 = vst [vmem:[%s13960_s26 + $0x88] sm:$0xff] %v6973_v61  ;;  %v6801_v59 = vmul.f32 %v6594_v58, %v13781_v56  ;;  %v5423_v56 = vadd.f32 %v15838_v25, %v15837_v22  ;;  %v9800_v55 = vld [vmem:[%s10708_s16 + $0x130] sm:$0xff]  ;;  %v15846_v25 = vld [vmem:[#allocation184_spill] sm:$0xff] }
 0x823   : > { %v6736_v13 = vmul.f32 %v9795_v54, %v6672_v1  ;;  %v6864_v20 = vmul.f32 %v9796_v49, %v6800_v7  ;;  %v9801_v7 = vld [vmem:[%s10701_s24 + $0x138] sm:$0xff] }
 0x824   : > { %v6737_v36 = vmul.f32 %v9797_v52, %v6673_v4  ;;  %v6865_v24 = vmul.f32 %v9798_v41, %v6801_v59  ;;  %v7236_v2 = vpop.f32.mrf.mxu0  ;;  %v7325_v63 = vpop.f32.mrf.mxu1  ;;  %v9802_v4 = vld [vmem:[%s10708_s16 + $0x138] sm:$0xff]  ;;  %v15843_v52 = vld [vmem:[#allocation109_spill] sm:$0xff] }
 0x825   : > { %v6928_v14 = vadd.f32 %v6864_v20, %v6736_v13  ;;  %v14317_v57 = vadd.f32 %v7325_v63, %v7236_v2 }
 0x826   : > { %v6929_v44 = vadd.f32 %v6865_v24, %v6737_v36  ;;  %v15844_v36 = vld [vmem:[#allocation110_spill] sm:$0xff] }
 0x827   : > { %7275 = vmatmul.bf16.gmra.mxu0 %v15839_v53  ;;  %7364 = vmatmul.bf16.gmra.mxu1 %v15840_v34  ;;  %v5426_v41 = vadd.f32 %v15844_v36, %v15843_v52  ;;  %v15853_v52 = vld [vmem:[#allocation177_spill] sm:$0xff] }
 0x828   : > { %v6974_v29 = vpack.c.bf16 %v6929_v44, %v6928_v14  ;;  %v6484_v31 = vpop.f32.mrf.mxu2  ;;  %v15845_v14 = vld [vmem:[#allocation140_spill] sm:$0xff] }
 0x829   : > { %v6597_v51 = vpop.f32.mrf.mxu3  ;;  %v6674_v46 = vmul.f32 %v6484_v31, %v15841_v43  ;;  %v6802_v10 = vmul.f32 %v6484_v31, %v5423_v56  ;;  %v9805_v43 = vld [vmem:[%s10701_s24 + $0x148] sm:$0xff] }
 0x82a   : > { %v6675_v27 = vmul.f32 %v6597_v51, %v15842_v16  ;;  %7006 = vst [vmem:[%s13960_s26 + $0x90] sm:$0xff] %v6974_v29  ;;  %v6803_v61 = vmul.f32 %v6597_v51, %v13793_v60  ;;  %v9804_v51 = vld [vmem:[%s10708_s16 + $0x140] sm:$0xff] }
 0x82b   : > { %v6738_v58 = vmul.f32 %v9799_v38, %v6674_v46  ;;  %v6866_v1 = vmul.f32 %v9800_v55, %v6802_v10  ;;  %v9806_v10 = vld [vmem:[%s10708_s16 + $0x148] sm:$0xff]  ;;  %v15847_v38 = vld [vmem:[#allocation164_spill] sm:$0xff] }
 0x82c   : > { %v6739_v45 = vmul.f32 %v9801_v7, %v6675_v27  ;;  %v6867_v59 = vmul.f32 %v9802_v4, %v6803_v61  ;;  %v7238_v54 = vpop.f32.mrf.mxu0  ;;  %v7327_v13 = vpop.f32.mrf.mxu1 }
 0x82d   : > { %v6930_v49 = vadd.f32 %v6866_v1, %v6738_v58  ;;  %v14331_v20 = vadd.f32 %v7327_v13, %v7238_v54  ;;  %7408 = vmatmul.bf16.gmra.mxu2 %v15449_v62  ;;  %v9803_v62 = vld [vmem:[%s10701_s24 + $0x140] sm:$0xff]  ;;  %v15848_v58 = vld [vmem:[#allocation165_spill] sm:$0xff]  ;;  %v15849_v1 = vld [vmem:[#allocation78_spill] sm:$0xff] }
 0x82e   : > { %7497 = vmatmul.bf16.gmra.mxu3 %v15764_v39  ;;  %v6931_v60 = vadd.f32 %v6867_v59, %v6739_v45  ;;  %v5428_v55 = vadd.f32 %v15848_v58, %v15847_v38  ;;  %v15851_v59 = vld [vmem:[#allocation141_spill] sm:$0xff]  ;;  %v15858_v58 = vld [vmem:[#allocation178_spill] sm:$0xff] }
 0x830   : > { %v6975_v24 = vpack.c.bf16 %v6931_v60, %v6930_v49  ;;  %v6487_v2 = vpop.f32.mrf.mxu2  ;;  %v15852_v49 = vld [vmem:[#allocation98_spill] sm:$0xff] }
 0x831   : > { %v6600_v63 = vpop.f32.mrf.mxu3  ;;  %v6676_v44 = vmul.f32 %v6487_v2, %v15845_v14  ;;  %v6804_v22 = vmul.f32 %v6487_v2, %v5426_v41  ;;  %v9807_v41 = vld [vmem:[%s10701_s24 + $0x150] sm:$0xff]  ;;  %v9809_v14 = vld [vmem:[%s10701_s24 + $0x158] sm:$0xff] }
 0x832   : > { %v6677_v56 = vmul.f32 %v6600_v63, %v15846_v25  ;;  %7007 = vst [vmem:[%s13960_s26 + $0x98] sm:$0xff] %v6975_v24  ;;  %v6805_v29 = vmul.f32 %v6600_v63, %v13805_v32  ;;  %v15850_v32 = vld [vmem:[#allocation79_spill] sm:$0xff]  ;;  %v9808_v2 = vld [vmem:[%s10708_s16 + $0x150] sm:$0xff] }
 0x833   : > { %v6740_v31 = vmul.f32 %v9803_v62, %v6676_v44  ;;  %v6868_v39 = vmul.f32 %v9804_v51, %v6804_v22  ;;  %v9810_v22 = vld [vmem:[%s10708_s16 + $0x158] sm:$0xff] }
 0x834   : > { %v6741_v46 = vmul.f32 %v9805_v43, %v6677_v56  ;;  %v6869_v16 = vmul.f32 %v9806_v10, %v6805_v29  ;;  %v15854_v62 = vld [vmem:[#allocation111_spill] sm:$0xff]  ;;  %v15856_v10 = vld [vmem:[#allocation70_spill] sm:$0xff] }
 0x835   : > { %v6932_v27 = vadd.f32 %v6868_v39, %v6740_v31  ;;  %v15855_v31 = vld [vmem:[#allocation112_spill] sm:$0xff] }
 0x836   : > { %v6933_v61 = vadd.f32 %v6869_v16, %v6741_v46  ;;  %v5431_v51 = vadd.f32 %v15855_v31, %v15854_v62 }
 0x837   : > { %7280 = vmatmul.bf16.gmra.mxu0 %v15849_v1  ;;  %7369 = vmatmul.bf16.gmra.mxu1 %v15850_v32 }
 0x838   : > { %v6976_v7 = vpack.c.bf16 %v6933_v61, %v6932_v27  ;;  %v6490_v45 = vpop.f32.mrf.mxu2  ;;  %v15857_v61 = vld [vmem:[#allocation188_spill] sm:$0xff] }
 0x839   : > { %v6603_v4 = vpop.f32.mrf.mxu3  ;;  %v6678_v54 = vmul.f32 %v6490_v45, %v15851_v59  ;;  %v6806_v13 = vmul.f32 %v6490_v45, %v5428_v55  ;;  %v9812_v45 = vld [vmem:[%s10708_s16 + $0x160] sm:$0xff] }
 0x83a   : > { %v6679_v60 = vmul.f32 %v6603_v4, %v15852_v49  ;;  %7008 = vst [vmem:[%s13960_s26 + $0xa0] sm:$0xff] %v6976_v7  ;;  %v6807_v36 = vmul.f32 %v6603_v4, %v15853_v52  ;;  %v9813_v4 = vld [vmem:[%s10701_s24 + $0x168] sm:$0xff]  ;;  %v15859_v52 = vld [vmem:[#allocation167_spill] sm:$0xff] }
 0x83b   : > { %v6742_v24 = vmul.f32 %v9807_v41, %v6678_v54  ;;  %v6870_v63 = vmul.f32 %v9808_v2, %v6806_v13  ;;  %v9814_v54 = vld [vmem:[%s10708_s16 + $0x168] sm:$0xff] }
 0x83c   : > { %v6743_v44 = vmul.f32 %v9809_v14, %v6679_v60  ;;  %v6871_v25 = vmul.f32 %v9810_v22, %v6807_v36  ;;  %v15860_v36 = vld [vmem:[#allocation168_spill] sm:$0xff]  ;;  %v15862_v2 = vld [vmem:[#allocation85_spill] sm:$0xff]  ;;  %v15863_v22 = vld [vmem:[#allocation71_spill] sm:$0xff] }
 0x83d   : > { %v6934_v56 = vadd.f32 %v6870_v63, %v6742_v24  ;;  %7413 = vmatmul.bf16.gmra.mxu2 %v15767_v42  ;;  %v9811_v42 = vld [vmem:[%s10701_s24 + $0x160] sm:$0xff]  ;;  %v5433_v41 = vadd.f32 %v15860_v36, %v15859_v52  ;;  %v15861_v24 = vld [vmem:[#allocation83_spill] sm:$0xff] }
 0x83e   : > { %7502 = vmatmul.bf16.gmra.mxu3 %v15768_v11  ;;  %v6935_v29 = vadd.f32 %v6871_v25, %v6743_v44  ;;  %v9820_v36 = vld [vmem:[%s10708_s16 + $0x180] sm:$0xff] }
 0x840   : > { %v6977_v39 = vpack.c.bf16 %v6935_v29, %v6934_v56  ;;  %v6493_v43 = vpop.f32.mrf.mxu2  ;;  %v15864_v29 = vld [vmem:[#allocation100_spill] sm:$0xff] }
 0x841   : > { %v6606_v46 = vpop.f32.mrf.mxu3  ;;  %v6680_v16 = vmul.f32 %v6493_v43, %v15856_v10  ;;  %v6808_v27 = vmul.f32 %v6493_v43, %v5431_v51  ;;  %v9815_v51 = vld [vmem:[%s10701_s24 + $0x170] sm:$0xff]  ;;  %v9817_v10 = vld [vmem:[%s10701_s24 + $0x178] sm:$0xff] }
 0x842   : > { %v6681_v38 = vmul.f32 %v6606_v46, %v15857_v61  ;;  %7009 = vst [vmem:[%s13960_s26 + $0xa8] sm:$0xff] %v6977_v39  ;;  %v6809_v55 = vmul.f32 %v6606_v46, %v15858_v58  ;;  %v9816_v43 = vld [vmem:[%s10708_s16 + $0x170] sm:$0xff] }
 0x843   : > { %v6744_v7 = vmul.f32 %v9811_v42, %v6680_v16  ;;  %v6872_v11 = vmul.f32 %v9812_v45, %v6808_v27  ;;  %v9818_v27 = vld [vmem:[%s10708_s16 + $0x178] sm:$0xff] }
 0x844   : > { %v6745_v59 = vmul.f32 %v9813_v4, %v6681_v38  ;;  %v6873_v13 = vmul.f32 %v9814_v54, %v6809_v55  ;;  %v15865_v55 = vld [vmem:[#allocation198_spill] sm:$0xff]  ;;  %v15867_v4 = vld [vmem:[#allocation80_spill] sm:$0xff] }
 0x845   : > { %v6936_v49 = vadd.f32 %v6872_v11, %v6744_v7 }
 0x846   : > { %v6937_v60 = vadd.f32 %v6873_v13, %v6745_v59  ;;  %v15868_v13 = vld [vmem:[#allocation192_spill] sm:$0xff] }
 0x847   : > { %7285 = vmatmul.bf16.gmra.mxu0 %v15861_v24  ;;  %7374 = vmatmul.bf16.gmra.mxu1 %v15862_v2 }
 0x848   : > { %v6978_v63 = vpack.c.bf16 %v6937_v60, %v6936_v49  ;;  %v6496_v14 = vpop.f32.mrf.mxu2 }
 0x849   : > { %v6609_v44 = vpop.f32.mrf.mxu3  ;;  %v6682_v25 = vmul.f32 %v6496_v14, %v15863_v22  ;;  %v6810_v56 = vmul.f32 %v6496_v14, %v5433_v41  ;;  %v9821_v41 = vld [vmem:[%s10701_s24 + $0x188] sm:$0xff] }
 0x84a   : > { %v6683_v62 = vmul.f32 %v6609_v44, %v15864_v29  ;;  %7010 = vst [vmem:[%s13960_s26 + $0xb0] sm:$0xff] %v6978_v63  ;;  %v6811_v31 = vmul.f32 %v6609_v44, %v13848_v37  ;;  %v15866_v37 = vld [vmem:[#allocation199_spill] sm:$0xff]  ;;  %v9822_v14 = vld [vmem:[%s10708_s16 + $0x188] sm:$0xff]  ;;  %v15870_v29 = vld [vmem:[#allocation114_spill] sm:$0xff] }
 0x84b   : > { %v6746_v39 = vmul.f32 %v9815_v51, %v6682_v25  ;;  %v6874_v46 = vmul.f32 %v9816_v43, %v6810_v56  ;;  %v5436_v42 = vadd.f32 %v15866_v37, %v15865_v55  ;;  %v15869_v56 = vld [vmem:[#allocation113_spill] sm:$0xff]  ;;  %v9824_v37 = vld [vmem:[%s10708_s16 + $0x190] sm:$0xff] }
 0x84c   : > { %v6747_v16 = vmul.f32 %v9817_v10, %v6683_v62  ;;  %v6875_v61 = vmul.f32 %v9818_v27, %v6811_v31  ;;  %v5438_v62 = vadd.f32 %v15870_v29, %v15869_v56  ;;  %v15871_v31 = vld [vmem:[#allocation89_spill] sm:$0xff]  ;;  %v15874_v27 = vld [vmem:[#allocation102_spill] sm:$0xff]  ;;  %v9828_v56 = vld [vmem:[%s10708_s16 + $0x1a0] sm:$0xff] }
 0x84d   : > { %v6938_v38 = vadd.f32 %v6874_v46, %v6746_v39  ;;  %7418 = vmatmul.bf16.gmra.mxu2 %v15771_v9  ;;  %v9819_v9 = vld [vmem:[%s10701_s24 + $0x180] sm:$0xff]  ;;  %v15873_v46 = vld [vmem:[#allocation81_spill] sm:$0xff] }
 0x84e   : > { %7507 = vmatmul.bf16.gmra.mxu3 %v15772_v35  ;;  %v6939_v58 = vadd.f32 %v6875_v61, %v6747_v16  ;;  %v9829_v29 = vld [vmem:[%s10701_s24 + $0x1a8] sm:$0xff] }
 0x850   : > { %v6979_v7 = vpack.c.bf16 %v6939_v58, %v6938_v38  ;;  %v6499_v45 = vpop.f32.mrf.mxu2  ;;  %v9823_v58 = vld [vmem:[%s10701_s24 + $0x190] sm:$0xff] }
 0x851   : > { %v6612_v11 = vpop.f32.mrf.mxu3  ;;  %v6684_v59 = vmul.f32 %v6499_v45, %v15867_v4  ;;  %v6812_v54 = vmul.f32 %v6499_v45, %v5436_v42 }
 0x852   : > { %v6685_v49 = vmul.f32 %v6612_v11, %v15868_v13  ;;  %7011 = vst [vmem:[%s13960_s26 + $0xb8] sm:$0xff] %v6979_v7  ;;  %v6813_v60 = vmul.f32 %v6612_v11, %v13865_v0  ;;  %v15872_v0 = vld [vmem:[#allocation90_spill] sm:$0xff]  ;;  %v9825_v7 = vld [vmem:[%s10701_s24 + $0x198] sm:$0xff]  ;;  %v15875_v13 = vld [vmem:[#allocation169_spill] sm:$0xff] }
 0x853   : > { %v6748_v52 = vmul.f32 %v9819_v9, %v6684_v59  ;;  %v6876_v35 = vmul.f32 %v9820_v36, %v6812_v54  ;;  %v9826_v11 = vld [vmem:[%s10708_s16 + $0x198] sm:$0xff]  ;;  %v15877_v36 = vld [vmem:[#allocation142_spill] sm:$0xff] }
 0x854   : > { %v6749_v63 = vmul.f32 %v9821_v41, %v6685_v49  ;;  %v6877_v44 = vmul.f32 %v9822_v14, %v6813_v60 }
 0x855   : > { %v6940_v22 = vadd.f32 %v6876_v35, %v6748_v52 }
 0x856   : > { %v6941_v25 = vadd.f32 %v6877_v44, %v6749_v63  ;;  %v15878_v63 = vld [vmem:[#allocation194_spill] sm:$0xff]  ;;  %v15879_v44 = vld [vmem:[#allocation205_spill] sm:$0xff] }
 0x857   : > { %7290 = vmatmul.bf16.gmra.mxu0 %v15871_v31  ;;  %7379 = vmatmul.bf16.gmra.mxu1 %v15872_v0 }
 0x858   : > { %v6980_v51 = vpack.c.bf16 %v6941_v25, %v6940_v22  ;;  %v6502_v39 = vpop.f32.mrf.mxu2 }
 0x859   : > { %v6615_v43 = vpop.f32.mrf.mxu3  ;;  %v6686_v10 = vmul.f32 %v6502_v39, %v15873_v46  ;;  %v6814_v16 = vmul.f32 %v6502_v39, %v5438_v62 }
 0x85a   : > { %v6687_v61 = vmul.f32 %v6615_v43, %v15874_v27  ;;  %7012 = vst [vmem:[%s13960_s26 + $0xc0] sm:$0xff] %v6980_v51  ;;  %v6815_v38 = vmul.f32 %v6615_v43, %v13879_v3  ;;  %v15876_v3 = vld [vmem:[#allocation170_spill] sm:$0xff]  ;;  %v9830_v51 = vld [vmem:[%s10708_s16 + $0x1a8] sm:$0xff] }
 0x85b   : > { %v6750_v55 = vmul.f32 %v9823_v58, %v6686_v10  ;;  %v6878_v42 = vmul.f32 %v9824_v37, %v6814_v16  ;;  %v5441_v49 = vadd.f32 %v15876_v3, %v15875_v13  ;;  %v15880_v10 = vld [vmem:[#allocation200_spill] sm:$0xff]  ;;  %v15881_v16 = vld [vmem:[#allocation115_spill] sm:$0xff]  ;;  %v9831_v13 = vld [vmem:[%s10701_s24 + $0x1b0] sm:$0xff] }
 0x85c   : > { %v6751_v45 = vmul.f32 %v9825_v7, %v6687_v61  ;;  %v6879_v4 = vmul.f32 %v9826_v11, %v6815_v38  ;;  %v5443_v27 = vadd.f32 %v15881_v16, %v15880_v10  ;;  %v15882_v61 = vld [vmem:[#allocation95_spill] sm:$0xff]  ;;  %v15883_v38 = vld [vmem:[#allocation96_spill] sm:$0xff] }
 0x85d   : > { %v6942_v59 = vadd.f32 %v6878_v42, %v6750_v55  ;;  %7423 = vmatmul.bf16.gmra.mxu2 %v15775_v30  ;;  %v9827_v30 = vld [vmem:[%s10701_s24 + $0x1a0] sm:$0xff]  ;;  %v15884_v42 = vld [vmem:[#allocation74_spill] sm:$0xff] }
 0x85e   : > { %7512 = vmatmul.bf16.gmra.mxu3 %v15776_v28  ;;  %v6943_v54 = vadd.f32 %v6879_v4, %v6751_v45  ;;  %v15885_v11 = vld [vmem:[#allocation104_spill] sm:$0xff] }
 0x860   : > { %v6981_v60 = vpack.c.bf16 %v6943_v54, %v6942_v59  ;;  %v6505_v9 = vpop.f32.mrf.mxu2  ;;  %v15886_v59 = vld [vmem:[#allocation206_spill] sm:$0xff] }
 0x861   : > { %v6618_v52 = vpop.f32.mrf.mxu3  ;;  %v6688_v35 = vmul.f32 %v6505_v9, %v15877_v36  ;;  %v6816_v41 = vmul.f32 %v6505_v9, %v5441_v49  ;;  %v9832_v49 = vld [vmem:[%s10708_s16 + $0x1b0] sm:$0xff]  ;;  %v9833_v9 = vld [vmem:[%s10701_s24 + $0x1b8] sm:$0xff] }
 0x862   : > { %v6689_v14 = vmul.f32 %v6618_v52, %v15878_v63  ;;  %7013 = vst [vmem:[%s13960_s26 + $0xc8] sm:$0xff] %v6981_v60  ;;  %v6817_v22 = vmul.f32 %v6618_v52, %v15879_v44  ;;  %v9834_v36 = vld [vmem:[%s10708_s16 + $0x1b8] sm:$0xff]  ;;  %v15888_v44 = vld [vmem:[#allocation173_spill] sm:$0xff] }
 0x863   : > { %v6752_v25 = vmul.f32 %v9827_v30, %v6688_v35  ;;  %v6880_v28 = vmul.f32 %v9828_v56, %v6816_v41 }
 0x864   : > { %v6753_v62 = vmul.f32 %v9829_v29, %v6689_v14  ;;  %v6881_v39 = vmul.f32 %v9830_v51, %v6817_v22  ;;  %v15887_v14 = vld [vmem:[#allocation116_spill] sm:$0xff] }
 0x865   : > { %v6944_v43 = vadd.f32 %v6880_v28, %v6752_v25  ;;  %v5446_v22 = vadd.f32 %v15888_v44, %v15887_v14  ;;  %v15889_v28 = vld [vmem:[#allocation166_spill] sm:$0xff]  ;;  %v15890_v51 = vld [vmem:[#allocation196_spill] sm:$0xff] }
 0x866   : > { %v6945_v46 = vadd.f32 %v6881_v39, %v6753_v62  ;;  %v9840_v14 = vld [vmem:[%s10708_s16 + $0x1d0] sm:$0xff] }
 0x867   : > { %7295 = vmatmul.bf16.gmra.mxu0 %v15882_v61  ;;  %7384 = vmatmul.bf16.gmra.mxu1 %v15883_v38 }
 0x868   : > { %v6982_v58 = vpack.c.bf16 %v6945_v46, %v6944_v43  ;;  %v6508_v55 = vpop.f32.mrf.mxu2  ;;  %v15891_v43 = vld [vmem:[#allocation121_spill] sm:$0xff] }
 0x869   : > { %v6621_v37 = vpop.f32.mrf.mxu3  ;;  %v6690_v7 = vmul.f32 %v6508_v55, %v15884_v42  ;;  %v6818_v45 = vmul.f32 %v6508_v55, %v5443_v27  ;;  %v9837_v27 = vld [vmem:[%s10701_s24 + $0x1c8] sm:$0xff] }
 0x86a   : > { %v6691_v4 = vmul.f32 %v6621_v37, %v15885_v11  ;;  %7014 = vst [vmem:[%s13960_s26 + $0xd0] sm:$0xff] %v6982_v58  ;;  %v6819_v54 = vmul.f32 %v6621_v37, %v15886_v59  ;;  %v9838_v55 = vld [vmem:[%s10708_s16 + $0x1c8] sm:$0xff]  ;;  %v15893_v11 = vld [vmem:[#allocation202_spill] sm:$0xff] }
 0x86b   : > { %v6754_v3 = vmul.f32 %v9831_v13, %v6690_v7  ;;  %v6882_v60 = vmul.f32 %v9832_v49, %v6818_v45  ;;  %v15892_v45 = vld [vmem:[#allocation201_spill] sm:$0xff] }
 0x86c   : > { %v6755_v52 = vmul.f32 %v9833_v9, %v6691_v4  ;;  %v6883_v35 = vmul.f32 %v9834_v36, %v6819_v54  ;;  %v5448_v4 = vadd.f32 %v15893_v11, %v15892_v45  ;;  %v15895_v9 = vld [vmem:[#allocation162_spill] sm:$0xff]  ;;  %v9845_v45 = vld [vmem:[%s10701_s24 + $0x1e8] sm:$0xff] }
 0x86d   : > { %v6946_v41 = vadd.f32 %v6882_v60, %v6754_v3  ;;  %7428 = vmatmul.bf16.gmra.mxu2 %v15784_v6  ;;  %v9835_v6 = vld [vmem:[%s10701_s24 + $0x1c0] sm:$0xff]  ;;  %v15894_v3 = vld [vmem:[#allocation145_spill] sm:$0xff]  ;;  %v15896_v36 = vld [vmem:[#allocation122_spill] sm:$0xff] }
 0x86e   : > { %7517 = vmatmul.bf16.gmra.mxu3 %v15785_v19  ;;  %v6947_v63 = vadd.f32 %v6883_v35, %v6755_v52  ;;  %v9836_v19 = vld [vmem:[%s10708_s16 + $0x1c0] sm:$0xff] }
 0x870   : > { %v6983_v30 = vpack.c.bf16 %v6947_v63, %v6946_v41  ;;  %v6511_v25 = vpop.f32.mrf.mxu2  ;;  %v9839_v41 = vld [vmem:[%s10701_s24 + $0x1d0] sm:$0xff] }
 0x871   : > { %v6624_v56 = vpop.f32.mrf.mxu3  ;;  %v6692_v29 = vmul.f32 %v6511_v25, %v15889_v28  ;;  %v6820_v62 = vmul.f32 %v6511_v25, %v5446_v22  ;;  %v9841_v22 = vld [vmem:[%s10701_s24 + $0x1d8] sm:$0xff] }
 0x872   : > { %v6693_v39 = vmul.f32 %v6624_v56, %v15890_v51  ;;  %7015 = vst [vmem:[%s13960_s26 + $0xd8] sm:$0xff] %v6983_v30  ;;  %v6821_v46 = vmul.f32 %v6624_v56, %v15891_v43  ;;  %v9842_v25 = vld [vmem:[%s10708_s16 + $0x1d8] sm:$0xff] }
 0x873   : > { %v6756_v10 = vmul.f32 %v9835_v6, %v6692_v29  ;;  %v6884_v16 = vmul.f32 %v9836_v19, %v6820_v62  ;;  %v15897_v62 = vld [vmem:[#allocation118_spill] sm:$0xff]  ;;  %v15898_v51 = vld [vmem:[#allocation175_spill] sm:$0xff] }
 0x874   : > { %v6757_v58 = vmul.f32 %v9837_v27, %v6693_v39  ;;  %v6885_v37 = vmul.f32 %v9838_v55, %v6821_v46  ;;  %v5451_v39 = vadd.f32 %v15898_v51, %v15897_v62  ;;  %v15900_v27 = vld [vmem:[#allocation65_spill] sm:$0xff]  ;;  %v9849_v62 = vld [vmem:[%s10701_s24 + $0x1f8] sm:$0xff] }
 0x875   : > { %v6948_v42 = vadd.f32 %v6884_v16, %v6756_v10  ;;  %v15899_v10 = vld [vmem:[#allocation172_spill] sm:$0xff] }
 0x876   : > { %v6949_v7 = vadd.f32 %v6885_v37, %v6757_v58 }
 0x878   : > { %v6984_v59 = vpack.c.bf16 %v6949_v7, %v6948_v42  ;;  %v6514_v54 = vpop.f32.mrf.mxu2  ;;  %v9844_v42 = vld [vmem:[%s10708_s16 + $0x1e0] sm:$0xff] }
 0x879   : > { %v6627_v13 = vpop.f32.mrf.mxu3  ;;  %v6694_v49 = vmul.f32 %v6514_v54, %v15894_v3  ;;  %v6822_v60 = vmul.f32 %v6514_v54, %v5448_v4  ;;  %v9846_v4 = vld [vmem:[%s10708_s16 + $0x1e8] sm:$0xff]  ;;  %v15902_v3 = vld [vmem:[#allocation203_spill] sm:$0xff] }
 0x87a   : > { %v6695_v52 = vmul.f32 %v6627_v13, %v15895_v9  ;;  %7016 = vst [vmem:[%s13960_s26 + $0xe0] sm:$0xff] %v6984_v59  ;;  %v6823_v35 = vmul.f32 %v6627_v13, %v15896_v36 }
 0x87b   : > { %v6758_v63 = vmul.f32 %v9839_v41, %v6694_v49  ;;  %v6886_v44 = vmul.f32 %v9840_v14, %v6822_v60  ;;  %v15903_v49 = vld [vmem:[#allocation204_spill] sm:$0xff] }
 0x87c   : > { %v6759_v30 = vmul.f32 %v9841_v22, %v6695_v52  ;;  %v6887_v56 = vmul.f32 %v9842_v25, %v6823_v35  ;;  %v5453_v60 = vadd.f32 %v15903_v49, %v15902_v3  ;;  %v15904_v35 = vld [vmem:[#allocation147_spill] sm:$0xff]  ;;  %v15905_v14 = vld [vmem:[#allocation108_spill] sm:$0xff]  ;;  %v15906_v22 = vld [vmem:[#allocation181_spill] sm:$0xff] }
 0x87d   : > { %v6950_v28 = vadd.f32 %v6886_v44, %v6758_v63  ;;  %7433 = vmatmul.bf16.gmra.mxu2 %v15796_v26  ;;  %v15901_v26 = vld [vmem:[#allocation180_spill] sm:$0xff]  ;;  %v9847_v25 = vld [vmem:[%s10701_s24 + $0x1f0] sm:$0xff] }
 0x87e   : > { %7522 = vmatmul.bf16.gmra.mxu3 %v15797_v15  ;;  %v6951_v29 = vadd.f32 %v6887_v56, %v6759_v30  ;;  %v9843_v15 = vld [vmem:[%s10701_s24 + $0x1e0] sm:$0xff]  ;;  %s14497_s24 = scalar_lea.vmem [#allocation24], %s12661_s22 }
 0x880   : > { %v6985_v43 = vpack.c.bf16 %v6951_v29, %v6950_v28  ;;  %v6517_v46 = vpop.f32.mrf.mxu2  ;;  %v9848_v28 = vld [vmem:[%s10708_s16 + $0x1f0] sm:$0xff] }
 0x881   : > { %v6630_v6 = vpop.f32.mrf.mxu3  ;;  %v6696_v19 = vmul.f32 %v6517_v46, %v15899_v10  ;;  %v6824_v16 = vmul.f32 %v6517_v46, %v5451_v39  ;;  %v9850_v39 = vld [vmem:[%s10708_s16 + $0x1f8] sm:$0xff]  ;;  %v7634_v10 = vld [vmem:[%s10689_s20] sm:$0xff]  ;;  %s14689_s16 = sshll.u32 %s15213_s27, 8 }
 0x882   : > { %v6697_v58 = vmul.f32 %v6630_v6, %v15900_v27  ;;  %7017 = vst [vmem:[%s13960_s26 + $0xe8] sm:$0xff] %v6985_v43  ;;  %v6825_v55 = vmul.f32 %v6630_v6, %v15901_v26  ;;  %v14478_v6 = vstv %s7568_s5  ;;  %v7635_v27 = vld [vmem:[%s10689_s20 + $0x8] sm:$0xff]  ;;  %s7937_s18 = scalar_lea.hbm %s15907_s15, %s14689_s16  ;;  %s15166_s5 = scalar_lea.sflag [#allocation22], %s10678_s11 }
 0x883   : > { %v6760_v37 = vmul.f32 %v9843_v15, %v6696_v19  ;;  %v6888_v7 = vmul.f32 %v9844_v42, %v6824_v16  ;;  %v14482_v19 = vstv %s14457_s1  ;;  %v7570_v15 = vmul.f32 %v14478_v6, %v14225_v40  ;;  %s14697_s6 = sshll.u32 %s7937_s18, 4  ;;  %s7955_s1 = scalar_lea.hbm %s15909_s21, %s14689_s16  ;;  %s7941_s6 = int_to_ptr.hbm [resolvable:$true] %s14697_s6 }
 0x884   : > { %v6761_v11 = vmul.f32 %v9845_v45, %v6697_v58  ;;  %v6889_v59 = vmul.f32 %v9846_v4, %v6825_v55  ;;  %v7637_v4 = vld [vmem:[%s10689_s20 + $0x18] sm:$0xff]  ;;  %v7572_v40 = vmul.f32 %v14478_v6, %v14244_v23  ;;  %v7638_v23 = vld [vmem:[%s10689_s20 + $0x20] sm:$0xff]  ;;  %s10150_s22 = sshra.s32 %s7941_s6, 4  ;;  %s10151_s22 = int_to_ptr.hbm [resolvable:$true] %s10150_s22 }
 0x885   : > { %v6952_v54 = vadd.f32 %v6888_v7, %v6760_v37  ;;  %s10152_s28 = scalar_lea.hbm %s10151_s22, 256  ;;  %p10157_p2 = scmp.lt.s32.totalorder %s10151_s22, %s15907_s15 }
 0x886   : > { %v6953_v13 = vadd.f32 %v6889_v59, %v6761_v11  ;;  %v7636_v11 = vld [vmem:[%s10689_s20 + $0x10] sm:$0xff]  ;;  %p10153_p4 = scmp.ne.s32.totalorder %s10151_s22, %s10152_s28  ;;  %p10158_p10 = scmp.lt.s32.totalorder %s10156_s2, %s10152_s28 }
 0x887   : > { %v7701_v3 = vmul.f32 %v14482_v19, %v7636_v11 }
 0x888   : > { %v6986_v9 = vpack.c.bf16 %v6953_v13, %v6952_v54  ;;  %v6520_v52 = vpop.f32.mrf.mxu2  ;;  %p10154_p1 = pnand %p10153_p4, %p10505_p3  ;;  %p10159_p13 = por %p10158_p10, %p10157_p2 }
 0x889   : > { %v6633_v36 = vpop.f32.mrf.mxu3  ;;  %v6698_v41 = vmul.f32 %v6520_v52, %v15904_v35  ;;  %v6826_v63 = vmul.f32 %v6520_v52, %v5453_v60  ;;  %v7702_v60 = vmul.f32 %v14482_v19, %v7637_v4  ;;  %v14503_v52 = vpop.f32.mrf.mxu1  ;;  %v7765_v35 = vadd.f32 %v7701_v3, %v7572_v40  ;;  %v7644_v3 = vld [vmem:[%s10689_s20 + $0x50] sm:$0xff] }
 0x88a   : > { %v6699_v44 = vmul.f32 %v6633_v36, %v15905_v14  ;;  %7018 = vst [vmem:[%s13960_s26 + $0xf0] sm:$0xff] %v6986_v9  ;;  %v6827_v30 = vmul.f32 %v6633_v36, %v15906_v22  ;;  %v14501_v9 = vpop.f32.mrf.mxu0  ;;  %v7578_v4 = vmul.f32 %v14478_v6, %v14289_v21  ;;  %v7580_v21 = vmul.f32 %v14478_v6, %v14303_v8  ;;  %v7646_v8 = vld [vmem:[%s10689_s20 + $0x60] sm:$0xff]  ;;  %p10155_p11 = pneg %p10154_p1 }
 0x88b   : > { %v6762_v56 = vmul.f32 %v9847_v25, %v6698_v41  ;;  %v6890_v29 = vmul.f32 %v9848_v28, %v6826_v63  ;;  %v7639_v63 = vld [vmem:[%s10689_s20 + $0x28] sm:$0xff]  ;;  %v7703_v25 = vmul.f32 %v14482_v19, %v7638_v23 }
 0x88c   : > { %v6763_v51 = vmul.f32 %v9849_v62, %v6699_v44  ;;  %v6891_v43 = vmul.f32 %v9850_v39, %v6827_v30  ;;  %v7574_v30 = vmul.f32 %v14478_v6, %v14259_v33  ;;  %v7704_v28 = vmul.f32 %v14482_v19, %v7639_v63  ;;  %v7640_v39 = vld [vmem:[%s10689_s20 + $0x30] sm:$0xff]  ;;  %p10160_p12 = pnand %p10159_p13, %p10155_p11 }
 0x88d   : > { %v6954_v46 = vadd.f32 %v6890_v29, %v6762_v56  ;;  %7438 = vmatmul.bf16.gmra.mxu2 %v15808_v50  ;;  %v7699_v50 = vmul.f32 %v14482_v19, %v7634_v10 }
 0x88e   : > { %7527 = vmatmul.bf16.gmra.mxu3 %v15809_v17  ;;  %v6955_v16 = vadd.f32 %v6891_v43, %v6763_v51  ;;  %v7700_v17 = vmul.f32 %v14482_v19, %v7635_v27  ;;  %v7641_v43 = vld [vmem:[%s10689_s20 + $0x38] sm:$0xff]  ;;  %v7705_v27 = vmul.f32 %v14482_v19, %v7640_v39  ;;  %v7711_v39 = vmul.f32 %v14482_v19, %v7646_v8 }
 0x88f   : > { %v7763_v7 = vadd.f32 %v7699_v50, %v7570_v15 }
 0x890   : > { %v6987_v58 = vpack.c.bf16 %v6955_v16, %v6954_v46  ;;  %v7399_v26 = vpop.f32.mrf.mxu2  ;;  %v7576_v16 = vmul.f32 %v14478_v6, %v14275_v48 }
 0x891   : > { %v7488_v55 = vpop.f32.mrf.mxu3  ;;  %v14518_v62 = vpop.f32.mrf.mxu1 }
 0x892   : > { %v7489_v37 = vadd.f32 %v7488_v55, %v7399_v26  ;;  %7019 = vst [vmem:[%s13960_s26 + $0xf8] sm:$0xff] %v6987_v58  ;;  %v14516_v29 = vpop.f32.mrf.mxu0  ;;  %v7706_v26 = vmul.f32 %v14482_v19, %v7641_v43  ;;  %v7769_v15 = vadd.f32 %v7705_v27, %v7576_v16  ;;  %v7648_v27 = vld [vmem:[%s10689_s20 + $0x70] sm:$0xff] }
 0x894   : > { %v7571_v42 = vmul.f32 %v14478_v6, %v7489_v37  ;;  %v7642_v37 = vld [vmem:[%s10689_s20 + $0x40] sm:$0xff] }
 0x896   : > { %v7764_v45 = vadd.f32 %v7700_v17, %v7571_v42  ;;  %v7643_v17 = vld [vmem:[%s10689_s20 + $0x48] sm:$0xff] }
 0x898   : > { %v7827_v59 = vpack.c.bf16 %v7764_v45, %v7763_v7  ;;  %v7401_v54 = vpop.f32.mrf.mxu2 }
 0x899   : > { %v7490_v13 = vpop.f32.mrf.mxu3  ;;  %v14534_v42 = vpop.f32.mrf.mxu1 }
 0x89a   : > { %7859 = vst [vmem:[%s14497_s24] sm:$0xff] %v7827_v59  ;;  %v7491_v49 = vadd.f32 %v7490_v13, %v7401_v54  ;;  %v14532_v48 = vpop.f32.mrf.mxu0  ;;  %v7707_v59 = vmul.f32 %v14482_v19, %v7642_v37 }
 0x89c   : > { %v7573_v36 = vmul.f32 %v14478_v6, %v7491_v49  ;;  %v7771_v13 = vadd.f32 %v7707_v59, %v7578_v4  ;;  %v7645_v49 = vld [vmem:[%s10689_s20 + $0x58] sm:$0xff] }
 0x89d   : > { %7443 = vmatmul.bf16.gmra.mxu2 %v15819_v47 }
 0x89e   : > { %v7766_v41 = vadd.f32 %v7702_v60, %v7573_v36  ;;  %7532 = vmatmul.bf16.gmra.mxu3 %v15820_v5  ;;  %v7767_v5 = vadd.f32 %v7703_v25, %v7574_v30 }
 0x8a0   : > { %v7828_v14 = vpack.c.bf16 %v7766_v41, %v7765_v35  ;;  %v7404_v44 = vpop.f32.mrf.mxu2  ;;  %v7709_v41 = vmul.f32 %v14482_v19, %v7644_v3 }
 0x8a1   : > { %v7493_v22 = vpop.f32.mrf.mxu3  ;;  %v14549_v63 = vpop.f32.mrf.mxu1 }
 0x8a2   : > { %7860 = vst [vmem:[%s14497_s24 + $0x8] sm:$0xff] %v7828_v14  ;;  %v7494_v56 = vadd.f32 %v7493_v22, %v7404_v44  ;;  %v14547_v23 = vpop.f32.mrf.mxu0  ;;  %v7710_v44 = vmul.f32 %v14482_v19, %v7645_v49  ;;  %v7773_v30 = vadd.f32 %v7709_v41, %v7580_v21  ;;  %v7653_v21 = vld [vmem:[%s10689_s20 + $0x98] sm:$0xff] }
 0x8a4   : > { %v7575_v47 = vmul.f32 %v14478_v6, %v7494_v56  ;;  %v7647_v56 = vld [vmem:[%s10689_s20 + $0x68] sm:$0xff] }
 0x8a6   : > { %v7768_v51 = vadd.f32 %v7704_v28, %v7575_v47 }
 0x8a8   : > { %v7829_v33 = vpack.c.bf16 %v7768_v51, %v7767_v5  ;;  %v7406_v46 = vpop.f32.mrf.mxu2  ;;  %v7582_v51 = vmul.f32 %v14478_v6, %v14317_v57 }
 0x8a9   : > { %v7495_v10 = vpop.f32.mrf.mxu3 }
 0x8aa   : > { %7861 = vst [vmem:[%s14497_s24 + $0x10] sm:$0xff] %v7829_v33  ;;  %v7496_v58 = vadd.f32 %v7495_v10, %v7406_v46  ;;  %v7712_v33 = vmul.f32 %v14482_v19, %v7647_v56  ;;  %v7775_v10 = vadd.f32 %v7711_v39, %v7582_v51  ;;  %v7654_v51 = vld [vmem:[%s10689_s20 + $0xa0] sm:$0xff]  ;;  %v7655_v39 = vld [vmem:[%s10689_s20 + $0xa8] sm:$0xff] }
 0x8ac   : > { %v7577_v55 = vmul.f32 %v14478_v6, %v7496_v58  ;;  %v7649_v58 = vld [vmem:[%s10689_s20 + $0x78] sm:$0xff] }
 0x8ad   : > { %7448 = vmatmul.bf16.gmra.mxu2 %v15829_v12 }
 0x8ae   : > { %v7770_v50 = vadd.f32 %v7706_v26, %v7577_v55  ;;  %7537 = vmatmul.bf16.gmra.mxu3 %v15830_v18  ;;  %v7708_v18 = vmul.f32 %v14482_v19, %v7643_v17  ;;  %v7714_v17 = vmul.f32 %v14482_v19, %v7649_v58 }
 0x8b0   : > { %v7830_v7 = vpack.c.bf16 %v7770_v50, %v7769_v15  ;;  %v7409_v45 = vpop.f32.mrf.mxu2  ;;  %v7584_v15 = vmul.f32 %v14478_v6, %v14331_v20  ;;  %v7713_v50 = vmul.f32 %v14482_v19, %v7648_v27  ;;  %v7650_v20 = vld [vmem:[%s10689_s20 + $0x80] sm:$0xff] }
 0x8b1   : > { %v7498_v11 = vpop.f32.mrf.mxu3 }
 0x8b2   : > { %7862 = vst [vmem:[%s14497_s24 + $0x18] sm:$0xff] %v7830_v7  ;;  %v7499_v12 = vadd.f32 %v7498_v11, %v7409_v45  ;;  %v7777_v45 = vadd.f32 %v7713_v50, %v7584_v15  ;;  %v7331_v11 = vadd.f32 %v14503_v52, %v14501_v9  ;;  %v7715_v9 = vmul.f32 %v14482_v19, %v7650_v20  ;;  %v7657_v15 = vld [vmem:[%s10689_s20 + $0xb8] sm:$0xff] }
 0x8b4   : > { %v7579_v54 = vmul.f32 %v14478_v6, %v7499_v12  ;;  %v7586_v3 = vmul.f32 %v14478_v6, %v7331_v11 }
 0x8b6   : > { %v7772_v40 = vadd.f32 %v7708_v18, %v7579_v54  ;;  %v7651_v18 = vld [vmem:[%s10689_s20 + $0x88] sm:$0xff] }
 0x8b7   : > { %v7716_v49 = vmul.f32 %v14482_v19, %v7651_v18 }
 0x8b8   : > { %v7831_v60 = vpack.c.bf16 %v7772_v40, %v7771_v13  ;;  %v7411_v36 = vpop.f32.mrf.mxu2 }
 0x8b9   : > { %v7500_v35 = vpop.f32.mrf.mxu3 }
 0x8ba   : > { %7863 = vst [vmem:[%s14497_s24 + $0x20] sm:$0xff] %v7831_v60  ;;  %v7501_v14 = vadd.f32 %v7500_v35, %v7411_v36  ;;  %v7779_v60 = vadd.f32 %v7715_v9, %v7586_v3  ;;  %v7652_v35 = vld [vmem:[%s10689_s20 + $0x90] sm:$0xff]  ;;  %v7659_v3 = vld [vmem:[%s10689_s20 + $0xc8] sm:$0xff] }
 0x8bb   : > { %v7717_v8 = vmul.f32 %v14482_v19, %v7652_v35 }
 0x8bc   : > { %v7581_v22 = vmul.f32 %v14478_v6, %v7501_v14 }
 0x8bd   : > { %7453 = vmatmul.bf16.gmra.mxu2 %v15839_v53  ;;  %v14563_v53 = vpop.f32.mrf.mxu0 }
 0x8be   : > { %v7774_v25 = vadd.f32 %v7710_v44, %v7581_v22  ;;  %7542 = vmatmul.bf16.gmra.mxu3 %v15840_v34  ;;  %v14565_v34 = vpop.f32.mrf.mxu1 }
 0x8c0   : > { %v7832_v28 = vpack.c.bf16 %v7774_v25, %v7773_v30  ;;  %v7414_v47 = vpop.f32.mrf.mxu2 }
 0x8c1   : > { %v7503_v5 = vpop.f32.mrf.mxu3 }
 0x8c2   : > { %7864 = vst [vmem:[%s14497_s24 + $0x28] sm:$0xff] %v7832_v28  ;;  %v7504_v43 = vadd.f32 %v7503_v5, %v7414_v47  ;;  %v7336_v47 = vadd.f32 %v14534_v42, %v14532_v48 }
 0x8c4   : > { %v7583_v46 = vmul.f32 %v14478_v6, %v7504_v43 }
 0x8c5   : > { %v14578_v4 = vpop.f32.mrf.mxu0 }
 0x8c6   : > { %v7776_v16 = vadd.f32 %v7712_v33, %v7583_v46  ;;  %v14580_v59 = vpop.f32.mrf.mxu1 }
 0x8c8   : > { %v7833_v26 = vpack.c.bf16 %v7776_v16, %v7775_v10  ;;  %v7416_v57 = vpop.f32.mrf.mxu2  ;;  %v7590_v10 = vmul.f32 %v14478_v6, %v7336_v47  ;;  %v7719_v16 = vmul.f32 %v14482_v19, %v7654_v51  ;;  %v7662_v51 = vld [vmem:[%s10689_s20 + $0xe0] sm:$0xff] }
 0x8c9   : > { %v7505_v55 = vpop.f32.mrf.mxu3 }
 0x8ca   : > { %7865 = vst [vmem:[%s14497_s24 + $0x30] sm:$0xff] %v7833_v26  ;;  %v7506_v37 = vadd.f32 %v7505_v55, %v7416_v57  ;;  %v7783_v58 = vadd.f32 %v7719_v16, %v7590_v10  ;;  %v7338_v26 = vadd.f32 %v14549_v63, %v14547_v23  ;;  %v7656_v55 = vld [vmem:[%s10689_s20 + $0xb0] sm:$0xff] }
 0x8cc   : > { %v7585_v7 = vmul.f32 %v14478_v6, %v7506_v37 }
 0x8cd   : > { %7458 = vmatmul.bf16.gmra.mxu2 %v15849_v1  ;;  %v14595_v41 = vpop.f32.mrf.mxu0 }
 0x8ce   : > { %v7778_v12 = vadd.f32 %v7714_v17, %v7585_v7  ;;  %7547 = vmatmul.bf16.gmra.mxu3 %v15850_v32  ;;  %v7333_v32 = vadd.f32 %v14518_v62, %v14516_v29  ;;  %v14597_v14 = vpop.f32.mrf.mxu1  ;;  %v7718_v29 = vmul.f32 %v14482_v19, %v7653_v21  ;;  %v7592_v7 = vmul.f32 %v14478_v6, %v7338_v26  ;;  %v7664_v26 = vld [vmem:[%s10689_s20 + $0xf0] sm:$0xff] }
 0x8cf   : > { %v7346_v47 = vadd.f32 %v14597_v14, %v14595_v41  ;;  %v7727_v41 = vmul.f32 %v14482_v19, %v7662_v51 }
 0x8d0   : > { %v7834_v54 = vpack.c.bf16 %v7778_v12, %v7777_v45  ;;  %v7419_v13 = vpop.f32.mrf.mxu2  ;;  %v7588_v25 = vmul.f32 %v14478_v6, %v7333_v32  ;;  %v7721_v45 = vmul.f32 %v14482_v19, %v7656_v55  ;;  %v7722_v12 = vmul.f32 %v14482_v19, %v7657_v15 }
 0x8d1   : > { %v7508_v40 = vpop.f32.mrf.mxu3 }
 0x8d2   : > { %7866 = vst [vmem:[%s14497_s24 + $0x38] sm:$0xff] %v7834_v54  ;;  %v7509_v52 = vadd.f32 %v7508_v40, %v7419_v13  ;;  %v7781_v28 = vadd.f32 %v7717_v8, %v7588_v25  ;;  %v7785_v18 = vadd.f32 %v7721_v45, %v7592_v7  ;;  %v7341_v54 = vadd.f32 %v14565_v34, %v14563_v53  ;;  %v7658_v40 = vld [vmem:[%s10689_s20 + $0xc0] sm:$0xff] }
 0x8d3   : > { %v7724_v53 = vmul.f32 %v14482_v19, %v7659_v3 }
 0x8d4   : > { %v7587_v1 = vmul.f32 %v14478_v6, %v7509_v52 }
 0x8d5   : > { %v14612_v27 = vpop.f32.mrf.mxu0 }
 0x8d6   : > { %v7780_v36 = vadd.f32 %v7716_v49, %v7587_v1  ;;  %v14614_v48 = vpop.f32.mrf.mxu1  ;;  %v7594_v1 = vmul.f32 %v14478_v6, %v7341_v54  ;;  %v7666_v54 = vld [vmem:[%s10689_s20 + $0x100] sm:$0xff] }
 0x8d8   : > { %v7835_v44 = vpack.c.bf16 %v7780_v36, %v7779_v60  ;;  %v7421_v22 = vpop.f32.mrf.mxu2  ;;  %v7723_v60 = vmul.f32 %v14482_v19, %v7658_v40 }
 0x8d9   : > { %v7510_v30 = vpop.f32.mrf.mxu3 }
 0x8da   : > { %7867 = vst [vmem:[%s14497_s24 + $0x40] sm:$0xff] %v7835_v44  ;;  %v7511_v56 = vadd.f32 %v7510_v30, %v7421_v22  ;;  %v7787_v34 = vadd.f32 %v7723_v60, %v7594_v1  ;;  %v7660_v44 = vld [vmem:[%s10689_s20 + $0xd0] sm:$0xff]  ;;  %v7661_v22 = vld [vmem:[%s10689_s20 + $0xd8] sm:$0xff] }
 0x8dc   : > { %v7589_v62 = vmul.f32 %v14478_v6, %v7511_v56 }
 0x8dd   : > { %7463 = vmatmul.bf16.gmra.mxu2 %v15861_v24  ;;  %v14627_v20 = vpop.f32.mrf.mxu0 }
 0x8de   : > { %v7782_v5 = vadd.f32 %v7718_v29, %v7589_v62  ;;  %7552 = vmatmul.bf16.gmra.mxu3 %v15862_v2  ;;  %v7720_v2 = vmul.f32 %v14482_v19, %v7655_v39  ;;  %v14629_v23 = vpop.f32.mrf.mxu1  ;;  %v7725_v29 = vmul.f32 %v14482_v19, %v7660_v44  ;;  %v7663_v39 = vld [vmem:[%s10689_s20 + $0xe8] sm:$0xff] }
 0x8e0   : > { %v7836_v43 = vpack.c.bf16 %v7782_v5, %v7781_v28  ;;  %v7424_v33 = vpop.f32.mrf.mxu2 }
 0x8e1   : > { %v7513_v46 = vpop.f32.mrf.mxu3 }
 0x8e2   : > { %7868 = vst [vmem:[%s14497_s24 + $0x48] sm:$0xff] %v7836_v43  ;;  %v7514_v24 = vadd.f32 %v7513_v46, %v7424_v33 }
 0x8e4   : > { %v7591_v42 = vmul.f32 %v14478_v6, %v7514_v24  ;;  %v7598_v24 = vmul.f32 %v14478_v6, %v7346_v47 }
 0x8e5   : > { %v14645_v36 = vpop.f32.mrf.mxu0 }
 0x8e6   : > { %v7784_v57 = vadd.f32 %v7720_v2, %v7591_v42  ;;  %v14647_v35 = vpop.f32.mrf.mxu1  ;;  %v7791_v2 = vadd.f32 %v7727_v41, %v7598_v24  ;;  %v7348_v42 = vadd.f32 %v14614_v48, %v14612_v27 }
 0x8e8   : > { %v7837_v50 = vpack.c.bf16 %v7784_v57, %v7783_v58  ;;  %v7426_v37 = vpop.f32.mrf.mxu2  ;;  %v7665_v57 = vld [vmem:[%s10689_s20 + $0xf8] sm:$0xff] }
 0x8e9   : > { %v7515_v17 = vpop.f32.mrf.mxu3  ;;  %v7730_v48 = vmul.f32 %v14482_v19, %v7665_v57 }
 0x8ea   : > { %7869 = vst [vmem:[%s14497_s24 + $0x50] sm:$0xff] %v7837_v50  ;;  %v7516_v11 = vadd.f32 %v7515_v17, %v7426_v37  ;;  %v7600_v37 = vmul.f32 %v14478_v6, %v7348_v42  ;;  %v7729_v17 = vmul.f32 %v14482_v19, %v7664_v26 }
 0x8ec   : > { %v7593_v63 = vmul.f32 %v14478_v6, %v7516_v11 }
 0x8ed   : > { %7468 = vmatmul.bf16.gmra.mxu2 %v15871_v31  ;;  %v14662_v43 = vpop.f32.mrf.mxu0 }
 0x8ee   : > { %v7786_v13 = vadd.f32 %v7722_v12, %v7593_v63  ;;  %7557 = vmatmul.bf16.gmra.mxu3 %v15872_v0  ;;  %v7343_v0 = vadd.f32 %v14580_v59, %v14578_v4  ;;  %v7726_v4 = vmul.f32 %v14482_v19, %v7661_v22  ;;  %v14664_v33 = vpop.f32.mrf.mxu1  ;;  %v7793_v12 = vadd.f32 %v7729_v17, %v7600_v37 }
 0x8ef   : > { %v7351_v63 = vadd.f32 %v14629_v23, %v14627_v20  ;;  %v7731_v23 = vmul.f32 %v14482_v19, %v7666_v54 }
 0x8f0   : > { %v7838_v9 = vpack.c.bf16 %v7786_v13, %v7785_v18  ;;  %v7429_v52 = vpop.f32.mrf.mxu2  ;;  %v7596_v56 = vmul.f32 %v14478_v6, %v7343_v0  ;;  %v7667_v13 = vld [vmem:[%s10689_s20 + $0x108] sm:$0xff] }
 0x8f1   : > { %v7518_v49 = vpop.f32.mrf.mxu3  ;;  %v7602_v20 = vmul.f32 %v14478_v6, %v7351_v63 }
 0x8f2   : > { %7870 = vst [vmem:[%s14497_s24 + $0x58] sm:$0xff] %v7838_v9  ;;  %v7519_v32 = vadd.f32 %v7518_v49, %v7429_v52  ;;  %v7789_v28 = vadd.f32 %v7725_v29, %v7596_v56  ;;  %v7732_v49 = vmul.f32 %v14482_v19, %v7667_v13 }
 0x8f4   : > { %v7595_v31 = vmul.f32 %v14478_v6, %v7519_v32 }
 0x8f5   : > { %v14677_v7 = vpop.f32.mrf.mxu0 }
 0x8f6   : > { %v7788_v21 = vadd.f32 %v7724_v53, %v7595_v31  ;;  %v14679_v45 = vpop.f32.mrf.mxu1 }
 0x8f8   : > { %v7839_v30 = vpack.c.bf16 %v7788_v21, %v7787_v34  ;;  %v7431_v25 = vpop.f32.mrf.mxu2 }
 0x8f9   : > { %v7520_v8 = vpop.f32.mrf.mxu3 }
 0x8fa   : > { %7871 = vst [vmem:[%s14497_s24 + $0x60] sm:$0xff] %v7839_v30  ;;  %v7521_v62 = vadd.f32 %v7520_v8, %v7431_v25 }
 0x8fc   : > { %v7597_v59 = vmul.f32 %v14478_v6, %v7521_v62 }
 0x8fd   : > { %7473 = vmatmul.bf16.gmra.mxu2 %v15882_v61  ;;  %v14704_v1 = vpop.f32.mrf.mxu0 }
 0x8fe   : > { %v7790_v5 = vadd.f32 %v7726_v4, %v7597_v59  ;;  %7562 = vmatmul.bf16.gmra.mxu3 %v15883_v38  ;;  %v7728_v38 = vmul.f32 %v14482_v19, %v7663_v39  ;;  %v14706_v60 = vpop.f32.mrf.mxu1 }
 0x900   : > { %v7840_v46 = vpack.c.bf16 %v7790_v5, %v7789_v28  ;;  %v7434_v10 = vpop.f32.mrf.mxu2 }
 0x901   : > { %v7523_v16 = vpop.f32.mrf.mxu3 }
 0x902   : > { %7872 = vst [vmem:[%s14497_s24 + $0x68] sm:$0xff] %v7840_v46  ;;  %v7524_v61 = vadd.f32 %v7523_v16, %v7434_v10 }
 0x904   : > { %v7599_v14 = vmul.f32 %v14478_v6, %v7524_v61 }
 0x906   : > { %v7792_v58 = vadd.f32 %v7728_v38, %v7599_v14 }
 0x908   : > { %v7841_v55 = vpack.c.bf16 %v7792_v58, %v7791_v2  ;;  %v7436_v15 = vpop.f32.mrf.mxu2 }
 0x909   : > { %v7525_v50 = vpop.f32.mrf.mxu3 }
 0x90a   : > { %7873 = vst [vmem:[%s14497_s24 + $0x70] sm:$0xff] %v7841_v55  ;;  %v7526_v27 = vadd.f32 %v7525_v50, %v7436_v15 }
 0x90c   : > { %v7601_v11 = vmul.f32 %v14478_v6, %v7526_v27 }
 0x90e   : > { %v7794_v18 = vadd.f32 %v7730_v48, %v7601_v11 }
 0x910   : > { %v7842_v40 = vpack.c.bf16 %v7794_v18, %v7793_v12  ;;  %v7439_v3 = vpop.f32.mrf.mxu2 }
 0x911   : > { %v7528_v9 = vpop.f32.mrf.mxu3 }
 0x912   : > { %7874 = vst [vmem:[%s14497_s24 + $0x78] sm:$0xff] %v7842_v40  ;;  %v7529_v52 = vadd.f32 %v7528_v9, %v7439_v3 }
 0x914   : > { %v7603_v32 = vmul.f32 %v14478_v6, %v7529_v52 }
 0x915   : > { %10163 = shalt.err (!%p10160_p12)
}
 0x916   : > { %s15167_s30 = smov 128   ;;  %s10327_s17 = smov 8   ;;  %v7795_v53 = vadd.f32 %v7731_v23, %v7602_v20  ;;  %v7353_v31 = vadd.f32 %v14647_v35, %v14645_v36  ;;  %v7796_v34 = vadd.f32 %v7732_v49, %v7603_v32  ;;  %v7668_v0 = vld [vmem:[%s10689_s20 + $0x110] sm:$0xff]  ;;  %v7669_v21 = vld [vmem:[%s10689_s20 + $0x118] sm:$0xff] }
 0x917   : > { %9325 = dma.vmem_to_hbm [thread:$0]  (%p10505_p3), %s7939_s8, 4096, %s7941_s6, %s15166_s5, %s15167_s30, %s15167_s30, %s10327_s17   ;;  %v7733_v30 = vmul.f32 %v14482_v19, %v7668_v0  ;;  %v7734_v8 = vmul.f32 %v14482_v19, %v7669_v21 }
 0x918   : > { %s14731_s2 = sshll.u32 %s7955_s1, 4  ;;  %s15910_s4 = sshll.u32 %s15213_s27, 9  ;;  %v7843_v44 = vpack.c.bf16 %v7796_v34, %v7795_v53  ;;  %v7441_v22 = vpop.f32.mrf.mxu2  ;;  %v7604_v35 = vmul.f32 %v14478_v6, %v7353_v31  ;;  %s7959_s2 = int_to_ptr.hbm [resolvable:$true] %s14731_s2 }
 0x919   : > { %s15911_s22 = sld [smem:[#allocation225_spill]]  ;;  %s7920_s8 = sshll.u32 %s10747_s14, 4  ;;  %v7530_v36 = vpop.f32.mrf.mxu3  ;;  %s7921_s8 = int_to_ptr.vmem [resolvable:$true] %s7920_s8 }
 0x91a   : > { %7875 = vst [vmem:[%s14497_s24 + $0x80] sm:$0xff] %v7843_v44  ;;  %v7531_v25 = vadd.f32 %v7530_v36, %v7441_v22  ;;  %s7892_s27 = scalar_lea.sflag [#allocation5], %s10664_s23 }
 0x91f   : > { %s7919_s28 = scalar_lea.hbm %s15911_s22, %s15910_s4  ;;  %s10184_s3 = scalar_lea.hbm %s15911_s22, 1024 }
 0x920   : > { %s7922_s6 = sshll.u32 %s7919_s28, 4  ;;  %s7923_s6 = int_to_ptr.hbm [resolvable:$true] %s7922_s6 }
 0x921   : > { %s10178_s1 = sshra.s32 %s7923_s6, 4  ;;  %s10179_s1 = int_to_ptr.hbm [resolvable:$true] %s10178_s1 }
 0x922   : > { %s10180_s18 = scalar_lea.hbm %s10179_s1, 512  ;;  %p10185_p5 = scmp.lt.s32.totalorder %s10179_s1, %s15911_s22 }
 0x923   : > { %p10181_p0 = scmp.ne.s32.totalorder %s10179_s1, %s10180_s18  ;;  %p10186_p7 = scmp.lt.s32.totalorder %s10184_s3, %s10180_s18 }
 0x925   : > { %p10182_p8 = pnand %p10181_p0, %p10505_p3  ;;  %p10187_p4 = por %p10186_p7, %p10185_p5 }
 0x927   : > { %p10183_p9 = pneg %p10182_p8 }
 0x929   : > { %p10188_p1 = pnand %p10187_p4, %p10183_p9 }
 0x92b   : > { %10191 = shalt.err (!%p10188_p1)
}
 0x92c   : > { %s10328_s5 = smov 256   ;;  %s10329_s30 = smov 16   ;;  %v7605_v56 = vmul.f32 %v14478_v6, %v7531_v25  ;;  %v7797_v29 = vadd.f32 %v7733_v30, %v7604_v35  ;;  %v7356_v62 = vadd.f32 %v14664_v33, %v14662_v43  ;;  %v7273_v4 = vpop.f32.mrf.mxu0  ;;  %v7362_v59 = vpop.f32.mrf.mxu1 }
 0x92d   : > { %9324 = dma.vmem_to_hbm [thread:$0]  (%p10505_p3), %s7921_s8, 8192, %s7923_s6, %s7892_s27, %s10328_s5, %s10328_s5, %s10329_s30  }
 0x92e   : > { %s7956_s14 = sshll.u32 %s13960_s26, 4  ;;  %v7798_v28 = vadd.f32 %v7734_v8, %v7605_v56  ;;  %s10206_s1 = sshra.s32 %s7959_s2, 4  ;;  %s7957_s14 = int_to_ptr.vmem [resolvable:$true] %s7956_s14  ;;  %s10207_s1 = int_to_ptr.hbm [resolvable:$true] %s10206_s1 }
 0x92f   : > { %s10208_s18 = scalar_lea.hbm %s10207_s1, 256  ;;  %s10212_s26 = scalar_lea.hbm %s15909_s21, 512 }
 0x930   : > { %p10209_p11 = scmp.ne.s32.totalorder %s10207_s1, %s10208_s18  ;;  %p10213_p13 = scmp.lt.s32.totalorder %s10207_s1, %s15909_s21 }
 0x931   : > { %p10214_p12 = scmp.lt.s32.totalorder %s10212_s26, %s10208_s18 }
 0x932   : > { %p10210_p2 = pnand %p10209_p11, %p10505_p3 }
 0x933   : > { %p10215_p0 = por %p10214_p12, %p10213_p13 }
 0x934   : > { %p10211_p10 = pneg %p10210_p2 }
 0x936   : > { %p10216_p8 = pnand %p10215_p0, %p10211_p10 }
 0x938   : > { %10219 = shalt.err (!%p10216_p8)
}
 0x939   : > { %s15912_s27 = smov 128   ;;  %s15913_s4 = scalar_lea.sflag [#allocation22], %s10678_s11  ;;  %v7670_v47 = vld [vmem:[%s10689_s20 + $0x120] sm:$0xff]  ;;  %v7671_v5 = vld [vmem:[%s10689_s20 + $0x128] sm:$0xff]  ;;  %v7844_v51 = vpack.c.bf16 %v7798_v28, %v7797_v29  ;;  %v7444_v39 = vpop.f32.mrf.mxu2  ;;  %v7533_v43 = vpop.f32.mrf.mxu3  ;;  %v7606_v33 = vmul.f32 %v14478_v6, %v7356_v62  ;;  %v7358_v61 = vadd.f32 %v14679_v45, %v14677_v7  ;;  %v7672_v14 = vld [vmem:[%s10689_s20 + $0x130] sm:$0xff]  ;;  %v7361_v27 = vadd.f32 %v14706_v60, %v14704_v1 }
 0x93a   : > { %9326 = dma.vmem_to_hbm [thread:$0]  (%p10505_p3), %s7957_s14, 4096, %s7959_s2, %s15913_s4, %s15912_s27, %s15912_s27, %s10327_s17   ;;  %v7735_v46 = vmul.f32 %v14482_v19, %v7670_v47  ;;  %v7534_v10 = vadd.f32 %v7533_v43, %v7444_v39  ;;  %v7736_v16 = vmul.f32 %v14482_v19, %v7671_v5  ;;  %v7276_v42 = vpop.f32.mrf.mxu0  ;;  %v7365_v58 = vpop.f32.mrf.mxu1  ;;  %v7737_v50 = vmul.f32 %v14482_v19, %v7672_v14 }
 0x93b   : > { %7876 = vst [vmem:[%s14497_s24 + $0x88] sm:$0xff] %v7844_v51  ;;  %v7673_v2 = vld [vmem:[%s10689_s20 + $0x138] sm:$0xff]  ;;  %v7608_v15 = vmul.f32 %v14478_v6, %v7358_v61  ;;  %v7674_v11 = vld [vmem:[%s10689_s20 + $0x140] sm:$0xff]  ;;  %v7675_v12 = vld [vmem:[%s10689_s20 + $0x148] sm:$0xff]  ;;  %v7610_v13 = vmul.f32 %v14478_v6, %v7361_v27  ;;  %v7363_v1 = vadd.f32 %v7362_v59, %v7273_v4  ;;  %v7366_v56 = vadd.f32 %v7365_v58, %v7276_v42  ;;  %s15914_s3 = sld [smem:[#allocation228_spill]]  ;;  %s7907_s14 = scalar_lea.sflag [#allocation25], %s10664_s23 }
 0x93c   : > { %v7607_v24 = vmul.f32 %v14478_v6, %v7534_v10  ;;  %v7799_v41 = vadd.f32 %v7735_v46, %v7606_v33  ;;  %v7738_v17 = vmul.f32 %v14482_v19, %v7673_v2  ;;  %v7739_v40 = vmul.f32 %v14482_v19, %v7674_v11  ;;  %v7676_v32 = vld [vmem:[%s10689_s20 + $0x150] sm:$0xff]  ;;  %v7677_v53 = vld [vmem:[%s10689_s20 + $0x158] sm:$0xff]  ;;  %v7678_v62 = vld [vmem:[%s10689_s20 + $0x160] sm:$0xff] }
 0x93d   : > { %v7801_v45 = vadd.f32 %v7737_v50, %v7608_v15  ;;  %v7740_v23 = vmul.f32 %v14482_v19, %v7675_v12  ;;  %v7612_v21 = vmul.f32 %v14478_v6, %v7363_v1  ;;  %v7741_v44 = vmul.f32 %v14482_v19, %v7676_v32  ;;  %v7679_v4 = vld [vmem:[%s10689_s20 + $0x168] sm:$0xff]  ;;  %v7680_v61 = vld [vmem:[%s10689_s20 + $0x170] sm:$0xff] }
 0x93e   : > { %v7800_v38 = vadd.f32 %v7736_v16, %v7607_v24  ;;  %v7803_v49 = vadd.f32 %v7739_v40, %v7610_v13  ;;  %v7742_v36 = vmul.f32 %v14482_v19, %v7677_v53  ;;  %v7614_v5 = vmul.f32 %v14478_v6, %v7366_v56 }
 0x93f   : > { %v7805_v8 = vadd.f32 %v7741_v44, %v7612_v21  ;;  %v7743_v51 = vmul.f32 %v14482_v19, %v7678_v62  ;;  %v7744_v43 = vmul.f32 %v14482_v19, %v7679_v4 }
 0x940   : > { %v7845_v26 = vpack.c.bf16 %v7800_v38, %v7799_v41  ;;  %v7681_v38 = vld [vmem:[%s10689_s20 + $0x178] sm:$0xff] }
 0x941   : > { %v7446_v57 = vpop.f32.mrf.mxu2  ;;  %v7535_v55 = vpop.f32.mrf.mxu3  ;;  %v7807_v46 = vadd.f32 %v7743_v51, %v7614_v5  ;;  %s7973_s13 = scalar_lea.hbm %s15914_s3, %s14689_s16  ;;  %s10240_s30 = scalar_lea.hbm %s15914_s3, 512 }
 0x942   : > { %7877 = vst [vmem:[%s14497_s24 + $0x90] sm:$0xff] %v7845_v26  ;;  %v7536_v37 = vadd.f32 %v7535_v55, %v7446_v57  ;;  %v7278_v3 = vpop.f32.mrf.mxu0  ;;  %v7367_v9 = vpop.f32.mrf.mxu1  ;;  %v7745_v26 = vmul.f32 %v14482_v19, %v7680_v61  ;;  %v7746_v55 = vmul.f32 %v14482_v19, %v7681_v38  ;;  %s7976_s28 = sshll.u32 %s7973_s13, 4  ;;  %s7977_s28 = int_to_ptr.hbm [resolvable:$true] %s7976_s28 }
 0x943   : > { %v7368_v10 = vadd.f32 %v7367_v9, %v7278_v3  ;;  %s10234_s1 = sshra.s32 %s7977_s28, 4  ;;  %s10235_s1 = int_to_ptr.hbm [resolvable:$true] %s10234_s1 }
 0x944   : > { %v7609_v7 = vmul.f32 %v14478_v6, %v7536_v37  ;;  %s10236_s18 = scalar_lea.hbm %s10235_s1, 256  ;;  %p10241_p4 = scmp.lt.s32.totalorder %s10235_s1, %s15914_s3 }
 0x945   : > { %v7616_v58 = vmul.f32 %v14478_v6, %v7368_v10  ;;  %v7688_v10 = vld [vmem:[%s10689_s20 + $0x1b0] sm:$0xff]  ;;  %p10237_p9 = scmp.ne.s32.totalorder %s10235_s1, %s10236_s18  ;;  %p10242_p1 = scmp.lt.s32.totalorder %s10240_s30, %s10236_s18 }
 0x946   : > { %v7802_v48 = vadd.f32 %v7738_v17, %v7609_v7  ;;  %v7682_v7 = vld [vmem:[%s10689_s20 + $0x180] sm:$0xff] }
 0x947   : > { %v7809_v50 = vadd.f32 %v7745_v26, %v7616_v58  ;;  %p10238_p5 = pnand %p10237_p9, %p10505_p3  ;;  %p10243_p11 = por %p10242_p1, %p10241_p4 }
 0x948   : > { %v7846_v63 = vpack.c.bf16 %v7802_v48, %v7801_v45  ;;  %v7683_v45 = vld [vmem:[%s10689_s20 + $0x188] sm:$0xff] }
 0x949   : > { %v7449_v18 = vpop.f32.mrf.mxu2  ;;  %v7538_v54 = vpop.f32.mrf.mxu3  ;;  %v7748_v40 = vmul.f32 %v14482_v19, %v7683_v45  ;;  %p10239_p7 = pneg %p10238_p5 }
 0x94a   : > { %7878 = vst [vmem:[%s14497_s24 + $0x98] sm:$0xff] %v7846_v63  ;;  %v7539_v20 = vadd.f32 %v7538_v54, %v7449_v18  ;;  %v7281_v35 = vpop.f32.mrf.mxu0  ;;  %v7370_v30 = vpop.f32.mrf.mxu1  ;;  %v7747_v54 = vmul.f32 %v14482_v19, %v7682_v7 }
 0x94b   : > { %v7371_v37 = vadd.f32 %v7370_v30, %v7281_v35  ;;  %p10244_p2 = pnand %p10243_p11, %p10239_p7 }
 0x94c   : > { %v7611_v52 = vmul.f32 %v14478_v6, %v7539_v20 }
 0x94d   : > { %v7618_v18 = vmul.f32 %v14478_v6, %v7371_v37  ;;  %v7690_v37 = vld [vmem:[%s10689_s20 + $0x1c0] sm:$0xff] }
 0x94e   : > { %v7804_v60 = vadd.f32 %v7740_v23, %v7611_v52  ;;  %v7684_v52 = vld [vmem:[%s10689_s20 + $0x190] sm:$0xff] }
 0x94f   : > { %v7811_v9 = vadd.f32 %v7747_v54, %v7618_v18 }
 0x950   : > { %v7847_v31 = vpack.c.bf16 %v7804_v60, %v7803_v49  ;;  %v7685_v49 = vld [vmem:[%s10689_s20 + $0x198] sm:$0xff] }
 0x951   : > { %v7451_v34 = vpop.f32.mrf.mxu2  ;;  %v7540_v0 = vpop.f32.mrf.mxu3  ;;  %v7750_v44 = vmul.f32 %v14482_v19, %v7685_v49 }
 0x952   : > { %7879 = vst [vmem:[%s14497_s24 + $0xa0] sm:$0xff] %v7847_v31  ;;  %v7541_v22 = vadd.f32 %v7540_v0, %v7451_v34  ;;  %v7283_v16 = vpop.f32.mrf.mxu0  ;;  %v7372_v24 = vpop.f32.mrf.mxu1  ;;  %v7749_v31 = vmul.f32 %v14482_v19, %v7684_v52 }
 0x953   : > { %v7373_v20 = vadd.f32 %v7372_v24, %v7283_v16  ;;  %v7689_v16 = vld [vmem:[%s10689_s20 + $0x1b8] sm:$0xff] }
 0x954   : > { %v7613_v25 = vmul.f32 %v14478_v6, %v7541_v22 }
 0x955   : > { %v7620_v53 = vmul.f32 %v14478_v6, %v7373_v20 }
 0x956   : > { %v7806_v29 = vadd.f32 %v7742_v36, %v7613_v25  ;;  %v7686_v25 = vld [vmem:[%s10689_s20 + $0x1a0] sm:$0xff] }
 0x957   : > { %v7813_v36 = vadd.f32 %v7749_v31, %v7620_v53 }
 0x958   : > { %v7848_v59 = vpack.c.bf16 %v7806_v29, %v7805_v8  ;;  %v7687_v8 = vld [vmem:[%s10689_s20 + $0x1a8] sm:$0xff] }
 0x959   : > { %v7454_v28 = vpop.f32.mrf.mxu2  ;;  %v7543_v47 = vpop.f32.mrf.mxu3 }
 0x95a   : > { %7880 = vst [vmem:[%s14497_s24 + $0xa8] sm:$0xff] %v7848_v59  ;;  %v7544_v39 = vadd.f32 %v7543_v47, %v7454_v28  ;;  %v7286_v27 = vpop.f32.mrf.mxu0  ;;  %v7375_v48 = vpop.f32.mrf.mxu1  ;;  %v7751_v59 = vmul.f32 %v14482_v19, %v7686_v25  ;;  %v7752_v47 = vmul.f32 %v14482_v19, %v7687_v8 }
 0x95b   : > { %v7376_v35 = vadd.f32 %v7375_v48, %v7286_v27 }
 0x95c   : > { %v7615_v33 = vmul.f32 %v14478_v6, %v7544_v39 }
 0x95d   : > { %v7622_v4 = vmul.f32 %v14478_v6, %v7376_v35 }
 0x95e   : > { %v7808_v41 = vadd.f32 %v7744_v43, %v7615_v33 }
 0x95f   : > { %v7815_v43 = vadd.f32 %v7751_v59, %v7622_v4 }
 0x960   : > { %v7849_v14 = vpack.c.bf16 %v7808_v41, %v7807_v46 }
 0x961   : > { %v7456_v2 = vpop.f32.mrf.mxu2  ;;  %v7545_v42 = vpop.f32.mrf.mxu3 }
 0x962   : > { %7881 = vst [vmem:[%s14497_s24 + $0xb0] sm:$0xff] %v7849_v14  ;;  %v7546_v57 = vadd.f32 %v7545_v42, %v7456_v2  ;;  %v7288_v34 = vpop.f32.mrf.mxu0  ;;  %v7377_v0 = vpop.f32.mrf.mxu1  ;;  %v7753_v14 = vmul.f32 %v14482_v19, %v7688_v10  ;;  %v7754_v42 = vmul.f32 %v14482_v19, %v7689_v16 }
 0x963   : > { %v7378_v33 = vadd.f32 %v7377_v0, %v7288_v34 }
 0x964   : > { %v7617_v15 = vmul.f32 %v14478_v6, %v7546_v57 }
 0x965   : > { %v7624_v38 = vmul.f32 %v14478_v6, %v7378_v33 }
 0x966   : > { %v7810_v17 = vadd.f32 %v7746_v55, %v7617_v15 }
 0x967   : > { %v7817_v26 = vadd.f32 %v7753_v14, %v7624_v38 }
 0x968   : > { %v7850_v11 = vpack.c.bf16 %v7810_v17, %v7809_v50  ;;  %v7691_v17 = vld [vmem:[%s10689_s20 + $0x1c8] sm:$0xff] }
 0x969   : > { %v7459_v12 = vpop.f32.mrf.mxu2  ;;  %v7548_v63 = vpop.f32.mrf.mxu3 }
 0x96a   : > { %7882 = vst [vmem:[%s14497_s24 + $0xb8] sm:$0xff] %v7850_v11  ;;  %v7549_v13 = vadd.f32 %v7548_v63, %v7459_v12  ;;  %v7291_v5 = vpop.f32.mrf.mxu0  ;;  %v7380_v51 = vpop.f32.mrf.mxu1  ;;  %v7755_v11 = vmul.f32 %v14482_v19, %v7690_v37  ;;  %v7756_v63 = vmul.f32 %v14482_v19, %v7691_v17 }
 0x96b   : > { %v7381_v57 = vadd.f32 %v7380_v51, %v7291_v5 }
 0x96c   : > { %v7619_v3 = vmul.f32 %v14478_v6, %v7549_v13 }
 0x96d   : > { %v7626_v48 = vmul.f32 %v14478_v6, %v7381_v57 }
 0x96e   : > { %v7812_v23 = vadd.f32 %v7748_v40, %v7619_v3  ;;  %v7692_v3 = vld [vmem:[%s10689_s20 + $0x1d0] sm:$0xff] }
 0x96f   : > { %v7819_v54 = vadd.f32 %v7755_v11, %v7626_v48 }
 0x970   : > { %v7851_v1 = vpack.c.bf16 %v7812_v23, %v7811_v9  ;;  %v7693_v9 = vld [vmem:[%s10689_s20 + $0x1d8] sm:$0xff] }
 0x971   : > { %v7461_v60 = vpop.f32.mrf.mxu2  ;;  %v7550_v32 = vpop.f32.mrf.mxu3  ;;  %v7758_v31 = vmul.f32 %v14482_v19, %v7693_v9 }
 0x972   : > { %7883 = vst [vmem:[%s14497_s24 + $0xc0] sm:$0xff] %v7851_v1  ;;  %v7551_v21 = vadd.f32 %v7550_v32, %v7461_v60  ;;  %v7293_v55 = vpop.f32.mrf.mxu0  ;;  %v7382_v15 = vpop.f32.mrf.mxu1  ;;  %v7757_v32 = vmul.f32 %v14482_v19, %v7692_v3 }
 0x973   : > { %v7383_v13 = vadd.f32 %v7382_v15, %v7293_v55 }
 0x974   : > { %v7621_v22 = vmul.f32 %v14478_v6, %v7551_v21 }
 0x975   : > { %v7628_v60 = vmul.f32 %v14478_v6, %v7383_v13 }
 0x976   : > { %v7814_v30 = vadd.f32 %v7750_v44, %v7621_v22  ;;  %v7694_v22 = vld [vmem:[%s10689_s20 + $0x1e0] sm:$0xff] }
 0x977   : > { %v7821_v0 = vadd.f32 %v7757_v32, %v7628_v60 }
 0x978   : > { %v7852_v56 = vpack.c.bf16 %v7814_v30, %v7813_v36  ;;  %v7695_v36 = vld [vmem:[%s10689_s20 + $0x1e8] sm:$0xff] }
 0x979   : > { %v7464_v29 = vpop.f32.mrf.mxu2  ;;  %v7553_v62 = vpop.f32.mrf.mxu3 }
 0x97a   : > { %7884 = vst [vmem:[%s14497_s24 + $0xc8] sm:$0xff] %v7852_v56  ;;  %v7554_v28 = vadd.f32 %v7553_v62, %v7464_v29  ;;  %v7296_v20 = vpop.f32.mrf.mxu0  ;;  %v7385_v23 = vpop.f32.mrf.mxu1  ;;  %v7759_v56 = vmul.f32 %v14482_v19, %v7694_v22  ;;  %v7760_v62 = vmul.f32 %v14482_v19, %v7695_v36 }
 0x97b   : > { %v7386_v21 = vadd.f32 %v7385_v23, %v7296_v20 }
 0x97c   : > { %v7623_v39 = vmul.f32 %v14478_v6, %v7554_v28 }
 0x97d   : > { %v7630_v8 = vmul.f32 %v14478_v6, %v7386_v21 }
 0x97e   : > { %v7816_v46 = vadd.f32 %v7752_v47, %v7623_v39  ;;  %v7696_v39 = vld [vmem:[%s10689_s20 + $0x1f0] sm:$0xff] }
 0x97f   : > { %v7823_v47 = vadd.f32 %v7759_v56, %v7630_v8 }
 0x980   : > { %v7853_v24 = vpack.c.bf16 %v7816_v46, %v7815_v43  ;;  %v7697_v43 = vld [vmem:[%s10689_s20 + $0x1f8] sm:$0xff]  ;;  %s7974_s20 = sshll.u32 %s14497_s24, 4  ;;  %s7975_s20 = int_to_ptr.vmem [resolvable:$true] %s7974_s20 }
 0x981   : > { %v7466_v41 = vpop.f32.mrf.mxu2  ;;  %v7555_v61 = vpop.f32.mrf.mxu3 }
 0x982   : > { %7885 = vst [vmem:[%s14497_s24 + $0xd0] sm:$0xff] %v7853_v24  ;;  %v7556_v2 = vadd.f32 %v7555_v61, %v7466_v41  ;;  %v7298_v4 = vpop.f32.mrf.mxu0  ;;  %v7387_v59 = vpop.f32.mrf.mxu1  ;;  %v7761_v24 = vmul.f32 %v14482_v19, %v7696_v39  ;;  %v7762_v61 = vmul.f32 %v14482_v19, %v7697_v43 }
 0x983   : > { %v7388_v5 = vadd.f32 %v7387_v59, %v7298_v4 }
 0x984   : > { %v7625_v58 = vmul.f32 %v14478_v6, %v7556_v2 }
 0x985   : > { %v7632_v16 = vmul.f32 %v14478_v6, %v7388_v5 }
 0x986   : > { %v7818_v50 = vadd.f32 %v7754_v42, %v7625_v58 }
 0x987   : > { %v7825_v14 = vadd.f32 %v7761_v24, %v7632_v16 }
 0x988   : > { %v7854_v7 = vpack.c.bf16 %v7818_v50, %v7817_v26 }
 0x989   : > { %v7469_v45 = vpop.f32.mrf.mxu2  ;;  %v7558_v27 = vpop.f32.mrf.mxu3 }
 0x98a   : > { %7886 = vst [vmem:[%s14497_s24 + $0xd8] sm:$0xff] %v7854_v7  ;;  %v7559_v12 = vadd.f32 %v7558_v27, %v7469_v45 }
 0x98c   : > { %v7627_v18 = vmul.f32 %v14478_v6, %v7559_v12 }
 0x98e   : > { %v7820_v40 = vadd.f32 %v7756_v63, %v7627_v18 }
 0x990   : > { %v7855_v52 = vpack.c.bf16 %v7820_v40, %v7819_v54 }
 0x991   : > { %v7471_v49 = vpop.f32.mrf.mxu2  ;;  %v7560_v1 = vpop.f32.mrf.mxu3 }
 0x992   : > { %7887 = vst [vmem:[%s14497_s24 + $0xe0] sm:$0xff] %v7855_v52  ;;  %v7561_v53 = vadd.f32 %v7560_v1, %v7471_v49 }
 0x994   : > { %v7629_v34 = vmul.f32 %v14478_v6, %v7561_v53 }
 0x996   : > { %v7822_v44 = vadd.f32 %v7758_v31, %v7629_v34 }
 0x998   : > { %v7856_v35 = vpack.c.bf16 %v7822_v44, %v7821_v0 }
 0x999   : > { %v7474_v30 = vpop.f32.mrf.mxu2  ;;  %v7563_v25 = vpop.f32.mrf.mxu3 }
 0x99a   : > { %7888 = vst [vmem:[%s14497_s24 + $0xe8] sm:$0xff] %v7856_v35  ;;  %v7564_v29 = vadd.f32 %v7563_v25, %v7474_v30 }
 0x99c   : > { %v7631_v28 = vmul.f32 %v14478_v6, %v7564_v29 }
 0x99e   : > { %v7824_v51 = vadd.f32 %v7760_v62, %v7631_v28 }
 0x9a0   : > { %v7857_v33 = vpack.c.bf16 %v7824_v51, %v7823_v47 }
 0x9a1   : > { %v7476_v46 = vpop.f32.mrf.mxu2  ;;  %v7565_v10 = vpop.f32.mrf.mxu3 }
 0x9a2   : > { %7889 = vst [vmem:[%s14497_s24 + $0xf0] sm:$0xff] %v7857_v33  ;;  %v7566_v41 = vadd.f32 %v7565_v10, %v7476_v46 }
 0x9a4   : > { %v7633_v38 = vmul.f32 %v14478_v6, %v7566_v41 }
 0x9a6   : > { %v7826_v2 = vadd.f32 %v7762_v61, %v7633_v38 }
 0x9a8   : > { %v7858_v42 = vpack.c.bf16 %v7826_v2, %v7825_v14 }
 0x9aa   : > { %7890 = vst [vmem:[%s14497_s24 + $0xf8] sm:$0xff] %v7858_v42 }
 0x9ab   : > { %10247 = shalt.err (!%p10244_p2)
}
 0x9ac   : > { %9327 = dma.vmem_to_hbm [thread:$0]  (%p10505_p3), %s7975_s20, 4096, %s7977_s28, %s7907_s14, %s15912_s27, %s15912_s27, %s10327_s17  }
 0x9ad PF: > { %s15915_s23 = sld [smem:[#allocation35_spill]]  ;;  %p15917_p10 = scmp.ge.s32.totalorder %s10314_s0, 2 }
 0x9af   : > { %p9365_p13 = pnand %p15917_p10, %p10460_p6 }
 0x9b1   : > { %p9366_p12 = pneg %p9365_p13 }
 0x9b3   : > { %s7991_s6 = sand.u32 1, %s15915_s23  }
 0x9b4   : > { %s7992_s4 = scalar_lea.sflag [#allocation5], %s7991_s6 }
 0x9b5   : > { %10289 = dma.done.wait (%p9366_p12), %s7992_s4, 8192  }
 0x9b6   : > { %10291 = vsyncadd (%p9366_p12), %s7992_s4, 4294959104  ;;  %s15918_s11 = sadd.s32 4294967294, %s10314_s0  }
 0x9b7   : > { %s8001_s2 = sand.u32 1, %s15918_s11  }
 0x9b8   : > { %s8002_s10 = scalar_lea.sflag [#allocation22], %s8001_s2 }
 0x9b9   : > { %10293 = dma.done.wait (%p9366_p12), %s8002_s10, 8192  }
 0x9ba   : > { %10295 = vsyncadd (%p9366_p12), %s8002_s10, 4294959104  ;;  %s8022_s13 = scalar_lea.sflag [#allocation25], %s7991_s6 }
 0x9bb   : > { %10297 = dma.done.wait (%p9366_p12), %s8022_s13, 4096  }
 0x9bc   : > { %10299 = vsyncadd (%p9366_p12), %s8022_s13, 4294963200  ;;  %s15919_s0 = sld [smem:[#allocation41_spill]]  ;;  %s15922_s28 = smov %s10310_s29 }
 0x9bd   : > { %s15920_s27 = sld [smem:[#allocation36_spill]] }
 0x9be   : > { %s15921_s17 = sld [smem:[#allocation43_spill]] }
 0x9c2   : > { %p47_p3 = scmp.ge.s32.totalorder %s15919_s0, 4  }
 0x9c4   : > { %s15923_s29 = smov %s15921_s17  ;;  %49 = sbr.rel (!%p47_p3) target bundleno = 39 (0x27), region = 239 }
 0x9c9   :  { %8028 = vsyncpa [#allocation4], 1 }
 0x9ca   :  { %8030 = vsyncpa [#allocation4 + $0x1], 1 }
 0x9cb   :  { %8031 = vsyncpa [#allocation9], 1 }
 0x9cc   :  { %8033 = vsyncpa [#allocation9 + $0x1], 1 }
 0x9cd   :  { %8034 = vsyncpa [#allocation12], 1 }
 0x9ce   :  { %8035 = vsyncpa [#allocation15], 1 }
 0x9cf   :  { %8036 = vsyncpa [#allocation18], 1 }
 0x9d0   :  { %8038 = vsyncpa [#allocation18 + $0x1], 1 }
 0x9d1   :  { %8039 = vsyncpa [#allocation5], 1 }
 0x9d2   :  { %8041 = vsyncpa [#allocation5 + $0x1], 1 }
 0x9d3   :  { %8042 = vsyncpa [#allocation22], 1 }
 0x9d4   :  { %8044 = vsyncpa [#allocation22 + $0x1], 1 }
 0x9d5   :  { %8045 = vsyncpa [#allocation25], 1 }
 0x9d6   :  { %8047 = vsyncpa [#allocation25 + $0x1], 1 }
 0x9d7   :  { %8048 = vsyncpa [#allocation6], 1 }
 0x9d8   :  { %8050 = vsyncpa [#allocation6 + $0x1], 1 }

</bundles_post_ra>
